<compile_context>
chip_gen: v6e
topology: v6e:2x2x1
jax: 0.10.0
libtpu: 0.0.40
codegen_flags: <defaults>
</compile_context>

<pallas_src>
import functools

import jax
import jax.numpy as jnp
from jax import lax
from jax.experimental import pallas as pl
from jax.experimental.pallas import tpu as pltpu


def _compiler_params(**kwargs):
    cls = getattr(pltpu, "CompilerParams", None)
    if cls is None:  # older JAX spelling
        cls = getattr(pltpu, "TPUCompilerParams")
    return cls(**kwargs)


# ----------------------------------------------------------------------------
# Kernel 1: conv1 (im2col matmul) + bias + ReLU + 2x2 maxpool, gridded over batch
# ----------------------------------------------------------------------------
def _conv1_relu_pool_kernel(p_ref, w_ref, b_ref, o_ref):
    # p_ref: [1, 32, 32, 27] f32 im2col patches for one image, last axis (kh,kw,cin)
    # w_ref: [27, C] bf16   b_ref: [1, C] f32   o_ref: [1, 16, 16, C] f32
    H, W = p_ref.shape[1], p_ref.shape[2]
    C = o_ref.shape[-1]

    patches = p_ref[0].reshape(H * W, p_ref.shape[-1]).astype(jnp.bfloat16)
    conv = jnp.dot(patches, w_ref[...], preferred_element_type=jnp.float32)
    conv = jnp.maximum(conv + b_ref[...], 0.0)                    # bias + ReLU
    conv = conv.reshape(H, W, C)

    # fused 2x2/2 max pool: H pairs via a leading-dim split, W pairs column by column
    c = conv.reshape(H // 2, 2, W, C)
    hp = jnp.maximum(c[:, 0], c[:, 1])                            # [H/2, W, C]
    cols = [jnp.maximum(hp[:, 2 * w:2 * w + 1, :], hp[:, 2 * w + 1:2 * w + 2, :])
            for w in range(W // 2)]
    o_ref[0] = jnp.concatenate(cols, axis=1)                      # [H/2, W/2, C]


def conv1_relu_pool(patches, w, b):
    B, H, W, K = patches.shape
    C = w.shape[-1]
    return pl.pallas_call(
        _conv1_relu_pool_kernel,
        out_shape=jax.ShapeDtypeStruct((B, H // 2, W // 2, C), jnp.float32),
        grid=(B,),
        in_specs=[
            pl.BlockSpec((1, H, W, K), lambda i: (i, 0, 0, 0)),
            pl.BlockSpec((K, C), lambda i: (0, 0)),
            pl.BlockSpec((1, C), lambda i: (0, 0)),
        ],
        out_specs=pl.BlockSpec((1, H // 2, W // 2, C), lambda i: (i, 0, 0, 0)),
        compiler_params=_compiler_params(dimension_semantics=("parallel",)),
    )(patches, w, b)


# ----------------------------------------------------------------------------
# Kernel 2: 10x shared ResBlock (conv -> BN(train) -> ReLU -> +residual) + final
#           2x2 maxpool, fully VMEM-resident with in-kernel im2col.
# ----------------------------------------------------------------------------
def _reschain_pool_kernel(x_ref, w_ref, g_ref, bt_ref, o_ref, pad_ref, *, n_blocks, eps):
    # x_ref : [B,16,16,C] f32 feature map      w_ref : [9,C,C] bf16 (tap-major kh*3+kw)
    # g_ref/bt_ref : [1,C] f32 BN weight/bias  o_ref : [B,8,8,C] f32 (after final pool)
    # pad_ref: [B,18,18,C] f32 VMEM scratch; interior = current feature map, 1-px zero
    #          border supplies the conv padding.  Stays resident for all n_blocks.
    B, H, W, C = x_ref.shape
    M = B * H * W

    pad_ref[...] = jnp.zeros_like(pad_ref)
    pad_ref[:, 1:H + 1, 1:W + 1, :] = x_ref[...]

    def block_body(_, carry):
        # conv3x3 (padding=1, no bias) as 9 accumulated matmuls over shifted taps
        acc = jnp.zeros((M, C), jnp.float32)
        for t in range(9):
            dh, dw = divmod(t, 3)
            tap = pad_ref[:, dh:dh + H, dw:dw + W, :].reshape(M, C).astype(jnp.bfloat16)
            acc = acc + jnp.dot(tap, w_ref[t], preferred_element_type=jnp.float32)
        # BatchNorm2d, training mode: per-channel stats over ALL N*H*W rows
        mean = jnp.mean(acc, axis=0, keepdims=True)
        cen = acc - mean
        var = jnp.mean(cen * cen, axis=0, keepdims=True)          # biased variance
        bn = cen * lax.rsqrt(var + eps) * g_ref[...] + bt_ref[...]
        # ReLU + residual; write new feature map back into the padded interior
        res = pad_ref[:, 1:H + 1, 1:W + 1, :].reshape(M, C)
        new = jnp.maximum(bn, 0.0) + res
        pad_ref[:, 1:H + 1, 1:W + 1, :] = new.reshape(B, H, W, C)
        return carry

    lax.fori_loop(0, n_blocks, block_body, 0)

    # final 2x2/2 max pool straight out of VMEM
    cur = pad_ref[:, 1:H + 1, 1:W + 1, :]                         # [B,16,16,C]
    c = cur.reshape(B, H // 2, 2, W, C)
    hp = jnp.maximum(c[:, :, 0], c[:, :, 1])                      # [B,8,16,C]
    cols = [jnp.maximum(hp[:, :, 2 * w:2 * w + 1, :], hp[:, :, 2 * w + 1:2 * w + 2, :])
            for w in range(W // 2)]
    o_ref[...] = jnp.concatenate(cols, axis=2)                    # [B,8,8,C]


def reschain_pool(feat, w, gamma, beta, *, n_blocks, eps=1e-5):
    B, H, W, C = feat.shape
    return pl.pallas_call(
        functools.partial(_reschain_pool_kernel, n_blocks=n_blocks, eps=eps),
        out_shape=jax.ShapeDtypeStruct((B, H // 2, W // 2, C), jnp.float32),
        grid=(1,),                       # whole batch in one program: BN stats span N,H,W
        in_specs=[
            pl.BlockSpec((B, H, W, C), lambda i: (0, 0, 0, 0)),
            pl.BlockSpec((9, C, C), lambda i: (0, 0, 0)),
            pl.BlockSpec((1, C), lambda i: (0, 0)),
            pl.BlockSpec((1, C), lambda i: (0, 0)),
        ],
        out_specs=pl.BlockSpec((B, H // 2, W // 2, C), lambda i: (0, 0, 0, 0)),
        scratch_shapes=[pltpu.VMEM((B, H + 2, W + 2, C), jnp.float32)],
    )(feat, w, gamma, beta)


# ----------------------------------------------------------------------------
# Kernel 3: fc1 + ReLU + fc2 (fused tail)
# ----------------------------------------------------------------------------
def _fc_head_kernel(x_ref, w1_ref, b1_ref, w2_ref, b2_ref, o_ref):
    x = x_ref[...].astype(jnp.bfloat16)
    h = jnp.dot(x, w1_ref[...], preferred_element_type=jnp.float32) + b1_ref[...]
    h = jnp.maximum(h, 0.0)
    o_ref[...] = (jnp.dot(h.astype(jnp.bfloat16), w2_ref[...],
                          preferred_element_type=jnp.float32) + b2_ref[...])


def fc_head(flat, w1, b1, w2, b2):
    B, F = flat.shape
    H1, O = w1.shape[1], w2.shape[1]
    return pl.pallas_call(
        _fc_head_kernel,
        out_shape=jax.ShapeDtypeStruct((B, O), jnp.float32),
        grid=(1,),
        in_specs=[
            pl.BlockSpec((B, F), lambda i: (0, 0)),
            pl.BlockSpec((F, H1), lambda i: (0, 0)),
            pl.BlockSpec((1, H1), lambda i: (0, 0)),
            pl.BlockSpec((H1, O), lambda i: (0, 0)),
            pl.BlockSpec((1, O), lambda i: (0, 0)),
        ],
        out_specs=pl.BlockSpec((B, O), lambda i: (0, 0)),
    )(flat, w1, b1, w2, b2)


# ----------------------------------------------------------------------------
# Parameters (PyTorch layout) and one-time kernel-layout preparation
# ----------------------------------------------------------------------------
def init_params(key, n_chans1=32):
    ks = jax.random.split(key, 8)
    p = {}
    fan_in1 = 3 * 3 * 3
    p["conv1_w"] = jax.random.normal(ks[0], (n_chans1, 3, 3, 3), jnp.float32) * jnp.sqrt(2.0 / fan_in1)
    p["conv1_b"] = jax.random.uniform(ks[1], (n_chans1,), jnp.float32,
                                      -1.0 / jnp.sqrt(fan_in1), 1.0 / jnp.sqrt(fan_in1))
    fan_inr = n_chans1 * 3 * 3
    p["res_conv_w"] = jax.random.normal(ks[2], (n_chans1, n_chans1, 3, 3), jnp.float32) * jnp.sqrt(2.0 / fan_inr)
    p["res_gamma"] = jnp.full((n_chans1,), 0.5, jnp.float32)
    p["res_beta"] = jnp.zeros((n_chans1,), jnp.float32)
    fin1 = 8 * 8 * n_chans1
    p["fc1_w"] = jax.random.uniform(ks[3], (32, fin1), jnp.float32,
                                    -1.0 / jnp.sqrt(fin1), 1.0 / jnp.sqrt(fin1))
    p["fc1_b"] = jax.random.uniform(ks[4], (32,), jnp.float32,
                                    -1.0 / jnp.sqrt(fin1), 1.0 / jnp.sqrt(fin1))
    p["fc2_w"] = jax.random.uniform(ks[5], (2, 32), jnp.float32,
                                    -1.0 / jnp.sqrt(32.0), 1.0 / jnp.sqrt(32.0))
    p["fc2_b"] = jax.random.uniform(ks[6], (2,), jnp.float32,
                                    -1.0 / jnp.sqrt(32.0), 1.0 / jnp.sqrt(32.0))
    return p


def prepare_kernel_params(p, n_chans1=32):
    """One-time layout prep (hoisted out of the forward pass)."""
    C = n_chans1
    kp = {}
    # conv1 [out,in,kh,kw] -> [kh*kw*in, out]  (matches patch last-axis order)
    kp["conv1_w"] = (jnp.transpose(p["conv1_w"], (2, 3, 1, 0))
                     .reshape(3 * 3 * 3, C).astype(jnp.bfloat16))
    kp["conv1_b"] = p["conv1_b"].reshape(1, C).astype(jnp.float32)
    # shared ResBlock conv [out,in,kh,kw] -> [9, in, out] (tap-major)
    kp["res_w"] = (jnp.transpose(p["res_conv_w"], (2, 3, 1, 0))
                   .reshape(9, C, C).astype(jnp.bfloat16))
    kp["res_gamma"] = p["res_gamma"].reshape(1, C).astype(jnp.float32)
    kp["res_beta"] = p["res_beta"].reshape(1, C).astype(jnp.float32)
    # fc1 consumed PyTorch's NCHW flatten (c,h,w); our activations flatten NHWC (h,w,c)
    # -> permute fc1's input columns once so no per-forward activation transpose is needed.
    w1 = p["fc1_w"].reshape(32, C, 8, 8)
    w1 = jnp.transpose(w1, (0, 2, 3, 1)).reshape(32, 8 * 8 * C)
    kp["fc1_w"] = jnp.transpose(w1, (1, 0)).astype(jnp.bfloat16)          # [8*8*C, 32]
    kp["fc1_b"] = p["fc1_b"].reshape(1, 32).astype(jnp.float32)
    kp["fc2_w"] = jnp.transpose(p["fc2_w"], (1, 0)).astype(jnp.bfloat16)  # [32, 2]
    kp["fc2_b"] = p["fc2_b"].reshape(1, 2).astype(jnp.float32)
    return kp


def _im2col_3x3_nhwc(x):
    """[B,H,W,Cin] -> [B,H,W,9*Cin] patches (padding=1), last axis ordered (kh,kw,cin)."""
    B, H, W, Cin = x.shape
    xp = jnp.pad(x, ((0, 0), (1, 1), (1, 1), (0, 0)))
    taps = [xp[:, dh:dh + H, dw:dw + W, :] for dh in range(3) for dw in range(3)]
    return jnp.concatenate(taps, axis=-1)


# ----------------------------------------------------------------------------
# Forward pass
# ----------------------------------------------------------------------------
def net_res_deep_forward(x_nchw, kp, *, n_blocks=10, n_chans1=32):
    # NCHW (PyTorch) -> NHWC (channels on the 128-lane axis)
    x = jnp.transpose(x_nchw, (0, 2, 3, 1)).astype(jnp.float32)
    B = x.shape[0]

    # conv1 + bias + ReLU + 2x2 maxpool  (one kernel, grid over batch, "parallel")
    patches = _im2col_3x3_nhwc(x)                                  # [B,32,32,27] one-time XLA prep
    feat = conv1_relu_pool(patches, kp["conv1_w"], kp["conv1_b"])  # [B,16,16,C]

    # 10x the SAME ResBlock + final 2x2 maxpool (one kernel, VMEM-resident chain)
    feat = reschain_pool(feat, kp["res_w"], kp["res_gamma"], kp["res_beta"],
                         n_blocks=n_blocks)                        # [B,8,8,C]

    # flatten (NHWC; fc1 columns were pre-permuted to match PyTorch's NCHW .view)
    flat = feat.reshape(B, 8 * 8 * n_chans1)

    # fc1 + ReLU + fc2 (one kernel)
    return fc_head(flat, kp["fc1_w"], kp["fc1_b"], kp["fc2_w"], kp["fc2_b"])


if __name__ == "__main__":
    key = jax.random.PRNGKey(0)
    k_x, k_p = jax.random.split(key)
    # fc1 expects 8*8*n_chans1 features -> input must be NCHW [B, 3, 32, 32].
    x = jax.random.normal(k_x, (2, 3, 32, 32), jnp.float32)
    params = init_params(k_p, n_chans1=32)
    kp = prepare_kernel_params(params, n_chans1=32)

    fwd = jax.jit(functools.partial(net_res_deep_forward, n_blocks=10, n_chans1=32))
    logits = jax.block_until_ready(fwd(x, kp))
    assert logits.shape == (2, 2) and logits.dtype == jnp.float32
    print("KERNEL_OK")
</pallas_src>

<mosaic_0001>
module attributes {stable_mosaic.version = 11 : i64} {
  func.func @_conv1_relu_pool_kernel(%arg0: i32, %arg1: memref<1x32x32x27xf32, #tpu.memory_space<vmem>>, %arg2: memref<27x32xbf16, #tpu.memory_space<vmem>>, %arg3: memref<1x32xf32, #tpu.memory_space<vmem>>, %arg4: memref<1x16x16x32xf32, #tpu.memory_space<vmem>>) attributes {dimension_semantics = [#tpu.dimension_semantics<parallel>], iteration_bounds = array<i64: 2>, scalar_prefetch = 0 : i64, scratch_operands = 0 : i64, tpu.core_type = #tpu.core_type<tc>, window_params = [{transform_indices = @transform_0, window_bounds = array<i64: 1, 32, 32, 27>}, {pipeline_mode = #tpu.pipeline_mode<synchronous>, transform_indices = @transform_1, window_bounds = array<i64: 27, 32>}, {pipeline_mode = #tpu.pipeline_mode<synchronous>, transform_indices = @transform_2, window_bounds = array<i64: 1, 32>}, {transform_indices = @transform_3, window_bounds = array<i64: 1, 16, 16, 32>}]} {
    %c0 = arith.constant 0 : index
    %c0_0 = arith.constant 0 : index
    %c0_1 = arith.constant 0 : index
    %c0_2 = arith.constant 0 : index
    %0 = vector.load %arg1[%c0, %c0_0, %c0_1, %c0_2] : memref<1x32x32x27xf32, #tpu.memory_space<vmem>>, vector<1x32x32x27xf32>
    %1 = vector.shape_cast %0 : vector<1x32x32x27xf32> to vector<32x32x27xf32>
    %2 = vector.shape_cast %1 : vector<32x32x27xf32> to vector<1024x27xf32>
    %3 = arith.truncf %2 : vector<1024x27xf32> to vector<1024x27xbf16>
    %c0_3 = arith.constant 0 : index
    %c0_4 = arith.constant 0 : index
    %4 = vector.load %arg2[%c0_3, %c0_4] : memref<27x32xbf16, #tpu.memory_space<vmem>>, vector<27x32xbf16>
    %cst = arith.constant dense<0.000000e+00> : vector<1024x32xf32>
    %5 = tpu.matmul %3, %4, %cst {dimension_numbers = #tpu.dot_dimension_numbers<[1], [0], [0], [1], [0, 0, 1, 1], [], []>} : vector<1024x27xbf16>, vector<27x32xbf16>, vector<1024x32xf32> -> vector<1024x32xf32>
    %c0_5 = arith.constant 0 : index
    %c0_6 = arith.constant 0 : index
    %6 = vector.load %arg3[%c0_5, %c0_6] : memref<1x32xf32, #tpu.memory_space<vmem>>, vector<1x32xf32>
    %7 = vector.broadcast %6 : vector<1x32xf32> to vector<1024x32xf32>
    %8 = arith.addf %5, %7 : vector<1024x32xf32>
    %cst_7 = arith.constant 0.000000e+00 : f32
    %9 = vector.broadcast %cst_7 : f32 to vector<1024x32xf32>
    %10 = arith.maximumf %8, %9 : vector<1024x32xf32>
    %11 = vector.shape_cast %10 : vector<1024x32xf32> to vector<32x32x32xf32>
    %12 = vector.shape_cast %11 : vector<32x32x32xf32> to vector<16x2x32x32xf32>
    %13 = vector.extract_strided_slice %12 {offsets = [0, 0, 0, 0], sizes = [16, 1, 32, 32], strides = [1, 1, 1, 1]} : vector<16x2x32x32xf32> to vector<16x1x32x32xf32>
    %14 = vector.shape_cast %13 : vector<16x1x32x32xf32> to vector<16x32x32xf32>
    %15 = vector.extract_strided_slice %12 {offsets = [0, 1, 0, 0], sizes = [16, 1, 32, 32], strides = [1, 1, 1, 1]} : vector<16x2x32x32xf32> to vector<16x1x32x32xf32>
    %16 = vector.shape_cast %15 : vector<16x1x32x32xf32> to vector<16x32x32xf32>
    %17 = arith.maximumf %14, %16 : vector<16x32x32xf32>
    %18 = vector.extract_strided_slice %17 {offsets = [0, 0, 0], sizes = [16, 1, 32], strides = [1, 1, 1]} : vector<16x32x32xf32> to vector<16x1x32xf32>
    %19 = vector.extract_strided_slice %17 {offsets = [0, 1, 0], sizes = [16, 1, 32], strides = [1, 1, 1]} : vector<16x32x32xf32> to vector<16x1x32xf32>
    %20 = arith.maximumf %18, %19 : vector<16x1x32xf32>
    %21 = vector.extract_strided_slice %17 {offsets = [0, 2, 0], sizes = [16, 1, 32], strides = [1, 1, 1]} : vector<16x32x32xf32> to vector<16x1x32xf32>
    %22 = vector.extract_strided_slice %17 {offsets = [0, 3, 0], sizes = [16, 1, 32], strides = [1, 1, 1]} : vector<16x32x32xf32> to vector<16x1x32xf32>
    %23 = arith.maximumf %21, %22 : vector<16x1x32xf32>
    %24 = vector.extract_strided_slice %17 {offsets = [0, 4, 0], sizes = [16, 1, 32], strides = [1, 1, 1]} : vector<16x32x32xf32> to vector<16x1x32xf32>
    %25 = vector.extract_strided_slice %17 {offsets = [0, 5, 0], sizes = [16, 1, 32], strides = [1, 1, 1]} : vector<16x32x32xf32> to vector<16x1x32xf32>
    %26 = arith.maximumf %24, %25 : vector<16x1x32xf32>
    %27 = vector.extract_strided_slice %17 {offsets = [0, 6, 0], sizes = [16, 1, 32], strides = [1, 1, 1]} : vector<16x32x32xf32> to vector<16x1x32xf32>
    %28 = vector.extract_strided_slice %17 {offsets = [0, 7, 0], sizes = [16, 1, 32], strides = [1, 1, 1]} : vector<16x32x32xf32> to vector<16x1x32xf32>
    %29 = arith.maximumf %27, %28 : vector<16x1x32xf32>
    %30 = vector.extract_strided_slice %17 {offsets = [0, 8, 0], sizes = [16, 1, 32], strides = [1, 1, 1]} : vector<16x32x32xf32> to vector<16x1x32xf32>
    %31 = vector.extract_strided_slice %17 {offsets = [0, 9, 0], sizes = [16, 1, 32], strides = [1, 1, 1]} : vector<16x32x32xf32> to vector<16x1x32xf32>
    %32 = arith.maximumf %30, %31 : vector<16x1x32xf32>
    %33 = vector.extract_strided_slice %17 {offsets = [0, 10, 0], sizes = [16, 1, 32], strides = [1, 1, 1]} : vector<16x32x32xf32> to vector<16x1x32xf32>
    %34 = vector.extract_strided_slice %17 {offsets = [0, 11, 0], sizes = [16, 1, 32], strides = [1, 1, 1]} : vector<16x32x32xf32> to vector<16x1x32xf32>
    %35 = arith.maximumf %33, %34 : vector<16x1x32xf32>
    %36 = vector.extract_strided_slice %17 {offsets = [0, 12, 0], sizes = [16, 1, 32], strides = [1, 1, 1]} : vector<16x32x32xf32> to vector<16x1x32xf32>
    %37 = vector.extract_strided_slice %17 {offsets = [0, 13, 0], sizes = [16, 1, 32], strides = [1, 1, 1]} : vector<16x32x32xf32> to vector<16x1x32xf32>
    %38 = arith.maximumf %36, %37 : vector<16x1x32xf32>
    %39 = vector.extract_strided_slice %17 {offsets = [0, 14, 0], sizes = [16, 1, 32], strides = [1, 1, 1]} : vector<16x32x32xf32> to vector<16x1x32xf32>
    %40 = vector.extract_strided_slice %17 {offsets = [0, 15, 0], sizes = [16, 1, 32], strides = [1, 1, 1]} : vector<16x32x32xf32> to vector<16x1x32xf32>
    %41 = arith.maximumf %39, %40 : vector<16x1x32xf32>
    %42 = vector.extract_strided_slice %17 {offsets = [0, 16, 0], sizes = [16, 1, 32], strides = [1, 1, 1]} : vector<16x32x32xf32> to vector<16x1x32xf32>
    %43 = vector.extract_strided_slice %17 {offsets = [0, 17, 0], sizes = [16, 1, 32], strides = [1, 1, 1]} : vector<16x32x32xf32> to vector<16x1x32xf32>
    %44 = arith.maximumf %42, %43 : vector<16x1x32xf32>
    %45 = vector.extract_strided_slice %17 {offsets = [0, 18, 0], sizes = [16, 1, 32], strides = [1, 1, 1]} : vector<16x32x32xf32> to vector<16x1x32xf32>
    %46 = vector.extract_strided_slice %17 {offsets = [0, 19, 0], sizes = [16, 1, 32], strides = [1, 1, 1]} : vector<16x32x32xf32> to vector<16x1x32xf32>
    %47 = arith.maximumf %45, %46 : vector<16x1x32xf32>
    %48 = vector.extract_strided_slice %17 {offsets = [0, 20, 0], sizes = [16, 1, 32], strides = [1, 1, 1]} : vector<16x32x32xf32> to vector<16x1x32xf32>
    %49 = vector.extract_strided_slice %17 {offsets = [0, 21, 0], sizes = [16, 1, 32], strides = [1, 1, 1]} : vector<16x32x32xf32> to vector<16x1x32xf32>
    %50 = arith.maximumf %48, %49 : vector<16x1x32xf32>
    %51 = vector.extract_strided_slice %17 {offsets = [0, 22, 0], sizes = [16, 1, 32], strides = [1, 1, 1]} : vector<16x32x32xf32> to vector<16x1x32xf32>
    %52 = vector.extract_strided_slice %17 {offsets = [0, 23, 0], sizes = [16, 1, 32], strides = [1, 1, 1]} : vector<16x32x32xf32> to vector<16x1x32xf32>
    %53 = arith.maximumf %51, %52 : vector<16x1x32xf32>
    %54 = vector.extract_strided_slice %17 {offsets = [0, 24, 0], sizes = [16, 1, 32], strides = [1, 1, 1]} : vector<16x32x32xf32> to vector<16x1x32xf32>
    %55 = vector.extract_strided_slice %17 {offsets = [0, 25, 0], sizes = [16, 1, 32], strides = [1, 1, 1]} : vector<16x32x32xf32> to vector<16x1x32xf32>
    %56 = arith.maximumf %54, %55 : vector<16x1x32xf32>
    %57 = vector.extract_strided_slice %17 {offsets = [0, 26, 0], sizes = [16, 1, 32], strides = [1, 1, 1]} : vector<16x32x32xf32> to vector<16x1x32xf32>
    %58 = vector.extract_strided_slice %17 {offsets = [0, 27, 0], sizes = [16, 1, 32], strides = [1, 1, 1]} : vector<16x32x32xf32> to vector<16x1x32xf32>
    %59 = arith.maximumf %57, %58 : vector<16x1x32xf32>
    %60 = vector.extract_strided_slice %17 {offsets = [0, 28, 0], sizes = [16, 1, 32], strides = [1, 1, 1]} : vector<16x32x32xf32> to vector<16x1x32xf32>
    %61 = vector.extract_strided_slice %17 {offsets = [0, 29, 0], sizes = [16, 1, 32], strides = [1, 1, 1]} : vector<16x32x32xf32> to vector<16x1x32xf32>
    %62 = arith.maximumf %60, %61 : vector<16x1x32xf32>
    %63 = vector.extract_strided_slice %17 {offsets = [0, 30, 0], sizes = [16, 1, 32], strides = [1, 1, 1]} : vector<16x32x32xf32> to vector<16x1x32xf32>
    %64 = vector.extract_strided_slice %17 {offsets = [0, 31, 0], sizes = [16, 1, 32], strides = [1, 1, 1]} : vector<16x32x32xf32> to vector<16x1x32xf32>
    %65 = arith.maximumf %63, %64 : vector<16x1x32xf32>
    %66 = tpu.concatenate %20, %23, %26, %29, %32, %35, %38, %41, %44, %47, %50, %53, %56, %59, %62, %65 in 1 : vector<16x1x32xf32>, vector<16x1x32xf32>, vector<16x1x32xf32>, vector<16x1x32xf32>, vector<16x1x32xf32>, vector<16x1x32xf32>, vector<16x1x32xf32>, vector<16x1x32xf32>, vector<16x1x32xf32>, vector<16x1x32xf32>, vector<16x1x32xf32>, vector<16x1x32xf32>, vector<16x1x32xf32>, vector<16x1x32xf32>, vector<16x1x32xf32>, vector<16x1x32xf32> -> vector<16x16x32xf32>
    %c0_8 = arith.constant 0 : index
    %c0_9 = arith.constant 0 : index
    %c0_10 = arith.constant 0 : index
    %c0_11 = arith.constant 0 : index
    %67 = vector.load %arg4[%c0_8, %c0_9, %c0_10, %c0_11] : memref<1x16x16x32xf32, #tpu.memory_space<vmem>>, vector<1x16x16x32xf32>
    %68 = vector.shape_cast %67 : vector<1x16x16x32xf32> to vector<16x16x32xf32>
    %69 = vector.shape_cast %66 : vector<16x16x32xf32> to vector<1x16x16x32xf32>
    tpu.vector_store %arg4[%c0_8, %c0_9, %c0_10, %c0_11], %69 {strides = array<i32>} : memref<1x16x16x32xf32, #tpu.memory_space<vmem>>, vector<1x16x16x32xf32>,
    return
  }
  func.func @transform_0(%arg0: i32) -> (i32, i32, i32, i32) {
    %c0_i32 = arith.constant 0 : i32
    %c0_i32_0 = arith.constant 0 : i32
    %c0_i32_1 = arith.constant 0 : i32
    %c0_i32_2 = arith.constant 0 : i32
    return %arg0, %c0_i32, %c0_i32_0, %c0_i32_1 : i32, i32, i32, i32
  }
  func.func @transform_1(%arg0: i32) -> (i32, i32) {
    %c0_i32 = arith.constant 0 : i32
    %c0_i32_0 = arith.constant 0 : i32
    %c0_i32_1 = arith.constant 0 : i32
    return %c0_i32, %c0_i32_0 : i32, i32
  }
  func.func @transform_2(%arg0: i32) -> (i32, i32) {
    %c0_i32 = arith.constant 0 : i32
    %c0_i32_0 = arith.constant 0 : i32
    %c0_i32_1 = arith.constant 0 : i32
    return %c0_i32, %c0_i32_0 : i32, i32
  }
  func.func @transform_3(%arg0: i32) -> (i32, i32, i32, i32) {
    %c0_i32 = arith.constant 0 : i32
    %c0_i32_0 = arith.constant 0 : i32
    %c0_i32_1 = arith.constant 0 : i32
    %c0_i32_2 = arith.constant 0 : i32
    return %arg0, %c0_i32, %c0_i32_0, %c0_i32_1 : i32, i32, i32, i32
  }
}

module attributes {stable_mosaic.version = 11 : i64} {
  func.func @_reschain_pool_kernel(%arg0: i32, %arg1: memref<2x16x16x32xf32, #tpu.memory_space<vmem>>, %arg2: memref<9x32x32xbf16, #tpu.memory_space<vmem>>, %arg3: memref<1x32xf32, #tpu.memory_space<vmem>>, %arg4: memref<1x32xf32, #tpu.memory_space<vmem>>, %arg5: memref<2x8x8x32xf32, #tpu.memory_space<vmem>>, %arg6: memref<2x18x18x32xf32, #tpu.memory_space<vmem>>) attributes {dimension_semantics = [#tpu.dimension_semantics<arbitrary>], iteration_bounds = array<i64: 1>, scalar_prefetch = 0 : i64, scratch_operands = 1 : i64, tpu.core_type = #tpu.core_type<tc>, window_params = [{pipeline_mode = #tpu.pipeline_mode<synchronous>, transform_indices = @transform_0, window_bounds = array<i64: 2, 16, 16, 32>}, {pipeline_mode = #tpu.pipeline_mode<synchronous>, transform_indices = @transform_1, window_bounds = array<i64: 9, 32, 32>}, {pipeline_mode = #tpu.pipeline_mode<synchronous>, transform_indices = @transform_2, window_bounds = array<i64: 1, 32>}, {pipeline_mode = #tpu.pipeline_mode<synchronous>, transform_indices = @transform_3, window_bounds = array<i64: 1, 32>}, {pipeline_mode = #tpu.pipeline_mode<synchronous>, transform_indices = @transform_4, window_bounds = array<i64: 2, 8, 8, 32>}]} {
    %cst = arith.constant 0.000000e+00 : f32
    %0 = vector.broadcast %cst : f32 to vector<2x18x18x32xf32>
    %c0 = arith.constant 0 : index
    %c0_0 = arith.constant 0 : index
    %c0_1 = arith.constant 0 : index
    %c0_2 = arith.constant 0 : index
    %1 = vector.load %arg6[%c0, %c0_0, %c0_1, %c0_2] : memref<2x18x18x32xf32, #tpu.memory_space<vmem>>, vector<2x18x18x32xf32>
    tpu.vector_store %arg6[%c0, %c0_0, %c0_1, %c0_2], %0 {strides = array<i32>} : memref<2x18x18x32xf32, #tpu.memory_space<vmem>>, vector<2x18x18x32xf32>,
    %c0_3 = arith.constant 0 : index
    %c0_4 = arith.constant 0 : index
    %c0_5 = arith.constant 0 : index
    %c0_6 = arith.constant 0 : index
    %2 = vector.load %arg1[%c0_3, %c0_4, %c0_5, %c0_6] : memref<2x16x16x32xf32, #tpu.memory_space<vmem>>, vector<2x16x16x32xf32>
    %c0_7 = arith.constant 0 : index
    %c1 = arith.constant 1 : index
    %c1_8 = arith.constant 1 : index
    %c0_9 = arith.constant 0 : index
    %3 = vector.load %arg6[%c0_7, %c1, %c1_8, %c0_9] : memref<2x18x18x32xf32, #tpu.memory_space<vmem>>, vector<2x16x16x32xf32>
    tpu.vector_store %arg6[%c0_7, %c1, %c1_8, %c0_9], %2 {strides = array<i32>} : memref<2x18x18x32xf32, #tpu.memory_space<vmem>>, vector<2x16x16x32xf32>,
    %c0_i32 = arith.constant 0 : i32
    %c10_i32 = arith.constant 10 : i32
    %4 = arith.addi %c0_i32, %c10_i32 : i32
    %c1_i32 = arith.constant 1 : i32
    scf.for %arg7 = %c0_i32 to %4 step %c1_i32  : i32 {
      %cst_18 = arith.constant 0.000000e+00 : f32
      %38 = vector.broadcast %cst_18 : f32 to vector<512x32xf32>
      %c0_19 = arith.constant 0 : index
      %c0_20 = arith.constant 0 : index
      %c0_21 = arith.constant 0 : index
      %c0_22 = arith.constant 0 : index
      %39 = vector.load %arg6[%c0_19, %c0_20, %c0_21, %c0_22] : memref<2x18x18x32xf32, #tpu.memory_space<vmem>>, vector<2x16x16x32xf32>
      %40 = vector.shape_cast %39 : vector<2x16x16x32xf32> to vector<512x32xf32>
      %41 = arith.truncf %40 : vector<512x32xf32> to vector<512x32xbf16>
      %c0_23 = arith.constant 0 : index
      %c0_24 = arith.constant 0 : index
      %c0_25 = arith.constant 0 : index
      %42 = vector.load %arg2[%c0_23, %c0_24, %c0_25] : memref<9x32x32xbf16, #tpu.memory_space<vmem>>, vector<1x32x32xbf16>
      %43 = vector.shape_cast %42 : vector<1x32x32xbf16> to vector<32x32xbf16>
      %cst_26 = arith.constant dense<0.000000e+00> : vector<512x32xf32>
      %44 = tpu.matmul %41, %43, %cst_26 {dimension_numbers = #tpu.dot_dimension_numbers<[1], [0], [0], [1], [0, 0, 1, 1], [], []>} : vector<512x32xbf16>, vector<32x32xbf16>, vector<512x32xf32> -> vector<512x32xf32>
      %45 = arith.addf %38, %44 : vector<512x32xf32>
      %c0_27 = arith.constant 0 : index
      %c0_28 = arith.constant 0 : index
      %c1_29 = arith.constant 1 : index
      %c0_30 = arith.constant 0 : index
      %46 = vector.load %arg6[%c0_27, %c0_28, %c1_29, %c0_30] : memref<2x18x18x32xf32, #tpu.memory_space<vmem>>, vector<2x16x16x32xf32>
      %47 = vector.shape_cast %46 : vector<2x16x16x32xf32> to vector<512x32xf32>
      %48 = arith.truncf %47 : vector<512x32xf32> to vector<512x32xbf16>
      %c1_31 = arith.constant 1 : index
      %c0_32 = arith.constant 0 : index
      %c0_33 = arith.constant 0 : index
      %49 = vector.load %arg2[%c1_31, %c0_32, %c0_33] : memref<9x32x32xbf16, #tpu.memory_space<vmem>>, vector<1x32x32xbf16>
      %50 = vector.shape_cast %49 : vector<1x32x32xbf16> to vector<32x32xbf16>
      %cst_34 = arith.constant dense<0.000000e+00> : vector<512x32xf32>
      %51 = tpu.matmul %48, %50, %cst_34 {dimension_numbers = #tpu.dot_dimension_numbers<[1], [0], [0], [1], [0, 0, 1, 1], [], []>} : vector<512x32xbf16>, vector<32x32xbf16>, vector<512x32xf32> -> vector<512x32xf32>
      %52 = arith.addf %45, %51 : vector<512x32xf32>
      %c0_35 = arith.constant 0 : index
      %c0_36 = arith.constant 0 : index
      %c2 = arith.constant 2 : index
      %c0_37 = arith.constant 0 : index
      %53 = vector.load %arg6[%c0_35, %c0_36, %c2, %c0_37] : memref<2x18x18x32xf32, #tpu.memory_space<vmem>>, vector<2x16x16x32xf32>
      %54 = vector.shape_cast %53 : vector<2x16x16x32xf32> to vector<512x32xf32>
      %55 = arith.truncf %54 : vector<512x32xf32> to vector<512x32xbf16>
      %c2_38 = arith.constant 2 : index
      %c0_39 = arith.constant 0 : index
      %c0_40 = arith.constant 0 : index
      %56 = vector.load %arg2[%c2_38, %c0_39, %c0_40] : memref<9x32x32xbf16, #tpu.memory_space<vmem>>, vector<1x32x32xbf16>
      %57 = vector.shape_cast %56 : vector<1x32x32xbf16> to vector<32x32xbf16>
      %cst_41 = arith.constant dense<0.000000e+00> : vector<512x32xf32>
      %58 = tpu.matmul %55, %57, %cst_41 {dimension_numbers = #tpu.dot_dimension_numbers<[1], [0], [0], [1], [0, 0, 1, 1], [], []>} : vector<512x32xbf16>, vector<32x32xbf16>, vector<512x32xf32> -> vector<512x32xf32>
      %59 = arith.addf %52, %58 : vector<512x32xf32>
      %c0_42 = arith.constant 0 : index
      %c1_43 = arith.constant 1 : index
      %c0_44 = arith.constant 0 : index
      %c0_45 = arith.constant 0 : index
      %60 = vector.load %arg6[%c0_42, %c1_43, %c0_44, %c0_45] : memref<2x18x18x32xf32, #tpu.memory_space<vmem>>, vector<2x16x16x32xf32>
      %61 = vector.shape_cast %60 : vector<2x16x16x32xf32> to vector<512x32xf32>
      %62 = arith.truncf %61 : vector<512x32xf32> to vector<512x32xbf16>
      %c3 = arith.constant 3 : index
      %c0_46 = arith.constant 0 : index
      %c0_47 = arith.constant 0 : index
      %63 = vector.load %arg2[%c3, %c0_46, %c0_47] : memref<9x32x32xbf16, #tpu.memory_space<vmem>>, vector<1x32x32xbf16>
      %64 = vector.shape_cast %63 : vector<1x32x32xbf16> to vector<32x32xbf16>
      %cst_48 = arith.constant dense<0.000000e+00> : vector<512x32xf32>
      %65 = tpu.matmul %62, %64, %cst_48 {dimension_numbers = #tpu.dot_dimension_numbers<[1], [0], [0], [1], [0, 0, 1, 1], [], []>} : vector<512x32xbf16>, vector<32x32xbf16>, vector<512x32xf32> -> vector<512x32xf32>
      %66 = arith.addf %59, %65 : vector<512x32xf32>
      %c0_49 = arith.constant 0 : index
      %c1_50 = arith.constant 1 : index
      %c1_51 = arith.constant 1 : index
      %c0_52 = arith.constant 0 : index
      %67 = vector.load %arg6[%c0_49, %c1_50, %c1_51, %c0_52] : memref<2x18x18x32xf32, #tpu.memory_space<vmem>>, vector<2x16x16x32xf32>
      %68 = vector.shape_cast %67 : vector<2x16x16x32xf32> to vector<512x32xf32>
      %69 = arith.truncf %68 : vector<512x32xf32> to vector<512x32xbf16>
      %c4 = arith.constant 4 : index
      %c0_53 = arith.constant 0 : index
      %c0_54 = arith.constant 0 : index
      %70 = vector.load %arg2[%c4, %c0_53, %c0_54] : memref<9x32x32xbf16, #tpu.memory_space<vmem>>, vector<1x32x32xbf16>
      %71 = vector.shape_cast %70 : vector<1x32x32xbf16> to vector<32x32xbf16>
      %cst_55 = arith.constant dense<0.000000e+00> : vector<512x32xf32>
      %72 = tpu.matmul %69, %71, %cst_55 {dimension_numbers = #tpu.dot_dimension_numbers<[1], [0], [0], [1], [0, 0, 1, 1], [], []>} : vector<512x32xbf16>, vector<32x32xbf16>, vector<512x32xf32> -> vector<512x32xf32>
      %73 = arith.addf %66, %72 : vector<512x32xf32>
      %c0_56 = arith.constant 0 : index
      %c1_57 = arith.constant 1 : index
      %c2_58 = arith.constant 2 : index
      %c0_59 = arith.constant 0 : index
      %74 = vector.load %arg6[%c0_56, %c1_57, %c2_58, %c0_59] : memref<2x18x18x32xf32, #tpu.memory_space<vmem>>, vector<2x16x16x32xf32>
      %75 = vector.shape_cast %74 : vector<2x16x16x32xf32> to vector<512x32xf32>
      %76 = arith.truncf %75 : vector<512x32xf32> to vector<512x32xbf16>
      %c5 = arith.constant 5 : index
      %c0_60 = arith.constant 0 : index
      %c0_61 = arith.constant 0 : index
      %77 = vector.load %arg2[%c5, %c0_60, %c0_61] : memref<9x32x32xbf16, #tpu.memory_space<vmem>>, vector<1x32x32xbf16>
      %78 = vector.shape_cast %77 : vector<1x32x32xbf16> to vector<32x32xbf16>
      %cst_62 = arith.constant dense<0.000000e+00> : vector<512x32xf32>
      %79 = tpu.matmul %76, %78, %cst_62 {dimension_numbers = #tpu.dot_dimension_numbers<[1], [0], [0], [1], [0, 0, 1, 1], [], []>} : vector<512x32xbf16>, vector<32x32xbf16>, vector<512x32xf32> -> vector<512x32xf32>
      %80 = arith.addf %73, %79 : vector<512x32xf32>
      %c0_63 = arith.constant 0 : index
      %c2_64 = arith.constant 2 : index
      %c0_65 = arith.constant 0 : index
      %c0_66 = arith.constant 0 : index
      %81 = vector.load %arg6[%c0_63, %c2_64, %c0_65, %c0_66] : memref<2x18x18x32xf32, #tpu.memory_space<vmem>>, vector<2x16x16x32xf32>
      %82 = vector.shape_cast %81 : vector<2x16x16x32xf32> to vector<512x32xf32>
      %83 = arith.truncf %82 : vector<512x32xf32> to vector<512x32xbf16>
      %c6 = arith.constant 6 : index
      %c0_67 = arith.constant 0 : index
      %c0_68 = arith.constant 0 : index
      %84 = vector.load %arg2[%c6, %c0_67, %c0_68] : memref<9x32x32xbf16, #tpu.memory_space<vmem>>, vector<1x32x32xbf16>
      %85 = vector.shape_cast %84 : vector<1x32x32xbf16> to vector<32x32xbf16>
      %cst_69 = arith.constant dense<0.000000e+00> : vector<512x32xf32>
      %86 = tpu.matmul %83, %85, %cst_69 {dimension_numbers = #tpu.dot_dimension_numbers<[1], [0], [0], [1], [0, 0, 1, 1], [], []>} : vector<512x32xbf16>, vector<32x32xbf16>, vector<512x32xf32> -> vector<512x32xf32>
      %87 = arith.addf %80, %86 : vector<512x32xf32>
      %c0_70 = arith.constant 0 : index
      %c2_71 = arith.constant 2 : index
      %c1_72 = arith.constant 1 : index
      %c0_73 = arith.constant 0 : index
      %88 = vector.load %arg6[%c0_70, %c2_71, %c1_72, %c0_73] : memref<2x18x18x32xf32, #tpu.memory_space<vmem>>, vector<2x16x16x32xf32>
      %89 = vector.shape_cast %88 : vector<2x16x16x32xf32> to vector<512x32xf32>
      %90 = arith.truncf %89 : vector<512x32xf32> to vector<512x32xbf16>
      %c7 = arith.constant 7 : index
      %c0_74 = arith.constant 0 : index
      %c0_75 = arith.constant 0 : index
      %91 = vector.load %arg2[%c7, %c0_74, %c0_75] : memref<9x32x32xbf16, #tpu.memory_space<vmem>>, vector<1x32x32xbf16>
      %92 = vector.shape_cast %91 : vector<1x32x32xbf16> to vector<32x32xbf16>
      %cst_76 = arith.constant dense<0.000000e+00> : vector<512x32xf32>
      %93 = tpu.matmul %90, %92, %cst_76 {dimension_numbers = #tpu.dot_dimension_numbers<[1], [0], [0], [1], [0, 0, 1, 1], [], []>} : vector<512x32xbf16>, vector<32x32xbf16>, vector<512x32xf32> -> vector<512x32xf32>
      %94 = arith.addf %87, %93 : vector<512x32xf32>
      %c0_77 = arith.constant 0 : index
      %c2_78 = arith.constant 2 : index
      %c2_79 = arith.constant 2 : index
      %c0_80 = arith.constant 0 : index
      %95 = vector.load %arg6[%c0_77, %c2_78, %c2_79, %c0_80] : memref<2x18x18x32xf32, #tpu.memory_space<vmem>>, vector<2x16x16x32xf32>
      %96 = vector.shape_cast %95 : vector<2x16x16x32xf32> to vector<512x32xf32>
      %97 = arith.truncf %96 : vector<512x32xf32> to vector<512x32xbf16>
      %c8 = arith.constant 8 : index
      %c0_81 = arith.constant 0 : index
      %c0_82 = arith.constant 0 : index
      %98 = vector.load %arg2[%c8, %c0_81, %c0_82] : memref<9x32x32xbf16, #tpu.memory_space<vmem>>, vector<1x32x32xbf16>
      %99 = vector.shape_cast %98 : vector<1x32x32xbf16> to vector<32x32xbf16>
      %cst_83 = arith.constant dense<0.000000e+00> : vector<512x32xf32>
      %100 = tpu.matmul %97, %99, %cst_83 {dimension_numbers = #tpu.dot_dimension_numbers<[1], [0], [0], [1], [0, 0, 1, 1], [], []>} : vector<512x32xbf16>, vector<32x32xbf16>, vector<512x32xf32> -> vector<512x32xf32>
      %101 = arith.addf %94, %100 : vector<512x32xf32>
      %cst_84 = arith.constant dense<0.000000e+00> : vector<32xf32>
      %102 = vector.multi_reduction <add>, %101, %cst_84 [0] : vector<512x32xf32> to vector<32xf32>
      %103 = vector.shape_cast %102 : vector<32xf32> to vector<1x32xf32>
      %cst_85 = arith.constant 5.120000e+02 : f32
      %104 = vector.broadcast %cst_85 : f32 to vector<1x32xf32>
      %105 = arith.divf %103, %104 : vector<1x32xf32>
      %106 = vector.broadcast %105 : vector<1x32xf32> to vector<512x32xf32>
      %107 = arith.subf %101, %106 : vector<512x32xf32>
      %108 = arith.mulf %107, %107 : vector<512x32xf32>
      %cst_86 = arith.constant dense<0.000000e+00> : vector<32xf32>
      %109 = vector.multi_reduction <add>, %108, %cst_86 [0] : vector<512x32xf32> to vector<32xf32>
      %110 = vector.shape_cast %109 : vector<32xf32> to vector<1x32xf32>
      %cst_87 = arith.constant 5.120000e+02 : f32
      %111 = vector.broadcast %cst_87 : f32 to vector<1x32xf32>
      %112 = arith.divf %110, %111 : vector<1x32xf32>
      %cst_88 = arith.constant 9.99999974E-6 : f32
      %113 = vector.broadcast %cst_88 : f32 to vector<1x32xf32>
      %114 = arith.addf %112, %113 : vector<1x32xf32>
      %115 = math.rsqrt %114 : vector<1x32xf32>
      %116 = vector.broadcast %115 : vector<1x32xf32> to vector<512x32xf32>
      %117 = arith.mulf %107, %116 : vector<512x32xf32>
      %c0_89 = arith.constant 0 : index
      %c0_90 = arith.constant 0 : index
      %118 = vector.load %arg3[%c0_89, %c0_90] : memref<1x32xf32, #tpu.memory_space<vmem>>, vector<1x32xf32>
      %119 = vector.broadcast %118 : vector<1x32xf32> to vector<512x32xf32>
      %120 = arith.mulf %117, %119 : vector<512x32xf32>
      %c0_91 = arith.constant 0 : index
      %c0_92 = arith.constant 0 : index
      %121 = vector.load %arg4[%c0_91, %c0_92] : memref<1x32xf32, #tpu.memory_space<vmem>>, vector<1x32xf32>
      %122 = vector.broadcast %121 : vector<1x32xf32> to vector<512x32xf32>
      %123 = arith.addf %120, %122 : vector<512x32xf32>
      %c0_93 = arith.constant 0 : index
      %c1_94 = arith.constant 1 : index
      %c1_95 = arith.constant 1 : index
      %c0_96 = arith.constant 0 : index
      %124 = vector.load %arg6[%c0_93, %c1_94, %c1_95, %c0_96] : memref<2x18x18x32xf32, #tpu.memory_space<vmem>>, vector<2x16x16x32xf32>
      %125 = vector.shape_cast %124 : vector<2x16x16x32xf32> to vector<512x32xf32>
      %cst_97 = arith.constant 0.000000e+00 : f32
      %126 = vector.broadcast %cst_97 : f32 to vector<512x32xf32>
      %127 = arith.maximumf %123, %126 : vector<512x32xf32>
      %128 = arith.addf %127, %125 : vector<512x32xf32>
      %129 = vector.shape_cast %128 : vector<512x32xf32> to vector<2x16x16x32xf32>
      %c0_98 = arith.constant 0 : index
      %c1_99 = arith.constant 1 : index
      %c1_100 = arith.constant 1 : index
      %c0_101 = arith.constant 0 : index
      %130 = vector.load %arg6[%c0_98, %c1_99, %c1_100, %c0_101] : memref<2x18x18x32xf32, #tpu.memory_space<vmem>>, vector<2x16x16x32xf32>
      tpu.vector_store %arg6[%c0_98, %c1_99, %c1_100, %c0_101], %129 {strides = array<i32>} : memref<2x18x18x32xf32, #tpu.memory_space<vmem>>, vector<2x16x16x32xf32>,
    }
    %c0_10 = arith.constant 0 : index
    %c1_11 = arith.constant 1 : index
    %c1_12 = arith.constant 1 : index
    %c0_13 = arith.constant 0 : index
    %5 = vector.load %arg6[%c0_10, %c1_11, %c1_12, %c0_13] : memref<2x18x18x32xf32, #tpu.memory_space<vmem>>, vector<2x16x16x32xf32>
    %6 = vector.shape_cast %5 : vector<2x16x16x32xf32> to vector<2x8x2x16x32xf32>
    %7 = vector.extract_strided_slice %6 {offsets = [0, 0, 0, 0, 0], sizes = [2, 8, 1, 16, 32], strides = [1, 1, 1, 1, 1]} : vector<2x8x2x16x32xf32> to vector<2x8x1x16x32xf32>
    %8 = vector.shape_cast %7 : vector<2x8x1x16x32xf32> to vector<2x8x16x32xf32>
    %9 = vector.extract_strided_slice %6 {offsets = [0, 0, 1, 0, 0], sizes = [2, 8, 1, 16, 32], strides = [1, 1, 1, 1, 1]} : vector<2x8x2x16x32xf32> to vector<2x8x1x16x32xf32>
    %10 = vector.shape_cast %9 : vector<2x8x1x16x32xf32> to vector<2x8x16x32xf32>
    %11 = arith.maximumf %8, %10 : vector<2x8x16x32xf32>
    %12 = vector.extract_strided_slice %11 {offsets = [0, 0, 0, 0], sizes = [2, 8, 1, 32], strides = [1, 1, 1, 1]} : vector<2x8x16x32xf32> to vector<2x8x1x32xf32>
    %13 = vector.extract_strided_slice %11 {offsets = [0, 0, 1, 0], sizes = [2, 8, 1, 32], strides = [1, 1, 1, 1]} : vector<2x8x16x32xf32> to vector<2x8x1x32xf32>
    %14 = arith.maximumf %12, %13 : vector<2x8x1x32xf32>
    %15 = vector.extract_strided_slice %11 {offsets = [0, 0, 2, 0], sizes = [2, 8, 1, 32], strides = [1, 1, 1, 1]} : vector<2x8x16x32xf32> to vector<2x8x1x32xf32>
    %16 = vector.extract_strided_slice %11 {offsets = [0, 0, 3, 0], sizes = [2, 8, 1, 32], strides = [1, 1, 1, 1]} : vector<2x8x16x32xf32> to vector<2x8x1x32xf32>
    %17 = arith.maximumf %15, %16 : vector<2x8x1x32xf32>
    %18 = vector.extract_strided_slice %11 {offsets = [0, 0, 4, 0], sizes = [2, 8, 1, 32], strides = [1, 1, 1, 1]} : vector<2x8x16x32xf32> to vector<2x8x1x32xf32>
    %19 = vector.extract_strided_slice %11 {offsets = [0, 0, 5, 0], sizes = [2, 8, 1, 32], strides = [1, 1, 1, 1]} : vector<2x8x16x32xf32> to vector<2x8x1x32xf32>
    %20 = arith.maximumf %18, %19 : vector<2x8x1x32xf32>
    %21 = vector.extract_strided_slice %11 {offsets = [0, 0, 6, 0], sizes = [2, 8, 1, 32], strides = [1, 1, 1, 1]} : vector<2x8x16x32xf32> to vector<2x8x1x32xf32>
    %22 = vector.extract_strided_slice %11 {offsets = [0, 0, 7, 0], sizes = [2, 8, 1, 32], strides = [1, 1, 1, 1]} : vector<2x8x16x32xf32> to vector<2x8x1x32xf32>
    %23 = arith.maximumf %21, %22 : vector<2x8x1x32xf32>
    %24 = vector.extract_strided_slice %11 {offsets = [0, 0, 8, 0], sizes = [2, 8, 1, 32], strides = [1, 1, 1, 1]} : vector<2x8x16x32xf32> to vector<2x8x1x32xf32>
    %25 = vector.extract_strided_slice %11 {offsets = [0, 0, 9, 0], sizes = [2, 8, 1, 32], strides = [1, 1, 1, 1]} : vector<2x8x16x32xf32> to vector<2x8x1x32xf32>
    %26 = arith.maximumf %24, %25 : vector<2x8x1x32xf32>
    %27 = vector.extract_strided_slice %11 {offsets = [0, 0, 10, 0], sizes = [2, 8, 1, 32], strides = [1, 1, 1, 1]} : vector<2x8x16x32xf32> to vector<2x8x1x32xf32>
    %28 = vector.extract_strided_slice %11 {offsets = [0, 0, 11, 0], sizes = [2, 8, 1, 32], strides = [1, 1, 1, 1]} : vector<2x8x16x32xf32> to vector<2x8x1x32xf32>
    %29 = arith.maximumf %27, %28 : vector<2x8x1x32xf32>
    %30 = vector.extract_strided_slice %11 {offsets = [0, 0, 12, 0], sizes = [2, 8, 1, 32], strides = [1, 1, 1, 1]} : vector<2x8x16x32xf32> to vector<2x8x1x32xf32>
    %31 = vector.extract_strided_slice %11 {offsets = [0, 0, 13, 0], sizes = [2, 8, 1, 32], strides = [1, 1, 1, 1]} : vector<2x8x16x32xf32> to vector<2x8x1x32xf32>
    %32 = arith.maximumf %30, %31 : vector<2x8x1x32xf32>
    %33 = vector.extract_strided_slice %11 {offsets = [0, 0, 14, 0], sizes = [2, 8, 1, 32], strides = [1, 1, 1, 1]} : vector<2x8x16x32xf32> to vector<2x8x1x32xf32>
    %34 = vector.extract_strided_slice %11 {offsets = [0, 0, 15, 0], sizes = [2, 8, 1, 32], strides = [1, 1, 1, 1]} : vector<2x8x16x32xf32> to vector<2x8x1x32xf32>
    %35 = arith.maximumf %33, %34 : vector<2x8x1x32xf32>
    %36 = tpu.concatenate %14, %17, %20, %23, %26, %29, %32, %35 in 2 : vector<2x8x1x32xf32>, vector<2x8x1x32xf32>, vector<2x8x1x32xf32>, vector<2x8x1x32xf32>, vector<2x8x1x32xf32>, vector<2x8x1x32xf32>, vector<2x8x1x32xf32>, vector<2x8x1x32xf32> -> vector<2x8x8x32xf32>
    %c0_14 = arith.constant 0 : index
    %c0_15 = arith.constant 0 : index
    %c0_16 = arith.constant 0 : index
    %c0_17 = arith.constant 0 : index
    %37 = vector.load %arg5[%c0_14, %c0_15, %c0_16, %c0_17] : memref<2x8x8x32xf32, #tpu.memory_space<vmem>>, vector<2x8x8x32xf32>
    tpu.vector_store %arg5[%c0_14, %c0_15, %c0_16, %c0_17], %36 {strides = array<i32>} : memref<2x8x8x32xf32, #tpu.memory_space<vmem>>, vector<2x8x8x32xf32>,
    return
  }
  func.func @transform_0(%arg0: i32) -> (i32, i32, i32, i32) {
    %c0_i32 = arith.constant 0 : i32
    %c0_i32_0 = arith.constant 0 : i32
    %c0_i32_1 = arith.constant 0 : i32
    %c0_i32_2 = arith.constant 0 : i32
    %c0_i32_3 = arith.constant 0 : i32
    return %c0_i32, %c0_i32_0, %c0_i32_1, %c0_i32_2 : i32, i32, i32, i32
  }
  func.func @transform_1(%arg0: i32) -> (i32, i32, i32) {
    %c0_i32 = arith.constant 0 : i32
    %c0_i32_0 = arith.constant 0 : i32
    %c0_i32_1 = arith.constant 0 : i32
    %c0_i32_2 = arith.constant 0 : i32
    return %c0_i32, %c0_i32_0, %c0_i32_1 : i32, i32, i32
  }
  func.func @transform_2(%arg0: i32) -> (i32, i32) {
    %c0_i32 = arith.constant 0 : i32
    %c0_i32_0 = arith.constant 0 : i32
    %c0_i32_1 = arith.constant 0 : i32
    return %c0_i32, %c0_i32_0 : i32, i32
  }
  func.func @transform_3(%arg0: i32) -> (i32, i32) {
    %c0_i32 = arith.constant 0 : i32
    %c0_i32_0 = arith.constant 0 : i32
    %c0_i32_1 = arith.constant 0 : i32
    return %c0_i32, %c0_i32_0 : i32, i32
  }
  func.func @transform_4(%arg0: i32) -> (i32, i32, i32, i32) {
    %c0_i32 = arith.constant 0 : i32
    %c0_i32_0 = arith.constant 0 : i32
    %c0_i32_1 = arith.constant 0 : i32
    %c0_i32_2 = arith.constant 0 : i32
    %c0_i32_3 = arith.constant 0 : i32
    return %c0_i32, %c0_i32_0, %c0_i32_1, %c0_i32_2 : i32, i32, i32, i32
  }
}

module attributes {stable_mosaic.version = 11 : i64} {
  func.func @_fc_head_kernel(%arg0: i32, %arg1: memref<2x2048xf32, #tpu.memory_space<vmem>>, %arg2: memref<2048x32xbf16, #tpu.memory_space<vmem>>, %arg3: memref<1x32xf32, #tpu.memory_space<vmem>>, %arg4: memref<32x2xbf16, #tpu.memory_space<vmem>>, %arg5: memref<1x2xf32, #tpu.memory_space<vmem>>, %arg6: memref<2x2xf32, #tpu.memory_space<vmem>>) attributes {dimension_semantics = [#tpu.dimension_semantics<arbitrary>], iteration_bounds = array<i64: 1>, scalar_prefetch = 0 : i64, scratch_operands = 0 : i64, tpu.core_type = #tpu.core_type<tc>, window_params = [{pipeline_mode = #tpu.pipeline_mode<synchronous>, transform_indices = @transform_0, window_bounds = array<i64: 2, 2048>}, {pipeline_mode = #tpu.pipeline_mode<synchronous>, transform_indices = @transform_1, window_bounds = array<i64: 2048, 32>}, {pipeline_mode = #tpu.pipeline_mode<synchronous>, transform_indices = @transform_2, window_bounds = array<i64: 1, 32>}, {pipeline_mode = #tpu.pipeline_mode<synchronous>, transform_indices = @transform_3, window_bounds = array<i64: 32, 2>}, {pipeline_mode = #tpu.pipeline_mode<synchronous>, transform_indices = @transform_4, window_bounds = array<i64: 1, 2>}, {pipeline_mode = #tpu.pipeline_mode<synchronous>, transform_indices = @transform_5, window_bounds = array<i64: 2, 2>}]} {
    %c0 = arith.constant 0 : index
    %c0_0 = arith.constant 0 : index
    %0 = vector.load %arg1[%c0, %c0_0] : memref<2x2048xf32, #tpu.memory_space<vmem>>, vector<2x2048xf32>
    %1 = arith.truncf %0 : vector<2x2048xf32> to vector<2x2048xbf16>
    %c0_1 = arith.constant 0 : index
    %c0_2 = arith.constant 0 : index
    %2 = vector.load %arg2[%c0_1, %c0_2] : memref<2048x32xbf16, #tpu.memory_space<vmem>>, vector<2048x32xbf16>
    %cst = arith.constant dense<0.000000e+00> : vector<2x32xf32>
    %3 = tpu.matmul %1, %2, %cst {dimension_numbers = #tpu.dot_dimension_numbers<[1], [0], [0], [1], [0, 0, 1, 1], [], []>} : vector<2x2048xbf16>, vector<2048x32xbf16>, vector<2x32xf32> -> vector<2x32xf32>
    %c0_3 = arith.constant 0 : index
    %c0_4 = arith.constant 0 : index
    %4 = vector.load %arg3[%c0_3, %c0_4] : memref<1x32xf32, #tpu.memory_space<vmem>>, vector<1x32xf32>
    %5 = vector.broadcast %4 : vector<1x32xf32> to vector<2x32xf32>
    %6 = arith.addf %3, %5 : vector<2x32xf32>
    %cst_5 = arith.constant 0.000000e+00 : f32
    %7 = vector.broadcast %cst_5 : f32 to vector<2x32xf32>
    %8 = arith.maximumf %6, %7 : vector<2x32xf32>
    %9 = arith.truncf %8 : vector<2x32xf32> to vector<2x32xbf16>
    %c0_6 = arith.constant 0 : index
    %c0_7 = arith.constant 0 : index
    %10 = vector.load %arg4[%c0_6, %c0_7] : memref<32x2xbf16, #tpu.memory_space<vmem>>, vector<32x2xbf16>
    %cst_8 = arith.constant dense<0.000000e+00> : vector<2x2xf32>
    %11 = tpu.matmul %9, %10, %cst_8 {dimension_numbers = #tpu.dot_dimension_numbers<[1], [0], [0], [1], [0, 0, 1, 1], [], []>} : vector<2x32xbf16>, vector<32x2xbf16>, vector<2x2xf32> -> vector<2x2xf32>
    %c0_9 = arith.constant 0 : index
    %c0_10 = arith.constant 0 : index
    %12 = vector.load %arg5[%c0_9, %c0_10] : memref<1x2xf32, #tpu.memory_space<vmem>>, vector<1x2xf32>
    %13 = vector.broadcast %12 : vector<1x2xf32> to vector<2x2xf32>
    %14 = arith.addf %11, %13 : vector<2x2xf32>
    %c0_11 = arith.constant 0 : index
    %c0_12 = arith.constant 0 : index
    %15 = vector.load %arg6[%c0_11, %c0_12] : memref<2x2xf32, #tpu.memory_space<vmem>>, vector<2x2xf32>
    tpu.vector_store %arg6[%c0_11, %c0_12], %14 {strides = array<i32>} : memref<2x2xf32, #tpu.memory_space<vmem>>, vector<2x2xf32>,
    return
  }
  func.func @transform_0(%arg0: i32) -> (i32, i32) {
    %c0_i32 = arith.constant 0 : i32
    %c0_i32_0 = arith.constant 0 : i32
    %c0_i32_1 = arith.constant 0 : i32
    return %c0_i32, %c0_i32_0 : i32, i32
  }
  func.func @transform_1(%arg0: i32) -> (i32, i32) {
    %c0_i32 = arith.constant 0 : i32
    %c0_i32_0 = arith.constant 0 : i32
    %c0_i32_1 = arith.constant 0 : i32
    return %c0_i32, %c0_i32_0 : i32, i32
  }
  func.func @transform_2(%arg0: i32) -> (i32, i32) {
    %c0_i32 = arith.constant 0 : i32
    %c0_i32_0 = arith.constant 0 : i32
    %c0_i32_1 = arith.constant 0 : i32
    return %c0_i32, %c0_i32_0 : i32, i32
  }
  func.func @transform_3(%arg0: i32) -> (i32, i32) {
    %c0_i32 = arith.constant 0 : i32
    %c0_i32_0 = arith.constant 0 : i32
    %c0_i32_1 = arith.constant 0 : i32
    return %c0_i32, %c0_i32_0 : i32, i32
  }
  func.func @transform_4(%arg0: i32) -> (i32, i32) {
    %c0_i32 = arith.constant 0 : i32
    %c0_i32_0 = arith.constant 0 : i32
    %c0_i32_1 = arith.constant 0 : i32
    return %c0_i32, %c0_i32_0 : i32, i32
  }
  func.func @transform_5(%arg0: i32) -> (i32, i32) {
    %c0_i32 = arith.constant 0 : i32
    %c0_i32_0 = arith.constant 0 : i32
    %c0_i32_1 = arith.constant 0 : i32
    return %c0_i32, %c0_i32_0 : i32, i32
  }
}

</mosaic_0001>

<bundles_post_ra>
// kernel: net_res_deep_forward.3
= control target key start
LH: loop header
LB: loop body
LE: loop exit
PB: predicated region body
PF: predicated region fallthrough
CT: control target
= control target key end

     0   :  { %s2731_s12 = smov 0   ;;  %s3702_s0 = inlined_call_operand.vmem [shape: f32[2,32,32,27], index: 0, kind: input, shape index: {}]   ;;  %s3703_s1 = inlined_call_operand.vmem [shape: bf16[27,32], index: 1, kind: input, shape index: {}]   ;;  %s3704_s2 = inlined_call_operand.vmem [shape: f32[1,32], index: 2, kind: input, shape index: {}]   ;;  %s3705_s3 = inlined_call_operand.vmem [shape: f32[2,16,16,32], index: 3, kind: output, shape index: {}]  }
   0x1 LB: > { %s2408_s13 = sadd.s32 4294967295, %s2708_s12   ;;  %p2412_p0 = scmp.ge.s32.totalorder %s2708_s12, 1  ;;  %s2708_s12 = sphi %s2731_s12, %s13_s12  }
   0x2   : > { %p137_p1 = scmp.lt.s32.totalorder %s2708_s12, 3 }
   0x4   : > { %p138_p2 = pnand %p2412_p0, %p137_p1 }
   0x5   : > { %p161_p3 = scmp.lt.s32.totalorder (!%p138_p2), %s2408_s13, 1 }
   0x6   : > { %141 = sbr.rel (%p138_p2) target bundleno = 453 (0x1c5), region = 32 }
   0xb   : > { %v2699_v0 = vld [vmem:[%s3703_s1 + $0x8] sm:$0x3f]   ;;  %vm579_vm0 = vcmask 1044480   ;;  %vm580_vm1 = vcmask 1045504   ;;  %v2710_v1 = vmov 65535   ;;  %v2700_v5 = vld [vmem:[%s3703_s1] sm:$0xff]  }
   0xc   : > { %v581_v2 = vsel %vm579_vm0, 4294967295, %v2710_v1  ;;  %s3707_s13 = smov (!%p161_p3, %s2408_s13), 1  ;;  %vm386_vm2 = vcmask 220160   ;;  %vm2091_vm3 = vcmask 1040384   ;;  %vm2108_vm4 = vcmask 1041408  }
   0xd   : > { %v582_v3 = vsel %vm580_vm1, %v581_v2, 0  ;;  %s2486_s18 = sshll.u32 %s3707_s13, 10  ;;  %vm2125_vm5 = vcmask 1042432   ;;  %vm2142_vm6 = vcmask 1043456   ;;  %vm2191_vm7 = vcmask 1046528   ;;  %s2487_s24 = sshll.u32 %s3707_s13, 8 }
   0xe   : > { %v584_v4 = vand.u32 %v2699_v0, %v582_v3  ;;  %s2753_s21 = scalar_lea.vmem %s3702_s0, %s2486_s18  ;;  %vm2320_vm8 = vcmask 261120   ;;  %s3022_s27 = scalar_lea.vmem %s3705_s3, %s2487_s24 }
   0xf   : > { %v172_v6 = vld [vmem:[%s2753_s21] sm:$0xff]  ;;  %v173_v7 = vld [vmem:[%s2753_s21 + $0x8] sm:$0xff]  ;;  %v174_v11 = vld [vmem:[%s2753_s21 + $0x10] sm:$0xff] }
  0x10   : > { %2554 = vmatprep.subr.bf16.mxu0 %v584_v4  ;;  %2686 = vmatprep.subr.bf16.mxu1 %v584_v4  ;;  %v236_v8 = vld [vmem:[%s2753_s21 + $0x200] sm:$0xff]  ;;  %v300_v9 = vpack.c.bf16 %v173_v7, %v172_v6  ;;  %v237_v10 = vld [vmem:[%s2753_s21 + $0x208] sm:$0xff]  ;;  %v175_v12 = vld [vmem:[%s2753_s21 + $0x18] sm:$0xff] }
  0x11   : > { %2555 = vmatpush3.bf16.msra.mxu0 %v584_v4  ;;  %2688 = vmatpush3.bf16.msra.mxu1 %v584_v4  ;;  %v332_v13 = vpack.c.bf16 %v237_v10, %v236_v8  ;;  %v301_v14 = vpack.c.bf16 %v175_v12, %v174_v11  ;;  %v238_v15 = vld [vmem:[%s2753_s21 + $0x210] sm:$0xff]  ;;  %v239_v16 = vld [vmem:[%s2753_s21 + $0x218] sm:$0xff]  ;;  %v176_v17 = vld [vmem:[%s2753_s21 + $0x20] sm:$0xff] }
  0x12   : > { %2556 = vmatprep.subr.bf16.mxu0 %v2700_v5  ;;  %2687 = vmatprep.subr.bf16.mxu1 %v2700_v5  ;;  %v333_v18 = vpack.c.bf16 %v239_v16, %v238_v15  ;;  %v177_v19 = vld [vmem:[%s2753_s21 + $0x28] sm:$0xff]  ;;  %v240_v20 = vld [vmem:[%s2753_s21 + $0x220] sm:$0xff]  ;;  %v178_v24 = vld [vmem:[%s2753_s21 + $0x30] sm:$0xff] }
  0x13   : > { %v241_v21 = vld [vmem:[%s2753_s21 + $0x228] sm:$0xff]  ;;  %2558 = vmatprep.mubr.msk.bf16.mxu0 %vm386_vm2, %v300_v9  ;;  %2622 = vmatprep.mubr.msk.bf16.mxu1 %vm386_vm2, %v332_v13  ;;  %v302_v22 = vpack.c.bf16 %v177_v19, %v176_v17  ;;  %v179_v25 = vld [vmem:[%s2753_s21 + $0x38] sm:$0xff]  ;;  %v242_v26 = vld [vmem:[%s2753_s21 + $0x230] sm:$0xff] }
  0x14   : > { %v334_v23 = vpack.c.bf16 %v241_v21, %v240_v20  ;;  %v243_v27 = vld [vmem:[%s2753_s21 + $0x238] sm:$0xff]  ;;  %v180_v28 = vld [vmem:[%s2753_s21 + $0x40] sm:$0xff]  ;;  %v181_v29 = vld [vmem:[%s2753_s21 + $0x48] sm:$0xff]  ;;  %v303_v32 = vpack.c.bf16 %v179_v25, %v178_v24 }
  0x15   : > { %2557 = vmatpush3.bf16.msra.mxu0 %v2700_v5  ;;  %2689 = vmatpush3.bf16.msra.mxu1 %v2700_v5  ;;  %v244_v30 = vld [vmem:[%s2753_s21 + $0x240] sm:$0xff]  ;;  %v245_v31 = vld [vmem:[%s2753_s21 + $0x248] sm:$0xff]  ;;  %v335_v33 = vpack.c.bf16 %v243_v27, %v242_v26  ;;  %v304_v34 = vpack.c.bf16 %v181_v29, %v180_v28  ;;  %v182_v36 = vld [vmem:[%s2753_s21 + $0x50] sm:$0xff] }
  0x16   : > { %v336_v35 = vpack.c.bf16 %v245_v31, %v244_v30  ;;  %v183_v37 = vld [vmem:[%s2753_s21 + $0x58] sm:$0xff]  ;;  %v246_v38 = vld [vmem:[%s2753_s21 + $0x250] sm:$0xff]  ;;  %v184_v40 = vld [vmem:[%s2753_s21 + $0x60] sm:$0xff] }
  0x17   : > { %v247_v39 = vld [vmem:[%s2753_s21 + $0x258] sm:$0xff]  ;;  %v185_v41 = vld [vmem:[%s2753_s21 + $0x68] sm:$0xff]  ;;  %v248_v42 = vld [vmem:[%s2753_s21 + $0x260] sm:$0xff]  ;;  %v305_v44 = vpack.c.bf16 %v183_v37, %v182_v36 }
  0x18   : > { %2559 = vmatmul.mubr.msk.bf16.vlgmr.msra.gmra.mxu0 %vm386_vm2, %v301_v14  ;;  %2623 = vmatmul.mubr.msk.bf16.vlgmr.msra.gmra.mxu1 %vm386_vm2, %v333_v18  ;;  %v249_v43 = vld [vmem:[%s2753_s21 + $0x268] sm:$0xff]  ;;  %v337_v45 = vpack.c.bf16 %v247_v39, %v246_v38  ;;  %v306_v46 = vpack.c.bf16 %v185_v41, %v184_v40  ;;  %v186_v48 = vld [vmem:[%s2753_s21 + $0x70] sm:$0xff]  ;;  %v187_v49 = vld [vmem:[%s2753_s21 + $0x78] sm:$0xff] }
  0x19   : > { %2562 = vmatprep.mubr.msk.bf16.mxu0 %vm386_vm2, %v302_v22  ;;  %2626 = vmatprep.mubr.msk.bf16.mxu1 %vm386_vm2, %v334_v23  ;;  %v338_v47 = vpack.c.bf16 %v249_v43, %v248_v42  ;;  %v250_v50 = vld [vmem:[%s2753_s21 + $0x270] sm:$0xff]  ;;  %v251_v51 = vld [vmem:[%s2753_s21 + $0x278] sm:$0xff]  ;;  %v188_v52 = vld [vmem:[%s2753_s21 + $0x80] sm:$0xff]  ;;  %v307_v56 = vpack.c.bf16 %v187_v49, %v186_v48 }
  0x1a   : > { %v189_v53 = vld [vmem:[%s2753_s21 + $0x88] sm:$0xff]  ;;  %v252_v54 = vld [vmem:[%s2753_s21 + $0x280] sm:$0xff]  ;;  %v339_v57 = vpack.c.bf16 %v251_v51, %v250_v50  ;;  %v190_v60 = vld [vmem:[%s2753_s21 + $0x90] sm:$0xff] }
  0x1b   : > { %v253_v55 = vld [vmem:[%s2753_s21 + $0x288] sm:$0xff]  ;;  %v308_v58 = vpack.c.bf16 %v189_v53, %v188_v52  ;;  %v191_v61 = vld [vmem:[%s2753_s21 + $0x98] sm:$0xff]  ;;  %v254_v62 = vld [vmem:[%s2753_s21 + $0x290] sm:$0xff] }
  0x1c   : > { %v340_v59 = vpack.c.bf16 %v253_v55, %v252_v54  ;;  %v255_v63 = vld [vmem:[%s2753_s21 + $0x298] sm:$0xff]  ;;  %v192_v0 = vld [vmem:[%s2753_s21 + $0xa0] sm:$0xff]  ;;  %v193_v1 = vld [vmem:[%s2753_s21 + $0xa8] sm:$0xff]  ;;  %v309_v4 = vpack.c.bf16 %v191_v61, %v190_v60 }
  0x1d   : > { %v256_v2 = vld [vmem:[%s2753_s21 + $0x2a0] sm:$0xff]  ;;  %v257_v3 = vld [vmem:[%s2753_s21 + $0x2a8] sm:$0xff]  ;;  %v341_v5 = vpack.c.bf16 %v255_v63, %v254_v62  ;;  %v310_v6 = vpack.c.bf16 %v193_v1, %v192_v0  ;;  %v194_v8 = vld [vmem:[%s2753_s21 + $0xb0] sm:$0xff] }
  0x1e   : > { %v342_v7 = vpack.c.bf16 %v257_v3, %v256_v2  ;;  %v195_v9 = vld [vmem:[%s2753_s21 + $0xb8] sm:$0xff]  ;;  %v258_v10 = vld [vmem:[%s2753_s21 + $0x2b0] sm:$0xff]  ;;  %v196_v12 = vld [vmem:[%s2753_s21 + $0xc0] sm:$0xff] }
  0x1f   : > { %v259_v11 = vld [vmem:[%s2753_s21 + $0x2b8] sm:$0xff]  ;;  %v197_v13 = vld [vmem:[%s2753_s21 + $0xc8] sm:$0xff]  ;;  %v260_v14 = vld [vmem:[%s2753_s21 + $0x2c0] sm:$0xff]  ;;  %v311_v16 = vpack.c.bf16 %v195_v9, %v194_v8 }
  0x20   : > { %2563 = vmatmul.mubr.msk.bf16.gmra.mxu0 %vm386_vm2, %v303_v32  ;;  %2627 = vmatmul.mubr.msk.bf16.gmra.mxu1 %vm386_vm2, %v335_v33  ;;  %v261_v15 = vld [vmem:[%s2753_s21 + $0x2c8] sm:$0xff]  ;;  %v343_v17 = vpack.c.bf16 %v259_v11, %v258_v10  ;;  %v312_v18 = vpack.c.bf16 %v197_v13, %v196_v12  ;;  %v198_v20 = vld [vmem:[%s2753_s21 + $0xd0] sm:$0xff]  ;;  %v199_v21 = vld [vmem:[%s2753_s21 + $0xd8] sm:$0xff] }
  0x21   : > { %2566 = vmatprep.mubr.msk.bf16.mxu0 %vm386_vm2, %v304_v34  ;;  %2630 = vmatprep.mubr.msk.bf16.mxu1 %vm386_vm2, %v336_v35  ;;  %v344_v19 = vpack.c.bf16 %v261_v15, %v260_v14  ;;  %v262_v22 = vld [vmem:[%s2753_s21 + $0x2d0] sm:$0xff]  ;;  %v263_v23 = vld [vmem:[%s2753_s21 + $0x2d8] sm:$0xff]  ;;  %v200_v24 = vld [vmem:[%s2753_s21 + $0xe0] sm:$0xff]  ;;  %v313_v28 = vpack.c.bf16 %v199_v21, %v198_v20 }
  0x22   : > { %v201_v25 = vld [vmem:[%s2753_s21 + $0xe8] sm:$0xff]  ;;  %v264_v26 = vld [vmem:[%s2753_s21 + $0x2e0] sm:$0xff]  ;;  %v345_v29 = vpack.c.bf16 %v263_v23, %v262_v22  ;;  %v202_v32 = vld [vmem:[%s2753_s21 + $0xf0] sm:$0xff] }
  0x23   : > { %v265_v27 = vld [vmem:[%s2753_s21 + $0x2e8] sm:$0xff]  ;;  %v314_v30 = vpack.c.bf16 %v201_v25, %v200_v24  ;;  %v203_v33 = vld [vmem:[%s2753_s21 + $0xf8] sm:$0xff]  ;;  %v266_v34 = vld [vmem:[%s2753_s21 + $0x2f0] sm:$0xff] }
  0x24   : > { %v346_v31 = vpack.c.bf16 %v265_v27, %v264_v26  ;;  %v267_v35 = vld [vmem:[%s2753_s21 + $0x2f8] sm:$0xff]  ;;  %v204_v36 = vld [vmem:[%s2753_s21 + $0x100] sm:$0xff]  ;;  %v205_v37 = vld [vmem:[%s2753_s21 + $0x108] sm:$0xff]  ;;  %v315_v40 = vpack.c.bf16 %v203_v33, %v202_v32 }
  0x25   : > { %v268_v38 = vld [vmem:[%s2753_s21 + $0x300] sm:$0xff]  ;;  %v269_v39 = vld [vmem:[%s2753_s21 + $0x308] sm:$0xff]  ;;  %v347_v41 = vpack.c.bf16 %v267_v35, %v266_v34  ;;  %v316_v42 = vpack.c.bf16 %v205_v37, %v204_v36 }
  0x26   : > { %v348_v43 = vpack.c.bf16 %v269_v39, %v268_v38  ;;  %v208_v48 = vld [vmem:[%s2753_s21 + $0x120] sm:$0xff]  ;;  %v209_v49 = vld [vmem:[%s2753_s21 + $0x128] sm:$0xff] }
  0x27   : > { %v272_v50 = vld [vmem:[%s2753_s21 + $0x320] sm:$0xff]  ;;  %v273_v51 = vld [vmem:[%s2753_s21 + $0x328] sm:$0xff]  ;;  %v318_v54 = vpack.c.bf16 %v209_v49, %v208_v48 }
  0x28   : > { %2567 = vmatmul.mubr.msk.bf16.gmra.mxu0 %vm386_vm2, %v305_v44  ;;  %2631 = vmatmul.mubr.msk.bf16.gmra.mxu1 %vm386_vm2, %v337_v45  ;;  %v206_v44 = vld [vmem:[%s2753_s21 + $0x110] sm:$0xff]  ;;  %v207_v45 = vld [vmem:[%s2753_s21 + $0x118] sm:$0xff]  ;;  %v350_v55 = vpack.c.bf16 %v273_v51, %v272_v50  ;;  %v212_v60 = vld [vmem:[%s2753_s21 + $0x140] sm:$0xff] }
  0x29   : > { %2570 = vmatprep.mubr.msk.bf16.mxu0 %vm386_vm2, %v306_v46  ;;  %2634 = vmatprep.mubr.msk.bf16.mxu1 %vm386_vm2, %v338_v47  ;;  %v270_v46 = vld [vmem:[%s2753_s21 + $0x310] sm:$0xff]  ;;  %v271_v47 = vld [vmem:[%s2753_s21 + $0x318] sm:$0xff]  ;;  %v317_v52 = vpack.c.bf16 %v207_v45, %v206_v44  ;;  %v213_v61 = vld [vmem:[%s2753_s21 + $0x148] sm:$0xff] }
  0x2a   : > { %v349_v53 = vpack.c.bf16 %v271_v47, %v270_v46  ;;  %v276_v62 = vld [vmem:[%s2753_s21 + $0x340] sm:$0xff]  ;;  %v277_v63 = vld [vmem:[%s2753_s21 + $0x348] sm:$0xff]  ;;  %v320_v2 = vpack.c.bf16 %v213_v61, %v212_v60 }
  0x2b   : > { %v352_v3 = vpack.c.bf16 %v277_v63, %v276_v62  ;;  %v216_v8 = vld [vmem:[%s2753_s21 + $0x160] sm:$0xff]  ;;  %v217_v9 = vld [vmem:[%s2753_s21 + $0x168] sm:$0xff] }
  0x2c   : > { %v280_v10 = vld [vmem:[%s2753_s21 + $0x360] sm:$0xff]  ;;  %v281_v11 = vld [vmem:[%s2753_s21 + $0x368] sm:$0xff]  ;;  %v322_v14 = vpack.c.bf16 %v217_v9, %v216_v8 }
  0x2d   : > { %v354_v15 = vpack.c.bf16 %v281_v11, %v280_v10  ;;  %v220_v20 = vld [vmem:[%s2753_s21 + $0x180] sm:$0xff]  ;;  %v221_v21 = vld [vmem:[%s2753_s21 + $0x188] sm:$0xff] }
  0x2e   : > { %v284_v22 = vld [vmem:[%s2753_s21 + $0x380] sm:$0xff]  ;;  %v285_v23 = vld [vmem:[%s2753_s21 + $0x388] sm:$0xff]  ;;  %v324_v26 = vpack.c.bf16 %v221_v21, %v220_v20 }
  0x2f   : > { %v356_v27 = vpack.c.bf16 %v285_v23, %v284_v22  ;;  %v224_v32 = vld [vmem:[%s2753_s21 + $0x1a0] sm:$0xff]  ;;  %v225_v33 = vld [vmem:[%s2753_s21 + $0x1a8] sm:$0xff] }
  0x30   : > { %2571 = vmatmul.mubr.msk.bf16.gmra.mxu0 %vm386_vm2, %v307_v56  ;;  %2635 = vmatmul.mubr.msk.bf16.gmra.mxu1 %vm386_vm2, %v339_v57  ;;  %v210_v56 = vld [vmem:[%s2753_s21 + $0x130] sm:$0xff]  ;;  %v211_v57 = vld [vmem:[%s2753_s21 + $0x138] sm:$0xff]  ;;  %v288_v34 = vld [vmem:[%s2753_s21 + $0x3a0] sm:$0xff]  ;;  %v326_v38 = vpack.c.bf16 %v225_v33, %v224_v32 }
  0x31   : > { %2574 = vmatprep.mubr.msk.bf16.mxu0 %vm386_vm2, %v308_v58  ;;  %2638 = vmatprep.mubr.msk.bf16.mxu1 %vm386_vm2, %v340_v59  ;;  %v274_v58 = vld [vmem:[%s2753_s21 + $0x330] sm:$0xff]  ;;  %v275_v59 = vld [vmem:[%s2753_s21 + $0x338] sm:$0xff]  ;;  %v319_v0 = vpack.c.bf16 %v211_v57, %v210_v56  ;;  %v289_v35 = vld [vmem:[%s2753_s21 + $0x3a8] sm:$0xff] }
  0x32   : > { %v351_v1 = vpack.c.bf16 %v275_v59, %v274_v58  ;;  %v358_v39 = vpack.c.bf16 %v289_v35, %v288_v34  ;;  %v228_v44 = vld [vmem:[%s2753_s21 + $0x1c0] sm:$0xff]  ;;  %v229_v45 = vld [vmem:[%s2753_s21 + $0x1c8] sm:$0xff] }
  0x33   : > { %v292_v46 = vld [vmem:[%s2753_s21 + $0x3c0] sm:$0xff]  ;;  %v293_v47 = vld [vmem:[%s2753_s21 + $0x3c8] sm:$0xff]  ;;  %v328_v50 = vpack.c.bf16 %v229_v45, %v228_v44 }
  0x34   : > { %v360_v51 = vpack.c.bf16 %v293_v47, %v292_v46  ;;  %v232_v56 = vld [vmem:[%s2753_s21 + $0x1e0] sm:$0xff]  ;;  %v233_v57 = vld [vmem:[%s2753_s21 + $0x1e8] sm:$0xff] }
  0x35   : > { %v296_v58 = vld [vmem:[%s2753_s21 + $0x3e0] sm:$0xff]  ;;  %v297_v59 = vld [vmem:[%s2753_s21 + $0x3e8] sm:$0xff]  ;;  %v330_v62 = vpack.c.bf16 %v233_v57, %v232_v56 }
  0x36   : > { %v362_v63 = vpack.c.bf16 %v297_v59, %v296_v58  ;;  %v2950_v10 = vld [vmem:[%s3704_s2] ss:$0 sm:$0xff] }
  0x38   : > { %2575 = vmatmul.mubr.msk.bf16.gmra.mxu0 %vm386_vm2, %v309_v4  ;;  %2639 = vmatmul.mubr.msk.bf16.gmra.mxu1 %vm386_vm2, %v341_v5  ;;  %v214_v4 = vld [vmem:[%s2753_s21 + $0x150] sm:$0xff]  ;;  %v215_v5 = vld [vmem:[%s2753_s21 + $0x158] sm:$0xff] }
  0x39   : > { %2578 = vmatprep.mubr.msk.bf16.mxu0 %vm386_vm2, %v310_v6  ;;  %2642 = vmatprep.mubr.msk.bf16.mxu1 %vm386_vm2, %v342_v7  ;;  %v278_v6 = vld [vmem:[%s2753_s21 + $0x350] sm:$0xff]  ;;  %v279_v7 = vld [vmem:[%s2753_s21 + $0x358] sm:$0xff]  ;;  %v321_v12 = vpack.c.bf16 %v215_v5, %v214_v4 }
  0x3a   : > { %v353_v13 = vpack.c.bf16 %v279_v7, %v278_v6 }
  0x40   : > { %2579 = vmatmul.mubr.msk.bf16.gmra.mxu0 %vm386_vm2, %v311_v16  ;;  %2643 = vmatmul.mubr.msk.bf16.gmra.mxu1 %vm386_vm2, %v343_v17  ;;  %v218_v16 = vld [vmem:[%s2753_s21 + $0x170] sm:$0xff]  ;;  %v219_v17 = vld [vmem:[%s2753_s21 + $0x178] sm:$0xff] }
  0x41   : > { %2582 = vmatprep.mubr.msk.bf16.mxu0 %vm386_vm2, %v312_v18  ;;  %2646 = vmatprep.mubr.msk.bf16.mxu1 %vm386_vm2, %v344_v19  ;;  %v282_v18 = vld [vmem:[%s2753_s21 + $0x370] sm:$0xff]  ;;  %v283_v19 = vld [vmem:[%s2753_s21 + $0x378] sm:$0xff]  ;;  %v323_v24 = vpack.c.bf16 %v219_v17, %v218_v16 }
  0x42   : > { %v355_v25 = vpack.c.bf16 %v283_v19, %v282_v18 }
  0x48   : > { %2583 = vmatmul.mubr.msk.bf16.gmra.mxu0 %vm386_vm2, %v313_v28  ;;  %2647 = vmatmul.mubr.msk.bf16.gmra.mxu1 %vm386_vm2, %v345_v29  ;;  %v222_v28 = vld [vmem:[%s2753_s21 + $0x190] sm:$0xff]  ;;  %v223_v29 = vld [vmem:[%s2753_s21 + $0x198] sm:$0xff] }
  0x49   : > { %2586 = vmatprep.mubr.msk.bf16.mxu0 %vm386_vm2, %v314_v30  ;;  %2650 = vmatprep.mubr.msk.bf16.mxu1 %vm386_vm2, %v346_v31  ;;  %v286_v30 = vld [vmem:[%s2753_s21 + $0x390] sm:$0xff]  ;;  %v287_v31 = vld [vmem:[%s2753_s21 + $0x398] sm:$0xff]  ;;  %v325_v36 = vpack.c.bf16 %v223_v29, %v222_v28 }
  0x4a   : > { %v357_v37 = vpack.c.bf16 %v287_v31, %v286_v30 }
  0x50   : > { %2587 = vmatmul.mubr.msk.bf16.gmra.mxu0 %vm386_vm2, %v315_v40  ;;  %2651 = vmatmul.mubr.msk.bf16.gmra.mxu1 %vm386_vm2, %v347_v41  ;;  %v226_v40 = vld [vmem:[%s2753_s21 + $0x1b0] sm:$0xff]  ;;  %v227_v41 = vld [vmem:[%s2753_s21 + $0x1b8] sm:$0xff] }
  0x51   : > { %2590 = vmatprep.mubr.msk.bf16.mxu0 %vm386_vm2, %v316_v42  ;;  %2654 = vmatprep.mubr.msk.bf16.mxu1 %vm386_vm2, %v348_v43  ;;  %v290_v42 = vld [vmem:[%s2753_s21 + $0x3b0] sm:$0xff]  ;;  %v291_v43 = vld [vmem:[%s2753_s21 + $0x3b8] sm:$0xff]  ;;  %v327_v48 = vpack.c.bf16 %v227_v41, %v226_v40 }
  0x52   : > { %v359_v49 = vpack.c.bf16 %v291_v43, %v290_v42 }
  0x58   : > { %2591 = vmatmul.mubr.msk.bf16.gmra.mxu0 %vm386_vm2, %v317_v52  ;;  %2655 = vmatmul.mubr.msk.bf16.gmra.mxu1 %vm386_vm2, %v349_v53  ;;  %v230_v52 = vld [vmem:[%s2753_s21 + $0x1d0] sm:$0xff]  ;;  %v231_v53 = vld [vmem:[%s2753_s21 + $0x1d8] sm:$0xff] }
  0x59   : > { %2594 = vmatprep.mubr.msk.bf16.mxu0 %vm386_vm2, %v318_v54  ;;  %2658 = vmatprep.mubr.msk.bf16.mxu1 %vm386_vm2, %v350_v55  ;;  %v294_v54 = vld [vmem:[%s2753_s21 + $0x3d0] sm:$0xff]  ;;  %v295_v55 = vld [vmem:[%s2753_s21 + $0x3d8] sm:$0xff]  ;;  %v329_v60 = vpack.c.bf16 %v231_v53, %v230_v52 }
  0x5a   : > { %v361_v61 = vpack.c.bf16 %v295_v55, %v294_v54 }
  0x60   : > { %2595 = vmatmul.mubr.msk.bf16.gmra.mxu0 %vm386_vm2, %v319_v0  ;;  %2659 = vmatmul.mubr.msk.bf16.gmra.mxu1 %vm386_vm2, %v351_v1  ;;  %v234_v0 = vld [vmem:[%s2753_s21 + $0x1f0] sm:$0xff]  ;;  %v235_v1 = vld [vmem:[%s2753_s21 + $0x1f8] sm:$0xff] }
  0x61   : > { %2598 = vmatprep.mubr.msk.bf16.mxu0 %vm386_vm2, %v320_v2  ;;  %2662 = vmatprep.mubr.msk.bf16.mxu1 %vm386_vm2, %v352_v3  ;;  %v298_v2 = vld [vmem:[%s2753_s21 + $0x3f0] sm:$0xff]  ;;  %v299_v3 = vld [vmem:[%s2753_s21 + $0x3f8] sm:$0xff]  ;;  %v331_v4 = vpack.c.bf16 %v235_v1, %v234_v0 }
  0x62   : > { %v363_v5 = vpack.c.bf16 %v299_v3, %v298_v2 }
  0x68   : > { %2599 = vmatmul.mubr.msk.bf16.gmra.mxu0 %vm386_vm2, %v321_v12  ;;  %2663 = vmatmul.mubr.msk.bf16.gmra.mxu1 %vm386_vm2, %v353_v13 }
  0x69   : > { %2602 = vmatprep.mubr.msk.bf16.mxu0 %vm386_vm2, %v322_v14  ;;  %2666 = vmatprep.mubr.msk.bf16.mxu1 %vm386_vm2, %v354_v15 }
  0x70   : > { %2603 = vmatmul.mubr.msk.bf16.gmra.mxu0 %vm386_vm2, %v323_v24  ;;  %2667 = vmatmul.mubr.msk.bf16.gmra.mxu1 %vm386_vm2, %v355_v25 }
  0x71   : > { %2606 = vmatprep.mubr.msk.bf16.mxu0 %vm386_vm2, %v324_v26  ;;  %2670 = vmatprep.mubr.msk.bf16.mxu1 %vm386_vm2, %v356_v27 }
  0x78   : > { %2607 = vmatmul.mubr.msk.bf16.gmra.mxu0 %vm386_vm2, %v325_v36  ;;  %2671 = vmatmul.mubr.msk.bf16.gmra.mxu1 %vm386_vm2, %v357_v37 }
  0x79   : > { %2610 = vmatprep.mubr.msk.bf16.mxu0 %vm386_vm2, %v326_v38  ;;  %2674 = vmatprep.mubr.msk.bf16.mxu1 %vm386_vm2, %v358_v39 }
  0x80   : > { %2611 = vmatmul.mubr.msk.bf16.gmra.mxu0 %vm386_vm2, %v327_v48  ;;  %2675 = vmatmul.mubr.msk.bf16.gmra.mxu1 %vm386_vm2, %v359_v49 }
  0x81   : > { %2614 = vmatprep.mubr.msk.bf16.mxu0 %vm386_vm2, %v328_v50  ;;  %2678 = vmatprep.mubr.msk.bf16.mxu1 %vm386_vm2, %v360_v51 }
  0x88   : > { %2615 = vmatmul.mubr.msk.bf16.gmra.mxu0 %vm386_vm2, %v329_v60  ;;  %2679 = vmatmul.mubr.msk.bf16.gmra.mxu1 %vm386_vm2, %v361_v61 }
  0x89   : > { %2618 = vmatprep.mubr.msk.bf16.mxu0 %vm386_vm2, %v330_v62  ;;  %2682 = vmatprep.mubr.msk.bf16.mxu1 %vm386_vm2, %v362_v63 }
  0x90   : > { %2619 = vmatmul.mubr.msk.bf16.gmra.mxu0 %vm386_vm2, %v331_v4  ;;  %2683 = vmatmul.mubr.msk.bf16.gmra.mxu1 %vm386_vm2, %v363_v5 }
  0xd8   : > { %v2560_v6 = vpop.f32.mrf.mxu0  ;;  %v2624_v7 = vpop.f32.mrf.mxu1 }
  0xd9   : > { %v629_v13 = vadd.f32 %v2560_v6, %v2950_v10  ;;  %v885_v14 = vadd.f32 %v2624_v7, %v2950_v10 }
  0xda   : > { %v620_v8 = vpop.f32.mrf.mxu0  ;;  %v876_v9 = vpop.f32.mrf.mxu1 }
  0xdb   : > { %v621_v17 = vadd.f32 %v2950_v10, %v620_v8  ;;  %v877_v18 = vadd.f32 %v2950_v10, %v876_v9  ;;  %v1133_v25 = vmax.f32 %v629_v13, 0.0  ;;  %v1197_v26 = vmax.f32 %v885_v14, 0.0 }
  0xdc   : > { %v2561_v11 = vpop.f32.mrf.mxu0  ;;  %v2625_v12 = vpop.f32.mrf.mxu1 }
  0xdd   : > { %v632_v19 = vadd.f32 %v2561_v11, %v2950_v10  ;;  %v888_v20 = vadd.f32 %v2625_v12, %v2950_v10  ;;  %v1131_v35 = vmax.f32 %v621_v17, 0.0  ;;  %v1195_v36 = vmax.f32 %v877_v18, 0.0 }
  0xde   : > { %v623_v15 = vpop.f32.mrf.mxu0  ;;  %v879_v16 = vpop.f32.mrf.mxu1 }
  0xdf   : > { %v2961_v27 = vadd.f32 %v2950_v10, %v623_v15  ;;  %v2964_v28 = vadd.f32 %v2950_v10, %v879_v16  ;;  %v1134_v37 = vmax.f32 %v632_v19, 0.0  ;;  %v1198_v38 = vmax.f32 %v888_v20, 0.0 }
  0xe0   : > { %v2564_v21 = vpop.f32.mrf.mxu0  ;;  %v2628_v22 = vpop.f32.mrf.mxu1 }
  0xe1   : > { %v645_v23 = vadd.f32 %v2564_v21, %v2950_v10  ;;  %v901_v24 = vadd.f32 %v2628_v22, %v2950_v10  ;;  %v1132_v45 = vmax.f32 %v2961_v27, 0.0  ;;  %v1196_v46 = vmax.f32 %v2964_v28, 0.0 }
  0xe2   : > { %v636_v29 = vpop.f32.mrf.mxu0  ;;  %v892_v30 = vpop.f32.mrf.mxu1 }
  0xe3   : > { %v1137_v31 = vmax.f32 %v645_v23, 0.0  ;;  %v1201_v32 = vmax.f32 %v901_v24, 0.0  ;;  %v637_v33 = vadd.f32 %v2950_v10, %v636_v29  ;;  %v893_v34 = vadd.f32 %v2950_v10, %v892_v30 }
  0xe4   : > { %v2565_v39 = vpop.f32.mrf.mxu0  ;;  %v2629_v40 = vpop.f32.mrf.mxu1 }
  0xe5   : > { %v1261_v41 = vmax.f32 %v1133_v25, %v1137_v31  ;;  %v1293_v42 = vmax.f32 %v1197_v26, %v1201_v32  ;;  %v1135_v43 = vmax.f32 %v637_v33, 0.0  ;;  %v1199_v44 = vmax.f32 %v893_v34, 0.0 }
  0xe6   : > { %v648_v47 = vadd.f32 %v2565_v39, %v2950_v10  ;;  %v904_v48 = vadd.f32 %v2629_v40, %v2950_v10  ;;  %v639_v49 = vpop.f32.mrf.mxu0  ;;  %v895_v50 = vpop.f32.mrf.mxu1 }
  0xe7   : > { %v1467_v51 = vrot.slane %v1261_v41, 1  ;;  %v1475_v52 = vrot.slane %v1293_v42, 1  ;;  %v1259_v53 = vmax.f32 %v1131_v35, %v1135_v43  ;;  %v1291_v54 = vmax.f32 %v1195_v36, %v1199_v44 }
  0xe8   : > { %v1138_v55 = vmax.f32 %v648_v47, 0.0  ;;  %v1202_v56 = vmax.f32 %v904_v48, 0.0  ;;  %v640_v57 = vadd.f32 %v2950_v10, %v639_v49  ;;  %v2974_v58 = vadd.f32 %v2950_v10, %v895_v50  ;;  %v2976_v59 = vpop.f32.mrf.mxu0  ;;  %v2978_v60 = vpop.f32.mrf.mxu1 }
  0xe9   : > { %v1499_v61 = vmax.f32 %v1261_v41, %v1467_v51  ;;  %v1507_v62 = vmax.f32 %v1293_v42, %v1475_v52  ;;  %v1339_v63 = vrot.slane %v1259_v53, 1  ;;  %v1347_v0 = vrot.slane %v1291_v54, 1 }
  0xea   : > { %v1262_v1 = vmax.f32 %v1134_v37, %v1138_v55  ;;  %v1294_v2 = vmax.f32 %v1198_v38, %v1202_v56  ;;  %v1136_v3 = vmax.f32 %v640_v57, 0.0  ;;  %v1200_v4 = vmax.f32 %v2974_v58, 0.0  ;;  %v2981_v5 = vpop.f32.mrf.mxu0  ;;  %v2983_v6 = vpop.f32.mrf.mxu1 }
  0xeb   : > { %v1851_v7 = vrot.slane %v1499_v61, 1  ;;  %v1883_v8 = vrot.slane %v1499_v61, 2  ;;  %v1915_v9 = vrot.slane %v1499_v61, 3  ;;  %v1859_v11 = vrot.slane %v1507_v62, 1 }
  0xec   : > { %v1891_v12 = vrot.slane %v1507_v62, 2  ;;  %v1923_v13 = vrot.slane %v1507_v62, 3  ;;  %v1371_v14 = vmax.f32 %v1259_v53, %v1339_v63  ;;  %v1379_v15 = vmax.f32 %v1291_v54, %v1347_v0  ;;  %v2985_v16 = vpop.f32.mrf.mxu0  ;;  %v2987_v17 = vpop.f32.mrf.mxu1 }
  0xed   : > { %v2208_v18 = vsel %vm2091_vm3, %v1499_v61, %v1851_v7  ;;  %v2216_v19 = vsel %vm2091_vm3, %v1507_v62, %v1859_v11  ;;  %v1531_v20 = vrot.slane %v1262_v1, 1  ;;  %v1539_v21 = vrot.slane %v1294_v2, 1 }
  0xee   : > { %v2224_v22 = vsel %vm2108_vm4, %v2208_v18, %v1883_v8  ;;  %v2232_v23 = vsel %vm2108_vm4, %v2216_v19, %v1891_v12  ;;  %v1595_v24 = vrot.slane %v1371_v14, 1  ;;  %v1627_v25 = vrot.slane %v1371_v14, 2  ;;  %v2993_v26 = vpop.f32.mrf.mxu0  ;;  %v2995_v27 = vpop.f32.mrf.mxu1 }
  0xef   : > { %v2240_v29 = vsel %vm2125_vm5, %v2224_v22, %v1915_v9  ;;  %v2248_v30 = vsel %vm2125_vm5, %v2232_v23, %v1923_v13  ;;  %v1659_v31 = vrot.slane %v1371_v14, 3  ;;  %v1603_v32 = vrot.slane %v1379_v15, 1 }
  0xf0   : > { %v2092_v33 = vsel %vm2091_vm3, %v1371_v14, %v1595_v24  ;;  %v1635_v34 = vrot.slane %v1379_v15, 2  ;;  %v1667_v35 = vrot.slane %v1379_v15, 3  ;;  %v1563_v36 = vmax.f32 %v1262_v1, %v1531_v20  ;;  %v3000_v37 = vpop.f32.mrf.mxu0  ;;  %v3002_v38 = vpop.f32.mrf.mxu1 }
  0xf1   : > { %v2109_v39 = vsel %vm2108_vm4, %v2092_v33, %v1627_v25  ;;  %v2100_v40 = vsel %vm2091_vm3, %v1379_v15, %v1603_v32  ;;  %v1571_v41 = vmax.f32 %v1294_v2, %v1539_v21  ;;  %v1260_v42 = vmax.f32 %v1132_v45, %v1136_v3 }
  0xf2   : > { %v2126_v43 = vsel %vm2125_vm5, %v2109_v39, %v1659_v31  ;;  %v2117_v44 = vsel %vm2108_vm4, %v2100_v40, %v1635_v34  ;;  %v1963_v47 = vrot.slane %v1563_v36, 4  ;;  %v1995_v48 = vrot.slane %v1563_v36, 5  ;;  %v3009_v49 = vpop.f32.mrf.mxu0  ;;  %v3011_v50 = vpop.f32.mrf.mxu1 }
  0xf3   : > { %v2134_v51 = vsel %vm2125_vm5, %v2117_v44, %v1667_v35  ;;  %v2027_v52 = vrot.slane %v1563_v36, 6  ;;  %v2059_v53 = vrot.slane %v1563_v36, 7  ;;  %v1971_v54 = vrot.slane %v1571_v41, 4 }
  0xf4   : > { %v2256_v55 = vsel %vm2142_vm6, %v2240_v29, %v1963_v47  ;;  %v2003_v56 = vrot.slane %v1571_v41, 5  ;;  %v2035_v45 = vrot.slane %v1571_v41, 6  ;;  %v2067_v57 = vrot.slane %v1571_v41, 7  ;;  %v3015_v58 = vpop.f32.mrf.mxu0  ;;  %v3017_v61 = vpop.f32.mrf.mxu1 }
  0xf5   : > { %v2272_v62 = vsel %vm579_vm0, %v2256_v55, %v1995_v48  ;;  %v2264_v63 = vsel %vm2142_vm6, %v2248_v30, %v1971_v54  ;;  %v1403_v0 = vrot.slane %v1260_v42, 1  ;;  %v1292_v1 = vmax.f32 %v1196_v46, %v1200_v4 }
  0xf6   : > { %v2288_v2 = vsel %vm580_vm1, %v2272_v62, %v2027_v52  ;;  %v2280_v3 = vsel %vm579_vm0, %v2264_v63, %v2003_v56  ;;  %v3032_v7 = vadd.f32 %v2976_v59, %v2950_v10  ;;  %v3036_v8 = vadd.f32 %v2978_v60, %v2950_v10  ;;  %v3038_v9 = vpop.f32.mrf.mxu0  ;;  %v3040_v11 = vpop.f32.mrf.mxu1 }
  0xf7   : > { %v2304_v28 = vsel %vm2191_vm7, %v2288_v2, %v2059_v53  ;;  %v2296_v46 = vsel %vm580_vm1, %v2280_v3, %v2035_v45  ;;  %v1435_v4 = vmax.f32 %v1260_v42, %v1403_v0  ;;  %v1411_v12 = vrot.slane %v1292_v1, 1 }
  0xf8   : > { %2322 = vst.msk [vmem:[%s3022_s27 + $0x8] sm:$0xff] %vm2320_vm8, %v2304_v28  ;;  %v2312_v13 = vsel %vm2191_vm7, %v2296_v46, %v2067_v57  ;;  %v1141_v59 = vmax.f32 %v3032_v7, 0.0  ;;  %v1205_v14 = vmax.f32 %v3036_v8, 0.0  ;;  %v653_v60 = vadd.f32 %v2950_v10, %v2981_v5  ;;  %v3051_v15 = vpop.f32.mrf.mxu0  ;;  %v3053_v18 = vpop.f32.mrf.mxu1 }
  0xf9   : > { %2338 = vst.msk [vmem:[%s3022_s27 + $0x88] sm:$0xff] %vm2320_vm8, %v2312_v13  ;;  %v1707_v19 = vrot.slane %v1435_v4, 4  ;;  %v1739_v20 = vrot.slane %v1435_v4, 5  ;;  %v1771_v21 = vrot.slane %v1435_v4, 6  ;;  %v1803_v22 = vrot.slane %v1435_v4, 7 }
  0xfa   : > { %v1443_v23 = vmax.f32 %v1292_v1, %v1411_v12  ;;  %v1139_v24 = vmax.f32 %v653_v60, 0.0  ;;  %v909_v25 = vadd.f32 %v2950_v10, %v2983_v6  ;;  %v664_v29 = vadd.f32 %v2985_v16, %v2950_v10  ;;  %v3061_v30 = vpop.f32.mrf.mxu0  ;;  %v3063_v5 = vpop.f32.mrf.mxu1 }
  0xfb   : > { %v2143_v31 = vsel %vm2142_vm6, %v2126_v43, %v1707_v19  ;;  %v920_v32 = vadd.f32 %v2987_v17, %v2950_v10  ;;  %v656_v33 = vadd.f32 %v2950_v10, %v2993_v26  ;;  %v912_v34 = vadd.f32 %v2950_v10, %v2995_v27 }
  0xfc   : > { %v2159_v6 = vsel %vm579_vm0, %v2143_v31, %v1739_v20  ;;  %v1715_v35 = vrot.slane %v1443_v23, 4  ;;  %v1747_v16 = vrot.slane %v1443_v23, 5  ;;  %v1779_v36 = vrot.slane %v1443_v23, 6  ;;  %v3073_v39 = vpop.f32.mrf.mxu0  ;;  %v3075_v40 = vpop.f32.mrf.mxu1 }
  0xfd   : > { %v2175_v41 = vsel %vm580_vm1, %v2159_v6, %v1771_v21  ;;  %v1811_v42 = vrot.slane %v1443_v23, 7  ;;  %v1203_v17 = vmax.f32 %v909_v25, 0.0  ;;  %v1142_v43 = vmax.f32 %v664_v29, 0.0 }
  0xfe   : > { %v2192_v26 = vsel %vm2191_vm7, %v2175_v41, %v1803_v22  ;;  %v2151_v44 = vsel %vm2142_vm6, %v2134_v51, %v1715_v35  ;;  %v1206_v27 = vmax.f32 %v920_v32, 0.0  ;;  %v1140_v47 = vmax.f32 %v656_v33, 0.0  ;;  %v3080_v48 = vpop.f32.mrf.mxu0  ;;  %v3082_v52 = vpop.f32.mrf.mxu1 }
  0xff   : > { %2321 = vst.msk [vmem:[%s3022_s27] sm:$0xff] %vm2320_vm8, %v2192_v26  ;;  %v2167_v53 = vsel %vm579_vm0, %v2151_v44, %v1747_v16  ;;  %v1204_v54 = vmax.f32 %v912_v34, 0.0  ;;  %v677_v55 = vadd.f32 %v3000_v37, %v2950_v10  ;;  %v933_v56 = vadd.f32 %v3002_v38, %v2950_v10 }
 0x100   : > { %v2183_v51 = vsel %vm580_vm1, %v2167_v53, %v1779_v36  ;;  %v669_v45 = vadd.f32 %v2950_v10, %v3009_v49  ;;  %v925_v57 = vadd.f32 %v2950_v10, %v3011_v50  ;;  %v680_v62 = vadd.f32 %v3015_v58, %v2950_v10  ;;  %v3098_v63 = vpop.f32.mrf.mxu0  ;;  %v3100_v0 = vpop.f32.mrf.mxu1 }
 0x101   : > { %v2200_v37 = vsel %vm2191_vm7, %v2183_v51, %v1811_v42  ;;  %v1145_v1 = vmax.f32 %v677_v55, 0.0  ;;  %v1209_v2 = vmax.f32 %v933_v56, 0.0  ;;  %v936_v38 = vadd.f32 %v3017_v61, %v2950_v10 }
 0x102   : > { %2337 = vst.msk [vmem:[%s3022_s27 + $0x80] sm:$0xff] %vm2320_vm8, %v2200_v37  ;;  %v1143_v49 = vmax.f32 %v669_v45, 0.0  ;;  %v1207_v3 = vmax.f32 %v925_v57, 0.0  ;;  %v1146_v7 = vmax.f32 %v680_v62, 0.0  ;;  %v672_v50 = vadd.f32 %v2950_v10, %v3038_v9  ;;  %v3109_v58 = vpop.f32.mrf.mxu0  ;;  %v3111_v8 = vpop.f32.mrf.mxu1 }
 0x103   : > { %v1265_v28 = vmax.f32 %v1141_v59, %v1145_v1  ;;  %v1297_v46 = vmax.f32 %v1205_v14, %v1209_v2  ;;  %v1210_v4 = vmax.f32 %v936_v38, 0.0  ;;  %v928_v12 = vadd.f32 %v2950_v10, %v3040_v11 }
 0x104   : > { %v1263_v13 = vmax.f32 %v1139_v24, %v1143_v49  ;;  %v1295_v61 = vmax.f32 %v1203_v17, %v1207_v3  ;;  %v1266_v60 = vmax.f32 %v1142_v43, %v1146_v7  ;;  %v1144_v19 = vmax.f32 %v672_v50, 0.0  ;;  %v3115_v20 = vpop.f32.mrf.mxu0  ;;  %v3117_v21 = vpop.f32.mrf.mxu1 }
 0x105   : > { %v1468_v22 = vrot.slane %v1265_v28, 1  ;;  %v1476_v9 = vrot.slane %v1297_v46, 1  ;;  %v1298_v23 = vmax.f32 %v1206_v27, %v1210_v4  ;;  %v1208_v25 = vmax.f32 %v928_v12, 0.0 }
 0x106   : > { %v1340_v29 = vrot.slane %v1263_v13, 1  ;;  %v1348_v31 = vrot.slane %v1295_v61, 1  ;;  %v1532_v59 = vrot.slane %v1266_v60, 1  ;;  %v1264_v14 = vmax.f32 %v1140_v47, %v1144_v19  ;;  %v3119_v24 = vpop.f32.mrf.mxu0  ;;  %v3121_v6 = vpop.f32.mrf.mxu1 }
 0x107   : > { %v1500_v32 = vmax.f32 %v1265_v28, %v1468_v22  ;;  %v1508_v33 = vmax.f32 %v1297_v46, %v1476_v9  ;;  %v1540_v34 = vrot.slane %v1298_v23, 1  ;;  %v1296_v11 = vmax.f32 %v1204_v54, %v1208_v25 }
 0x108   : > { %v1372_v35 = vmax.f32 %v1263_v13, %v1340_v29  ;;  %v1380_v16 = vmax.f32 %v1295_v61, %v1348_v31  ;;  %v1564_v36 = vmax.f32 %v1266_v60, %v1532_v59  ;;  %v1404_v41 = vrot.slane %v1264_v14, 1  ;;  %v3125_v45 = vpop.f32.mrf.mxu0  ;;  %v3127_v57 = vpop.f32.mrf.mxu1 }
 0x109   : > { %v1852_v42 = vrot.slane %v1500_v32, 1  ;;  %v1884_v17 = vrot.slane %v1500_v32, 2  ;;  %v1916_v43 = vrot.slane %v1500_v32, 3  ;;  %v1860_v26 = vrot.slane %v1508_v33, 1 }
 0x10a   : > { %v1892_v44 = vrot.slane %v1508_v33, 2  ;;  %v1924_v27 = vrot.slane %v1508_v33, 3  ;;  %v1596_v53 = vrot.slane %v1372_v35, 1  ;;  %v1628_v47 = vrot.slane %v1372_v35, 2  ;;  %v3138_v19 = vpop.f32.mrf.mxu0  ;;  %v3140_v22 = vpop.f32.mrf.mxu1 }
 0x10b   : > { %v2209_v55 = vsel %vm2091_vm3, %v1500_v32, %v1852_v42  ;;  %v2217_v54 = vsel %vm2091_vm3, %v1508_v33, %v1860_v26  ;;  %v1660_v56 = vrot.slane %v1372_v35, 3  ;;  %v1604_v51 = vrot.slane %v1380_v16, 1 }
 0x10c   : > { %v2225_v62 = vsel %vm2108_vm4, %v2209_v55, %v1884_v17  ;;  %v2233_v37 = vsel %vm2108_vm4, %v2217_v54, %v1892_v44  ;;  %v2093_v1 = vsel %vm2091_vm3, %v1372_v35, %v1596_v53  ;;  %v1636_v2 = vrot.slane %v1380_v16, 2 }
 0x10d   : > { %v2241_v38 = vsel %vm2125_vm5, %v2225_v62, %v1916_v43  ;;  %v2249_v49 = vsel %vm2125_vm5, %v2233_v37, %v1924_v27  ;;  %v2110_v3 = vsel %vm2108_vm4, %v2093_v1, %v1628_v47  ;;  %v1668_v7 = vrot.slane %v1380_v16, 3 }
 0x10e   : > { %v2127_v50 = vsel %vm2125_vm5, %v2110_v3, %v1660_v56  ;;  %v2101_v28 = vsel %vm2091_vm3, %v1380_v16, %v1604_v51  ;;  %v1964_v46 = vrot.slane %v1564_v36, 4  ;;  %v1996_v4 = vrot.slane %v1564_v36, 5 }
 0x10f   : > { %v2118_v12 = vsel %vm2108_vm4, %v2101_v28, %v1636_v2  ;;  %v2028_v13 = vrot.slane %v1564_v36, 6  ;;  %v2060_v61 = vrot.slane %v1564_v36, 7  ;;  %v1572_v60 = vmax.f32 %v1298_v23, %v1540_v34 }
 0x110   : > { %v2135_v9 = vsel %vm2125_vm5, %v2118_v12, %v1668_v7  ;;  %v2257_v25 = vsel %vm2142_vm6, %v2241_v38, %v1964_v46  ;;  %v1436_v29 = vmax.f32 %v1264_v14, %v1404_v41  ;;  %v1412_v31 = vrot.slane %v1296_v11, 1  ;;  %v3148_v14 = vpop.f32.mrf.mxu0  ;;  %v3150_v41 = vpop.f32.mrf.mxu1 }
 0x111   : > { %v2273_v59 = vsel %vm579_vm0, %v2257_v25, %v1996_v4  ;;  %v1972_v32 = vrot.slane %v1572_v60, 4  ;;  %v2004_v33 = vrot.slane %v1572_v60, 5  ;;  %v2036_v35 = vrot.slane %v1572_v60, 6 }
 0x112   : > { %v2289_v16 = vsel %vm580_vm1, %v2273_v59, %v2028_v13  ;;  %v2068_v36 = vrot.slane %v1572_v60, 7  ;;  %v1708_v23 = vrot.slane %v1436_v29, 4  ;;  %v1740_v34 = vrot.slane %v1436_v29, 5  ;;  %v3169_v3 = vpop.f32.mrf.mxu0  ;;  %v3171_v7 = vpop.f32.mrf.mxu1 }
 0x113   : > { %v2305_v42 = vsel %vm2191_vm7, %v2289_v16, %v2060_v61  ;;  %v2265_v17 = vsel %vm2142_vm6, %v2249_v49, %v1972_v32  ;;  %v1772_v43 = vrot.slane %v1436_v29, 6  ;;  %v1804_v26 = vrot.slane %v1436_v29, 7 }
 0x114   : > { %2324 = vst.msk [vmem:[%s3022_s27 + $0x18] sm:$0xff] %vm2320_vm8, %v2305_v42  ;;  %v2281_v44 = vsel %vm579_vm0, %v2265_v17, %v2004_v33  ;;  %v2144_v27 = vsel %vm2142_vm6, %v2127_v50, %v1708_v23  ;;  %v1444_v53 = vmax.f32 %v1296_v11, %v1412_v31  ;;  %v693_v47 = vadd.f32 %v3051_v15, %v2950_v10  ;;  %v3191_v59 = vpop.f32.mrf.mxu0 }
 0x115   : > { %v2297_v55 = vsel %vm580_vm1, %v2281_v44, %v2036_v35  ;;  %v2160_v54 = vsel %vm579_vm0, %v2144_v27, %v1740_v34  ;;  %v949_v56 = vadd.f32 %v3053_v18, %v2950_v10  ;;  %v685_v51 = vadd.f32 %v2950_v10, %v3061_v30 }
 0x116   : > { %v2313_v62 = vsel %vm2191_vm7, %v2297_v55, %v2068_v36  ;;  %v2176_v37 = vsel %vm580_vm1, %v2160_v54, %v1772_v43  ;;  %v1716_v1 = vrot.slane %v1444_v53, 4  ;;  %v1748_v11 = vrot.slane %v1444_v53, 5 }
 0x117   : > { %2340 = vst.msk [vmem:[%s3022_s27 + $0x98] sm:$0xff] %vm2320_vm8, %v2313_v62  ;;  %v2193_v15 = vsel %vm2191_vm7, %v2176_v37, %v1804_v26  ;;  %v1780_v2 = vrot.slane %v1444_v53, 6  ;;  %v1812_v38 = vrot.slane %v1444_v53, 7  ;;  %v1149_v49 = vmax.f32 %v693_v47, 0.0 }
 0x118   : > { %2323 = vst.msk [vmem:[%s3022_s27 + $0x10] sm:$0xff] %vm2320_vm8, %v2193_v15  ;;  %v2152_v18 = vsel %vm2142_vm6, %v2135_v9, %v1716_v1  ;;  %v1213_v30 = vmax.f32 %v949_v56, 0.0  ;;  %v1147_v50 = vmax.f32 %v685_v51, 0.0  ;;  %v941_v28 = vadd.f32 %v2950_v10, %v3063_v5 }
 0x119   : > { %v2168_v46 = vsel %vm579_vm0, %v2152_v18, %v1748_v11  ;;  %v696_v4 = vadd.f32 %v3073_v39, %v2950_v10  ;;  %v952_v12 = vadd.f32 %v3075_v40, %v2950_v10  ;;  %v688_v13 = vadd.f32 %v2950_v10, %v3080_v48  ;;  %v3193_v40 = vpop.f32.mrf.mxu1 }
 0x11a   : > { %v2184_v61 = vsel %vm580_vm1, %v2168_v46, %v1780_v2  ;;  %v1211_v60 = vmax.f32 %v941_v28, 0.0  ;;  %v944_v9 = vadd.f32 %v2950_v10, %v3082_v52  ;;  %v709_v5 = vadd.f32 %v3098_v63, %v2950_v10 }
 0x11b   : > { %v2201_v25 = vsel %vm2191_vm7, %v2184_v61, %v1812_v38  ;;  %v1150_v29 = vmax.f32 %v696_v4, 0.0  ;;  %v1214_v31 = vmax.f32 %v952_v12, 0.0  ;;  %v1148_v39 = vmax.f32 %v688_v13, 0.0  ;;  %v3213_v44 = vpop.f32.mrf.mxu1 }
 0x11c   : > { %2339 = vst.msk [vmem:[%s3022_s27 + $0x90] sm:$0xff] %vm2320_vm8, %v2201_v25  ;;  %v1212_v48 = vmax.f32 %v944_v9, 0.0  ;;  %v1153_v32 = vmax.f32 %v709_v5, 0.0  ;;  %v965_v33 = vadd.f32 %v3100_v0, %v2950_v10  ;;  %v701_v52 = vadd.f32 %v2950_v10, %v3109_v58 }
 0x11d   : > { %v957_v63 = vadd.f32 %v2950_v10, %v3111_v8  ;;  %v712_v35 = vadd.f32 %v3115_v20, %v2950_v10  ;;  %v968_v16 = vadd.f32 %v3117_v21, %v2950_v10  ;;  %v704_v36 = vadd.f32 %v2950_v10, %v3119_v24  ;;  %v3211_v8 = vpop.f32.mrf.mxu0  ;;  %v3219_v38 = vpop.f32.mrf.mxu1 }
 0x11e   : > { %v1269_v23 = vmax.f32 %v1149_v49, %v1153_v32  ;;  %v1217_v34 = vmax.f32 %v965_v33, 0.0  ;;  %v1151_v42 = vmax.f32 %v701_v52, 0.0  ;;  %v960_v0 = vadd.f32 %v2950_v10, %v3121_v6 }
 0x11f   : > { %v1215_v17 = vmax.f32 %v957_v63, 0.0  ;;  %v1154_v58 = vmax.f32 %v712_v35, 0.0  ;;  %v1218_v43 = vmax.f32 %v968_v16, 0.0  ;;  %v1152_v26 = vmax.f32 %v704_v36, 0.0  ;;  %v3217_v2 = vpop.f32.mrf.mxu0 }
 0x120   : > { %v1469_v20 = vrot.slane %v1269_v23, 1  ;;  %v1301_v27 = vmax.f32 %v1213_v30, %v1217_v34  ;;  %v1267_v21 = vmax.f32 %v1147_v50, %v1151_v42  ;;  %v1216_v53 = vmax.f32 %v960_v0, 0.0 }
 0x121   : > { %v1299_v47 = vmax.f32 %v1211_v60, %v1215_v17  ;;  %v1270_v24 = vmax.f32 %v1150_v29, %v1154_v58  ;;  %v1302_v55 = vmax.f32 %v1214_v31, %v1218_v43  ;;  %v1268_v54 = vmax.f32 %v1148_v39, %v1152_v26  ;;  %v3223_v39 = vpop.f32.mrf.mxu0 }
 0x122   : > { %v1501_v56 = vmax.f32 %v1269_v23, %v1469_v20  ;;  %v1477_v51 = vrot.slane %v1301_v27, 1  ;;  %v1341_v62 = vrot.slane %v1267_v21, 1  ;;  %v3215_v6 = vmax.f32 %v1212_v48, %v1216_v53  ;;  %v3225_v48 = vpop.f32.mrf.mxu1 }
 0x123   : > { %v1349_v37 = vrot.slane %v1299_v47, 1  ;;  %v1533_v1 = vrot.slane %v1270_v24, 1  ;;  %v1541_v11 = vrot.slane %v1302_v55, 1  ;;  %v1405_v15 = vrot.slane %v1268_v54, 1 }
 0x124   : > { %v1853_v49 = vrot.slane %v1501_v56, 1  ;;  %v1885_v18 = vrot.slane %v1501_v56, 2  ;;  %v1917_v30 = vrot.slane %v1501_v56, 3  ;;  %v1509_v50 = vmax.f32 %v1301_v27, %v1477_v51  ;;  %v3236_v27 = vpop.f32.mrf.mxu0 }
 0x125   : > { %v1373_v28 = vmax.f32 %v1267_v21, %v1341_v62  ;;  %v1381_v46 = vmax.f32 %v1299_v47, %v1349_v37  ;;  %v1565_v4 = vmax.f32 %v1270_v24, %v1533_v1  ;;  %v1573_v12 = vmax.f32 %v1302_v55, %v1541_v11  ;;  %v3238_v21 = vpop.f32.mrf.mxu1 }
 0x126   : > { %v2210_v13 = vsel %vm2091_vm3, %v1501_v56, %v1853_v49  ;;  %v1861_v61 = vrot.slane %v1509_v50, 1  ;;  %v1893_v60 = vrot.slane %v1509_v50, 2  ;;  %v1925_v9 = vrot.slane %v1509_v50, 3 }
 0x127   : > { %v2226_v5 = vsel %vm2108_vm4, %v2210_v13, %v1885_v18  ;;  %v1597_v25 = vrot.slane %v1373_v28, 1  ;;  %v1629_v29 = vrot.slane %v1373_v28, 2  ;;  %v1661_v31 = vrot.slane %v1373_v28, 3 }
 0x128   : > { %v2242_v32 = vsel %vm2125_vm5, %v2226_v5, %v1917_v30  ;;  %v2218_v33 = vsel %vm2091_vm3, %v1509_v50, %v1861_v61  ;;  %v1605_v52 = vrot.slane %v1381_v46, 1  ;;  %v1637_v63 = vrot.slane %v1381_v46, 2 }
 0x129   : > { %v2234_v35 = vsel %vm2108_vm4, %v2218_v33, %v1893_v60  ;;  %v2094_v16 = vsel %vm2091_vm3, %v1373_v28, %v1597_v25  ;;  %v1669_v36 = vrot.slane %v1381_v46, 3  ;;  %v1965_v23 = vrot.slane %v1565_v4, 4 }
 0x12a   : > { %v2250_v34 = vsel %vm2125_vm5, %v2234_v35, %v1925_v9  ;;  %v2111_v42 = vsel %vm2108_vm4, %v2094_v16, %v1629_v29  ;;  %v2102_v0 = vsel %vm2091_vm3, %v1381_v46, %v1605_v52  ;;  %v1997_v17 = vrot.slane %v1565_v4, 5 }
 0x12b   : > { %v2128_v58 = vsel %vm2125_vm5, %v2111_v42, %v1661_v31  ;;  %v2119_v43 = vsel %vm2108_vm4, %v2102_v0, %v1637_v63  ;;  %v2029_v26 = vrot.slane %v1565_v4, 6  ;;  %v2061_v20 = vrot.slane %v1565_v4, 7  ;;  %v3250_v4 = vpop.f32.mrf.mxu0 }
 0x12c   : > { %v2136_v53 = vsel %vm2125_vm5, %v2119_v43, %v1669_v36  ;;  %v2258_v47 = vsel %vm2142_vm6, %v2242_v32, %v1965_v23  ;;  %v1973_v24 = vrot.slane %v1573_v12, 4  ;;  %v2005_v55 = vrot.slane %v1573_v12, 5 }
 0x12d   : > { %v2274_v56 = vsel %vm579_vm0, %v2258_v47, %v1997_v17  ;;  %v2037_v51 = vrot.slane %v1573_v12, 6  ;;  %v2069_v62 = vrot.slane %v1573_v12, 7  ;;  %v1437_v37 = vmax.f32 %v1268_v54, %v1405_v15  ;;  %v3252_v12 = vpop.f32.mrf.mxu1  ;;  %v3268_v35 = vpop.f32.mrf.mxu0 }
 0x12e   : > { %v2290_v1 = vsel %vm580_vm1, %v2274_v56, %v2029_v26  ;;  %v2266_v11 = vsel %vm2142_vm6, %v2250_v34, %v1973_v24  ;;  %v1413_v49 = vrot.slane %v3215_v6, 1  ;;  %v725_v18 = vadd.f32 %v3125_v45, %v2950_v10 }
 0x12f   : > { %v2306_v30 = vsel %vm2191_vm7, %v2290_v1, %v2061_v20  ;;  %v2282_v50 = vsel %vm579_vm0, %v2266_v11, %v2005_v55  ;;  %v1709_v28 = vrot.slane %v1437_v37, 4  ;;  %v1741_v46 = vrot.slane %v1437_v37, 5  ;;  %v3270_v16 = vpop.f32.mrf.mxu1  ;;  %v3291_v24 = vpop.f32.mrf.mxu0 }
 0x130   : > { %2326 = vst.msk [vmem:[%s3022_s27 + $0x28] sm:$0xff] %vm2320_vm8, %v2306_v30  ;;  %v2298_v54 = vsel %vm580_vm1, %v2282_v50, %v2037_v51  ;;  %v1773_v15 = vrot.slane %v1437_v37, 6  ;;  %v1805_v13 = vrot.slane %v1437_v37, 7  ;;  %v1445_v61 = vmax.f32 %v3215_v6, %v1413_v49 }
 0x131   : > { %v2314_v45 = vsel %vm2191_vm7, %v2298_v54, %v2069_v62  ;;  %v2145_v60 = vsel %vm2142_vm6, %v2128_v58, %v1709_v28  ;;  %v1157_v9 = vmax.f32 %v725_v18, 0.0  ;;  %v981_v5 = vadd.f32 %v3127_v57, %v2950_v10  ;;  %v3311_v50 = vpop.f32.mrf.mxu0 }
 0x132   : > { %2342 = vst.msk [vmem:[%s3022_s27 + $0xa8] sm:$0xff] %vm2320_vm8, %v2314_v45  ;;  %v2161_v25 = vsel %vm579_vm0, %v2145_v60, %v1741_v46  ;;  %v1717_v29 = vrot.slane %v1445_v61, 4  ;;  %v1749_v31 = vrot.slane %v1445_v61, 5  ;;  %v1781_v32 = vrot.slane %v1445_v61, 6 }
 0x133   : > { %v2177_v33 = vsel %vm580_vm1, %v2161_v25, %v1773_v15  ;;  %v1813_v52 = vrot.slane %v1445_v61, 7  ;;  %v1221_v6 = vmax.f32 %v981_v5, 0.0  ;;  %v717_v63 = vadd.f32 %v2950_v10, %v3138_v19 }
 0x134   : > { %v2194_v57 = vsel %vm2191_vm7, %v2177_v33, %v1805_v13  ;;  %v2153_v36 = vsel %vm2142_vm6, %v2136_v53, %v1717_v29  ;;  %v973_v23 = vadd.f32 %v2950_v10, %v3140_v22  ;;  %v728_v34 = vadd.f32 %v3148_v14, %v2950_v10 }
 0x135   : > { %2325 = vst.msk [vmem:[%s3022_s27 + $0x20] sm:$0xff] %vm2320_vm8, %v2194_v57  ;;  %v2169_v42 = vsel %vm579_vm0, %v2153_v36, %v1749_v31  ;;  %v1155_v19 = vmax.f32 %v717_v63, 0.0  ;;  %v984_v0 = vadd.f32 %v3150_v41, %v2950_v10  ;;  %v720_v17 = vadd.f32 %v2950_v10, %v3169_v3  ;;  %v3293_v41 = vpop.f32.mrf.mxu1  ;;  %v3315_v31 = vpop.f32.mrf.mxu0 }
 0x136   : > { %v2185_v58 = vsel %vm580_vm1, %v2169_v42, %v1781_v32  ;;  %v1219_v43 = vmax.f32 %v973_v23, 0.0  ;;  %v1158_v26 = vmax.f32 %v728_v34, 0.0  ;;  %v976_v22 = vadd.f32 %v2950_v10, %v3171_v7 }
 0x137   : > { %v2202_v14 = vsel %vm2191_vm7, %v2185_v58, %v1813_v52  ;;  %v1222_v20 = vmax.f32 %v984_v0, 0.0  ;;  %v1156_v53 = vmax.f32 %v720_v17, 0.0  ;;  %v741_v47 = vadd.f32 %v3191_v59, %v2950_v10  ;;  %v3313_v28 = vpop.f32.mrf.mxu1 }
 0x138   : > { %2341 = vst.msk [vmem:[%s3022_s27 + $0xa0] sm:$0xff] %vm2320_vm8, %v2202_v14  ;;  %v1220_v3 = vmax.f32 %v976_v22, 0.0  ;;  %v997_v55 = vadd.f32 %v3193_v40, %v2950_v10  ;;  %v733_v7 = vadd.f32 %v2950_v10, %v3211_v8  ;;  %v989_v56 = vadd.f32 %v2950_v10, %v3213_v44  ;;  %v3320_v14 = vpop.f32.mrf.mxu0 }
 0x139   : > { %v1161_v51 = vmax.f32 %v741_v47, 0.0  ;;  %v744_v59 = vadd.f32 %v3217_v2, %v2950_v10  ;;  %v1000_v62 = vadd.f32 %v3219_v38, %v2950_v10  ;;  %v736_v37 = vadd.f32 %v2950_v10, %v3223_v39  ;;  %v3317_v32 = vpop.f32.mrf.mxu1 }
 0x13a   : > { %v1225_v1 = vmax.f32 %v997_v55, 0.0  ;;  %v1159_v11 = vmax.f32 %v733_v7, 0.0  ;;  %v1223_v49 = vmax.f32 %v989_v56, 0.0  ;;  %v992_v40 = vadd.f32 %v2950_v10, %v3225_v48 }
 0x13b   : > { %v1273_v8 = vmax.f32 %v1157_v9, %v1161_v51  ;;  %v1162_v18 = vmax.f32 %v744_v59, 0.0  ;;  %v1226_v30 = vmax.f32 %v1000_v62, 0.0  ;;  %v1160_v44 = vmax.f32 %v736_v37, 0.0 }
 0x13c   : > { %v1305_v2 = vmax.f32 %v1221_v6, %v1225_v1  ;;  %v1271_v46 = vmax.f32 %v1155_v19, %v1159_v11  ;;  %v1303_v38 = vmax.f32 %v1219_v43, %v1223_v49  ;;  %v1224_v54 = vmax.f32 %v992_v40, 0.0 }
 0x13d   : > { %v1470_v15 = vrot.slane %v1273_v8, 1  ;;  %v1274_v39 = vmax.f32 %v1158_v26, %v1162_v18  ;;  %v1306_v13 = vmax.f32 %v1222_v20, %v1226_v30  ;;  %v1272_v61 = vmax.f32 %v1156_v53, %v1160_v44  ;;  %v3322_v20 = vpop.f32.mrf.mxu1  ;;  %v3334_v30 = vpop.f32.mrf.mxu0 }
 0x13e   : > { %v1478_v45 = vrot.slane %v1305_v2, 1  ;;  %v1342_v60 = vrot.slane %v1271_v46, 1  ;;  %v1350_v5 = vrot.slane %v1303_v38, 1  ;;  %v1304_v10 = vmax.f32 %v1220_v3, %v1224_v54 }
 0x13f   : > { %v1502_v48 = vmax.f32 %v1273_v8, %v1470_v15  ;;  %v1534_v9 = vrot.slane %v1274_v39, 1  ;;  %v1542_v25 = vrot.slane %v1306_v13, 1  ;;  %v1406_v29 = vrot.slane %v1272_v61, 1  ;;  %v3336_v44 = vpop.f32.mrf.mxu1 }
 0x140   : > { %v1510_v33 = vmax.f32 %v1305_v2, %v1478_v45  ;;  %v1374_v52 = vmax.f32 %v1271_v46, %v1342_v60  ;;  %v1382_v6 = vmax.f32 %v1303_v38, %v1350_v5  ;;  %v1414_v63 = vrot.slane %v1304_v10, 1  ;;  %v3344_v45 = vld [vmem:[%s3704_s2] ss:$0 sm:$0xff] }
 0x141   : > { %v1854_v57 = vrot.slane %v1502_v48, 1  ;;  %v1886_v36 = vrot.slane %v1502_v48, 2  ;;  %v1918_v23 = vrot.slane %v1502_v48, 3  ;;  %v1566_v34 = vmax.f32 %v1274_v39, %v1534_v9 }
 0x142   : > { %v1862_v42 = vrot.slane %v1510_v33, 1  ;;  %v1894_v19 = vrot.slane %v1510_v33, 2  ;;  %v1926_v0 = vrot.slane %v1510_v33, 3  ;;  %v1598_v17 = vrot.slane %v1374_v52, 1 }
 0x143   : > { %v2211_v58 = vsel %vm2091_vm3, %v1502_v48, %v1854_v57  ;;  %v1630_v43 = vrot.slane %v1374_v52, 2  ;;  %v1662_v26 = vrot.slane %v1374_v52, 3  ;;  %v1606_v22 = vrot.slane %v1382_v6, 1 }
 0x144   : > { %v2227_v53 = vsel %vm2108_vm4, %v2211_v58, %v1886_v36  ;;  %v2219_v47 = vsel %vm2091_vm3, %v1510_v33, %v1862_v42  ;;  %v2095_v3 = vsel %vm2091_vm3, %v1374_v52, %v1598_v17  ;;  %v1638_v55 = vrot.slane %v1382_v6, 2  ;;  %v3354_v52 = vpop.f32.mrf.mxu0 }
 0x145   : > { %v2243_v7 = vsel %vm2125_vm5, %v2227_v53, %v1918_v23  ;;  %v2235_v56 = vsel %vm2108_vm4, %v2219_v47, %v1894_v19  ;;  %v2112_v51 = vsel %vm2108_vm4, %v2095_v3, %v1630_v43  ;;  %v1670_v59 = vrot.slane %v1382_v6, 3 }
 0x146   : > { %v2251_v62 = vsel %vm2125_vm5, %v2235_v56, %v1926_v0  ;;  %v2129_v37 = vsel %vm2125_vm5, %v2112_v51, %v1662_v26  ;;  %v2103_v1 = vsel %vm2091_vm3, %v1382_v6, %v1606_v22  ;;  %v1966_v11 = vrot.slane %v1566_v34, 4  ;;  %v3356_v6 = vpop.f32.mrf.mxu1  ;;  %v3369_v47 = vpop.f32.mrf.mxu0 }
 0x147   : > { %v2120_v49 = vsel %vm2108_vm4, %v2103_v1, %v1638_v55  ;;  %v1998_v40 = vrot.slane %v1566_v34, 5  ;;  %v2030_v8 = vrot.slane %v1566_v34, 6  ;;  %v2062_v18 = vrot.slane %v1566_v34, 7 }
 0x148   : > { %v2137_v2 = vsel %vm2125_vm5, %v2120_v49, %v1670_v59  ;;  %v2259_v46 = vsel %vm2142_vm6, %v2243_v7, %v1966_v11  ;;  %v1574_v38 = vmax.f32 %v1306_v13, %v1542_v25  ;;  %v1438_v54 = vmax.f32 %v1272_v61, %v1406_v29  ;;  %v3371_v3 = vpop.f32.mrf.mxu1 }
 0x149   : > { %v2275_v15 = vsel %vm579_vm0, %v2259_v46, %v1998_v40  ;;  %v1446_v39 = vmax.f32 %v1304_v10, %v1414_v63  ;;  %v757_v60 = vadd.f32 %v3344_v45, %v3236_v27  ;;  %v3350_v5 = vadd.f32 %v3344_v45, %v3238_v21 }
 0x14a   : > { %v2291_v48 = vsel %vm580_vm1, %v2275_v15, %v2030_v8  ;;  %v1974_v13 = vrot.slane %v1574_v38, 4  ;;  %v2006_v61 = vrot.slane %v1574_v38, 5  ;;  %v2038_v9 = vrot.slane %v1574_v38, 6 }
 0x14b   : > { %v2307_v25 = vsel %vm2191_vm7, %v2291_v48, %v2062_v18  ;;  %v2070_v10 = vrot.slane %v1574_v38, 7  ;;  %v1710_v29 = vrot.slane %v1438_v54, 4  ;;  %v1742_v33 = vrot.slane %v1438_v54, 5 }
 0x14c   : > { %2328 = vst.msk [vmem:[%s3022_s27 + $0x38] sm:$0xff] %vm2320_vm8, %v2307_v25  ;;  %v2267_v27 = vsel %vm2142_vm6, %v2251_v62, %v1974_v13  ;;  %v1774_v21 = vrot.slane %v1438_v54, 6  ;;  %v1806_v63 = vrot.slane %v1438_v54, 7  ;;  %v1718_v57 = vrot.slane %v1446_v39, 4 }
 0x14d   : > { %v2283_v36 = vsel %vm579_vm0, %v2267_v27, %v2006_v61  ;;  %v2146_v23 = vsel %vm2142_vm6, %v2129_v37, %v1710_v29  ;;  %v1750_v34 = vrot.slane %v1446_v39, 5  ;;  %v1782_v42 = vrot.slane %v1446_v39, 6 }
 0x14e   : > { %v2299_v19 = vsel %vm580_vm1, %v2283_v36, %v2038_v9  ;;  %v2162_v0 = vsel %vm579_vm0, %v2146_v23, %v1742_v33  ;;  %v1814_v17 = vrot.slane %v1446_v39, 7  ;;  %v2154_v58 = vsel %vm2142_vm6, %v2137_v2, %v1718_v57  ;;  %v3399_v2 = vpop.f32.mrf.mxu0 }
 0x14f   : > { %v2315_v43 = vsel %vm2191_vm7, %v2299_v19, %v2070_v10  ;;  %v2178_v26 = vsel %vm580_vm1, %v2162_v0, %v1774_v21  ;;  %v2170_v22 = vsel %vm579_vm0, %v2154_v58, %v1750_v34  ;;  %v1165_v53 = vmax.f32 %v757_v60, 0.0 }
 0x150   : > { %2344 = vst.msk [vmem:[%s3022_s27 + $0xb8] sm:$0xff] %vm2320_vm8, %v2315_v43  ;;  %v2195_v55 = vsel %vm2191_vm7, %v2178_v26, %v1806_v63  ;;  %v2186_v7 = vsel %vm580_vm1, %v2170_v22, %v1782_v42  ;;  %v1229_v56 = vmax.f32 %v3350_v5, 0.0  ;;  %v749_v51 = vadd.f32 %v3344_v45, %v3250_v4  ;;  %v3415_v25 = vpop.f32.mrf.mxu0 }
 0x151   : > { %2327 = vst.msk [vmem:[%s3022_s27 + $0x30] sm:$0xff] %vm2320_vm8, %v2195_v55  ;;  %v2203_v59 = vsel %vm2191_vm7, %v2186_v7, %v1814_v17  ;;  %v1005_v62 = vadd.f32 %v3344_v45, %v3252_v12  ;;  %v760_v37 = vadd.f32 %v3344_v45, %v3268_v35  ;;  %v1016_v1 = vadd.f32 %v3344_v45, %v3270_v16  ;;  %v3401_v16 = vpop.f32.mrf.mxu1 }
 0x152   : > { %2343 = vst.msk [vmem:[%s3022_s27 + $0xb0] sm:$0xff] %vm2320_vm8, %v2203_v59  ;;  %v1163_v11 = vmax.f32 %v749_v51, 0.0  ;;  %v752_v49 = vadd.f32 %v3344_v45, %v3291_v24  ;;  %v1008_v4 = vadd.f32 %v3344_v45, %v3293_v41  ;;  %v773_v40 = vadd.f32 %v3344_v45, %v3311_v50  ;;  %v3421_v0 = vpop.f32.mrf.mxu0 }
 0x153   : > { %v1227_v8 = vmax.f32 %v1005_v62, 0.0  ;;  %v1166_v12 = vmax.f32 %v760_v37, 0.0  ;;  %v1230_v18 = vmax.f32 %v1016_v1, 0.0  ;;  %v1029_v35 = vadd.f32 %v3344_v45, %v3313_v28 }
 0x154   : > { %v1164_v46 = vmax.f32 %v752_v49, 0.0  ;;  %v1228_v38 = vmax.f32 %v1008_v4, 0.0  ;;  %v1169_v54 = vmax.f32 %v773_v40, 0.0  ;;  %v765_v24 = vadd.f32 %v3344_v45, %v3315_v31  ;;  %v3428_v40 = vpop.f32.mrf.mxu0 }
 0x155   : > { %v1233_v41 = vmax.f32 %v1029_v35, 0.0  ;;  %v1021_v50 = vadd.f32 %v3344_v45, %v3317_v32  ;;  %v776_v15 = vadd.f32 %v3344_v45, %v3320_v14  ;;  %v1032_v28 = vadd.f32 %v3344_v45, %v3322_v20  ;;  %v3417_v32 = vpop.f32.mrf.mxu1 }
 0x156   : > { %v1277_v39 = vmax.f32 %v1165_v53, %v1169_v54  ;;  %v1167_v60 = vmax.f32 %v765_v24, 0.0  ;;  %v768_v5 = vadd.f32 %v3344_v45, %v3334_v30  ;;  %v1024_v48 = vadd.f32 %v3344_v45, %v3336_v44 }
 0x157   : > { %v1309_v13 = vmax.f32 %v1229_v56, %v1233_v41  ;;  %v1231_v31 = vmax.f32 %v1021_v50, 0.0  ;;  %v1170_v61 = vmax.f32 %v776_v15, 0.0  ;;  %v1234_v9 = vmax.f32 %v1032_v28, 0.0  ;;  %v3423_v17 = vpop.f32.mrf.mxu1 }
 0x158   : > { %v1471_v14 = vrot.slane %v1277_v39, 1  ;;  %v1275_v10 = vmax.f32 %v1163_v11, %v1167_v60  ;;  %v1168_v29 = vmax.f32 %v768_v5, 0.0  ;;  %v1232_v20 = vmax.f32 %v1024_v48, 0.0 }
 0x159   : > { %v1479_v33 = vrot.slane %v1309_v13, 1  ;;  %v1307_v27 = vmax.f32 %v1227_v8, %v1231_v31  ;;  %v1278_v21 = vmax.f32 %v1166_v12, %v1170_v61  ;;  %v1310_v63 = vmax.f32 %v1230_v18, %v1234_v9  ;;  %v3430_v8 = vpop.f32.mrf.mxu1  ;;  %v3441_v31 = vpop.f32.mrf.mxu0 }
 0x15a   : > { %v1503_v30 = vmax.f32 %v1277_v39, %v1471_v14  ;;  %v1343_v57 = vrot.slane %v1275_v10, 1  ;;  %v1276_v36 = vmax.f32 %v1164_v46, %v1168_v29  ;;  %v3419_v44 = vmax.f32 %v1228_v38, %v1232_v20 }
 0x15b   : > { %v1511_v23 = vmax.f32 %v1309_v13, %v1479_v33  ;;  %v1351_v34 = vrot.slane %v1307_v27, 1  ;;  %v1535_v42 = vrot.slane %v1278_v21, 1  ;;  %v1543_v19 = vrot.slane %v1310_v63, 1  ;;  %v3443_v61 = vpop.f32.mrf.mxu1 }
 0x15c   : > { %v1855_v58 = vrot.slane %v1503_v30, 1  ;;  %v1887_v43 = vrot.slane %v1503_v30, 2  ;;  %v1919_v26 = vrot.slane %v1503_v30, 3  ;;  %v1375_v22 = vmax.f32 %v1275_v10, %v1343_v57 }
 0x15d   : > { %v1863_v53 = vrot.slane %v1511_v23, 1  ;;  %v1895_v55 = vrot.slane %v1511_v23, 2  ;;  %v1927_v7 = vrot.slane %v1511_v23, 3  ;;  %v1383_v56 = vmax.f32 %v1307_v27, %v1351_v34 }
 0x15e   : > { %v2212_v51 = vsel %vm2091_vm3, %v1503_v30, %v1855_v58  ;;  %v1599_v59 = vrot.slane %v1375_v22, 1  ;;  %v1631_v62 = vrot.slane %v1375_v22, 2  ;;  %v1663_v37 = vrot.slane %v1375_v22, 3  ;;  %v799_v58 = vpop.f32.mrf.mxu0 }
 0x15f   : > { %v2228_v1 = vsel %vm2108_vm4, %v2212_v51, %v1887_v43  ;;  %v2220_v11 = vsel %vm2091_vm3, %v1511_v23, %v1863_v53  ;;  %v1607_v49 = vrot.slane %v1383_v56, 1  ;;  %v1639_v4 = vrot.slane %v1383_v56, 2  ;;  %v1055_v43 = vpop.f32.mrf.mxu1 }
 0x160   : > { %v2244_v12 = vsel %vm2125_vm5, %v2228_v1, %v1919_v26  ;;  %v2236_v18 = vsel %vm2108_vm4, %v2220_v11, %v1895_v55  ;;  %v2096_v35 = vsel %vm2091_vm3, %v1375_v22, %v1599_v59  ;;  %v1671_v46 = vrot.slane %v1383_v56, 3 }
 0x161   : > { %v2252_v38 = vsel %vm2125_vm5, %v2236_v18, %v1927_v7  ;;  %v2113_v54 = vsel %vm2108_vm4, %v2096_v35, %v1631_v62  ;;  %v2104_v24 = vsel %vm2091_vm3, %v1383_v56, %v1607_v49  ;;  %v1567_v41 = vmax.f32 %v1278_v21, %v1535_v42 }
 0x162   : > { %v2130_v50 = vsel %vm2125_vm5, %v2113_v54, %v1663_v37  ;;  %v2121_v15 = vsel %vm2108_vm4, %v2104_v24, %v1639_v4  ;;  %v1575_v28 = vmax.f32 %v1310_v63, %v1543_v19  ;;  %v1407_v39 = vrot.slane %v1276_v36, 1 }
 0x163   : > { %v2138_v60 = vsel %vm2125_vm5, %v2121_v15, %v1671_v46  ;;  %v1967_v5 = vrot.slane %v1567_v41, 4  ;;  %v1999_v48 = vrot.slane %v1567_v41, 5  ;;  %v2031_v13 = vrot.slane %v1567_v41, 6 }
 0x164   : > { %v2063_v9 = vrot.slane %v1567_v41, 7  ;;  %v1975_v14 = vrot.slane %v1575_v28, 4  ;;  %v2007_v10 = vrot.slane %v1575_v28, 5  ;;  %v2039_v29 = vrot.slane %v1575_v28, 6 }
 0x165   : > { %v2260_v20 = vsel %vm2142_vm6, %v2244_v12, %v1967_v5  ;;  %v2071_v33 = vrot.slane %v1575_v28, 7  ;;  %v1439_v27 = vmax.f32 %v1276_v36, %v1407_v39  ;;  %v1415_v21 = vrot.slane %v3419_v44, 1  ;;  %v3470_v12 = vpop.f32.mrf.mxu0 }
 0x166   : > { %v2276_v63 = vsel %vm579_vm0, %v2260_v20, %v1999_v48  ;;  %v2268_v30 = vsel %vm2142_vm6, %v2252_v38, %v1975_v14  ;;  %v789_v57 = vadd.f32 %v3344_v45, %v3354_v52  ;;  %v1045_v23 = vadd.f32 %v3344_v45, %v3356_v6 }
 0x167   : > { %v2292_v34 = vsel %vm580_vm1, %v2276_v63, %v2031_v13  ;;  %v2284_v42 = vsel %vm579_vm0, %v2268_v30, %v2007_v10  ;;  %v1711_v19 = vrot.slane %v1439_v27, 4  ;;  %v1743_v36 = vrot.slane %v1439_v27, 5  ;;  %v3492_v5 = vpop.f32.mrf.mxu0 }
 0x168   : > { %v2308_v26 = vsel %vm2191_vm7, %v2292_v34, %v2063_v9  ;;  %v2300_v22 = vsel %vm580_vm1, %v2284_v42, %v2039_v29  ;;  %v1775_v53 = vrot.slane %v1439_v27, 6  ;;  %v1807_v55 = vrot.slane %v1439_v27, 7 }
 0x169   : > { %2330 = vst.msk [vmem:[%s3022_s27 + $0x48] sm:$0xff] %vm2320_vm8, %v2308_v26  ;;  %v2316_v52 = vsel %vm2191_vm7, %v2300_v22, %v2071_v33  ;;  %v2147_v6 = vsel %vm2142_vm6, %v2130_v50, %v1711_v19  ;;  %v1447_v7 = vmax.f32 %v3419_v44, %v1415_v21  ;;  %v1173_v56 = vmax.f32 %v789_v57, 0.0  ;;  %v3472_v44 = vpop.f32.mrf.mxu1 }
 0x16a   : > { %2346 = vst.msk [vmem:[%s3022_s27 + $0xc8] sm:$0xff] %vm2320_vm8, %v2316_v52  ;;  %v2163_v51 = vsel %vm579_vm0, %v2147_v6, %v1743_v36  ;;  %v1237_v59 = vmax.f32 %v1045_v23, 0.0  ;;  %v781_v62 = vadd.f32 %v3344_v45, %v3369_v47  ;;  %v1037_v37 = vadd.f32 %v3344_v45, %v3371_v3 }
 0x16b   : > { %v2179_v1 = vsel %vm580_vm1, %v2163_v51, %v1775_v53  ;;  %v1719_v11 = vrot.slane %v1447_v7, 4  ;;  %v1751_v49 = vrot.slane %v1447_v7, 5  ;;  %v1783_v4 = vrot.slane %v1447_v7, 6  ;;  %v3494_v48 = vpop.f32.mrf.mxu1 }
 0x16c   : > { %v2196_v18 = vsel %vm2191_vm7, %v2179_v1, %v1807_v55  ;;  %v1815_v35 = vrot.slane %v1447_v7, 7  ;;  %v1171_v46 = vmax.f32 %v781_v62, 0.0  ;;  %v1235_v38 = vmax.f32 %v1037_v37, 0.0 }
 0x16d   : > { %2329 = vst.msk [vmem:[%s3022_s27 + $0x40] sm:$0xff] %vm2320_vm8, %v2196_v18  ;;  %v2155_v47 = vsel %vm2142_vm6, %v2138_v60, %v1719_v11  ;;  %v792_v3 = vadd.f32 %v3344_v45, %v3399_v2  ;;  %v1048_v54 = vadd.f32 %v3344_v45, %v3401_v16  ;;  %v784_v24 = vadd.f32 %v3344_v45, %v3415_v25  ;;  %v3511_v23 = vpop.f32.mrf.mxu1 }
 0x16e   : > { %v2171_v41 = vsel %vm579_vm0, %v2155_v47, %v1751_v49  ;;  %v1040_v50 = vadd.f32 %v3344_v45, %v3417_v32  ;;  %v805_v15 = vadd.f32 %v3344_v45, %v3421_v0  ;;  %v1061_v28 = vadd.f32 %v3344_v45, %v3423_v17 }
 0x16f   : > { %v2187_v2 = vsel %vm580_vm1, %v2171_v41, %v1783_v4  ;;  %v1174_v39 = vmax.f32 %v792_v3, 0.0  ;;  %v1238_v60 = vmax.f32 %v1048_v54, 0.0  ;;  %v1172_v16 = vmax.f32 %v784_v24, 0.0  ;;  %v3517_v51 = vpop.f32.mrf.mxu1 }
 0x170   : > { %v2204_v25 = vsel %vm2191_vm7, %v2187_v2, %v1815_v35  ;;  %v1236_v13 = vmax.f32 %v1040_v50, 0.0  ;;  %v1177_v9 = vmax.f32 %v805_v15, 0.0  ;;  %v1241_v32 = vmax.f32 %v1061_v28, 0.0 }
 0x171   : > { %2345 = vst.msk [vmem:[%s3022_s27 + $0xc0] sm:$0xff] %vm2320_vm8, %v2204_v25  ;;  %v797_v0 = vadd.f32 %v3344_v45, %v3428_v40  ;;  %v1053_v17 = vadd.f32 %v3344_v45, %v3430_v8  ;;  %v808_v14 = vadd.f32 %v3344_v45, %v3441_v31  ;;  %v1064_v10 = vadd.f32 %v3344_v45, %v3443_v61  ;;  %v3509_v40 = vpop.f32.mrf.mxu0  ;;  %v3525_v15 = vpop.f32.mrf.mxu1 }
 0x172   : > { %v1281_v29 = vmax.f32 %v1173_v56, %v1177_v9  ;;  %v1313_v20 = vmax.f32 %v1237_v59, %v1241_v32  ;;  %v800_v33 = vadd.f32 %v3344_v45, %v799_v58  ;;  %v1056_v27 = vadd.f32 %v3344_v45, %v1055_v43 }
 0x173   : > { %v1175_v21 = vmax.f32 %v797_v0, 0.0  ;;  %v1239_v63 = vmax.f32 %v1053_v17, 0.0  ;;  %v1178_v30 = vmax.f32 %v808_v14, 0.0  ;;  %v1242_v57 = vmax.f32 %v1064_v10, 0.0  ;;  %v3515_v56 = vpop.f32.mrf.mxu0 }
 0x174   : > { %v1472_v8 = vrot.slane %v1281_v29, 1  ;;  %v1480_v34 = vrot.slane %v1313_v20, 1  ;;  %v1176_v31 = vmax.f32 %v800_v33, 0.0  ;;  %v1240_v42 = vmax.f32 %v1056_v27, 0.0 }
 0x175   : > { %v1279_v19 = vmax.f32 %v1171_v46, %v1175_v21  ;;  %v1311_v61 = vmax.f32 %v1235_v38, %v1239_v63  ;;  %v1282_v36 = vmax.f32 %v1174_v39, %v1178_v30  ;;  %v1314_v26 = vmax.f32 %v1238_v60, %v1242_v57  ;;  %v3523_v50 = vpop.f32.mrf.mxu0  ;;  %v1084_v21 = vpop.f32.mrf.mxu1 }
 0x176   : > { %v1504_v22 = vmax.f32 %v1281_v29, %v1472_v8  ;;  %v1512_v58 = vmax.f32 %v1313_v20, %v1480_v34  ;;  %v1280_v53 = vmax.f32 %v1172_v16, %v1176_v31  ;;  %v3513_v43 = vmax.f32 %v1236_v13, %v1240_v42 }
 0x177   : > { %v1344_v55 = vrot.slane %v1279_v19, 1  ;;  %v1352_v52 = vrot.slane %v1311_v61, 1  ;;  %v1536_v6 = vrot.slane %v1282_v36, 1  ;;  %v1544_v7 = vrot.slane %v1314_v26, 1  ;;  %v828_v27 = vpop.f32.mrf.mxu0 }
 0x178   : > { %v1856_v59 = vrot.slane %v1504_v22, 1  ;;  %v1888_v62 = vrot.slane %v1504_v22, 2  ;;  %v1920_v37 = vrot.slane %v1504_v22, 3  ;;  %v1864_v1 = vrot.slane %v1512_v58, 1 }
 0x179   : > { %v1896_v11 = vrot.slane %v1512_v58, 2  ;;  %v1928_v49 = vrot.slane %v1512_v58, 3  ;;  %v1376_v4 = vmax.f32 %v1279_v19, %v1344_v55  ;;  %v1384_v18 = vmax.f32 %v1311_v61, %v1352_v52 }
 0x17a   : > { %v2213_v35 = vsel %vm2091_vm3, %v1504_v22, %v1856_v59  ;;  %v2221_v46 = vsel %vm2091_vm3, %v1512_v58, %v1864_v1  ;;  %v1568_v38 = vmax.f32 %v1282_v36, %v1536_v6  ;;  %v1576_v47 = vmax.f32 %v1314_v26, %v1544_v7  ;;  %v2613_v7 = vpop.f32.mrf.mxu0  ;;  %v2677_v59 = vpop.f32.mrf.mxu1 }
 0x17b   : > { %v2229_v3 = vsel %vm2108_vm4, %v2213_v35, %v1888_v62  ;;  %v2237_v54 = vsel %vm2108_vm4, %v2221_v46, %v1896_v11  ;;  %v1600_v24 = vrot.slane %v1376_v4, 1  ;;  %v1632_v41 = vrot.slane %v1376_v4, 2 }
 0x17c   : > { %v2245_v28 = vsel %vm2125_vm5, %v2229_v3, %v1920_v37  ;;  %v2253_v2 = vsel %vm2125_vm5, %v2237_v54, %v1928_v49  ;;  %v1664_v39 = vrot.slane %v1376_v4, 3  ;;  %v1608_v60 = vrot.slane %v1384_v18, 1  ;;  %v831_v3 = vpop.f32.mrf.mxu0  ;;  %v1087_v54 = vpop.f32.mrf.mxu1 }
 0x17d   : > { %v2097_v16 = vsel %vm2091_vm3, %v1376_v4, %v1600_v24  ;;  %v1640_v25 = vrot.slane %v1384_v18, 2  ;;  %v1672_v13 = vrot.slane %v1384_v18, 3  ;;  %v1968_v9 = vrot.slane %v1568_v38, 4 }
 0x17e   : > { %v2114_v32 = vsel %vm2108_vm4, %v2097_v16, %v1632_v41  ;;  %v2105_v0 = vsel %vm2091_vm3, %v1384_v18, %v1608_v60  ;;  %v2000_v17 = vrot.slane %v1568_v38, 5  ;;  %v2032_v14 = vrot.slane %v1568_v38, 6 }
 0x17f   : > { %v2131_v10 = vsel %vm2125_vm5, %v2114_v32, %v1664_v39  ;;  %v2122_v29 = vsel %vm2108_vm4, %v2105_v0, %v1640_v25  ;;  %v2064_v20 = vrot.slane %v1568_v38, 7  ;;  %v2261_v33 = vsel %vm2142_vm6, %v2245_v28, %v1968_v9 }
 0x180   : > { %v2139_v63 = vsel %vm2125_vm5, %v2122_v29, %v1672_v13  ;;  %v2277_v30 = vsel %vm579_vm0, %v2261_v33, %v2000_v17  ;;  %v1976_v57 = vrot.slane %v1576_v47, 4  ;;  %v2008_v8 = vrot.slane %v1576_v47, 5 }
 0x181   : > { %v2293_v34 = vsel %vm580_vm1, %v2277_v30, %v2032_v14  ;;  %v2040_v31 = vrot.slane %v1576_v47, 6  ;;  %v2072_v42 = vrot.slane %v1576_v47, 7  ;;  %v1408_v19 = vrot.slane %v1280_v53, 1  ;;  %v3577_v14 = vpop.f32.mrf.mxu0 }
 0x182   : > { %v2309_v61 = vsel %vm2191_vm7, %v2293_v34, %v2064_v20  ;;  %v2269_v36 = vsel %vm2142_vm6, %v2253_v2, %v1976_v57  ;;  %v1416_v26 = vrot.slane %v3513_v43, 1  ;;  %v821_v22 = vadd.f32 %v3344_v45, %v3470_v12 }
 0x183   : > { %2332 = vst.msk [vmem:[%s3022_s27 + $0x58] sm:$0xff] %vm2320_vm8, %v2309_v61  ;;  %v2285_v58 = vsel %vm579_vm0, %v2269_v36, %v2008_v8  ;;  %v1440_v55 = vmax.f32 %v1280_v53, %v1408_v19  ;;  %v1077_v52 = vadd.f32 %v3344_v45, %v3472_v44  ;;  %v813_v6 = vadd.f32 %v3344_v45, %v3492_v5  ;;  %v3591_v36 = vpop.f32.mrf.mxu0 }
 0x184   : > { %v2301_v62 = vsel %vm580_vm1, %v2285_v58, %v2040_v31  ;;  %v1448_v37 = vmax.f32 %v3513_v43, %v1416_v26  ;;  %v1181_v1 = vmax.f32 %v821_v22, 0.0  ;;  %v1069_v12 = vadd.f32 %v3344_v45, %v3494_v48 }
 0x185   : > { %v2317_v11 = vsel %vm2191_vm7, %v2301_v62, %v2072_v42  ;;  %v1712_v49 = vrot.slane %v1440_v55, 4  ;;  %v1744_v53 = vrot.slane %v1440_v55, 5  ;;  %v1776_v4 = vrot.slane %v1440_v55, 6 }
 0x186   : > { %2348 = vst.msk [vmem:[%s3022_s27 + $0xd8] sm:$0xff] %vm2320_vm8, %v2317_v11  ;;  %v1808_v44 = vrot.slane %v1440_v55, 7  ;;  %v1720_v18 = vrot.slane %v1448_v37, 4  ;;  %v1752_v5 = vrot.slane %v1448_v37, 5  ;;  %v1784_v35 = vrot.slane %v1448_v37, 6 }
 0x187   : > { %v2148_v46 = vsel %vm2142_vm6, %v2131_v10, %v1712_v49  ;;  %v1816_v38 = vrot.slane %v1448_v37, 7  ;;  %v1245_v47 = vmax.f32 %v1077_v52, 0.0  ;;  %v1179_v43 = vmax.f32 %v813_v6, 0.0 }
 0x188   : > { %v2164_v48 = vsel %vm579_vm0, %v2148_v46, %v1744_v53  ;;  %v2156_v24 = vsel %vm2142_vm6, %v2139_v63, %v1720_v18  ;;  %v1243_v41 = vmax.f32 %v1069_v12, 0.0  ;;  %v824_v28 = vadd.f32 %v3344_v45, %v3509_v40  ;;  %v3595_v53 = vpop.f32.mrf.mxu0 }
 0x189   : > { %v2180_v2 = vsel %vm580_vm1, %v2164_v48, %v1776_v4  ;;  %v2172_v39 = vsel %vm579_vm0, %v2156_v24, %v1752_v5  ;;  %v1080_v60 = vadd.f32 %v3344_v45, %v3511_v23  ;;  %v816_v16 = vadd.f32 %v3344_v45, %v3515_v56  ;;  %v3579_v56 = vpop.f32.mrf.mxu1 }
 0x18a   : > { %v2197_v25 = vsel %vm2191_vm7, %v2180_v2, %v1808_v44  ;;  %v2188_v13 = vsel %vm580_vm1, %v2172_v39, %v1784_v35  ;;  %v1182_v9 = vmax.f32 %v824_v28, 0.0  ;;  %v1072_v32 = vadd.f32 %v3344_v45, %v3517_v51 }
 0x18b   : > { %2331 = vst.msk [vmem:[%s3022_s27 + $0x50] sm:$0xff] %vm2320_vm8, %v2197_v25  ;;  %v2205_v40 = vsel %vm2191_vm7, %v2188_v13, %v1816_v38  ;;  %v1246_v0 = vmax.f32 %v1080_v60, 0.0  ;;  %v1180_v17 = vmax.f32 %v816_v16, 0.0  ;;  %v837_v23 = vadd.f32 %v3344_v45, %v3523_v50  ;;  %v3600_v60 = vpop.f32.mrf.mxu0 }
 0x18c   : > { %2347 = vst.msk [vmem:[%s3022_s27 + $0xd0] sm:$0xff] %vm2320_vm8, %v2205_v40  ;;  %v1244_v10 = vmax.f32 %v1072_v32, 0.0  ;;  %v1093_v29 = vadd.f32 %v3344_v45, %v3525_v15  ;;  %v829_v51 = vadd.f32 %v3344_v45, %v828_v27  ;;  %v1085_v20 = vadd.f32 %v3344_v45, %v1084_v21  ;;  %v3593_v27 = vpop.f32.mrf.mxu1 }
 0x18d   : > { %v1185_v33 = vmax.f32 %v837_v23, 0.0  ;;  %v840_v63 = vadd.f32 %v3344_v45, %v2613_v7  ;;  %v1096_v30 = vadd.f32 %v3344_v45, %v2677_v59  ;;  %v832_v50 = vadd.f32 %v3344_v45, %v831_v3 }
 0x18e   : > { %v1249_v57 = vmax.f32 %v1093_v29, 0.0  ;;  %v1183_v8 = vmax.f32 %v829_v51, 0.0  ;;  %v1247_v34 = vmax.f32 %v1085_v20, 0.0  ;;  %v1088_v31 = vadd.f32 %v3344_v45, %v1087_v54  ;;  %v3597_v4 = vpop.f32.mrf.mxu1 }
 0x18f   : > { %v1285_v42 = vmax.f32 %v1181_v1, %v1185_v33  ;;  %v1186_v19 = vmax.f32 %v840_v63, 0.0  ;;  %v1250_v61 = vmax.f32 %v1096_v30, 0.0  ;;  %v1184_v15 = vmax.f32 %v832_v50, 0.0 }
 0x190   : > { %v1317_v21 = vmax.f32 %v1245_v47, %v1249_v57  ;;  %v1283_v26 = vmax.f32 %v1179_v43, %v1183_v8  ;;  %v1315_v22 = vmax.f32 %v1243_v41, %v1247_v34  ;;  %v1248_v58 = vmax.f32 %v1088_v31, 0.0  ;;  %v3602_v16 = vpop.f32.mrf.mxu1  ;;  %v2620_v57 = vpop.f32.mrf.mxu0 }
 0x191   : > { %v1473_v55 = vrot.slane %v1285_v42, 1  ;;  %v1286_v52 = vmax.f32 %v1182_v9, %v1186_v19  ;;  %v1318_v6 = vmax.f32 %v1246_v0, %v1250_v61  ;;  %v1284_v7 = vmax.f32 %v1180_v17, %v1184_v15 }
 0x192   : > { %v1481_v59 = vrot.slane %v1317_v21, 1  ;;  %v1345_v62 = vrot.slane %v1283_v26, 1  ;;  %v1353_v37 = vrot.slane %v1315_v22, 1  ;;  %v1316_v12 = vmax.f32 %v1244_v10, %v1248_v58  ;;  %v2684_v8 = vpop.f32.mrf.mxu1 }
 0x193   : > { %v1505_v1 = vmax.f32 %v1285_v42, %v1473_v55  ;;  %v1537_v11 = vrot.slane %v1286_v52, 1  ;;  %v1545_v49 = vrot.slane %v1318_v6, 1  ;;  %v1409_v35 = vrot.slane %v1284_v7, 1 }
 0x194   : > { %v1513_v44 = vmax.f32 %v1317_v21, %v1481_v59  ;;  %v1377_v18 = vmax.f32 %v1283_v26, %v1345_v62  ;;  %v1385_v5 = vmax.f32 %v1315_v22, %v1353_v37  ;;  %v1417_v43 = vrot.slane %v1316_v12, 1  ;;  %v860_v37 = vpop.f32.mrf.mxu0 }
 0x195   : > { %v1857_v46 = vrot.slane %v1505_v1, 1  ;;  %v1889_v38 = vrot.slane %v1505_v1, 2  ;;  %v1921_v47 = vrot.slane %v1505_v1, 3  ;;  %v1569_v24 = vmax.f32 %v1286_v52, %v1537_v11 }
 0x196   : > { %v1865_v3 = vrot.slane %v1513_v44, 1  ;;  %v1897_v54 = vrot.slane %v1513_v44, 2  ;;  %v1601_v48 = vrot.slane %v1377_v18, 1  ;;  %v1929_v28 = vrot.slane %v1513_v44, 3 }
 0x197   : > { %v2214_v41 = vsel %vm2091_vm3, %v1505_v1, %v1857_v46  ;;  %v1633_v2 = vrot.slane %v1377_v18, 2  ;;  %v1609_v39 = vrot.slane %v1385_v5, 1  ;;  %v1641_v32 = vrot.slane %v1385_v5, 2  ;;  %v1116_v1 = vpop.f32.mrf.mxu1 }
 0x198   : > { %v2230_v25 = vsel %vm2108_vm4, %v2214_v41, %v1889_v38  ;;  %v2222_v13 = vsel %vm2091_vm3, %v1513_v44, %v1865_v3  ;;  %v2098_v9 = vsel %vm2091_vm3, %v1377_v18, %v1601_v48  ;;  %v1665_v17 = vrot.slane %v1377_v18, 3 }
 0x199   : > { %v2246_v40 = vsel %vm2125_vm5, %v2230_v25, %v1921_v47  ;;  %v2238_v0 = vsel %vm2108_vm4, %v2222_v13, %v1897_v54  ;;  %v2115_v23 = vsel %vm2108_vm4, %v2098_v9, %v1633_v2  ;;  %v1673_v29 = vrot.slane %v1385_v5, 3  ;;  %v2685_v41 = vpop.f32.mrf.mxu1 }
 0x19a   : > { %v2254_v10 = vsel %vm2125_vm5, %v2238_v0, %v1929_v28  ;;  %v2106_v51 = vsel %vm2091_vm3, %v1385_v5, %v1609_v39  ;;  %v1969_v20 = vrot.slane %v1569_v24, 4  ;;  %v2132_v33 = vsel %vm2125_vm5, %v2115_v23, %v1665_v17 }
 0x19b   : > { %v2123_v63 = vsel %vm2108_vm4, %v2106_v51, %v1641_v32  ;;  %v2001_v30 = vrot.slane %v1569_v24, 5  ;;  %v2033_v50 = vrot.slane %v1569_v24, 6  ;;  %v2065_v34 = vrot.slane %v1569_v24, 7  ;;  %v2621_v24 = vpop.f32.mrf.mxu0  ;;  %v1119_v51 = vpop.f32.mrf.mxu1 }
 0x19c   : > { %v2262_v31 = vsel %vm2142_vm6, %v2246_v40, %v1969_v20  ;;  %v1577_v42 = vmax.f32 %v1318_v6, %v1545_v49  ;;  %v1441_v19 = vmax.f32 %v1284_v7, %v1409_v35  ;;  %v2140_v61 = vsel %vm2125_vm5, %v2123_v63, %v1673_v29 }
 0x19d   : > { %v2278_v15 = vsel %vm579_vm0, %v2262_v31, %v2001_v30  ;;  %v1449_v21 = vmax.f32 %v1316_v12, %v1417_v43  ;;  %v853_v26 = vadd.f32 %v3344_v45, %v3577_v14  ;;  %v1109_v52 = vadd.f32 %v3344_v45, %v3579_v56 }
 0x19e   : > { %v2294_v22 = vsel %vm580_vm1, %v2278_v15, %v2033_v50  ;;  %v1977_v58 = vrot.slane %v1577_v42, 4  ;;  %v2009_v55 = vrot.slane %v1577_v42, 5  ;;  %v2041_v6 = vrot.slane %v1577_v42, 6 }
 0x19f   : > { %v2310_v59 = vsel %vm2191_vm7, %v2294_v22, %v2065_v34  ;;  %v1713_v62 = vrot.slane %v1441_v19, 4  ;;  %v1745_v7 = vrot.slane %v1441_v19, 5  ;;  %v2073_v12 = vrot.slane %v1577_v42, 7 }
 0x1a0   : > { %2334 = vst.msk [vmem:[%s3022_s27 + $0x68] sm:$0xff] %vm2320_vm8, %v2310_v59  ;;  %v2270_v11 = vsel %vm2142_vm6, %v2254_v10, %v1977_v58  ;;  %v1777_v14 = vrot.slane %v1441_v19, 6  ;;  %v1721_v49 = vrot.slane %v1449_v21, 4  ;;  %v1809_v18 = vrot.slane %v1441_v19, 7 }
 0x1a1   : > { %v2286_v44 = vsel %vm579_vm0, %v2270_v11, %v2009_v55  ;;  %v2149_v56 = vsel %vm2142_vm6, %v2132_v33, %v1713_v62  ;;  %v1753_v5 = vrot.slane %v1449_v21, 5  ;;  %v1785_v38 = vrot.slane %v1449_v21, 6 }
 0x1a2   : > { %v2302_v35 = vsel %vm580_vm1, %v2286_v44, %v2041_v6  ;;  %v2165_v46 = vsel %vm579_vm0, %v2149_v56, %v1745_v7  ;;  %v2157_v47 = vsel %vm2142_vm6, %v2140_v61, %v1721_v49  ;;  %v1817_v54 = vrot.slane %v1449_v21, 7 }
 0x1a3   : > { %v2318_v43 = vsel %vm2191_vm7, %v2302_v35, %v2073_v12  ;;  %v2181_v3 = vsel %vm580_vm1, %v2165_v46, %v1777_v14  ;;  %v2173_v48 = vsel %vm579_vm0, %v2157_v47, %v1753_v5  ;;  %v845_v39 = vadd.f32 %v3344_v45, %v3591_v36 }
 0x1a4   : > { %2350 = vst.msk [vmem:[%s3022_s27 + $0xe8] sm:$0xff] %vm2320_vm8, %v2318_v43  ;;  %v2198_v28 = vsel %vm2191_vm7, %v2181_v3, %v1809_v18  ;;  %v2189_v2 = vsel %vm580_vm1, %v2173_v48, %v1785_v38  ;;  %v1101_v13 = vadd.f32 %v3344_v45, %v3593_v27  ;;  %v856_v9 = vadd.f32 %v3344_v45, %v3595_v53  ;;  %v863_v53 = vpop.f32.mrf.mxu0 }
 0x1a5   : > { %2333 = vst.msk [vmem:[%s3022_s27 + $0x60] sm:$0xff] %vm2320_vm8, %v2198_v28  ;;  %v2206_v25 = vsel %vm2191_vm7, %v2189_v2, %v1817_v54  ;;  %v1112_v32 = vadd.f32 %v3344_v45, %v3597_v4  ;;  %v1189_v40 = vmax.f32 %v853_v26, 0.0  ;;  %v1253_v0 = vmax.f32 %v1109_v52, 0.0 }
 0x1a6   : > { %2349 = vst.msk [vmem:[%s3022_s27 + $0xe0] sm:$0xff] %vm2320_vm8, %v2206_v25  ;;  %v1187_v17 = vmax.f32 %v845_v39, 0.0  ;;  %v869_v36 = vadd.f32 %v3344_v45, %v2620_v57  ;;  %v1251_v23 = vmax.f32 %v1101_v13, 0.0  ;;  %v848_v10 = vadd.f32 %v3344_v45, %v3600_v60 }
 0x1a7   : > { %v1104_v27 = vadd.f32 %v3344_v45, %v3602_v16  ;;  %v1125_v29 = vadd.f32 %v3344_v45, %v2684_v8  ;;  %v1190_v20 = vmax.f32 %v856_v9, 0.0  ;;  %v1254_v4 = vmax.f32 %v1112_v32, 0.0 }
 0x1a8   : > { %v1193_v33 = vmax.f32 %v869_v36, 0.0  ;;  %v861_v63 = vadd.f32 %v3344_v45, %v860_v37  ;;  %v1117_v50 = vadd.f32 %v3344_v45, %v1116_v1  ;;  %v872_v57 = vadd.f32 %v3344_v45, %v2621_v24 }
 0x1a9   : > { %v1257_v30 = vmax.f32 %v1125_v29, 0.0  ;;  %v1128_v34 = vadd.f32 %v3344_v45, %v2685_v41  ;;  %v864_v16 = vadd.f32 %v3344_v45, %v863_v53  ;;  %v1120_v8 = vadd.f32 %v3344_v45, %v1119_v51 }
 0x1aa   : > { %v1289_v60 = vmax.f32 %v1189_v40, %v1193_v33  ;;  %v1191_v31 = vmax.f32 %v861_v63, 0.0  ;;  %v1255_v19 = vmax.f32 %v1117_v50, 0.0  ;;  %v1194_v61 = vmax.f32 %v872_v57, 0.0 }
 0x1ab   : > { %v1321_v42 = vmax.f32 %v1253_v0, %v1257_v30  ;;  %v1258_v15 = vmax.f32 %v1128_v34, 0.0  ;;  %v1192_v22 = vmax.f32 %v864_v16, 0.0  ;;  %v1256_v58 = vmax.f32 %v1120_v8, 0.0 }
 0x1ac   : > { %v1474_v21 = vrot.slane %v1289_v60, 1  ;;  %v1287_v26 = vmax.f32 %v1187_v17, %v1191_v31  ;;  %v1188_v55 = vmax.f32 %v848_v10, 0.0  ;;  %v1319_v59 = vmax.f32 %v1251_v23, %v1255_v19 }
 0x1ad   : > { %v1482_v52 = vrot.slane %v1321_v42, 1  ;;  %v1290_v6 = vmax.f32 %v1190_v20, %v1194_v61  ;;  %v1252_v62 = vmax.f32 %v1104_v27, 0.0  ;;  %v1322_v1 = vmax.f32 %v1254_v4, %v1258_v15 }
 0x1ae   : > { %v1506_v7 = vmax.f32 %v1289_v60, %v1474_v21  ;;  %v1346_v37 = vrot.slane %v1287_v26, 1  ;;  %v1354_v11 = vrot.slane %v1319_v59, 1  ;;  %v1288_v14 = vmax.f32 %v1188_v55, %v1192_v22 }
 0x1af   : > { %v1514_v12 = vmax.f32 %v1321_v42, %v1482_v52  ;;  %v1320_v18 = vmax.f32 %v1252_v62, %v1256_v58  ;;  %v1538_v46 = vrot.slane %v1290_v6, 1  ;;  %v1546_v3 = vrot.slane %v1322_v1, 1 }
 0x1b0   : > { %v1858_v45 = vrot.slane %v1506_v7, 1  ;;  %v1890_v49 = vrot.slane %v1506_v7, 2  ;;  %v1378_v44 = vmax.f32 %v1287_v26, %v1346_v37  ;;  %v1386_v35 = vmax.f32 %v1319_v59, %v1354_v11 }
 0x1b1   : > { %v1866_v56 = vrot.slane %v1514_v12, 1  ;;  %v1898_v5 = vrot.slane %v1514_v12, 2  ;;  %v1922_v54 = vrot.slane %v1506_v7, 3  ;;  %v1930_v28 = vrot.slane %v1514_v12, 3 }
 0x1b2   : > { %v2215_v38 = vsel %vm2091_vm3, %v1506_v7, %v1858_v45  ;;  %v1602_v47 = vrot.slane %v1378_v44, 1  ;;  %v1634_v43 = vrot.slane %v1378_v44, 2  ;;  %v1610_v41 = vrot.slane %v1386_v35, 1 }
 0x1b3   : > { %v2231_v48 = vsel %vm2108_vm4, %v2215_v38, %v1890_v49  ;;  %v2223_v24 = vsel %vm2091_vm3, %v1514_v12, %v1866_v56  ;;  %v1642_v25 = vrot.slane %v1386_v35, 2  ;;  %v1666_v13 = vrot.slane %v1378_v44, 3 }
 0x1b4   : > { %v2239_v2 = vsel %vm2108_vm4, %v2223_v24, %v1898_v5  ;;  %v2099_v39 = vsel %vm2091_vm3, %v1378_v44, %v1602_v47  ;;  %v2107_v32 = vsel %vm2091_vm3, %v1386_v35, %v1610_v41  ;;  %v1570_v40 = vmax.f32 %v1290_v6, %v1538_v46 }
 0x1b5   : > { %v2116_v9 = vsel %vm2108_vm4, %v2099_v39, %v1634_v43  ;;  %v2247_v0 = vsel %vm2125_vm5, %v2231_v48, %v1922_v54  ;;  %v1578_v17 = vmax.f32 %v1322_v1, %v1546_v3  ;;  %v1410_v36 = vrot.slane %v1288_v14, 1 }
 0x1b6   : > { %v2255_v23 = vsel %vm2125_vm5, %v2239_v2, %v1930_v28  ;;  %v2133_v10 = vsel %vm2125_vm5, %v2116_v9, %v1666_v13  ;;  %v1970_v27 = vrot.slane %v1570_v40, 4  ;;  %v2002_v29 = vrot.slane %v1570_v40, 5 }
 0x1b7   : > { %v2124_v53 = vsel %vm2108_vm4, %v2107_v32, %v1642_v25  ;;  %v2034_v51 = vrot.slane %v1570_v40, 6  ;;  %v1978_v20 = vrot.slane %v1578_v17, 4  ;;  %v2010_v4 = vrot.slane %v1578_v17, 5 }
 0x1b8   : > { %v2066_v33 = vrot.slane %v1570_v40, 7  ;;  %v2263_v63 = vsel %vm2142_vm6, %v2247_v0, %v1970_v27  ;;  %v1442_v30 = vmax.f32 %v1288_v14, %v1410_v36  ;;  %v1418_v50 = vrot.slane %v1320_v18, 1 }
 0x1b9   : > { %v2279_v57 = vsel %vm579_vm0, %v2263_v63, %v2002_v29  ;;  %v2042_v34 = vrot.slane %v1578_v17, 6  ;;  %v2074_v60 = vrot.slane %v1578_v17, 7  ;;  %v2271_v31 = vsel %vm2142_vm6, %v2255_v23, %v1978_v20 }
 0x1ba   : > { %v2295_v16 = vsel %vm580_vm1, %v2279_v57, %v2034_v51  ;;  %v2287_v8 = vsel %vm579_vm0, %v2271_v31, %v2010_v4  ;;  %v1714_v42 = vrot.slane %v1442_v30, 4  ;;  %v1746_v19 = vrot.slane %v1442_v30, 5 }
 0x1bb   : > { %v1674_v61 = vrot.slane %v1386_v35, 3  ;;  %v2311_v15 = vsel %vm2191_vm7, %v2295_v16, %v2066_v33  ;;  %v2303_v21 = vsel %vm580_vm1, %v2287_v8, %v2042_v34  ;;  %v1778_v22 = vrot.slane %v1442_v30, 6 }
 0x1bc   : > { %2336 = vst.msk [vmem:[%s3022_s27 + $0x78] sm:$0xff] %vm2320_vm8, %v2311_v15  ;;  %v2319_v26 = vsel %vm2191_vm7, %v2303_v21, %v2074_v60  ;;  %v2150_v58 = vsel %vm2142_vm6, %v2133_v10, %v1714_v42  ;;  %v1450_v55 = vmax.f32 %v1320_v18, %v1418_v50  ;;  %v1810_v59 = vrot.slane %v1442_v30, 7 }
 0x1bd   : > { %v2141_v52 = vsel %vm2125_vm5, %v2124_v53, %v1674_v61  ;;  %2352 = vst.msk [vmem:[%s3022_s27 + $0xf8] sm:$0xff] %vm2320_vm8, %v2319_v26  ;;  %v2166_v6 = vsel %vm579_vm0, %v2150_v58, %v1746_v19 }
 0x1be   : > { %v2182_v62 = vsel %vm580_vm1, %v2166_v6, %v1778_v22  ;;  %v1722_v7 = vrot.slane %v1450_v55, 4  ;;  %v1754_v37 = vrot.slane %v1450_v55, 5  ;;  %v1786_v12 = vrot.slane %v1450_v55, 6 }
 0x1bf   : > { %v2199_v1 = vsel %vm2191_vm7, %v2182_v62, %v1810_v59  ;;  %v1818_v14 = vrot.slane %v1450_v55, 7 }
 0x1c0   : > { %2335 = vst.msk [vmem:[%s3022_s27 + $0x70] sm:$0xff] %vm2320_vm8, %v2199_v1  ;;  %v2158_v11 = vsel %vm2142_vm6, %v2141_v52, %v1722_v7 }
 0x1c1   : > { %v2174_v45 = vsel %vm579_vm0, %v2158_v11, %v1754_v37 }
 0x1c2   : > { %v2190_v49 = vsel %vm580_vm1, %v2174_v45, %v1786_v12 }
 0x1c3   : > { %v2207_v44 = vsel %vm2191_vm7, %v2190_v49, %v1818_v14 }
 0x1c4   : > { %2351 = vst.msk [vmem:[%s3022_s27 + $0xf0] sm:$0xff] %vm2320_vm8, %v2207_v44 }
 0x1c5 PF: > { %s13_s12 = sadd.s32 1, %s2708_s12  }
 0x1c6   : > { %p10_p4 = scmp.ge.s32.totalorder %s13_s12, 4  }
 0x1c8   :  { %12 = sbr.rel (!%p10_p4) target bundleno = 1 (0x1), region = 62 }

// kernel: net_res_deep_forward.5
= control target key start
LH: loop header
LB: loop body
LE: loop exit
PB: predicated region body
PF: predicated region fallthrough
CT: control target
= control target key end

     0   :  { %v34_v28 = vlaneseq  ;;  %v2046_v36 = vmov 1983009808   ;;  %s2501_s0 = inlined_call_operand.vmem [shape: f32[2,2048], index: 0, kind: input, shape index: {}]   ;;  %s2502_s1 = inlined_call_operand.vmem [shape: bf16[2048,32], index: 1, kind: input, shape index: {}]   ;;  %s2503_s2 = inlined_call_operand.vmem [shape: f32[1,32], index: 2, kind: input, shape index: {}]   ;;  %s2504_s3 = inlined_call_operand.vmem [shape: bf16[32,2], index: 3, kind: input, shape index: {}]   ;;  %s2505_s4 = inlined_call_operand.vmem [shape: f32[1,2], index: 4, kind: input, shape index: {}]   ;;  %s2506_s5 = inlined_call_operand.hbm [shape: f32[2,2], index: 5, kind: output, shape index: {}]  }
   0x1   :  { %v1890_v0 = vld [vmem:[%s2502_s1 + $0x78] sm:$0xff]   ;;  %v1894_v4 = vld [vmem:[%s2502_s1 + $0x70] sm:$0xff]   ;;  %v1898_v8 = vld [vmem:[%s2502_s1 + $0x68] sm:$0xff]   ;;  %v32_v37 = vunpack.c.l.s4 %v2046_v36 }
   0x2   :  { %v1891_v1 = vld [vmem:[%s2502_s1 + $0xf8] sm:$0xff]   ;;  %1699 = vmatprep.subr.bf16.mxu0 %v1890_v0  ;;  %v1895_v5 = vld [vmem:[%s2502_s1 + $0xf0] sm:$0xff]   ;;  %v1899_v9 = vld [vmem:[%s2502_s1 + $0xe8] sm:$0xff]   ;;  %v35_v33 = vshrl.u32 %v34_v28, 7 }
   0x3   :  { %v1892_v2 = vld [vmem:[%s2502_s1 + $0x38] sm:$0xff]   ;;  %1721 = vmatprep.subr.bf16.mxu1 %v1891_v1  ;;  %v1896_v6 = vld [vmem:[%s2502_s1 + $0x30] sm:$0xff]   ;;  %v1900_v10 = vld [vmem:[%s2502_s1 + $0x28] sm:$0xff]   ;;  %v33_v39 = vunpack.c.0.s8 %v32_v37 }
   0x4   :  { %v1893_v3 = vld [vmem:[%s2502_s1 + $0xb8] sm:$0xff]   ;;  %1700 = vmatpush3.bf16.msra.mxu0 %v1892_v2  ;;  %v1897_v7 = vld [vmem:[%s2502_s1 + $0xb0] sm:$0xff]   ;;  %v1901_v11 = vld [vmem:[%s2502_s1 + $0xa8] sm:$0xff]  }
   0x5   :  { %1722 = vmatpush3.bf16.msra.mxu1 %v1893_v3  ;;  %1701 = vmatprep.subr.bf16.mxu0 %v1894_v4  ;;  %v1902_v12 = vld [vmem:[%s2502_s1 + $0x60] sm:$0xff]   ;;  %v1906_v16 = vld [vmem:[%s2502_s1 + $0x58] sm:$0xff]   ;;  %v1910_v20 = vld [vmem:[%s2502_s1 + $0x50] sm:$0xff]   ;;  %v2185_v41 = vsub.s32 %v33_v39, %v35_v33 }
   0x6   :  { %1723 = vmatprep.subr.bf16.mxu1 %v1895_v5  ;;  %v1903_v13 = vld [vmem:[%s2502_s1 + $0xe0] sm:$0xff]   ;;  %v1907_v17 = vld [vmem:[%s2502_s1 + $0xd8] sm:$0xff]   ;;  %v1911_v21 = vld [vmem:[%s2502_s1 + $0xd0] sm:$0xff]  }
   0x7   :  { %v1904_v14 = vld [vmem:[%s2502_s1 + $0x20] sm:$0xff]   ;;  %v1908_v18 = vld [vmem:[%s2502_s1 + $0x18] sm:$0xff]   ;;  %v1912_v22 = vld [vmem:[%s2502_s1 + $0x10] sm:$0xff]  }
   0x8   :  { %1702 = vmatpush3.bf16.msra.mxu0 %v1896_v6  ;;  %v1905_v15 = vld [vmem:[%s2502_s1 + $0xa0] sm:$0xff]   ;;  %v1909_v19 = vld [vmem:[%s2502_s1 + $0x98] sm:$0xff]   ;;  %v1913_v23 = vld [vmem:[%s2502_s1 + $0x90] sm:$0xff]  }
   0x9   :  { %1724 = vmatpush3.bf16.msra.mxu1 %v1897_v7  ;;  %1703 = vmatprep.subr.bf16.mxu0 %v1898_v8  ;;  %v1914_v24 = vld [vmem:[%s2502_s1 + $0x48] sm:$0xff]   ;;  %v1918_v29 = vld [vmem:[%s2502_s1 + $0x40] sm:$0xff]   ;;  %v1923_v35 = vld [vmem:[%s2502_s1 + $0x178] sm:$0xff]  }
   0xa   :  { %1725 = vmatprep.subr.bf16.mxu1 %v1899_v9  ;;  %v1915_v25 = vld [vmem:[%s2502_s1 + $0xc8] sm:$0xff]   ;;  %v1919_v30 = vld [vmem:[%s2502_s1 + $0xc0] sm:$0xff]   ;;  %v1924_v38 = vld [vmem:[%s2502_s1 + $0x1f8] sm:$0xff]  }
   0xb   :  { %v1916_v26 = vld [vmem:[%s2502_s1 + $0x8] sm:$0xff]   ;;  %v1920_v31 = vld [vmem:[%s2502_s1] sm:$0xff]   ;;  %v1925_v46 = vld [vmem:[%s2502_s1 + $0x138] sm:$0xff]  }
   0xc   :  { %1704 = vmatpush3.bf16.msra.mxu0 %v1900_v10  ;;  %v1917_v27 = vld [vmem:[%s2502_s1 + $0x88] sm:$0xff]   ;;  %v1921_v32 = vld [vmem:[%s2502_s1 + $0x80] sm:$0xff]   ;;  %v1926_v49 = vld [vmem:[%s2502_s1 + $0x1b8] sm:$0xff]  }
   0xd   :  { %1726 = vmatpush3.bf16.msra.mxu1 %v1901_v11  ;;  %1705 = vmatprep.subr.bf16.mxu0 %v1902_v12  ;;  %v22_v34 = vld [vmem:[%s2501_s0] sm:$0xff]  ;;  %v1927_v52 = vld [vmem:[%s2502_s1 + $0x170] sm:$0xff]   ;;  %v1931_v56 = vld [vmem:[%s2502_s1 + $0x168] sm:$0xff]  }
   0xe   :  { %1727 = vmatprep.subr.bf16.mxu1 %v1903_v13  ;;  %v30_v40 = vcombine.high %v22_v34, %v22_v34  ;;  %v37_v42 = vrot.slane %v22_v34, %v2185_v41  ;;  %v1928_v53 = vld [vmem:[%s2502_s1 + $0x1f0] sm:$0xff]   ;;  %v1932_v57 = vld [vmem:[%s2502_s1 + $0x1e8] sm:$0xff]   ;;  %v1935_v60 = vld [vmem:[%s2502_s1 + $0x160] sm:$0xff]  }
   0xf   :  { %v1929_v54 = vld [vmem:[%s2502_s1 + $0x130] sm:$0xff]   ;;  %v1933_v58 = vld [vmem:[%s2502_s1 + $0x128] sm:$0xff]   ;;  %v1936_v61 = vld [vmem:[%s2502_s1 + $0x1e0] sm:$0xff]  }
  0x10   :  { %1706 = vmatpush3.bf16.msra.mxu0 %v1904_v14  ;;  %v44_v43 = vrot.slane %v30_v40, %v2185_v41  ;;  %v45_v44 = vcombine.high %v37_v42, %v37_v42  ;;  %v114_v47 = vpack.c.bf16 %v37_v42, %v37_v42  ;;  %v1930_v55 = vld [vmem:[%s2502_s1 + $0x1b0] sm:$0xff]   ;;  %v1934_v59 = vld [vmem:[%s2502_s1 + $0x1a8] sm:$0xff]   ;;  %v1937_v62 = vld [vmem:[%s2502_s1 + $0x120] sm:$0xff]  }
  0x11   :  { %1728 = vmatpush3.bf16.msra.mxu1 %v1905_v15  ;;  %1707 = vmatprep.subr.bf16.mxu0 %v1906_v16  ;;  %v1938_v63 = vld [vmem:[%s2502_s1 + $0x1a0] sm:$0xff]   ;;  %v1939_v0 = vld [vmem:[%s2502_s1 + $0x158] sm:$0xff]   ;;  %v1943_v4 = vld [vmem:[%s2502_s1 + $0x150] sm:$0xff]  }
  0x12   :  { %1729 = vmatprep.subr.bf16.mxu1 %v1907_v17  ;;  %v46_v45 = vcombine.high %v44_v43, %v44_v43  ;;  %v116_v48 = vpack.c.bf16 %v44_v43, %v44_v43  ;;  %v115_v50 = vpack.c.bf16 %v45_v44, %v45_v44  ;;  %v1940_v1 = vld [vmem:[%s2502_s1 + $0x1d8] sm:$0xff]   ;;  %v1944_v5 = vld [vmem:[%s2502_s1 + $0x1d0] sm:$0xff]   ;;  %v1947_v8 = vld [vmem:[%s2502_s1 + $0x148] sm:$0xff]  }
  0x13   :  { %v1941_v2 = vld [vmem:[%s2502_s1 + $0x118] sm:$0xff]   ;;  %v1945_v6 = vld [vmem:[%s2502_s1 + $0x110] sm:$0xff]   ;;  %v1948_v9 = vld [vmem:[%s2502_s1 + $0x1c8] sm:$0xff]  }
  0x14   :  { %1708 = vmatpush3.bf16.msra.mxu0 %v1908_v18  ;;  %v117_v51 = vpack.c.bf16 %v46_v45, %v46_v45  ;;  %1193 = vmatprep.mubr.bf16.mxu0 %v115_v50  ;;  %v1942_v3 = vld [vmem:[%s2502_s1 + $0x198] sm:$0xff]   ;;  %v1946_v7 = vld [vmem:[%s2502_s1 + $0x190] sm:$0xff]   ;;  %v23_v10 = vld [vmem:[%s2501_s0 + $0x8] sm:$0xff] }
  0x15   :  { %1730 = vmatpush3.bf16.msra.mxu1 %v1909_v19  ;;  %1709 = vmatprep.subr.bf16.mxu0 %v1910_v20  ;;  %v1949_v11 = vld [vmem:[%s2502_s1 + $0x108] sm:$0xff]   ;;  %v54_v12 = vrot.slane %v23_v10, %v2185_v41  ;;  %v47_v13 = vcombine.high %v23_v10, %v23_v10  ;;  %v1951_v15 = vld [vmem:[%s2502_s1 + $0x140] sm:$0xff]   ;;  %v1963_v33 = vld [vmem:[%s2502_s1 + $0x2b0] sm:$0xff]  }
  0x16   :  { %1731 = vmatprep.subr.bf16.mxu1 %v1911_v21  ;;  %1233 = vmatprep.mubr.bf16.mxu1 %v117_v51  ;;  %v1950_v14 = vld [vmem:[%s2502_s1 + $0x188] sm:$0xff]   ;;  %v1952_v18 = vld [vmem:[%s2502_s1 + $0x1c0] sm:$0xff]   ;;  %v1972_v43 = vld [vmem:[%s2502_s1 + $0x258] sm:$0xff]  }
  0x17   :  { %v62_v16 = vcombine.high %v54_v12, %v54_v12  ;;  %v61_v17 = vrot.slane %v47_v13, %v2185_v41  ;;  %v1953_v19 = vld [vmem:[%s2502_s1 + $0x100] sm:$0xff]   ;;  %v1964_v34 = vld [vmem:[%s2502_s1 + $0x268] sm:$0xff]   ;;  %v1973_v44 = vld [vmem:[%s2502_s1 + $0x2d8] sm:$0xff]  }
  0x18   :  { %1710 = vmatpush3.bf16.msra.mxu0 %v1912_v22  ;;  %v1954_v22 = vld [vmem:[%s2502_s1 + $0x180] sm:$0xff]   ;;  %v1966_v36 = vld [vmem:[%s2502_s1 + $0x228] sm:$0xff]   ;;  %v1974_v45 = vld [vmem:[%s2502_s1 + $0x218] sm:$0xff]  }
  0x19   :  { %1732 = vmatpush3.bf16.msra.mxu1 %v1913_v23  ;;  %1711 = vmatprep.subr.bf16.mxu0 %v1914_v24  ;;  %v119_v20 = vpack.c.bf16 %v62_v16, %v62_v16  ;;  %v63_v21 = vcombine.high %v61_v17, %v61_v17  ;;  %v1956_v24 = vld [vmem:[%s2502_s1 + $0x278] sm:$0xff]   ;;  %v120_v28 = vpack.c.bf16 %v61_v17, %v61_v17  ;;  %v1967_v37 = vld [vmem:[%s2502_s1 + $0x2a8] sm:$0xff]   ;;  %v1969_v39 = vld [vmem:[%s2502_s1 + $0x2e0] sm:$0xff]  }
  0x1a   :  { %1733 = vmatprep.subr.bf16.mxu1 %v1915_v25  ;;  %v1957_v25 = vld [vmem:[%s2502_s1 + $0x2f8] sm:$0xff]   ;;  %v1970_v40 = vld [vmem:[%s2502_s1 + $0x220] sm:$0xff]   ;;  %v1979_v50 = vld [vmem:[%s2502_s1 + $0x290] sm:$0xff]  }
  0x1b   :  { %v121_v23 = vpack.c.bf16 %v63_v21, %v63_v21  ;;  %v1971_v42 = vld [vmem:[%s2502_s1 + $0x2a0] sm:$0xff]   ;;  %v1980_v51 = vld [vmem:[%s2502_s1 + $0x248] sm:$0xff]   ;;  %v1994_v10 = vld [vmem:[%s2502_s1 + $0x3f0] sm:$0xff]  }
  0x1c   :  { %1712 = vmatpush3.bf16.msra.mxu0 %v1916_v26  ;;  %v1958_v26 = vld [vmem:[%s2502_s1 + $0x238] sm:$0xff]   ;;  %v1997_v13 = vld [vmem:[%s2502_s1 + $0x368] sm:$0xff]   ;;  %v2001_v17 = vld [vmem:[%s2502_s1 + $0x360] sm:$0xff]  }
  0x1d   :  { %1734 = vmatpush3.bf16.msra.mxu1 %v1917_v27  ;;  %1713 = vmatprep.subr.bf16.mxu0 %v1918_v29  ;;  %v118_v27 = vpack.c.bf16 %v54_v12, %v54_v12  ;;  %v1959_v29 = vld [vmem:[%s2502_s1 + $0x2b8] sm:$0xff]   ;;  %v1996_v12 = vld [vmem:[%s2502_s1 + $0x3b0] sm:$0xff]   ;;  %v2000_v16 = vld [vmem:[%s2502_s1 + $0x3a8] sm:$0xff]  }
  0x1e   :  { %1735 = vmatprep.subr.bf16.mxu1 %v1919_v30  ;;  %v1960_v30 = vld [vmem:[%s2502_s1 + $0x270] sm:$0xff]   ;;  %v2005_v21 = vld [vmem:[%s2502_s1 + $0x358] sm:$0xff]  }
  0x20   :  { %1714 = vmatpush3.bf16.msra.mxu0 %v1920_v31  ;;  %v1961_v31 = vld [vmem:[%s2502_s1 + $0x2f0] sm:$0xff]  }
  0x21   :  { %1736 = vmatpush3.bf16.msra.mxu1 %v1921_v32  ;;  %1743 = vmatprep.subr.bf16.mxu0 %v1923_v35  ;;  %v1962_v32 = vld [vmem:[%s2502_s1 + $0x230] sm:$0xff]   ;;  %v1965_v35 = vld [vmem:[%s2502_s1 + $0x2e8] sm:$0xff]  }
  0x22   :  { %1765 = vmatprep.subr.bf16.mxu1 %v1924_v38  ;;  %v1968_v38 = vld [vmem:[%s2502_s1 + $0x260] sm:$0xff]  }
  0x23   :  { %1194 = vmatmul.mubr.bf16.vlgmr.msra.gmra.mxu0 %v114_v47  ;;  %v1976_v47 = vld [vmem:[%s2502_s1 + $0x250] sm:$0xff]  }
  0x24   :  { %1234 = vmatmul.mubr.bf16.vlgmr.msra.gmra.mxu1 %v116_v48  ;;  %1744 = vmatpush3.bf16.msra.mxu0 %v1925_v46  ;;  %v1975_v46 = vld [vmem:[%s2502_s1 + $0x298] sm:$0xff]   ;;  %v1977_v48 = vld [vmem:[%s2502_s1 + $0x2d0] sm:$0xff]  }
  0x25   :  { %1766 = vmatpush3.bf16.msra.mxu1 %v1926_v49  ;;  %1745 = vmatprep.subr.bf16.mxu0 %v1927_v52  ;;  %v1978_v49 = vld [vmem:[%s2502_s1 + $0x210] sm:$0xff]   ;;  %v1981_v52 = vld [vmem:[%s2502_s1 + $0x2c8] sm:$0xff]  }
  0x26   :  { %1767 = vmatprep.subr.bf16.mxu1 %v1928_v53  ;;  %1273 = vmatprep.mubr.bf16.mxu0 %v119_v20  ;;  %v24_v53 = vld [vmem:[%s2501_s0 + $0x10] sm:$0xff]  ;;  %v2004_v20 = vld [vmem:[%s2502_s1 + $0x3a0] sm:$0xff]  }
  0x27   :  { %1313 = vmatprep.mubr.bf16.mxu1 %v121_v23  ;;  %v2007_v23 = vld [vmem:[%s2502_s1 + $0x318] sm:$0xff]  }
  0x28   :  { %1746 = vmatpush3.bf16.msra.mxu0 %v1929_v54  ;;  %v1982_v54 = vld [vmem:[%s2502_s1 + $0x208] sm:$0xff]  }
  0x29   :  { %1768 = vmatpush3.bf16.msra.mxu1 %v1930_v55  ;;  %1747 = vmatprep.subr.bf16.mxu0 %v1931_v56  ;;  %v71_v55 = vrot.slane %v24_v53, %v2185_v41  ;;  %v64_v56 = vcombine.high %v24_v53, %v24_v53 }
  0x2a   :  { %1769 = vmatprep.subr.bf16.mxu1 %v1932_v57  ;;  %v1983_v57 = vld [vmem:[%s2502_s1 + $0x288] sm:$0xff]  }
  0x2c   :  { %1748 = vmatpush3.bf16.msra.mxu0 %v1933_v58  ;;  %v1984_v58 = vld [vmem:[%s2502_s1 + $0x240] sm:$0xff]  }
  0x2d   :  { %1770 = vmatpush3.bf16.msra.mxu1 %v1934_v59  ;;  %1749 = vmatprep.subr.bf16.mxu0 %v1935_v60  ;;  %v79_v59 = vcombine.high %v71_v55, %v71_v55  ;;  %v78_v60 = vrot.slane %v64_v56, %v2185_v41 }
  0x2e   :  { %1771 = vmatprep.subr.bf16.mxu1 %v1936_v61  ;;  %v1985_v61 = vld [vmem:[%s2502_s1 + $0x2c0] sm:$0xff]  }
  0x30   :  { %1750 = vmatpush3.bf16.msra.mxu0 %v1937_v62  ;;  %v1986_v62 = vld [vmem:[%s2502_s1 + $0x200] sm:$0xff]  }
  0x31   :  { %1772 = vmatpush3.bf16.msra.mxu1 %v1938_v63  ;;  %1751 = vmatprep.subr.bf16.mxu0 %v1939_v0  ;;  %v123_v63 = vpack.c.bf16 %v79_v59, %v79_v59  ;;  %v80_v0 = vcombine.high %v78_v60, %v78_v60 }
  0x32   :  { %1773 = vmatprep.subr.bf16.mxu1 %v1940_v1  ;;  %v1987_v1 = vld [vmem:[%s2502_s1 + $0x280] sm:$0xff]  }
  0x34   :  { %1752 = vmatpush3.bf16.msra.mxu0 %v1941_v2  ;;  %v125_v2 = vpack.c.bf16 %v80_v0, %v80_v0 }
  0x35   :  { %1774 = vmatpush3.bf16.msra.mxu1 %v1942_v3  ;;  %1753 = vmatprep.subr.bf16.mxu0 %v1943_v4  ;;  %v1989_v3 = vld [vmem:[%s2502_s1 + $0x378] sm:$0xff]  }
  0x36   :  { %1775 = vmatprep.subr.bf16.mxu1 %v1944_v5  ;;  %v1990_v4 = vld [vmem:[%s2502_s1 + $0x3f8] sm:$0xff]  }
  0x37   :  { %v1991_v5 = vld [vmem:[%s2502_s1 + $0x338] sm:$0xff]  }
  0x38   :  { %1754 = vmatpush3.bf16.msra.mxu0 %v1945_v6  ;;  %v122_v6 = vpack.c.bf16 %v71_v55, %v71_v55 }
  0x39   :  { %1776 = vmatpush3.bf16.msra.mxu1 %v1946_v7  ;;  %1755 = vmatprep.subr.bf16.mxu0 %v1947_v8  ;;  %v124_v7 = vpack.c.bf16 %v78_v60, %v78_v60  ;;  %v1992_v8 = vld [vmem:[%s2502_s1 + $0x3b8] sm:$0xff]  }
  0x3a   :  { %1777 = vmatprep.subr.bf16.mxu1 %v1948_v9  ;;  %v1993_v9 = vld [vmem:[%s2502_s1 + $0x370] sm:$0xff]  }
  0x3c   :  { %1756 = vmatpush3.bf16.msra.mxu0 %v1949_v11  ;;  %v1995_v11 = vld [vmem:[%s2502_s1 + $0x330] sm:$0xff]  }
  0x3d   :  { %1778 = vmatpush3.bf16.msra.mxu1 %v1950_v14  ;;  %1757 = vmatprep.subr.bf16.mxu0 %v1951_v15  ;;  %v1998_v14 = vld [vmem:[%s2502_s1 + $0x3e8] sm:$0xff]  }
  0x3e   :  { %1779 = vmatprep.subr.bf16.mxu1 %v1952_v18  ;;  %v1999_v15 = vld [vmem:[%s2502_s1 + $0x328] sm:$0xff]   ;;  %v2002_v18 = vld [vmem:[%s2502_s1 + $0x3e0] sm:$0xff]  }
  0x40   :  { %1758 = vmatpush3.bf16.msra.mxu0 %v1953_v19  ;;  %v2003_v19 = vld [vmem:[%s2502_s1 + $0x320] sm:$0xff]  }
  0x41   :  { %1780 = vmatpush3.bf16.msra.mxu1 %v1954_v22  ;;  %1787 = vmatprep.subr.bf16.mxu0 %v1956_v24  ;;  %v2006_v22 = vld [vmem:[%s2502_s1 + $0x3d8] sm:$0xff]  }
  0x42   :  { %1809 = vmatprep.subr.bf16.mxu1 %v1957_v25  ;;  %v2008_v24 = vld [vmem:[%s2502_s1 + $0x398] sm:$0xff]   ;;  %v2009_v25 = vld [vmem:[%s2502_s1 + $0x350] sm:$0xff]  }
  0x43   :  { %1274 = vmatmul.mubr.bf16.vlgmr.msra.gmra.mxu0 %v118_v27  ;;  %v2011_v27 = vld [vmem:[%s2502_s1 + $0x310] sm:$0xff]  }
  0x44   :  { %1314 = vmatmul.mubr.bf16.vlgmr.msra.gmra.mxu1 %v120_v28  ;;  %1788 = vmatpush3.bf16.msra.mxu0 %v1958_v26  ;;  %v2010_v26 = vld [vmem:[%s2502_s1 + $0x3d0] sm:$0xff]  }
  0x45   :  { %1810 = vmatpush3.bf16.msra.mxu1 %v1959_v29  ;;  %1789 = vmatprep.subr.bf16.mxu0 %v1960_v30  ;;  %v2012_v28 = vld [vmem:[%s2502_s1 + $0x390] sm:$0xff]   ;;  %v2013_v29 = vld [vmem:[%s2502_s1 + $0x348] sm:$0xff]  }
  0x46   :  { %1811 = vmatprep.subr.bf16.mxu1 %v1961_v31  ;;  %1353 = vmatprep.mubr.bf16.mxu0 %v123_v63  ;;  %v2014_v30 = vld [vmem:[%s2502_s1 + $0x3c8] sm:$0xff]   ;;  %v25_v31 = vld [vmem:[%s2501_s0 + $0x18] sm:$0xff] }
  0x47   :  { %1393 = vmatprep.mubr.bf16.mxu1 %v125_v2 }
  0x48   :  { %1790 = vmatpush3.bf16.msra.mxu0 %v1962_v32  ;;  %v88_v32 = vrot.slane %v25_v31, %v2185_v41 }
  0x49   :  { %1812 = vmatpush3.bf16.msra.mxu1 %v1963_v33  ;;  %1791 = vmatprep.subr.bf16.mxu0 %v1964_v34  ;;  %v81_v33 = vcombine.high %v25_v31, %v25_v31  ;;  %v2015_v34 = vld [vmem:[%s2502_s1 + $0x308] sm:$0xff]  }
  0x4a   :  { %1813 = vmatprep.subr.bf16.mxu1 %v1965_v35  ;;  %v2016_v35 = vld [vmem:[%s2502_s1 + $0x388] sm:$0xff]  }
  0x4c   :  { %1792 = vmatpush3.bf16.msra.mxu0 %v1966_v36 }
  0x4d   :  { %1814 = vmatpush3.bf16.msra.mxu1 %v1967_v37  ;;  %1793 = vmatprep.subr.bf16.mxu0 %v1968_v38 }
  0x4e   :  { %1815 = vmatprep.subr.bf16.mxu1 %v1969_v39 }
  0x50   :  { %1794 = vmatpush3.bf16.msra.mxu0 %v1970_v40 }
  0x51   :  { %1816 = vmatpush3.bf16.msra.mxu1 %v1971_v42  ;;  %1795 = vmatprep.subr.bf16.mxu0 %v1972_v43 }
  0x52   :  { %1817 = vmatprep.subr.bf16.mxu1 %v1973_v44 }
  0x54   :  { %1796 = vmatpush3.bf16.msra.mxu0 %v1974_v45 }
  0x55   :  { %1818 = vmatpush3.bf16.msra.mxu1 %v1975_v46  ;;  %1797 = vmatprep.subr.bf16.mxu0 %v1976_v47 }
  0x56   :  { %1819 = vmatprep.subr.bf16.mxu1 %v1977_v48 }
  0x58   :  { %1798 = vmatpush3.bf16.msra.mxu0 %v1978_v49 }
  0x59   :  { %1820 = vmatpush3.bf16.msra.mxu1 %v1979_v50  ;;  %1799 = vmatprep.subr.bf16.mxu0 %v1980_v51 }
  0x5a   :  { %1821 = vmatprep.subr.bf16.mxu1 %v1981_v52 }
  0x5c   :  { %1800 = vmatpush3.bf16.msra.mxu0 %v1982_v54 }
  0x5d   :  { %1822 = vmatpush3.bf16.msra.mxu1 %v1983_v57  ;;  %1801 = vmatprep.subr.bf16.mxu0 %v1984_v58 }
  0x5e   :  { %1823 = vmatprep.subr.bf16.mxu1 %v1985_v61 }
  0x60   :  { %1802 = vmatpush3.bf16.msra.mxu0 %v1986_v62 }
  0x61   :  { %1824 = vmatpush3.bf16.msra.mxu1 %v1987_v1  ;;  %1831 = vmatprep.subr.bf16.mxu0 %v1989_v3 }
  0x62   :  { %1853 = vmatprep.subr.bf16.mxu1 %v1990_v4 }
  0x63   :  { %1354 = vmatmul.mubr.bf16.vlgmr.msra.gmra.mxu0 %v122_v6 }
  0x64   :  { %1394 = vmatmul.mubr.bf16.vlgmr.msra.gmra.mxu1 %v124_v7  ;;  %1832 = vmatpush3.bf16.msra.mxu0 %v1991_v5 }
  0x65   :  { %1854 = vmatpush3.bf16.msra.mxu1 %v1992_v8  ;;  %1833 = vmatprep.subr.bf16.mxu0 %v1993_v9 }
  0x66   :  { %1855 = vmatprep.subr.bf16.mxu1 %v1994_v10 }
  0x68   :  { %1834 = vmatpush3.bf16.msra.mxu0 %v1995_v11 }
  0x69   :  { %1856 = vmatpush3.bf16.msra.mxu1 %v1996_v12  ;;  %1835 = vmatprep.subr.bf16.mxu0 %v1997_v13 }
  0x6a   :  { %1857 = vmatprep.subr.bf16.mxu1 %v1998_v14 }
  0x6c   :  { %1836 = vmatpush3.bf16.msra.mxu0 %v1999_v15 }
  0x6d   :  { %1858 = vmatpush3.bf16.msra.mxu1 %v2000_v16  ;;  %1837 = vmatprep.subr.bf16.mxu0 %v2001_v17 }
  0x6e   :  { %1859 = vmatprep.subr.bf16.mxu1 %v2002_v18 }
  0x70   :  { %1838 = vmatpush3.bf16.msra.mxu0 %v2003_v19 }
  0x71   :  { %1860 = vmatpush3.bf16.msra.mxu1 %v2004_v20  ;;  %1839 = vmatprep.subr.bf16.mxu0 %v2005_v21 }
  0x72   :  { %1861 = vmatprep.subr.bf16.mxu1 %v2006_v22 }
  0x74   :  { %1840 = vmatpush3.bf16.msra.mxu0 %v2007_v23 }
  0x75   :  { %1862 = vmatpush3.bf16.msra.mxu1 %v2008_v24  ;;  %1841 = vmatprep.subr.bf16.mxu0 %v2009_v25 }
  0x76   :  { %1863 = vmatprep.subr.bf16.mxu1 %v2010_v26 }
  0x78   :  { %1842 = vmatpush3.bf16.msra.mxu0 %v2011_v27 }
  0x79   :  { %1864 = vmatpush3.bf16.msra.mxu1 %v2012_v28 }
  0x7a   :  { %10 = vsyncpa [#allocation3], 0  ;;  %1843 = vmatprep.subr.bf16.mxu0 %v2013_v29  ;;  %1865 = vmatprep.subr.bf16.mxu1 %v2014_v30  ;;  %v2017_v36 = vld [vmem:[%s2502_s1 + $0x340] sm:$0xff]   ;;  %v96_v38 = vcombine.high %v88_v32, %v88_v32  ;;  %v95_v39 = vrot.slane %v81_v33, %v2185_v41  ;;  %v126_v46 = vpack.c.bf16 %v88_v32, %v88_v32  ;;  %v2022_v41 = vld [vmem:[%s2504_s3 + $0x8] sm:$0xff]   ;;  %v2047_v48 = vmov 0.0   ;;  %s2049_s11 = smov [#allocation2]  }
  0x7b   :  { %v2018_v37 = vld [vmem:[%s2502_s1 + $0x3c0] sm:$0xff]   ;;  %vm2048_vm0 = vmmov 0   ;;  %vm1506_vm1 = vcmask 261120   ;;  %s1558_s12 = sshll.u32 %s2049_s11, 4  ;;  %vm1550_vm2 = vcmask 9216   ;;  %s1559_s12 = int_to_ptr.vmem [resolvable:$true] %s1558_s12 }
  0x7c   :  { %v127_v40 = vpack.c.bf16 %v96_v38, %v96_v38  ;;  %v97_v42 = vcombine.high %v95_v39, %v95_v39  ;;  %1844 = vmatpush3.bf16.msra.mxu0 %v2015_v34  ;;  %v2019_v43 = vld [vmem:[%s2502_s1 + $0x300] sm:$0xff]   ;;  %v128_v47 = vpack.c.bf16 %v95_v39, %v95_v39  ;;  %s2024_s13 = scalar_lea.vmem %s1559_s12, 32  ;;  %p2029_p1 = scmp.lt.s32.totalorder %s1559_s12, %s1559_s12 }
  0x7d   :  { %1866 = vmatpush3.bf16.msra.mxu1 %v2016_v35  ;;  %v2020_v44 = vld [vmem:[%s2502_s1 + $0x380] sm:$0xff]   ;;  %1845 = vmatprep.subr.bf16.mxu0 %v2017_v36  ;;  %p2025_p0 = scmp.ne.s32.totalorder %s1559_s12, %s2024_s13  ;;  %p2030_p2 = scmp.lt.s32.totalorder %s2024_s13, %s2024_s13 }
  0x7e   :  { %1867 = vmatprep.subr.bf16.mxu1 %v2018_v37  ;;  %v129_v45 = vpack.c.bf16 %v97_v42, %v97_v42  ;;  %1433 = vmatprep.mubr.bf16.mxu0 %v127_v40  ;;  %v2023_v49 = vld [vmem:[%s2504_s3] sm:$0xff]  }
  0x7f   :  { %v1566_v52 = vld [vmem:[%s2503_s2] ss:$0 sm:$0xff]  ;;  %p2031_p3 = por %p2030_p2, %p2029_p1 }
  0x80   :  { %1473 = vmatprep.mubr.bf16.mxu1 %v129_v45  ;;  %1846 = vmatpush3.bf16.msra.mxu0 %v2019_v43  ;;  %v1695_v37 = vld [vmem:[%s2505_s4] ss:$0 sm:$0xff] }
  0x81   :  { %1868 = vmatpush3.bf16.msra.mxu1 %v2020_v44  ;;  %1878 = vmatprep.subr.bf16.mxu0 %v2047_v48  ;;  %p2032_p4 = pnand %p2031_p3, %p2025_p0 }
  0x83   :  { %1434 = vmatmul.mubr.bf16.vlgmr.msra.gmra.mxu0 %v126_v46 }
  0x84   :  { %1474 = vmatmul.mubr.bf16.vlgmr.msra.gmra.mxu1 %v128_v47  ;;  %1879 = vmatpush3.bf16.msra.mxu0 %v2022_v41 }
  0x85   :  { %1880 = vmatprep.subr.bf16.mxu0 %v2047_v48  ;;  %1882 = vmatprep.mubr.msk.bf16.mxu0 %vm2048_vm0, %v2047_v48 }
  0x88   :  { %1881 = vmatpush3.bf16.msra.mxu0 %v2023_v49 }
  0xe3   :  { %v1715_v50 = vpop.f32.mrf.mxu0 }
  0xe4   :  { %v1737_v51 = vpop.f32.mrf.mxu1 }
  0xe5   :  { %v1716_v53 = vpop.f32.mrf.mxu0 }
  0xe6   :  { %v1738_v54 = vpop.f32.mrf.mxu1  ;;  %v1717_v55 = vadd.f32 %v1716_v53, %v1715_v50 }
  0xe7   :  { %v1739_v56 = vadd.f32 %v1738_v54, %v1737_v51  ;;  %v1718_v57 = vpop.f32.mrf.mxu0 }
  0xe8   :  { %v1740_v58 = vpop.f32.mrf.mxu1  ;;  %v1196_v59 = vadd.f32 %v1717_v55, %v1566_v52 }
  0xe9   :  { %v1719_v60 = vpop.f32.mrf.mxu0 }
  0xea   :  { %v1741_v61 = vpop.f32.mrf.mxu1  ;;  %v1236_v62 = vadd.f32 %v1739_v56, %v1196_v59 }
 0x103   :  { %v1759_v63 = vpop.f32.mrf.mxu0 }
 0x104   :  { %v1781_v0 = vpop.f32.mrf.mxu1 }
 0x105   :  { %v1760_v1 = vpop.f32.mrf.mxu0 }
 0x106   :  { %v1782_v2 = vpop.f32.mrf.mxu1  ;;  %v1761_v15 = vadd.f32 %v1760_v1, %v1759_v63 }
 0x107   :  { %v1762_v3 = vpop.f32.mrf.mxu0  ;;  %v1783_v17 = vadd.f32 %v1782_v2, %v1781_v0 }
 0x108   :  { %v1784_v4 = vpop.f32.mrf.mxu1  ;;  %v1276_v16 = vadd.f32 %v1761_v15, %v1236_v62 }
 0x109   :  { %v1763_v5 = vpop.f32.mrf.mxu0 }
 0x10a   :  { %v1785_v6 = vpop.f32.mrf.mxu1  ;;  %v1316_v19 = vadd.f32 %v1783_v17, %v1276_v16 }
 0x123   :  { %v1803_v7 = vpop.f32.mrf.mxu0 }
 0x124   :  { %v1825_v8 = vpop.f32.mrf.mxu1 }
 0x125   :  { %v1804_v9 = vpop.f32.mrf.mxu0 }
 0x126   :  { %v1826_v10 = vpop.f32.mrf.mxu1  ;;  %v1805_v18 = vadd.f32 %v1804_v9, %v1803_v7 }
 0x127   :  { %v1806_v11 = vpop.f32.mrf.mxu0  ;;  %v1827_v21 = vadd.f32 %v1826_v10, %v1825_v8 }
 0x128   :  { %v1828_v12 = vpop.f32.mrf.mxu1  ;;  %v1356_v20 = vadd.f32 %v1805_v18, %v1316_v19 }
 0x129   :  { %v1807_v13 = vpop.f32.mrf.mxu0 }
 0x12a   :  { %v1829_v14 = vpop.f32.mrf.mxu1  ;;  %v1396_v26 = vadd.f32 %v1827_v21, %v1356_v20 }
 0x143   :  { %v1847_v22 = vpop.f32.mrf.mxu0 }
 0x144   :  { %v1869_v23 = vpop.f32.mrf.mxu1 }
 0x145   :  { %v1848_v24 = vpop.f32.mrf.mxu0 }
 0x146   :  { %v1870_v25 = vpop.f32.mrf.mxu1  ;;  %v1849_v27 = vadd.f32 %v1848_v24, %v1847_v22 }
 0x147   :  { %v1850_v28 = vpop.f32.mrf.mxu0  ;;  %v1871_v31 = vadd.f32 %v1870_v25, %v1869_v23 }
 0x148   :  { %v1872_v29 = vpop.f32.mrf.mxu1  ;;  %v1436_v30 = vadd.f32 %v1849_v27, %v1396_v26 }
 0x149   :  { %v1851_v32 = vpop.f32.mrf.mxu0 }
 0x14a   :  { %v1873_v33 = vpop.f32.mrf.mxu1  ;;  %v1476_v34 = vadd.f32 %v1871_v31, %v1436_v30 }
 0x14c   :  { %v1481_v35 = vmax.f32 %v1476_v34, 0.0 }
 0x14e   :  { %v1482_v36 = vpack.c.bf16 %v1481_v35, %v1481_v35 }
 0x150   :  { %1883 = vmatmul.mubr.msk.bf16.vlgmr.msra.gmra.mxu0 %vm1506_vm1, %v1482_v36 }
 0x210   :  { %v1544_v38 = vpop.f32.mrf.mxu0 }
 0x211   :  { %v1545_v39 = vadd.f32 %v1695_v37, %v1544_v38 }
 0x212   :  { %v1884_v40 = vpop.f32.mrf.mxu0 }
 0x213   :  { %1551 = vst.msk [vmem:[#allocation2] sm:$0x3] %vm1550_vm2, %v1545_v39 }
 0x214   :  { %v1547_v42 = vpop.f32.mrf.mxu0 }
 0x215   :  { %2035 = shalt.err (!%p2032_p4)
}
 0x216   :  { %1561 = dma.vmem_to_hbm [thread:$0]  %s1559_s12, 32, %s2506_s5, [#allocation3]   ;;  %v1885_v43 = vpop.f32.mrf.mxu0 }
 0x217   :  { %2044 = dma.done.wait [#allocation3], 32  }
 0x218   :  { %2045 = vsyncadd [#allocation3], 4294967264 }
 0x219   :  { %1565 = vsyncpa [#allocation3], 1 }

// kernel: net_res_deep_forward.4
= control target key start
LH: loop header
LB: loop body
LE: loop exit
PB: predicated region body
PF: predicated region fallthrough
CT: control target
= control target key end

     0   :  { %vm18_vm0 = vcmask 261120   ;;  %vm21_vm1 = vcmask 254976   ;;  %v7977_v0 = vmov 0.0   ;;  %s8475_s13 = smov 0   ;;  %s11767_s1 = inlined_call_operand.vmem [shape: bf16[9,32,32], index: 1, kind: input, shape index: {}]   ;;  %s11768_s2 = inlined_call_operand.vmem [shape: f32[1,32], index: 2, kind: input, shape index: {}]   ;;  %s11769_s3 = inlined_call_operand.vmem [shape: f32[1,32], index: 3, kind: input, shape index: {}]   ;;  %s11770_s4 = inlined_call_operand.vmem [shape: f32[2,8,8,32], index: 4, kind: output, shape index: {}]   ;;  %s11771_s0 = inlined_call_operand.vmem [shape: f32[2,16,16,32], index: 0, kind: input, shape index: {}]  }
   0x1   :  { %23 = vst.msk [vmem:[#allocation2 + $0x18] sm:$0xff] %vm18_vm0, %v7977_v0  ;;  %19 = vst.msk [vmem:[#allocation2] sm:$0xff] %vm18_vm0, %v7977_v0  ;;  %v128_v1 = vld [vmem:[%s11771_s0] sm:$0xff]  ;;  %v129_v2 = vld [vmem:[%s11771_s0 + $0x8] sm:$0xff] }
   0x2   :  { %20 = vst.msk [vmem:[#allocation2 + $0x8] sm:$0xff] %vm18_vm0, %v7977_v0  ;;  %24 = vst.msk [vmem:[#allocation2 + $0x20] sm:$0xff] %vm18_vm0, %v7977_v0  ;;  %v130_v3 = vld [vmem:[%s11771_s0 + $0x10] sm:$0xff]  ;;  %v131_v4 = vld [vmem:[%s11771_s0 + $0x18] sm:$0xff] }
   0x3   :  { %26 = vst.msk [vmem:[#allocation2 + $0x30] sm:$0xff] %vm18_vm0, %v7977_v0  ;;  %27 = vst.msk [vmem:[#allocation2 + $0x38] sm:$0xff] %vm18_vm0, %v7977_v0  ;;  %v132_v5 = vld [vmem:[%s11771_s0 + $0x20] sm:$0xff]  ;;  %v133_v6 = vld [vmem:[%s11771_s0 + $0x28] sm:$0xff] }
   0x4   :  { %29 = vst.msk [vmem:[#allocation2 + $0x48] sm:$0xff] %vm18_vm0, %v7977_v0  ;;  %30 = vst.msk [vmem:[#allocation2 + $0x50] sm:$0xff] %vm18_vm0, %v7977_v0  ;;  %v134_v7 = vld [vmem:[%s11771_s0 + $0x30] sm:$0xff]  ;;  %v135_v8 = vld [vmem:[%s11771_s0 + $0x38] sm:$0xff] }
   0x5   :  { %32 = vst.msk [vmem:[#allocation2 + $0x60] sm:$0xff] %vm18_vm0, %v7977_v0  ;;  %33 = vst.msk [vmem:[#allocation2 + $0x68] sm:$0xff] %vm18_vm0, %v7977_v0  ;;  %v136_v9 = vld [vmem:[%s11771_s0 + $0x40] sm:$0xff]  ;;  %v137_v10 = vld [vmem:[%s11771_s0 + $0x48] sm:$0xff] }
   0x6   :  { %35 = vst.msk [vmem:[#allocation2 + $0x78] sm:$0xff] %vm18_vm0, %v7977_v0  ;;  %36 = vst.msk [vmem:[#allocation2 + $0x80] sm:$0xff] %vm18_vm0, %v7977_v0  ;;  %v138_v11 = vld [vmem:[%s11771_s0 + $0x50] sm:$0xff]  ;;  %v139_v12 = vld [vmem:[%s11771_s0 + $0x58] sm:$0xff] }
   0x7   :  { %38 = vst.msk [vmem:[#allocation2 + $0x90] sm:$0xff] %vm18_vm0, %v7977_v0  ;;  %39 = vst.msk [vmem:[#allocation2 + $0x98] sm:$0xff] %vm18_vm0, %v7977_v0  ;;  %v140_v13 = vld [vmem:[%s11771_s0 + $0x60] sm:$0xff]  ;;  %v141_v14 = vld [vmem:[%s11771_s0 + $0x68] sm:$0xff] }
   0x8   :  { %41 = vst.msk [vmem:[#allocation2 + $0xa8] sm:$0xff] %vm18_vm0, %v7977_v0  ;;  %42 = vst.msk [vmem:[#allocation2 + $0xb0] sm:$0xff] %vm18_vm0, %v7977_v0  ;;  %v142_v15 = vld [vmem:[%s11771_s0 + $0x70] sm:$0xff]  ;;  %v143_v16 = vld [vmem:[%s11771_s0 + $0x78] sm:$0xff] }
   0x9   :  { %44 = vst.msk [vmem:[#allocation2 + $0xc0] sm:$0xff] %vm18_vm0, %v7977_v0  ;;  %45 = vst.msk [vmem:[#allocation2 + $0xc8] sm:$0xff] %vm18_vm0, %v7977_v0  ;;  %v144_v17 = vld [vmem:[%s11771_s0 + $0x80] sm:$0xff]  ;;  %v145_v18 = vld [vmem:[%s11771_s0 + $0x88] sm:$0xff] }
   0xa   :  { %47 = vst.msk [vmem:[#allocation2 + $0xd8] sm:$0xff] %vm18_vm0, %v7977_v0  ;;  %48 = vst.msk [vmem:[#allocation2 + $0xe0] sm:$0xff] %vm18_vm0, %v7977_v0  ;;  %v146_v19 = vld [vmem:[%s11771_s0 + $0x90] sm:$0xff]  ;;  %v147_v20 = vld [vmem:[%s11771_s0 + $0x98] sm:$0xff] }
   0xb   :  { %50 = vst.msk [vmem:[#allocation2 + $0xf0] sm:$0xff] %vm18_vm0, %v7977_v0  ;;  %51 = vst.msk [vmem:[#allocation2 + $0xf8] sm:$0xff] %vm18_vm0, %v7977_v0  ;;  %v148_v21 = vld [vmem:[%s11771_s0 + $0xa0] sm:$0xff]  ;;  %v149_v22 = vld [vmem:[%s11771_s0 + $0xa8] sm:$0xff] }
   0xc   :  { %53 = vst.msk [vmem:[#allocation2 + $0x108] sm:$0xff] %vm18_vm0, %v7977_v0  ;;  %54 = vst.msk [vmem:[#allocation2 + $0x110] sm:$0xff] %vm18_vm0, %v7977_v0  ;;  %v150_v23 = vld [vmem:[%s11771_s0 + $0xb0] sm:$0xff]  ;;  %v151_v24 = vld [vmem:[%s11771_s0 + $0xb8] sm:$0xff] }
   0xd   :  { %56 = vst.msk [vmem:[#allocation2 + $0x120] sm:$0xff] %vm18_vm0, %v7977_v0  ;;  %57 = vst.msk [vmem:[#allocation2 + $0x128] sm:$0xff] %vm18_vm0, %v7977_v0  ;;  %v152_v25 = vld [vmem:[%s11771_s0 + $0xc0] sm:$0xff]  ;;  %v153_v26 = vld [vmem:[%s11771_s0 + $0xc8] sm:$0xff] }
   0xe   :  { %59 = vst.msk [vmem:[#allocation2 + $0x138] sm:$0xff] %vm18_vm0, %v7977_v0  ;;  %60 = vst.msk [vmem:[#allocation2 + $0x140] sm:$0xff] %vm18_vm0, %v7977_v0  ;;  %v154_v27 = vld [vmem:[%s11771_s0 + $0xd0] sm:$0xff]  ;;  %v155_v28 = vld [vmem:[%s11771_s0 + $0xd8] sm:$0xff] }
   0xf   :  { %62 = vst.msk [vmem:[#allocation2 + $0x150] sm:$0xff] %vm18_vm0, %v7977_v0  ;;  %63 = vst.msk [vmem:[#allocation2 + $0x158] sm:$0xff] %vm18_vm0, %v7977_v0  ;;  %v156_v29 = vld [vmem:[%s11771_s0 + $0xe0] sm:$0xff]  ;;  %v157_v30 = vld [vmem:[%s11771_s0 + $0xe8] sm:$0xff] }
  0x10   :  { %65 = vst.msk [vmem:[#allocation2 + $0x168] sm:$0xff] %vm18_vm0, %v7977_v0  ;;  %66 = vst.msk [vmem:[#allocation2 + $0x170] sm:$0xff] %vm18_vm0, %v7977_v0  ;;  %v158_v31 = vld [vmem:[%s11771_s0 + $0xf0] sm:$0xff]  ;;  %v159_v32 = vld [vmem:[%s11771_s0 + $0xf8] sm:$0xff] }
  0x11   :  { %68 = vst.msk [vmem:[#allocation2 + $0x180] sm:$0xff] %vm18_vm0, %v7977_v0  ;;  %69 = vst.msk [vmem:[#allocation2 + $0x188] sm:$0xff] %vm18_vm0, %v7977_v0  ;;  %v160_v33 = vld [vmem:[%s11771_s0 + $0x100] sm:$0xff]  ;;  %v161_v34 = vld [vmem:[%s11771_s0 + $0x108] sm:$0xff] }
  0x12   :  { %71 = vst.msk [vmem:[#allocation2 + $0x198] sm:$0xff] %vm18_vm0, %v7977_v0  ;;  %72 = vst.msk [vmem:[#allocation2 + $0x1a0] sm:$0xff] %vm18_vm0, %v7977_v0  ;;  %v162_v35 = vld [vmem:[%s11771_s0 + $0x110] sm:$0xff]  ;;  %v163_v36 = vld [vmem:[%s11771_s0 + $0x118] sm:$0xff] }
  0x13   :  { %74 = vst.msk [vmem:[#allocation2 + $0x1b0] sm:$0xff] %vm18_vm0, %v7977_v0  ;;  %75 = vst.msk [vmem:[#allocation2 + $0x1b8] sm:$0xff] %vm18_vm0, %v7977_v0  ;;  %v164_v37 = vld [vmem:[%s11771_s0 + $0x120] sm:$0xff]  ;;  %v165_v38 = vld [vmem:[%s11771_s0 + $0x128] sm:$0xff] }
  0x14   :  { %77 = vst.msk [vmem:[#allocation2 + $0x1c8] sm:$0xff] %vm18_vm0, %v7977_v0  ;;  %78 = vst.msk [vmem:[#allocation2 + $0x1d0] sm:$0xff] %vm18_vm0, %v7977_v0  ;;  %v166_v39 = vld [vmem:[%s11771_s0 + $0x130] sm:$0xff]  ;;  %v167_v40 = vld [vmem:[%s11771_s0 + $0x138] sm:$0xff] }
  0x15   :  { %80 = vst.msk [vmem:[#allocation2 + $0x1e0] sm:$0xff] %vm18_vm0, %v7977_v0  ;;  %81 = vst.msk [vmem:[#allocation2 + $0x1e8] sm:$0xff] %vm18_vm0, %v7977_v0  ;;  %v168_v41 = vld [vmem:[%s11771_s0 + $0x140] sm:$0xff]  ;;  %v169_v42 = vld [vmem:[%s11771_s0 + $0x148] sm:$0xff] }
  0x16   :  { %83 = vst.msk [vmem:[#allocation2 + $0x1f8] sm:$0xff] %vm18_vm0, %v7977_v0  ;;  %84 = vst.msk [vmem:[#allocation2 + $0x200] sm:$0xff] %vm18_vm0, %v7977_v0  ;;  %v170_v43 = vld [vmem:[%s11771_s0 + $0x150] sm:$0xff]  ;;  %v171_v44 = vld [vmem:[%s11771_s0 + $0x158] sm:$0xff] }
  0x17   :  { %86 = vst.msk [vmem:[#allocation2 + $0x210] sm:$0xff] %vm18_vm0, %v7977_v0  ;;  %87 = vst.msk [vmem:[#allocation2 + $0x218] sm:$0xff] %vm18_vm0, %v7977_v0  ;;  %v172_v45 = vld [vmem:[%s11771_s0 + $0x160] sm:$0xff]  ;;  %v173_v46 = vld [vmem:[%s11771_s0 + $0x168] sm:$0xff] }
  0x18   :  { %89 = vst.msk [vmem:[#allocation2 + $0x228] sm:$0xff] %vm18_vm0, %v7977_v0  ;;  %90 = vst.msk [vmem:[#allocation2 + $0x230] sm:$0xff] %vm18_vm0, %v7977_v0  ;;  %v174_v47 = vld [vmem:[%s11771_s0 + $0x170] sm:$0xff]  ;;  %v175_v48 = vld [vmem:[%s11771_s0 + $0x178] sm:$0xff] }
  0x19   :  { %92 = vst.msk [vmem:[#allocation2 + $0x240] sm:$0xff] %vm18_vm0, %v7977_v0  ;;  %93 = vst.msk [vmem:[#allocation2 + $0x248] sm:$0xff] %vm18_vm0, %v7977_v0  ;;  %v176_v49 = vld [vmem:[%s11771_s0 + $0x180] sm:$0xff]  ;;  %v177_v50 = vld [vmem:[%s11771_s0 + $0x188] sm:$0xff] }
  0x1a   :  { %95 = vst.msk [vmem:[#allocation2 + $0x258] sm:$0xff] %vm18_vm0, %v7977_v0  ;;  %96 = vst.msk [vmem:[#allocation2 + $0x260] sm:$0xff] %vm18_vm0, %v7977_v0  ;;  %v178_v51 = vld [vmem:[%s11771_s0 + $0x190] sm:$0xff]  ;;  %v179_v52 = vld [vmem:[%s11771_s0 + $0x198] sm:$0xff] }
  0x1b   :  { %98 = vst.msk [vmem:[#allocation2 + $0x270] sm:$0xff] %vm18_vm0, %v7977_v0  ;;  %99 = vst.msk [vmem:[#allocation2 + $0x278] sm:$0xff] %vm18_vm0, %v7977_v0  ;;  %v180_v53 = vld [vmem:[%s11771_s0 + $0x1a0] sm:$0xff]  ;;  %v181_v54 = vld [vmem:[%s11771_s0 + $0x1a8] sm:$0xff] }
  0x1c   :  { %101 = vst.msk [vmem:[#allocation2 + $0x288] sm:$0xff] %vm18_vm0, %v7977_v0  ;;  %102 = vst.msk [vmem:[#allocation2 + $0x290] sm:$0xff] %vm18_vm0, %v7977_v0  ;;  %v182_v55 = vld [vmem:[%s11771_s0 + $0x1b0] sm:$0xff]  ;;  %v183_v56 = vld [vmem:[%s11771_s0 + $0x1b8] sm:$0xff] }
  0x1d   :  { %104 = vst.msk [vmem:[#allocation2 + $0x2a0] sm:$0xff] %vm18_vm0, %v7977_v0  ;;  %105 = vst.msk [vmem:[#allocation2 + $0x2a8] sm:$0xff] %vm18_vm0, %v7977_v0  ;;  %v184_v57 = vld [vmem:[%s11771_s0 + $0x1c0] sm:$0xff]  ;;  %v185_v58 = vld [vmem:[%s11771_s0 + $0x1c8] sm:$0xff] }
  0x1e   :  { %107 = vst.msk [vmem:[#allocation2 + $0x2b8] sm:$0xff] %vm18_vm0, %v7977_v0  ;;  %108 = vst.msk [vmem:[#allocation2 + $0x2c0] sm:$0xff] %vm18_vm0, %v7977_v0  ;;  %v186_v59 = vld [vmem:[%s11771_s0 + $0x1d0] sm:$0xff]  ;;  %v187_v60 = vld [vmem:[%s11771_s0 + $0x1d8] sm:$0xff] }
  0x1f   :  { %110 = vst.msk [vmem:[#allocation2 + $0x2d0] sm:$0xff] %vm18_vm0, %v7977_v0  ;;  %111 = vst.msk [vmem:[#allocation2 + $0x2d8] sm:$0xff] %vm18_vm0, %v7977_v0  ;;  %v188_v61 = vld [vmem:[%s11771_s0 + $0x1e0] sm:$0xff]  ;;  %v189_v62 = vld [vmem:[%s11771_s0 + $0x1e8] sm:$0xff] }
  0x20   :  { %113 = vst.msk [vmem:[#allocation2 + $0x2e8] sm:$0xff] %vm18_vm0, %v7977_v0  ;;  %114 = vst.msk [vmem:[#allocation2 + $0x2f0] sm:$0xff] %vm18_vm0, %v7977_v0  ;;  %v190_v63 = vld [vmem:[%s11771_s0 + $0x1f0] sm:$0xff] }
  0x21   :  { %116 = vst.msk [vmem:[#allocation2 + $0x300] sm:$0xff] %vm18_vm0, %v7977_v0  ;;  %117 = vst.msk [vmem:[#allocation2 + $0x308] sm:$0xff] %vm18_vm0, %v7977_v0 }
  0x22   :  { %119 = vst.msk [vmem:[#allocation2 + $0x318] sm:$0xff] %vm18_vm0, %v7977_v0  ;;  %120 = vst.msk [vmem:[#allocation2 + $0x320] sm:$0xff] %vm18_vm0, %v7977_v0 }
  0x23   :  { %122 = vst.msk [vmem:[#allocation2 + $0x330] sm:$0xff] %vm18_vm0, %v7977_v0  ;;  %123 = vst.msk [vmem:[#allocation2 + $0x338] sm:$0xff] %vm18_vm0, %v7977_v0 }
  0x24   :  { %125 = vst.msk [vmem:[#allocation2 + $0x348] sm:$0xff] %vm18_vm0, %v7977_v0  ;;  %126 = vst.msk [vmem:[#allocation2 + $0x350] sm:$0xff] %vm18_vm0, %v7977_v0 }
  0x25   :  { %25 = vst.msk [vmem:[#allocation2 + $0x28] sm:$0x3] %vm21_vm1, %v7977_v0  ;;  %22 = vst.msk [vmem:[#allocation2 + $0x10] sm:$0x3] %vm21_vm1, %v7977_v0 }
  0x26   :  { %28 = vst.msk [vmem:[#allocation2 + $0x40] sm:$0x3] %vm21_vm1, %v7977_v0  ;;  %31 = vst.msk [vmem:[#allocation2 + $0x58] sm:$0x3] %vm21_vm1, %v7977_v0 }
  0x27   :  { %34 = vst.msk [vmem:[#allocation2 + $0x70] sm:$0x3] %vm21_vm1, %v7977_v0  ;;  %37 = vst.msk [vmem:[#allocation2 + $0x88] sm:$0x3] %vm21_vm1, %v7977_v0 }
  0x28   :  { %40 = vst.msk [vmem:[#allocation2 + $0xa0] sm:$0x3] %vm21_vm1, %v7977_v0  ;;  %43 = vst.msk [vmem:[#allocation2 + $0xb8] sm:$0x3] %vm21_vm1, %v7977_v0 }
  0x29   :  { %46 = vst.msk [vmem:[#allocation2 + $0xd0] sm:$0x3] %vm21_vm1, %v7977_v0  ;;  %49 = vst.msk [vmem:[#allocation2 + $0xe8] sm:$0x3] %vm21_vm1, %v7977_v0 }
  0x2a   :  { %52 = vst.msk [vmem:[#allocation2 + $0x100] sm:$0x3] %vm21_vm1, %v7977_v0  ;;  %55 = vst.msk [vmem:[#allocation2 + $0x118] sm:$0x3] %vm21_vm1, %v7977_v0 }
  0x2b   :  { %58 = vst.msk [vmem:[#allocation2 + $0x130] sm:$0x3] %vm21_vm1, %v7977_v0  ;;  %61 = vst.msk [vmem:[#allocation2 + $0x148] sm:$0x3] %vm21_vm1, %v7977_v0 }
  0x2c   :  { %64 = vst.msk [vmem:[#allocation2 + $0x160] sm:$0x3] %vm21_vm1, %v7977_v0  ;;  %67 = vst.msk [vmem:[#allocation2 + $0x178] sm:$0x3] %vm21_vm1, %v7977_v0 }
  0x2d   :  { %70 = vst.msk [vmem:[#allocation2 + $0x190] sm:$0x3] %vm21_vm1, %v7977_v0  ;;  %73 = vst.msk [vmem:[#allocation2 + $0x1a8] sm:$0x3] %vm21_vm1, %v7977_v0 }
  0x2e   :  { %76 = vst.msk [vmem:[#allocation2 + $0x1c0] sm:$0x3] %vm21_vm1, %v7977_v0  ;;  %79 = vst.msk [vmem:[#allocation2 + $0x1d8] sm:$0x3] %vm21_vm1, %v7977_v0 }
  0x2f   :  { %82 = vst.msk [vmem:[#allocation2 + $0x1f0] sm:$0x3] %vm21_vm1, %v7977_v0  ;;  %85 = vst.msk [vmem:[#allocation2 + $0x208] sm:$0x3] %vm21_vm1, %v7977_v0 }
  0x30   :  { %88 = vst.msk [vmem:[#allocation2 + $0x220] sm:$0x3] %vm21_vm1, %v7977_v0  ;;  %91 = vst.msk [vmem:[#allocation2 + $0x238] sm:$0x3] %vm21_vm1, %v7977_v0 }
  0x31   :  { %94 = vst.msk [vmem:[#allocation2 + $0x250] sm:$0x3] %vm21_vm1, %v7977_v0  ;;  %97 = vst.msk [vmem:[#allocation2 + $0x268] sm:$0x3] %vm21_vm1, %v7977_v0 }
  0x32   :  { %100 = vst.msk [vmem:[#allocation2 + $0x280] sm:$0x3] %vm21_vm1, %v7977_v0  ;;  %103 = vst.msk [vmem:[#allocation2 + $0x298] sm:$0x3] %vm21_vm1, %v7977_v0 }
  0x33   :  { %106 = vst.msk [vmem:[#allocation2 + $0x2b0] sm:$0x3] %vm21_vm1, %v7977_v0  ;;  %109 = vst.msk [vmem:[#allocation2 + $0x2c8] sm:$0x3] %vm21_vm1, %v7977_v0 }
  0x34   :  { %112 = vst.msk [vmem:[#allocation2 + $0x2e0] sm:$0x3] %vm21_vm1, %v7977_v0  ;;  %115 = vst.msk [vmem:[#allocation2 + $0x2f8] sm:$0x3] %vm21_vm1, %v7977_v0 }
  0x35   :  { %118 = vst.msk [vmem:[#allocation2 + $0x310] sm:$0x3] %vm21_vm1, %v7977_v0  ;;  %121 = vst.msk [vmem:[#allocation2 + $0x328] sm:$0x3] %vm21_vm1, %v7977_v0 }
  0x36   :  { %124 = vst.msk [vmem:[#allocation2 + $0x340] sm:$0x3] %vm21_vm1, %v7977_v0  ;;  %127 = vst.msk [vmem:[#allocation2 + $0x358] sm:$0x3] %vm21_vm1, %v7977_v0  ;;  %v191_v0 = vld [vmem:[%s11771_s0 + $0x1f8] sm:$0xff] }
  0x37   :  { %193 = vst.msk [vmem:[#allocation2 + $0x19] sm:$0xff] %vm18_vm0, %v128_v1  ;;  %194 = vst.msk [vmem:[#allocation2 + $0x21] sm:$0xff] %vm18_vm0, %v129_v2 }
  0x38   :  { %195 = vst.msk [vmem:[#allocation2 + $0x31] sm:$0xff] %vm18_vm0, %v130_v3  ;;  %196 = vst.msk [vmem:[#allocation2 + $0x39] sm:$0xff] %vm18_vm0, %v131_v4 }
  0x39   :  { %197 = vst.msk [vmem:[#allocation2 + $0x49] sm:$0xff] %vm18_vm0, %v132_v5  ;;  %198 = vst.msk [vmem:[#allocation2 + $0x51] sm:$0xff] %vm18_vm0, %v133_v6 }
  0x3a   :  { %199 = vst.msk [vmem:[#allocation2 + $0x61] sm:$0xff] %vm18_vm0, %v134_v7  ;;  %200 = vst.msk [vmem:[#allocation2 + $0x69] sm:$0xff] %vm18_vm0, %v135_v8 }
  0x3b   :  { %201 = vst.msk [vmem:[#allocation2 + $0x79] sm:$0xff] %vm18_vm0, %v136_v9  ;;  %202 = vst.msk [vmem:[#allocation2 + $0x81] sm:$0xff] %vm18_vm0, %v137_v10 }
  0x3c   :  { %203 = vst.msk [vmem:[#allocation2 + $0x91] sm:$0xff] %vm18_vm0, %v138_v11  ;;  %204 = vst.msk [vmem:[#allocation2 + $0x99] sm:$0xff] %vm18_vm0, %v139_v12 }
  0x3d   :  { %205 = vst.msk [vmem:[#allocation2 + $0xa9] sm:$0xff] %vm18_vm0, %v140_v13  ;;  %206 = vst.msk [vmem:[#allocation2 + $0xb1] sm:$0xff] %vm18_vm0, %v141_v14 }
  0x3e   :  { %207 = vst.msk [vmem:[#allocation2 + $0xc1] sm:$0xff] %vm18_vm0, %v142_v15  ;;  %208 = vst.msk [vmem:[#allocation2 + $0xc9] sm:$0xff] %vm18_vm0, %v143_v16 }
  0x3f   :  { %209 = vst.msk [vmem:[#allocation2 + $0xd9] sm:$0xff] %vm18_vm0, %v144_v17  ;;  %210 = vst.msk [vmem:[#allocation2 + $0xe1] sm:$0xff] %vm18_vm0, %v145_v18 }
  0x40   :  { %211 = vst.msk [vmem:[#allocation2 + $0xf1] sm:$0xff] %vm18_vm0, %v146_v19  ;;  %212 = vst.msk [vmem:[#allocation2 + $0xf9] sm:$0xff] %vm18_vm0, %v147_v20 }
  0x41   :  { %213 = vst.msk [vmem:[#allocation2 + $0x109] sm:$0xff] %vm18_vm0, %v148_v21  ;;  %214 = vst.msk [vmem:[#allocation2 + $0x111] sm:$0xff] %vm18_vm0, %v149_v22 }
  0x42   :  { %215 = vst.msk [vmem:[#allocation2 + $0x121] sm:$0xff] %vm18_vm0, %v150_v23  ;;  %216 = vst.msk [vmem:[#allocation2 + $0x129] sm:$0xff] %vm18_vm0, %v151_v24 }
  0x43   :  { %217 = vst.msk [vmem:[#allocation2 + $0x139] sm:$0xff] %vm18_vm0, %v152_v25  ;;  %218 = vst.msk [vmem:[#allocation2 + $0x141] sm:$0xff] %vm18_vm0, %v153_v26 }
  0x44   :  { %219 = vst.msk [vmem:[#allocation2 + $0x151] sm:$0xff] %vm18_vm0, %v154_v27  ;;  %220 = vst.msk [vmem:[#allocation2 + $0x159] sm:$0xff] %vm18_vm0, %v155_v28 }
  0x45   :  { %221 = vst.msk [vmem:[#allocation2 + $0x169] sm:$0xff] %vm18_vm0, %v156_v29  ;;  %222 = vst.msk [vmem:[#allocation2 + $0x171] sm:$0xff] %vm18_vm0, %v157_v30 }
  0x46   :  { %223 = vst.msk [vmem:[#allocation2 + $0x181] sm:$0xff] %vm18_vm0, %v158_v31  ;;  %224 = vst.msk [vmem:[#allocation2 + $0x189] sm:$0xff] %vm18_vm0, %v159_v32 }
  0x47   :  { %225 = vst.msk [vmem:[#allocation2 + $0x1c9] sm:$0xff] %vm18_vm0, %v160_v33  ;;  %226 = vst.msk [vmem:[#allocation2 + $0x1d1] sm:$0xff] %vm18_vm0, %v161_v34 }
  0x48   :  { %227 = vst.msk [vmem:[#allocation2 + $0x1e1] sm:$0xff] %vm18_vm0, %v162_v35  ;;  %228 = vst.msk [vmem:[#allocation2 + $0x1e9] sm:$0xff] %vm18_vm0, %v163_v36 }
  0x49   :  { %229 = vst.msk [vmem:[#allocation2 + $0x1f9] sm:$0xff] %vm18_vm0, %v164_v37  ;;  %230 = vst.msk [vmem:[#allocation2 + $0x201] sm:$0xff] %vm18_vm0, %v165_v38 }
  0x4a   :  { %231 = vst.msk [vmem:[#allocation2 + $0x211] sm:$0xff] %vm18_vm0, %v166_v39  ;;  %232 = vst.msk [vmem:[#allocation2 + $0x219] sm:$0xff] %vm18_vm0, %v167_v40 }
  0x4b   :  { %233 = vst.msk [vmem:[#allocation2 + $0x229] sm:$0xff] %vm18_vm0, %v168_v41  ;;  %234 = vst.msk [vmem:[#allocation2 + $0x231] sm:$0xff] %vm18_vm0, %v169_v42 }
  0x4c   :  { %235 = vst.msk [vmem:[#allocation2 + $0x241] sm:$0xff] %vm18_vm0, %v170_v43  ;;  %236 = vst.msk [vmem:[#allocation2 + $0x249] sm:$0xff] %vm18_vm0, %v171_v44 }
  0x4d   :  { %237 = vst.msk [vmem:[#allocation2 + $0x259] sm:$0xff] %vm18_vm0, %v172_v45  ;;  %238 = vst.msk [vmem:[#allocation2 + $0x261] sm:$0xff] %vm18_vm0, %v173_v46 }
  0x4e   :  { %239 = vst.msk [vmem:[#allocation2 + $0x271] sm:$0xff] %vm18_vm0, %v174_v47  ;;  %240 = vst.msk [vmem:[#allocation2 + $0x279] sm:$0xff] %vm18_vm0, %v175_v48 }
  0x4f   :  { %241 = vst.msk [vmem:[#allocation2 + $0x289] sm:$0xff] %vm18_vm0, %v176_v49  ;;  %242 = vst.msk [vmem:[#allocation2 + $0x291] sm:$0xff] %vm18_vm0, %v177_v50 }
  0x50   :  { %243 = vst.msk [vmem:[#allocation2 + $0x2a1] sm:$0xff] %vm18_vm0, %v178_v51  ;;  %244 = vst.msk [vmem:[#allocation2 + $0x2a9] sm:$0xff] %vm18_vm0, %v179_v52 }
  0x51   :  { %245 = vst.msk [vmem:[#allocation2 + $0x2b9] sm:$0xff] %vm18_vm0, %v180_v53  ;;  %246 = vst.msk [vmem:[#allocation2 + $0x2c1] sm:$0xff] %vm18_vm0, %v181_v54 }
  0x52   :  { %247 = vst.msk [vmem:[#allocation2 + $0x2d1] sm:$0xff] %vm18_vm0, %v182_v55  ;;  %248 = vst.msk [vmem:[#allocation2 + $0x2d9] sm:$0xff] %vm18_vm0, %v183_v56 }
  0x53   :  { %249 = vst.msk [vmem:[#allocation2 + $0x2e9] sm:$0xff] %vm18_vm0, %v184_v57  ;;  %250 = vst.msk [vmem:[#allocation2 + $0x2f1] sm:$0xff] %vm18_vm0, %v185_v58 }
  0x54   :  { %251 = vst.msk [vmem:[#allocation2 + $0x301] sm:$0xff] %vm18_vm0, %v186_v59  ;;  %252 = vst.msk [vmem:[#allocation2 + $0x309] sm:$0xff] %vm18_vm0, %v187_v60 }
  0x55   :  { %253 = vst.msk [vmem:[#allocation2 + $0x319] sm:$0xff] %vm18_vm0, %v188_v61  ;;  %254 = vst.msk [vmem:[#allocation2 + $0x321] sm:$0xff] %vm18_vm0, %v189_v62 }
  0x56   :  { %255 = vst.msk [vmem:[#allocation2 + $0x331] sm:$0xff] %vm18_vm0, %v190_v63  ;;  %256 = vst.msk [vmem:[#allocation2 + $0x339] sm:$0xff] %vm18_vm0, %v191_v0 }
  0x57 LB: > { %v7885_v1 = vld [vmem:[%s11767_s1 + $0x18] sm:$0xff]   ;;  %v7886_v2 = vld [vmem:[%s11767_s1 + $0x10] sm:$0xff]   ;;  %v363_v3 = vld [vmem:[#allocation2 + $0x1] sm:$0xff]  ;;  %s262_s13 = sadd.s32 1, %s7975_s13   ;;  %s7975_s13 = sphi %s8475_s13, %s262_s13  }
  0x58   : > { %7260 = vmatprep.subr.bf16.mxu0 %v7885_v1  ;;  %7872 = vmatprep.subr.bf16.mxu1 %v7885_v1  ;;  %v364_v4 = vld [vmem:[#allocation2 + $0x9] sm:$0xff]  ;;  %v395_v5 = vld [vmem:[#allocation2 + $0x1b1] sm:$0xff]  ;;  %v396_v7 = vld [vmem:[#allocation2 + $0x1b9] sm:$0xff]  ;;  %p259_p0 = scmp.ge.s32.totalorder %s262_s13, 10  }
  0x59   : > { %7261 = vmatpush3.bf16.msra.mxu0 %v7885_v1  ;;  %7874 = vmatpush3.bf16.msra.mxu1 %v7885_v1  ;;  %v427_v6 = vpack.c.bf16 %v364_v4, %v363_v3  ;;  %v365_v8 = vld [vmem:[#allocation2 + $0x19] sm:$0xff]  ;;  %v366_v9 = vld [vmem:[#allocation2 + $0x21] sm:$0xff]  ;;  %v443_v10 = vpack.c.bf16 %v396_v7, %v395_v5  ;;  %v397_v11 = vld [vmem:[#allocation2 + $0x1c9] sm:$0xff]  ;;  %vm6470_vm2 = vcmask (%p259_p0), 1040384   ;;  %vm6487_vm3 = vcmask (%p259_p0), 1041408  }
  0x5a   : > { %7262 = vmatprep.subr.bf16.mxu0 %v7886_v2  ;;  %7873 = vmatprep.subr.bf16.mxu1 %v7886_v2  ;;  %v398_v12 = vld [vmem:[#allocation2 + $0x1d1] sm:$0xff]  ;;  %v7887_v13 = vld [vmem:[%s11767_s1 + $0x8] sm:$0xff]   ;;  %v8491_v14 = vpack.c.bf16 %v366_v9, %v365_v8  ;;  %v368_v18 = vld [vmem:[#allocation2 + $0x39] sm:$0xff]  ;;  %vm6504_vm4 = vcmask (%p259_p0), 1042432   ;;  %vm6521_vm5 = vcmask (%p259_p0), 1043456   ;;  %vm6538_vm6 = vcmask (%p259_p0), 1044480  }
  0x5b   : > { %7264 = vmatprep.mubr.msk.bf16.mxu0 %vm18_vm0, %v427_v6  ;;  %7296 = vmatprep.mubr.msk.bf16.mxu1 %vm18_vm0, %v443_v10  ;;  %v444_v15 = vpack.c.bf16 %v398_v12, %v397_v11  ;;  %v7888_v16 = vld [vmem:[%s11767_s1 + $0x28] sm:$0xff]   ;;  %v367_v17 = vld [vmem:[#allocation2 + $0x31] sm:$0xff]  ;;  %v401_v25 = vld [vmem:[#allocation2 + $0x1f9] sm:$0xff]  ;;  %vm6555_vm7 = vcmask (%p259_p0), 1045504   ;;  %vm6572_vm8 = vcmask (%p259_p0), 1046528  }
  0x5c   : > { %v399_v19 = vld [vmem:[#allocation2 + $0x1e1] sm:$0xff]  ;;  %v400_v20 = vld [vmem:[#allocation2 + $0x1e9] sm:$0xff]  ;;  %v8496_v21 = vpack.c.bf16 %v368_v18, %v367_v17  ;;  %v370_v24 = vld [vmem:[#allocation2 + $0x51] sm:$0xff] }
  0x5d   : > { %7263 = vmatpush3.bf16.msra.mxu0 %v7886_v2  ;;  %7875 = vmatpush3.bf16.msra.mxu1 %v7886_v2  ;;  %v445_v22 = vpack.c.bf16 %v400_v20, %v399_v19  ;;  %v369_v23 = vld [vmem:[#allocation2 + $0x49] sm:$0xff]  ;;  %v402_v26 = vld [vmem:[#allocation2 + $0x201] sm:$0xff]  ;;  %v403_v29 = vld [vmem:[#allocation2 + $0x211] sm:$0xff] }
  0x5e   : > { %7328 = vmatprep.subr.bf16.mxu1 %v7887_v13  ;;  %7396 = vmatprep.subr.bf16.mxu0 %v7888_v16  ;;  %v371_v27 = vld [vmem:[#allocation2 + $0x61] sm:$0xff]  ;;  %v372_v28 = vld [vmem:[#allocation2 + $0x69] sm:$0xff]  ;;  %v404_v30 = vld [vmem:[#allocation2 + $0x219] sm:$0xff]  ;;  %v8504_v31 = vpack.c.bf16 %v370_v24, %v369_v23  ;;  %v446_v32 = vpack.c.bf16 %v402_v26, %v401_v25 }
  0x5f   : > { %v8506_v33 = vpack.c.bf16 %v372_v28, %v371_v27  ;;  %v447_v34 = vpack.c.bf16 %v404_v30, %v403_v29  ;;  %v373_v35 = vld [vmem:[#allocation2 + $0x79] sm:$0xff]  ;;  %v374_v36 = vld [vmem:[#allocation2 + $0x81] sm:$0xff]  ;;  %v405_v37 = vld [vmem:[#allocation2 + $0x229] sm:$0xff] }
  0x60   : > { %7265 = vmatmul.mubr.msk.bf16.vlgmr.msra.gmra.mxu0 %vm18_vm0, %v8491_v14  ;;  %7297 = vmatmul.mubr.msk.bf16.vlgmr.msra.gmra.mxu1 %vm18_vm0, %v444_v15  ;;  %v7889_v38 = vld [vmem:[%s11767_s1] sm:$0xff]   ;;  %v406_v39 = vld [vmem:[#allocation2 + $0x231] sm:$0xff]  ;;  %v408_v44 = vld [vmem:[#allocation2 + $0x249] sm:$0xff]  ;;  %v8520_v45 = vpack.c.bf16 %v374_v36, %v373_v35 }
  0x61   : > { %7329 = vmatpush3.bf16.msra.mxu1 %v7887_v13  ;;  %7397 = vmatpush3.bf16.msra.mxu0 %v7888_v16  ;;  %v375_v40 = vld [vmem:[#allocation2 + $0x91] sm:$0xff]  ;;  %v7890_v41 = vld [vmem:[%s11767_s1 + $0x20] sm:$0xff]   ;;  %v448_v46 = vpack.c.bf16 %v406_v39, %v405_v37  ;;  %v377_v49 = vld [vmem:[#allocation2 + $0xa9] sm:$0xff] }
  0x62   : > { %7268 = vmatprep.mubr.msk.bf16.mxu0 %vm18_vm0, %v8496_v21  ;;  %7300 = vmatprep.mubr.msk.bf16.mxu1 %vm18_vm0, %v445_v22  ;;  %v376_v42 = vld [vmem:[#allocation2 + $0x99] sm:$0xff]  ;;  %v407_v43 = vld [vmem:[#allocation2 + $0x241] sm:$0xff]  ;;  %v378_v50 = vld [vmem:[#allocation2 + $0xb1] sm:$0xff] }
  0x63   : > { %7330 = vmatprep.subr.bf16.mxu1 %v7889_v38  ;;  %7398 = vmatprep.subr.bf16.mxu0 %v7890_v41  ;;  %v8522_v47 = vpack.c.bf16 %v376_v42, %v375_v40  ;;  %v449_v48 = vpack.c.bf16 %v408_v44, %v407_v43  ;;  %v409_v51 = vld [vmem:[#allocation2 + $0x259] sm:$0xff]  ;;  %v410_v52 = vld [vmem:[#allocation2 + $0x261] sm:$0xff]  ;;  %v380_v54 = vld [vmem:[#allocation2 + $0xc9] sm:$0xff]  ;;  %v8530_v57 = vpack.c.bf16 %v378_v50, %v377_v49 }
  0x64   : > { %v379_v53 = vld [vmem:[#allocation2 + $0xc1] sm:$0xff]  ;;  %v411_v55 = vld [vmem:[#allocation2 + $0x271] sm:$0xff]  ;;  %v412_v56 = vld [vmem:[#allocation2 + $0x279] sm:$0xff]  ;;  %v450_v58 = vpack.c.bf16 %v410_v52, %v409_v51 }
  0x65   : > { %7331 = vmatpush3.bf16.msra.mxu1 %v7889_v38  ;;  %7399 = vmatpush3.bf16.msra.mxu0 %v7890_v41  ;;  %v8535_v59 = vld [vmem:[%s11767_s1 + $0x38] sm:$0xff]   ;;  %v8537_v60 = vpack.c.bf16 %v380_v54, %v379_v53  ;;  %v451_v61 = vpack.c.bf16 %v412_v56, %v411_v55  ;;  %v8542_v62 = vld [vmem:[%s11767_s1 + $0x48] sm:$0xff]   ;;  %v263_v43 = vld [vmem:[#allocation2] sm:$0xff] }
  0x66   : > { %7464 = vmatprep.subr.bf16.mxu1 %v8535_v59  ;;  %7532 = vmatprep.subr.bf16.mxu0 %v8542_v62  ;;  %v381_v63 = vld [vmem:[#allocation2 + $0xd9] sm:$0xff]  ;;  %v382_v0 = vld [vmem:[#allocation2 + $0xe1] sm:$0xff]  ;;  %v413_v1 = vld [vmem:[#allocation2 + $0x289] sm:$0xff] }
  0x67   : > { %v414_v2 = vld [vmem:[#allocation2 + $0x291] sm:$0xff]  ;;  %v384_v4 = vld [vmem:[#allocation2 + $0xf9] sm:$0xff]  ;;  %v415_v5 = vld [vmem:[#allocation2 + $0x2a1] sm:$0xff]  ;;  %v8552_v7 = vpack.c.bf16 %v382_v0, %v381_v63 }
  0x68   : > { %7269 = vmatmul.mubr.msk.bf16.gmra.mxu0 %vm18_vm0, %v8504_v31  ;;  %7301 = vmatmul.mubr.msk.bf16.gmra.mxu1 %vm18_vm0, %v446_v32  ;;  %v383_v3 = vld [vmem:[#allocation2 + $0xf1] sm:$0xff]  ;;  %v416_v6 = vld [vmem:[#allocation2 + $0x2a9] sm:$0xff]  ;;  %v452_v8 = vpack.c.bf16 %v414_v2, %v413_v1  ;;  %v417_v13 = vld [vmem:[#allocation2 + $0x2b9] sm:$0xff] }
  0x69   : > { %7272 = vmatprep.mubr.msk.bf16.mxu0 %vm18_vm0, %v8506_v33  ;;  %7304 = vmatprep.mubr.msk.bf16.mxu1 %vm18_vm0, %v447_v34  ;;  %v8554_v9 = vpack.c.bf16 %v384_v4, %v383_v3  ;;  %v453_v10 = vpack.c.bf16 %v416_v6, %v415_v5  ;;  %v385_v11 = vld [vmem:[#allocation2 + $0x109] sm:$0xff]  ;;  %v386_v12 = vld [vmem:[#allocation2 + $0x111] sm:$0xff]  ;;  %v418_v15 = vld [vmem:[#allocation2 + $0x2c1] sm:$0xff] }
  0x6a   : > { %v387_v16 = vld [vmem:[#allocation2 + $0x121] sm:$0xff]  ;;  %v388_v17 = vld [vmem:[#allocation2 + $0x129] sm:$0xff]  ;;  %v419_v18 = vld [vmem:[#allocation2 + $0x2d1] sm:$0xff]  ;;  %v8562_v20 = vpack.c.bf16 %v386_v12, %v385_v11  ;;  %v454_v22 = vpack.c.bf16 %v418_v15, %v417_v13 }
  0x6b   : > { %v420_v19 = vld [vmem:[#allocation2 + $0x2d9] sm:$0xff]  ;;  %v8564_v23 = vpack.c.bf16 %v388_v17, %v387_v16  ;;  %v390_v26 = vld [vmem:[#allocation2 + $0x141] sm:$0xff]  ;;  %v421_v27 = vld [vmem:[#allocation2 + $0x2e9] sm:$0xff] }
  0x6c   : > { %v455_v24 = vpack.c.bf16 %v420_v19, %v419_v18  ;;  %v389_v25 = vld [vmem:[#allocation2 + $0x139] sm:$0xff]  ;;  %v422_v28 = vld [vmem:[#allocation2 + $0x2f1] sm:$0xff]  ;;  %v423_v32 = vld [vmem:[#allocation2 + $0x301] sm:$0xff] }
  0x6d   : > { %v391_v29 = vld [vmem:[#allocation2 + $0x151] sm:$0xff]  ;;  %v392_v30 = vld [vmem:[#allocation2 + $0x159] sm:$0xff]  ;;  %v424_v34 = vld [vmem:[#allocation2 + $0x309] sm:$0xff]  ;;  %v8572_v35 = vpack.c.bf16 %v390_v26, %v389_v25  ;;  %v456_v36 = vpack.c.bf16 %v422_v28, %v421_v27 }
  0x6e   : > { %v8574_v37 = vpack.c.bf16 %v392_v30, %v391_v29  ;;  %v457_v38 = vpack.c.bf16 %v424_v34, %v423_v32  ;;  %v393_v39 = vld [vmem:[#allocation2 + $0x169] sm:$0xff]  ;;  %v394_v40 = vld [vmem:[#allocation2 + $0x171] sm:$0xff]  ;;  %v425_v41 = vld [vmem:[#allocation2 + $0x319] sm:$0xff] }
  0x6f   : > { %v426_v42 = vld [vmem:[#allocation2 + $0x321] sm:$0xff]  ;;  %v8582_v49 = vpack.c.bf16 %v394_v40, %v393_v39  ;;  %v265_v53 = vld [vmem:[#allocation2 + $0x18] sm:$0xff]  ;;  %v270_v6 = vld [vmem:[#allocation2 + $0x50] sm:$0xff] }
  0x70   : > { %7273 = vmatmul.mubr.msk.bf16.gmra.mxu0 %vm18_vm0, %v8520_v45  ;;  %7305 = vmatmul.mubr.msk.bf16.gmra.mxu1 %vm18_vm0, %v448_v46  ;;  %v264_v44 = vld [vmem:[#allocation2 + $0x8] sm:$0xff]  ;;  %v458_v50 = vpack.c.bf16 %v426_v42, %v425_v41  ;;  %v266_v54 = vld [vmem:[#allocation2 + $0x20] sm:$0xff]  ;;  %v1262_v63 = vld [vmem:[#allocation2 + $0x32] sm:$0xff] }
  0x71   : > { %7276 = vmatprep.mubr.msk.bf16.mxu0 %vm18_vm0, %v8522_v47  ;;  %7308 = vmatprep.mubr.msk.bf16.mxu1 %vm18_vm0, %v449_v48  ;;  %v1258_v46 = vld [vmem:[#allocation2 + $0x2] sm:$0xff]  ;;  %v1259_v48 = vld [vmem:[#allocation2 + $0xa] sm:$0xff]  ;;  %v327_v51 = vpack.c.bf16 %v264_v44, %v263_v43  ;;  %v1260_v55 = vld [vmem:[#allocation2 + $0x1a] sm:$0xff]  ;;  %v8589_v1 = vpack.c.bf16 %v266_v54, %v265_v53 }
  0x72   : > { %v1322_v52 = vpack.c.bf16 %v1259_v48, %v1258_v46  ;;  %v1261_v56 = vld [vmem:[#allocation2 + $0x22] sm:$0xff]  ;;  %v1263_v0 = vld [vmem:[#allocation2 + $0x3a] sm:$0xff]  ;;  %v7893_v11 = vld [vmem:[%s11767_s1 + $0x30] sm:$0xff]  }
  0x73   : > { %v1323_v2 = vpack.c.bf16 %v1261_v56, %v1260_v55  ;;  %v1324_v4 = vpack.c.bf16 %v1263_v0, %v1262_v63  ;;  %v269_v5 = vld [vmem:[#allocation2 + $0x48] sm:$0xff]  ;;  %v7894_v12 = vld [vmem:[%s11767_s1 + $0x40] sm:$0xff]   ;;  %v8605_v18 = vld [vmem:[%s11767_s1 + $0x58] sm:$0xff]  }
  0x74   : > { %v271_v13 = vld [vmem:[#allocation2 + $0x60] sm:$0xff]  ;;  %v272_v15 = vld [vmem:[#allocation2 + $0x68] sm:$0xff]  ;;  %v275_v29 = vld [vmem:[#allocation2 + $0x90] sm:$0xff] }
  0x75   : > { %v1266_v16 = vld [vmem:[#allocation2 + $0x62] sm:$0xff]  ;;  %v1267_v17 = vld [vmem:[#allocation2 + $0x6a] sm:$0xff]  ;;  %v8619_v25 = vpack.c.bf16 %v272_v15, %v271_v13  ;;  %v1268_v27 = vld [vmem:[#allocation2 + $0x7a] sm:$0xff] }
  0x76   : > { %v8615_v19 = vld [vmem:[%s11767_s1 + $0x68] sm:$0xff]   ;;  %v274_v26 = vld [vmem:[#allocation2 + $0x80] sm:$0xff]  ;;  %v276_v30 = vld [vmem:[#allocation2 + $0x98] sm:$0xff] }
  0x77   : > { %v1269_v28 = vld [vmem:[#allocation2 + $0x82] sm:$0xff]  ;;  %v1270_v32 = vld [vmem:[#allocation2 + $0x92] sm:$0xff]  ;;  %v1271_v34 = vld [vmem:[#allocation2 + $0x9a] sm:$0xff]  ;;  %v8631_v39 = vpack.c.bf16 %v276_v30, %v275_v29 }
  0x78   : > { %7277 = vmatmul.mubr.msk.bf16.gmra.mxu0 %vm18_vm0, %v8530_v57  ;;  %7309 = vmatmul.mubr.msk.bf16.gmra.mxu1 %vm18_vm0, %v450_v58  ;;  %v267_v58 = vld [vmem:[#allocation2 + $0x30] sm:$0xff]  ;;  %v1328_v40 = vpack.c.bf16 %v1271_v34, %v1270_v32  ;;  %v277_v41 = vld [vmem:[#allocation2 + $0xa8] sm:$0xff]  ;;  %v279_v46 = vld [vmem:[#allocation2 + $0xc0] sm:$0xff] }
  0x79   : > { %7280 = vmatprep.mubr.msk.bf16.mxu0 %vm18_vm0, %v8537_v60  ;;  %7312 = vmatprep.mubr.msk.bf16.mxu1 %vm18_vm0, %v451_v61  ;;  %v268_v61 = vld [vmem:[#allocation2 + $0x38] sm:$0xff]  ;;  %v278_v42 = vld [vmem:[#allocation2 + $0xb0] sm:$0xff]  ;;  %v280_v48 = vld [vmem:[#allocation2 + $0xc8] sm:$0xff] }
  0x7a   : > { %v8591_v3 = vpack.c.bf16 %v268_v61, %v267_v58  ;;  %v1272_v43 = vld [vmem:[#allocation2 + $0xaa] sm:$0xff]  ;;  %v1273_v44 = vld [vmem:[#allocation2 + $0xb2] sm:$0xff]  ;;  %v8641_v54 = vpack.c.bf16 %v280_v48, %v279_v46  ;;  %v282_v58 = vld [vmem:[#allocation2 + $0xe0] sm:$0xff] }
  0x7b   : > { %v1329_v53 = vpack.c.bf16 %v1273_v44, %v1272_v43  ;;  %v281_v56 = vld [vmem:[#allocation2 + $0xd8] sm:$0xff]  ;;  %v1277_v63 = vld [vmem:[#allocation2 + $0xe2] sm:$0xff]  ;;  %v283_v0 = vld [vmem:[#allocation2 + $0xf0] sm:$0xff] }
  0x7c   : > { %v1276_v61 = vld [vmem:[#allocation2 + $0xda] sm:$0xff]  ;;  %v286_v13 = vld [vmem:[#allocation2 + $0x110] sm:$0xff] }
  0x7d   : > { %v1280_v15 = vld [vmem:[#allocation2 + $0x10a] sm:$0xff]  ;;  %v289_v30 = vld [vmem:[#allocation2 + $0x138] sm:$0xff]  ;;  %v290_v32 = vld [vmem:[#allocation2 + $0x140] sm:$0xff] }
  0x7e   : > { %v1284_v34 = vld [vmem:[#allocation2 + $0x13a] sm:$0xff]  ;;  %v8669_v44 = vpack.c.bf16 %v290_v32, %v289_v30 }
  0x7f   : > { %v1287_v43 = vld [vmem:[#allocation2 + $0x15a] sm:$0xff] }
  0x80   : > { %7281 = vmatmul.mubr.msk.bf16.gmra.mxu0 %vm18_vm0, %v8552_v7  ;;  %7313 = vmatmul.mubr.msk.bf16.gmra.mxu1 %vm18_vm0, %v452_v8  ;;  %v1264_v8 = vld [vmem:[#allocation2 + $0x4a] sm:$0xff]  ;;  %v301_v32 = vld [vmem:[#allocation2 + $0x1f8] sm:$0xff] }
  0x81   : > { %7284 = vmatprep.mubr.msk.bf16.mxu0 %vm18_vm0, %v8554_v9  ;;  %7316 = vmatprep.mubr.msk.bf16.mxu1 %vm18_vm0, %v453_v10  ;;  %v1265_v10 = vld [vmem:[#allocation2 + $0x52] sm:$0xff] }
  0x88   : > { %7285 = vmatmul.mubr.msk.bf16.gmra.mxu0 %vm18_vm0, %v8562_v20  ;;  %7317 = vmatmul.mubr.msk.bf16.gmra.mxu1 %vm18_vm0, %v454_v22  ;;  %v8617_v22 = vpack.c.bf16 %v270_v6, %v269_v5  ;;  %v1279_v5 = vld [vmem:[#allocation2 + $0xfa] sm:$0xff]  ;;  %v8649_v6 = vpack.c.bf16 %v282_v58, %v281_v56  ;;  %v1289_v56 = vld [vmem:[#allocation2 + $0x172] sm:$0xff] }
  0x89   : > { %7288 = vmatprep.mubr.msk.bf16.mxu0 %vm18_vm0, %v8564_v23  ;;  %7320 = vmatprep.mubr.msk.bf16.mxu1 %vm18_vm0, %v455_v24  ;;  %v1325_v24 = vpack.c.bf16 %v1265_v10, %v1264_v8  ;;  %v1331_v8 = vpack.c.bf16 %v1277_v63, %v1276_v61  ;;  %v295_v58 = vld [vmem:[#allocation2 + $0x1b0] sm:$0xff]  ;;  %v296_v61 = vld [vmem:[#allocation2 + $0x1b8] sm:$0xff] }
  0x8a   : > { %v1290_v63 = vld [vmem:[#allocation2 + $0x1b2] sm:$0xff] }
  0x90   : > { %7289 = vmatmul.mubr.msk.bf16.gmra.mxu0 %vm18_vm0, %v8572_v35  ;;  %7321 = vmatmul.mubr.msk.bf16.gmra.mxu1 %vm18_vm0, %v456_v36 }
  0x91   : > { %7292 = vmatprep.mubr.msk.bf16.mxu0 %vm18_vm0, %v8574_v37  ;;  %7324 = vmatprep.mubr.msk.bf16.mxu1 %vm18_vm0, %v457_v38  ;;  %v1327_v38 = vpack.c.bf16 %v1269_v28, %v1268_v27 }
  0x98   : > { %7293 = vmatmul.mubr.msk.bf16.gmra.mxu0 %vm18_vm0, %v8582_v49  ;;  %7325 = vmatmul.mubr.msk.bf16.gmra.mxu1 %vm18_vm0, %v458_v50  ;;  %v1274_v50 = vld [vmem:[#allocation2 + $0xc2] sm:$0xff] }
  0x99   : > { %7332 = vmatprep.mubr.msk.bf16.mxu1 %vm18_vm0, %v327_v51  ;;  %7400 = vmatprep.mubr.msk.bf16.mxu0 %vm18_vm0, %v1322_v52  ;;  %v1275_v51 = vld [vmem:[#allocation2 + $0xca] sm:$0xff]  ;;  %v8639_v52 = vpack.c.bf16 %v278_v42, %v277_v41  ;;  %v292_v41 = vld [vmem:[#allocation2 + $0x158] sm:$0xff] }
  0x9a   : > { %v1330_v55 = vpack.c.bf16 %v1275_v51, %v1274_v50  ;;  %v1286_v42 = vld [vmem:[#allocation2 + $0x152] sm:$0xff]  ;;  %v293_v51 = vld [vmem:[#allocation2 + $0x168] sm:$0xff] }
  0x9b   : > { %v1336_v50 = vpack.c.bf16 %v1287_v43, %v1286_v42  ;;  %v304_v42 = vld [vmem:[#allocation2 + $0x218] sm:$0xff] }
  0x9c   : > { %v1298_v43 = vld [vmem:[#allocation2 + $0x212] sm:$0xff] }
  0xa0   : > { %7333 = vmatmul.mubr.msk.bf16.vlgmr.msra.gmra.mxu1 %vm18_vm0, %v8589_v1  ;;  %7401 = vmatmul.mubr.msk.bf16.vlgmr.msra.gmra.mxu0 %vm18_vm0, %v1323_v2  ;;  %v284_v2 = vld [vmem:[#allocation2 + $0xf8] sm:$0xff] }
  0xa1   : > { %7465 = vmatpush3.bf16.msra.mxu1 %v8535_v59  ;;  %7533 = vmatpush3.bf16.msra.mxu0 %v8542_v62  ;;  %v1326_v59 = vpack.c.bf16 %v1267_v17, %v1266_v16  ;;  %v273_v62 = vld [vmem:[#allocation2 + $0x78] sm:$0xff]  ;;  %v8651_v10 = vpack.c.bf16 %v284_v2, %v283_v0  ;;  %v287_v17 = vld [vmem:[#allocation2 + $0x120] sm:$0xff] }
  0xa2   : > { %7336 = vmatprep.mubr.msk.bf16.mxu1 %vm18_vm0, %v8591_v3  ;;  %7404 = vmatprep.mubr.msk.bf16.mxu0 %vm18_vm0, %v1324_v4  ;;  %v8629_v36 = vpack.c.bf16 %v274_v26, %v273_v62  ;;  %v1278_v4 = vld [vmem:[#allocation2 + $0xf2] sm:$0xff]  ;;  %v1283_v62 = vld [vmem:[#allocation2 + $0x12a] sm:$0xff]  ;;  %v1291_v0 = vld [vmem:[#allocation2 + $0x1ba] sm:$0xff] }
  0xa3   : > { %7466 = vmatprep.subr.bf16.mxu1 %v7893_v11  ;;  %7534 = vmatprep.subr.bf16.mxu0 %v7894_v12  ;;  %v1281_v16 = vld [vmem:[#allocation2 + $0x112] sm:$0xff] }
  0xa4   : > { %v1333_v27 = vpack.c.bf16 %v1281_v16, %v1280_v15  ;;  %v1293_v15 = vld [vmem:[#allocation2 + $0x1d2] sm:$0xff]  ;;  %v299_v16 = vld [vmem:[#allocation2 + $0x1e0] sm:$0xff] }
  0xa5   : > { %7467 = vmatpush3.bf16.msra.mxu1 %v7893_v11  ;;  %7535 = vmatpush3.bf16.msra.mxu0 %v7894_v12  ;;  %v1332_v11 = vpack.c.bf16 %v1279_v5, %v1278_v4  ;;  %v285_v12 = vld [vmem:[#allocation2 + $0x108] sm:$0xff]  ;;  %v343_v5 = vpack.c.bf16 %v296_v61, %v295_v58  ;;  %v306_v58 = vld [vmem:[#allocation2 + $0x230] sm:$0xff] }
  0xa6   : > { %7600 = vmatprep.subr.bf16.mxu1 %v8605_v18  ;;  %7668 = vmatprep.subr.bf16.mxu0 %v8615_v19  ;;  %v8659_v26 = vpack.c.bf16 %v286_v13, %v285_v12  ;;  %v298_v12 = vld [vmem:[#allocation2 + $0x1d0] sm:$0xff] }
  0xa7   : > { %v1292_v13 = vld [vmem:[#allocation2 + $0x1ca] sm:$0xff] }
  0xa8   : > { %7337 = vmatmul.mubr.msk.bf16.gmra.mxu1 %vm18_vm0, %v8617_v22  ;;  %7405 = vmatmul.mubr.msk.bf16.gmra.mxu0 %vm18_vm0, %v1325_v24  ;;  %v288_v24 = vld [vmem:[#allocation2 + $0x128] sm:$0xff] }
  0xa9   : > { %7340 = vmatprep.mubr.msk.bf16.mxu1 %vm18_vm0, %v8619_v25  ;;  %7408 = vmatprep.mubr.msk.bf16.mxu0 %vm18_vm0, %v1326_v59  ;;  %v1282_v59 = vld [vmem:[#allocation2 + $0x122] sm:$0xff]  ;;  %v8661_v28 = vpack.c.bf16 %v288_v24, %v287_v17  ;;  %v1300_v61 = vld [vmem:[#allocation2 + $0x22a] sm:$0xff] }
  0xaa   : > { %v1334_v29 = vpack.c.bf16 %v1283_v62, %v1282_v59  ;;  %v300_v17 = vld [vmem:[#allocation2 + $0x1e8] sm:$0xff] }
  0xab   : > { %v1294_v24 = vld [vmem:[#allocation2 + $0x1e2] sm:$0xff]  ;;  %v1295_v59 = vld [vmem:[#allocation2 + $0x1ea] sm:$0xff] }
  0xac   : > { %v1340_v30 = vpack.c.bf16 %v1295_v59, %v1294_v24  ;;  %v1304_v24 = vld [vmem:[#allocation2 + $0x25a] sm:$0xff]  ;;  %v1305_v59 = vld [vmem:[#allocation2 + $0x262] sm:$0xff] }
  0xb0   : > { %7341 = vmatmul.mubr.msk.bf16.gmra.mxu1 %vm18_vm0, %v8629_v36  ;;  %7409 = vmatmul.mubr.msk.bf16.gmra.mxu0 %vm18_vm0, %v1327_v38  ;;  %v1285_v38 = vld [vmem:[#allocation2 + $0x142] sm:$0xff] }
  0xb1   : > { %7344 = vmatprep.mubr.msk.bf16.mxu1 %vm18_vm0, %v8631_v39  ;;  %7412 = vmatprep.mubr.msk.bf16.mxu0 %vm18_vm0, %v1328_v40  ;;  %v291_v40 = vld [vmem:[#allocation2 + $0x150] sm:$0xff]  ;;  %v1335_v46 = vpack.c.bf16 %v1285_v38, %v1284_v34  ;;  %v302_v34 = vld [vmem:[#allocation2 + $0x200] sm:$0xff] }
  0xb2   : > { %v8671_v48 = vpack.c.bf16 %v292_v41, %v291_v40  ;;  %v1296_v38 = vld [vmem:[#allocation2 + $0x1fa] sm:$0xff]  ;;  %v1297_v40 = vld [vmem:[#allocation2 + $0x202] sm:$0xff]  ;;  %v303_v41 = vld [vmem:[#allocation2 + $0x210] sm:$0xff] }
  0xb8   : > { %7345 = vmatmul.mubr.msk.bf16.gmra.mxu1 %vm18_vm0, %v8639_v52  ;;  %7413 = vmatmul.mubr.msk.bf16.gmra.mxu0 %vm18_vm0, %v1329_v53  ;;  %v294_v53 = vld [vmem:[#allocation2 + $0x170] sm:$0xff] }
  0xb9   : > { %7348 = vmatprep.mubr.msk.bf16.mxu1 %vm18_vm0, %v8641_v54  ;;  %7416 = vmatprep.mubr.msk.bf16.mxu0 %vm18_vm0, %v1330_v55  ;;  %v1288_v55 = vld [vmem:[#allocation2 + $0x16a] sm:$0xff]  ;;  %v8679_v2 = vpack.c.bf16 %v294_v53, %v293_v51  ;;  %v1341_v51 = vpack.c.bf16 %v1297_v40, %v1296_v38  ;;  %v8698_v53 = vpack.c.bf16 %v304_v42, %v303_v41 }
  0xba   : > { %v1337_v4 = vpack.c.bf16 %v1289_v56, %v1288_v55  ;;  %v305_v56 = vld [vmem:[#allocation2 + $0x228] sm:$0xff]  ;;  %v1345_v40 = vpack.c.bf16 %v1305_v59, %v1304_v24  ;;  %v319_v24 = vld [vmem:[#allocation2 + $0x2d0] sm:$0xff]  ;;  %v320_v59 = vld [vmem:[#allocation2 + $0x2d8] sm:$0xff] }
  0xc0   : > { %7349 = vmatmul.mubr.msk.bf16.gmra.mxu1 %vm18_vm0, %v8649_v6  ;;  %7417 = vmatmul.mubr.msk.bf16.gmra.mxu0 %vm18_vm0, %v1331_v8  ;;  %v1338_v8 = vpack.c.bf16 %v1291_v0, %v1290_v63  ;;  %v1301_v63 = vld [vmem:[#allocation2 + $0x232] sm:$0xff]  ;;  %v307_v0 = vld [vmem:[#allocation2 + $0x240] sm:$0xff] }
  0xc1   : > { %7352 = vmatprep.mubr.msk.bf16.mxu1 %vm18_vm0, %v8651_v10  ;;  %7420 = vmatprep.mubr.msk.bf16.mxu0 %vm18_vm0, %v1332_v11  ;;  %v297_v11 = vld [vmem:[#allocation2 + $0x1c8] sm:$0xff] }
  0xc2   : > { %v8686_v62 = vpack.c.bf16 %v298_v12, %v297_v11  ;;  %v8706_v11 = vpack.c.bf16 %v306_v58, %v305_v56  ;;  %v1343_v12 = vpack.c.bf16 %v1301_v63, %v1300_v61  ;;  %v315_v56 = vld [vmem:[#allocation2 + $0x2a0] sm:$0xff]  ;;  %v316_v58 = vld [vmem:[#allocation2 + $0x2a8] sm:$0xff] }
  0xc3   : > { %v1310_v61 = vld [vmem:[#allocation2 + $0x2a2] sm:$0xff]  ;;  %v1311_v63 = vld [vmem:[#allocation2 + $0x2aa] sm:$0xff] }
  0xc8   : > { %7353 = vmatmul.mubr.msk.bf16.gmra.mxu1 %vm18_vm0, %v8659_v26  ;;  %7421 = vmatmul.mubr.msk.bf16.gmra.mxu0 %vm18_vm0, %v1333_v27  ;;  %v1339_v27 = vpack.c.bf16 %v1293_v15, %v1292_v13 }
  0xc9   : > { %7356 = vmatprep.mubr.msk.bf16.mxu1 %vm18_vm0, %v8661_v28  ;;  %7424 = vmatprep.mubr.msk.bf16.mxu0 %vm18_vm0, %v1334_v29  ;;  %v8688_v29 = vpack.c.bf16 %v300_v17, %v299_v16  ;;  %v309_v16 = vld [vmem:[#allocation2 + $0x258] sm:$0xff]  ;;  %v310_v17 = vld [vmem:[#allocation2 + $0x260] sm:$0xff] }
  0xca   : > { %v8716_v38 = vpack.c.bf16 %v310_v17, %v309_v16  ;;  %v1312_v16 = vld [vmem:[#allocation2 + $0x2ba] sm:$0xff]  ;;  %v1313_v17 = vld [vmem:[#allocation2 + $0x2c2] sm:$0xff] }
  0xd0   : > { %7357 = vmatmul.mubr.msk.bf16.gmra.mxu1 %vm18_vm0, %v8669_v44  ;;  %7425 = vmatmul.mubr.msk.bf16.gmra.mxu0 %vm18_vm0, %v1335_v46  ;;  %v1299_v46 = vld [vmem:[#allocation2 + $0x21a] sm:$0xff] }
  0xd1   : > { %7360 = vmatprep.mubr.msk.bf16.mxu1 %vm18_vm0, %v8671_v48  ;;  %7428 = vmatprep.mubr.msk.bf16.mxu0 %vm18_vm0, %v1336_v50  ;;  %v8696_v50 = vpack.c.bf16 %v302_v34, %v301_v32  ;;  %v1342_v55 = vpack.c.bf16 %v1299_v46, %v1298_v43  ;;  %v1306_v32 = vld [vmem:[#allocation2 + $0x272] sm:$0xff]  ;;  %v1307_v34 = vld [vmem:[#allocation2 + $0x27a] sm:$0xff]  ;;  %v313_v43 = vld [vmem:[#allocation2 + $0x288] sm:$0xff] }
  0xd2   : > { %v1346_v42 = vpack.c.bf16 %v1307_v34, %v1306_v32  ;;  %v314_v46 = vld [vmem:[#allocation2 + $0x290] sm:$0xff]  ;;  %v1349_v34 = vpack.c.bf16 %v1313_v17, %v1312_v16  ;;  %v325_v16 = vld [vmem:[#allocation2 + $0x318] sm:$0xff]  ;;  %v326_v17 = vld [vmem:[#allocation2 + $0x320] sm:$0xff] }
  0xd8   : > { %7361 = vmatmul.mubr.msk.bf16.gmra.mxu1 %vm18_vm0, %v8679_v2  ;;  %7429 = vmatmul.mubr.msk.bf16.gmra.mxu0 %vm18_vm0, %v1337_v4  ;;  %v308_v4 = vld [vmem:[#allocation2 + $0x248] sm:$0xff] }
  0xd9   : > { %7364 = vmatprep.mubr.msk.bf16.mxu1 %vm18_vm0, %v343_v5  ;;  %7432 = vmatprep.mubr.msk.bf16.mxu0 %vm18_vm0, %v1338_v8  ;;  %v1302_v5 = vld [vmem:[#allocation2 + $0x242] sm:$0xff]  ;;  %v1303_v8 = vld [vmem:[#allocation2 + $0x24a] sm:$0xff]  ;;  %v8708_v13 = vpack.c.bf16 %v308_v4, %v307_v0  ;;  %v8726_v0 = vpack.c.bf16 %v314_v46, %v313_v43 }
  0xda   : > { %v1344_v15 = vpack.c.bf16 %v1303_v8, %v1302_v5  ;;  %v8728_v5 = vpack.c.bf16 %v316_v58, %v315_v56  ;;  %v1348_v8 = vpack.c.bf16 %v1311_v63, %v1310_v61  ;;  %v321_v43 = vld [vmem:[#allocation2 + $0x2e8] sm:$0xff]  ;;  %v322_v46 = vld [vmem:[#allocation2 + $0x2f0] sm:$0xff]  ;;  %v323_v56 = vld [vmem:[#allocation2 + $0x300] sm:$0xff] }
  0xdb   : > { %v324_v58 = vld [vmem:[#allocation2 + $0x308] sm:$0xff] }
  0xdc   : > { %v1318_v61 = vld [vmem:[#allocation2 + $0x302] sm:$0xff]  ;;  %v1319_v63 = vld [vmem:[#allocation2 + $0x30a] sm:$0xff] }
  0xe0   : > { %7365 = vmatmul.mubr.msk.bf16.gmra.mxu1 %vm18_vm0, %v8686_v62  ;;  %7433 = vmatmul.mubr.msk.bf16.gmra.mxu0 %vm18_vm0, %v1339_v27  ;;  %v311_v27 = vld [vmem:[#allocation2 + $0x270] sm:$0xff] }
  0xe1   : > { %7368 = vmatprep.mubr.msk.bf16.mxu1 %vm18_vm0, %v8688_v29  ;;  %7436 = vmatprep.mubr.msk.bf16.mxu0 %vm18_vm0, %v1340_v30  ;;  %v312_v30 = vld [vmem:[#allocation2 + $0x278] sm:$0xff] }
  0xe2   : > { %v8718_v41 = vpack.c.bf16 %v312_v30, %v311_v27  ;;  %v1314_v27 = vld [vmem:[#allocation2 + $0x2d2] sm:$0xff]  ;;  %v1315_v30 = vld [vmem:[#allocation2 + $0x2da] sm:$0xff] }
  0xe8   : > { %7369 = vmatmul.mubr.msk.bf16.gmra.mxu1 %vm18_vm0, %v8696_v50  ;;  %7437 = vmatmul.mubr.msk.bf16.gmra.mxu0 %vm18_vm0, %v1341_v51  ;;  %v1308_v51 = vld [vmem:[#allocation2 + $0x28a] sm:$0xff] }
  0xe9   : > { %7372 = vmatprep.mubr.msk.bf16.mxu1 %vm18_vm0, %v8698_v53  ;;  %7440 = vmatprep.mubr.msk.bf16.mxu0 %vm18_vm0, %v1342_v55  ;;  %v1309_v55 = vld [vmem:[#allocation2 + $0x292] sm:$0xff] }
  0xea   : > { %v1347_v4 = vpack.c.bf16 %v1309_v55, %v1308_v51  ;;  %v1316_v51 = vld [vmem:[#allocation2 + $0x2ea] sm:$0xff]  ;;  %v1317_v55 = vld [vmem:[#allocation2 + $0x2f2] sm:$0xff] }
  0xf0   : > { %7373 = vmatmul.mubr.msk.bf16.gmra.mxu1 %vm18_vm0, %v8706_v11  ;;  %7441 = vmatmul.mubr.msk.bf16.gmra.mxu0 %vm18_vm0, %v1343_v12  ;;  %v317_v12 = vld [vmem:[#allocation2 + $0x2b8] sm:$0xff] }
  0xf1   : > { %7376 = vmatprep.mubr.msk.bf16.mxu1 %vm18_vm0, %v8708_v13  ;;  %7444 = vmatprep.mubr.msk.bf16.mxu0 %vm18_vm0, %v1344_v15  ;;  %v318_v15 = vld [vmem:[#allocation2 + $0x2c0] sm:$0xff] }
  0xf2   : > { %v8736_v32 = vpack.c.bf16 %v318_v15, %v317_v12  ;;  %v8748_v12 = vpack.c.bf16 %v324_v58, %v323_v56  ;;  %v1352_v15 = vpack.c.bf16 %v1319_v63, %v1318_v61 }
  0xf8   : > { %7377 = vmatmul.mubr.msk.bf16.gmra.mxu1 %vm18_vm0, %v8716_v38  ;;  %7445 = vmatmul.mubr.msk.bf16.gmra.mxu0 %vm18_vm0, %v1345_v40  ;;  %v8738_v40 = vpack.c.bf16 %v320_v59, %v319_v24  ;;  %v1320_v24 = vld [vmem:[#allocation2 + $0x31a] sm:$0xff]  ;;  %v1321_v59 = vld [vmem:[#allocation2 + $0x322] sm:$0xff] }
  0xf9   : > { %7380 = vmatprep.mubr.msk.bf16.mxu1 %vm18_vm0, %v8718_v41  ;;  %7448 = vmatprep.mubr.msk.bf16.mxu0 %vm18_vm0, %v1346_v42  ;;  %v1350_v42 = vpack.c.bf16 %v1315_v30, %v1314_v27  ;;  %v8756_v27 = vpack.c.bf16 %v326_v17, %v325_v16  ;;  %v1353_v30 = vpack.c.bf16 %v1321_v59, %v1320_v24 }
 0x100   : > { %7381 = vmatmul.mubr.msk.bf16.gmra.mxu1 %vm18_vm0, %v8726_v0  ;;  %7449 = vmatmul.mubr.msk.bf16.gmra.mxu0 %vm18_vm0, %v1347_v4  ;;  %v8746_v4 = vpack.c.bf16 %v322_v46, %v321_v43 }
 0x101   : > { %7384 = vmatprep.mubr.msk.bf16.mxu1 %vm18_vm0, %v8728_v5  ;;  %7452 = vmatprep.mubr.msk.bf16.mxu0 %vm18_vm0, %v1348_v8  ;;  %v1351_v8 = vpack.c.bf16 %v1317_v55, %v1316_v51 }
 0x108   : > { %7385 = vmatmul.mubr.msk.bf16.gmra.mxu1 %vm18_vm0, %v8736_v32  ;;  %7453 = vmatmul.mubr.msk.bf16.gmra.mxu0 %vm18_vm0, %v1349_v34  ;;  %v7897_v34 = vld [vmem:[%s11767_s1 + $0x50] sm:$0xff]  }
 0x109   : > { %7388 = vmatprep.mubr.msk.bf16.mxu1 %vm18_vm0, %v8738_v40  ;;  %7456 = vmatprep.mubr.msk.bf16.mxu0 %vm18_vm0, %v1350_v42  ;;  %v7898_v42 = vld [vmem:[%s11767_s1 + $0x60] sm:$0xff]  }
 0x110   : > { %7389 = vmatmul.mubr.msk.bf16.gmra.mxu1 %vm18_vm0, %v8746_v4  ;;  %7457 = vmatmul.mubr.msk.bf16.gmra.mxu0 %vm18_vm0, %v1351_v8 }
 0x111   : > { %7392 = vmatprep.mubr.msk.bf16.mxu1 %vm18_vm0, %v8748_v12  ;;  %7460 = vmatprep.mubr.msk.bf16.mxu0 %vm18_vm0, %v1352_v15 }
 0x118   : > { %7393 = vmatmul.mubr.msk.bf16.gmra.mxu1 %vm18_vm0, %v8756_v27  ;;  %7461 = vmatmul.mubr.msk.bf16.gmra.mxu0 %vm18_vm0, %v1353_v30 }
 0x119   : > { %7468 = vmatprep.mubr.msk.bf16.mxu1 %vm18_vm0, %v8589_v1  ;;  %7536 = vmatprep.mubr.msk.bf16.mxu0 %vm18_vm0, %v8491_v14 }
 0x120   : > { %v8771_v43 = vpop.f32.mrf.mxu0  ;;  %v8773_v46 = vpop.f32.mrf.mxu1  ;;  %7469 = vmatmul.mubr.msk.bf16.vlgmr.msra.gmra.mxu1 %vm18_vm0, %v8591_v3  ;;  %7537 = vmatmul.mubr.msk.bf16.vlgmr.msra.gmra.mxu0 %vm18_vm0, %v8496_v21  ;;  %v8792_v21 = vld [vmem:[%s11767_s1 + $0x78] sm:$0xff]  }
 0x121   : > { %11851 = vst [vmem:[#allocation3_spill] sm:$0xff] %v8773_v46  ;;  %7601 = vmatpush3.bf16.msra.mxu1 %v8605_v18  ;;  %7669 = vmatpush3.bf16.msra.mxu0 %v8615_v19  ;;  %11853 = vst [vmem:[#allocation5_spill] sm:$0xff] %v8792_v21  ;;  %v8801_v19 = vld [vmem:[%s11767_s1 + $0x88] sm:$0xff]  }
 0x122   : > { %v8781_v14 = vpop.f32.mrf.mxu0  ;;  %v8783_v1 = vpop.f32.mrf.mxu1  ;;  %7472 = vmatprep.mubr.msk.bf16.mxu1 %vm18_vm0, %v8617_v22  ;;  %7540 = vmatprep.mubr.msk.bf16.mxu0 %vm18_vm0, %v8504_v31  ;;  %11855 = vst [vmem:[#allocation7_spill] sm:$0xff] %v8801_v19 }
 0x123   : > { %11852 = vst [vmem:[#allocation4_spill] sm:$0xff] %v8783_v1  ;;  %7602 = vmatprep.subr.bf16.mxu1 %v7897_v34  ;;  %7670 = vmatprep.subr.bf16.mxu0 %v7898_v42 }
 0x124   : > { %v8794_v3 = vpop.f32.mrf.mxu0  ;;  %v8796_v18 = vpop.f32.mrf.mxu1 }
 0x125   : > { %11854 = vst [vmem:[#allocation6_spill] sm:$0xff] %v8796_v18  ;;  %7603 = vmatpush3.bf16.msra.mxu1 %v7897_v34  ;;  %7671 = vmatpush3.bf16.msra.mxu0 %v7898_v42 }
 0x126   : > { %v8803_v22 = vpop.f32.mrf.mxu0  ;;  %v8805_v31 = vpop.f32.mrf.mxu1  ;;  %7736 = vmatprep.subr.bf16.mxu1 %v8792_v21  ;;  %7804 = vmatprep.subr.bf16.mxu0 %v8801_v19 }
 0x127   : > { %11856 = vst [vmem:[#allocation8_spill] sm:$0xff] %v8805_v31 }
 0x128   : > { %v8809_v51 = vpop.f32.mrf.mxu0  ;;  %v8811_v55 = vpop.f32.mrf.mxu1  ;;  %7473 = vmatmul.mubr.msk.bf16.gmra.mxu1 %vm18_vm0, %v8619_v25  ;;  %7541 = vmatmul.mubr.msk.bf16.gmra.mxu0 %vm18_vm0, %v8506_v33 }
 0x129   : > { %11857 = vst [vmem:[#allocation9_spill] sm:$0xff] %v8811_v55  ;;  %7476 = vmatprep.mubr.msk.bf16.mxu1 %vm18_vm0, %v8629_v36  ;;  %7544 = vmatprep.mubr.msk.bf16.mxu0 %vm18_vm0, %v8520_v45 }
 0x12a   : > { %v8821_v56 = vpop.f32.mrf.mxu0  ;;  %v8823_v58 = vpop.f32.mrf.mxu1 }
 0x12b   : > { %11858 = vst [vmem:[#allocation10_spill] sm:$0xff] %v8823_v58 }
 0x12c   : > { %v8825_v61 = vpop.f32.mrf.mxu0  ;;  %v8827_v63 = vpop.f32.mrf.mxu1 }
 0x12d   : > { %11859 = vst [vmem:[#allocation11_spill] sm:$0xff] %v8827_v63 }
 0x12e   : > { %v8829_v8 = vpop.f32.mrf.mxu0  ;;  %v8831_v25 = vpop.f32.mrf.mxu1 }
 0x12f   : > { %11860 = vst [vmem:[#allocation12_spill] sm:$0xff] %v8831_v25 }
 0x130   : > { %v8833_v15 = vpop.f32.mrf.mxu0  ;;  %v8835_v33 = vpop.f32.mrf.mxu1  ;;  %7477 = vmatmul.mubr.msk.bf16.gmra.mxu1 %vm18_vm0, %v8631_v39  ;;  %7545 = vmatmul.mubr.msk.bf16.gmra.mxu0 %vm18_vm0, %v8522_v47 }
 0x131   : > { %11861 = vst [vmem:[#allocation13_spill] sm:$0xff] %v8835_v33  ;;  %7480 = vmatprep.mubr.msk.bf16.mxu1 %vm18_vm0, %v8639_v52  ;;  %7548 = vmatprep.mubr.msk.bf16.mxu0 %vm18_vm0, %v8530_v57 }
 0x132   : > { %v8845_v45 = vpop.f32.mrf.mxu0  ;;  %v8847_v36 = vpop.f32.mrf.mxu1 }
 0x133   : > { %11862 = vst [vmem:[#allocation14_spill] sm:$0xff] %v8847_v36 }
 0x134   : > { %v8849_v16 = vpop.f32.mrf.mxu0  ;;  %v8851_v17 = vpop.f32.mrf.mxu1 }
 0x135   : > { %11863 = vst [vmem:[#allocation15_spill] sm:$0xff] %v8851_v17  ;;  %v2415_v17 = vld [vmem:[#allocation2 + $0x1d1] sm:$0xff] }
 0x136   : > { %v8853_v24 = vpop.f32.mrf.mxu0  ;;  %v8855_v39 = vpop.f32.mrf.mxu1 }
 0x137   : > { %11864 = vst [vmem:[#allocation16_spill] sm:$0xff] %v8855_v39 }
 0x138   : > { %v8857_v59 = vpop.f32.mrf.mxu0  ;;  %v8859_v47 = vpop.f32.mrf.mxu1  ;;  %7481 = vmatmul.mubr.msk.bf16.gmra.mxu1 %vm18_vm0, %v8641_v54  ;;  %7549 = vmatmul.mubr.msk.bf16.gmra.mxu0 %vm18_vm0, %v8537_v60 }
 0x139   : > { %11865 = vst [vmem:[#allocation17_spill] sm:$0xff] %v8859_v47  ;;  %7484 = vmatprep.mubr.msk.bf16.mxu1 %vm18_vm0, %v8649_v6  ;;  %7552 = vmatprep.mubr.msk.bf16.mxu0 %vm18_vm0, %v8552_v7 }
 0x13a   : > { %v8869_v57 = vpop.f32.mrf.mxu0  ;;  %v8871_v52 = vpop.f32.mrf.mxu1 }
 0x13b   : > { %11866 = vst [vmem:[#allocation18_spill] sm:$0xff] %v8871_v52 }
 0x13c   : > { %v8873_v30 = vpop.f32.mrf.mxu0  ;;  %v8875_v34 = vpop.f32.mrf.mxu1 }
 0x13d   : > { %11867 = vst [vmem:[#allocation19_spill] sm:$0xff] %v8875_v34 }
 0x13e   : > { %v8877_v42 = vpop.f32.mrf.mxu0  ;;  %v8879_v54 = vpop.f32.mrf.mxu1 }
 0x13f   : > { %11868 = vst [vmem:[#allocation20_spill] sm:$0xff] %v8879_v54 }
 0x140   : > { %v8881_v47 = vpop.f32.mrf.mxu0  ;;  %v8883_v60 = vpop.f32.mrf.mxu1  ;;  %7485 = vmatmul.mubr.msk.bf16.gmra.mxu1 %vm18_vm0, %v8651_v10  ;;  %7553 = vmatmul.mubr.msk.bf16.gmra.mxu0 %vm18_vm0, %v8554_v9 }
 0x141   : > { %11869 = vst [vmem:[#allocation21_spill] sm:$0xff] %v8883_v60  ;;  %7488 = vmatprep.mubr.msk.bf16.mxu1 %vm18_vm0, %v8659_v26  ;;  %7556 = vmatprep.mubr.msk.bf16.mxu0 %vm18_vm0, %v8562_v20 }
 0x142   : > { %v8893_v7 = vpop.f32.mrf.mxu0  ;;  %v8895_v6 = vpop.f32.mrf.mxu1 }
 0x143   : > { %11870 = vst [vmem:[#allocation22_spill] sm:$0xff] %v8895_v6 }
 0x144   : > { %v8897_v54 = vpop.f32.mrf.mxu0  ;;  %v8899_v34 = vpop.f32.mrf.mxu1 }
 0x145   : > { %11871 = vst [vmem:[#allocation23_spill] sm:$0xff] %v8899_v34 }
 0x146   : > { %v8901_v60 = vpop.f32.mrf.mxu0  ;;  %v8903_v10 = vpop.f32.mrf.mxu1 }
 0x147   : > { %11872 = vst [vmem:[#allocation24_spill] sm:$0xff] %v8903_v10 }
 0x148   : > { %v8905_v52 = vpop.f32.mrf.mxu0  ;;  %v8907_v9 = vpop.f32.mrf.mxu1  ;;  %7489 = vmatmul.mubr.msk.bf16.gmra.mxu1 %vm18_vm0, %v8661_v28  ;;  %7557 = vmatmul.mubr.msk.bf16.gmra.mxu0 %vm18_vm0, %v8564_v23 }
 0x149   : > { %11873 = vst [vmem:[#allocation25_spill] sm:$0xff] %v8907_v9  ;;  %7492 = vmatprep.mubr.msk.bf16.mxu1 %vm18_vm0, %v8669_v44  ;;  %7560 = vmatprep.mubr.msk.bf16.mxu0 %vm18_vm0, %v8572_v35  ;;  %v1850_v35 = vld [vmem:[#allocation2 + $0x180] sm:$0xff]  ;;  %v1851_v44 = vld [vmem:[#allocation2 + $0x188] sm:$0xff] }
 0x14a   : > { %v8917_v20 = vpop.f32.mrf.mxu0  ;;  %v8919_v26 = vpop.f32.mrf.mxu1 }
 0x14b   : > { %11874 = vst [vmem:[#allocation26_spill] sm:$0xff] %v8919_v26 }
 0x14c   : > { %v8921_v10 = vpop.f32.mrf.mxu0  ;;  %v8923_v34 = vpop.f32.mrf.mxu1 }
 0x14d   : > { %11875 = vst [vmem:[#allocation27_spill] sm:$0xff] %v8923_v34  ;;  %v2412_v34 = vld [vmem:[#allocation2 + $0x181] sm:$0xff] }
 0x14e   : > { %v8925_v9 = vpop.f32.mrf.mxu0  ;;  %v8927_v28 = vpop.f32.mrf.mxu1 }
 0x14f   : > { %11876 = vst [vmem:[#allocation28_spill] sm:$0xff] %v8927_v28  ;;  %v2413_v28 = vld [vmem:[#allocation2 + $0x189] sm:$0xff] }
 0x150   : > { %v8929_v6 = vpop.f32.mrf.mxu0  ;;  %v8931_v23 = vpop.f32.mrf.mxu1  ;;  %7493 = vmatmul.mubr.msk.bf16.gmra.mxu1 %vm18_vm0, %v8671_v48  ;;  %7561 = vmatmul.mubr.msk.bf16.gmra.mxu0 %vm18_vm0, %v8574_v37  ;;  %v1899_v37 = vpack.c.bf16 %v1851_v44, %v1850_v35  ;;  %v2461_v33 = vpack.c.bf16 %v2413_v28, %v2412_v34  ;;  %v2416_v35 = vld [vmem:[#allocation2 + $0x1e1] sm:$0xff]  ;;  %v2417_v34 = vld [vmem:[#allocation2 + $0x1e9] sm:$0xff] }
 0x151   : > { %11877 = vst [vmem:[#allocation29_spill] sm:$0xff] %v8931_v23  ;;  %7496 = vmatprep.mubr.msk.bf16.mxu1 %vm18_vm0, %v8679_v2  ;;  %7564 = vmatprep.mubr.msk.bf16.mxu0 %vm18_vm0, %v8582_v49  ;;  %v2414_v23 = vld [vmem:[#allocation2 + $0x1c9] sm:$0xff]  ;;  %v2419_v44 = vld [vmem:[#allocation2 + $0x201] sm:$0xff] }
 0x152   : > { %v8941_v26 = vpop.f32.mrf.mxu0  ;;  %v8943_v39 = vpop.f32.mrf.mxu1  ;;  %v2462_v25 = vpack.c.bf16 %v2415_v17, %v2414_v23  ;;  %v2418_v23 = vld [vmem:[#allocation2 + $0x1f9] sm:$0xff] }
 0x153   : > { %11878 = vst [vmem:[#allocation30_spill] sm:$0xff] %v8943_v39 }
 0x154   : > { %v8945_v48 = vpop.f32.mrf.mxu0  ;;  %v8947_v36 = vpop.f32.mrf.mxu1 }
 0x155   : > { %11879 = vst [vmem:[#allocation31_spill] sm:$0xff] %v8947_v36  ;;  %v2464_v36 = vpack.c.bf16 %v2419_v44, %v2418_v23 }
 0x156   : > { %v8949_v2 = vpop.f32.mrf.mxu0  ;;  %v8951_v63 = vpop.f32.mrf.mxu1 }
 0x157   : > { %11880 = vst [vmem:[#allocation32_spill] sm:$0xff] %v8951_v63 }
 0x158   : > { %v8953_v49 = vpop.f32.mrf.mxu0  ;;  %v8955_v58 = vpop.f32.mrf.mxu1  ;;  %7497 = vmatmul.mubr.msk.bf16.gmra.mxu1 %vm18_vm0, %v1899_v37  ;;  %7565 = vmatmul.mubr.msk.bf16.gmra.mxu0 %vm18_vm0, %v2461_v33  ;;  %v2463_v37 = vpack.c.bf16 %v2417_v34, %v2416_v35  ;;  %v2420_v35 = vld [vmem:[#allocation2 + $0x211] sm:$0xff]  ;;  %v2421_v34 = vld [vmem:[#allocation2 + $0x219] sm:$0xff] }
 0x159   : > { %11881 = vst [vmem:[#allocation33_spill] sm:$0xff] %v8955_v58  ;;  %7500 = vmatprep.mubr.msk.bf16.mxu1 %vm18_vm0, %v8686_v62  ;;  %7568 = vmatprep.mubr.msk.bf16.mxu0 %vm18_vm0, %v2462_v25 }
 0x15a   : > { %v8962_v17 = vpop.f32.mrf.mxu0  ;;  %v8964_v28 = vpop.f32.mrf.mxu1 }
 0x15b   : > { %11882 = vst [vmem:[#allocation34_spill] sm:$0xff] %v8964_v28 }
 0x15c   : > { %v8966_v63 = vpop.f32.mrf.mxu0  ;;  %v8968_v58 = vpop.f32.mrf.mxu1 }
 0x15d   : > { %11883 = vst [vmem:[#allocation35_spill] sm:$0xff] %v8968_v58  ;;  %v2422_v58 = vld [vmem:[#allocation2 + $0x229] sm:$0xff] }
 0x15e   : > { %v8970_v33 = vpop.f32.mrf.mxu0  ;;  %v8972_v39 = vpop.f32.mrf.mxu1 }
 0x15f   : > { %11884 = vst [vmem:[#allocation36_spill] sm:$0xff] %v8970_v33  ;;  %11885 = vst [vmem:[#allocation37_spill] sm:$0xff] %v8972_v39  ;;  %v2423_v39 = vld [vmem:[#allocation2 + $0x231] sm:$0xff] }
 0x160   : > { %v7334_v62 = vpop.f32.mrf.mxu1  ;;  %v7402_v25 = vpop.f32.mrf.mxu0  ;;  %7501 = vmatmul.mubr.msk.bf16.gmra.mxu1 %vm18_vm0, %v8688_v29  ;;  %7569 = vmatmul.mubr.msk.bf16.gmra.mxu0 %vm18_vm0, %v2463_v37  ;;  %v2465_v37 = vpack.c.bf16 %v2421_v34, %v2420_v35 }
 0x161   : > { %v1012_v28 = vadd.f32 %v7334_v62, %v8771_v43  ;;  %7504 = vmatprep.mubr.msk.bf16.mxu1 %vm18_vm0, %v8696_v50  ;;  %7572 = vmatprep.mubr.msk.bf16.mxu0 %vm18_vm0, %v2464_v36  ;;  %v2466_v50 = vpack.c.bf16 %v2423_v39, %v2422_v58  ;;  %v2426_v39 = vld [vmem:[#allocation2 + $0x259] sm:$0xff] }
 0x162   : > { %v1003_v23 = vpop.f32.mrf.mxu1  ;;  %v1501_v44 = vpop.f32.mrf.mxu0 }
 0x163   : > { %v8981_v55 = vadd.f32 %v7402_v25, %v1012_v28  ;;  %v1004_v31 = vadd.f32 %v1003_v23, %v8781_v14  ;;  %v2427_v28 = vld [vmem:[#allocation2 + $0x261] sm:$0xff] }
 0x164   : > { %v7335_v29 = vpop.f32.mrf.mxu1  ;;  %v7403_v18 = vpop.f32.mrf.mxu0 }
 0x165   : > { %v8984_v1 = vadd.f32 %v1501_v44, %v1004_v31  ;;  %v1015_v43 = vadd.f32 %v7335_v29, %v8794_v3  ;;  %v2424_v3 = vld [vmem:[#allocation2 + $0x241] sm:$0xff] }
 0x166   : > { %v1006_v62 = vpop.f32.mrf.mxu1  ;;  %v1504_v36 = vpop.f32.mrf.mxu0 }
 0x167   : > { %v8987_v19 = vadd.f32 %v7403_v18, %v1015_v43  ;;  %v1007_v21 = vadd.f32 %v1006_v62, %v8803_v22  ;;  %v2425_v18 = vld [vmem:[#allocation2 + $0x249] sm:$0xff]  ;;  %v2429_v62 = vld [vmem:[#allocation2 + $0x279] sm:$0xff] }
 0x168   : > { %v7338_v46 = vpop.f32.mrf.mxu1  ;;  %v7406_v33 = vpop.f32.mrf.mxu0  ;;  %7505 = vmatmul.mubr.msk.bf16.gmra.mxu1 %vm18_vm0, %v8698_v53  ;;  %7573 = vmatmul.mubr.msk.bf16.gmra.mxu0 %vm18_vm0, %v2465_v37  ;;  %v2467_v34 = vpack.c.bf16 %v2425_v18, %v2424_v3  ;;  %v2431_v3 = vld [vmem:[#allocation2 + $0x291] sm:$0xff] }
 0x169   : > { %v8993_v14 = vadd.f32 %v1504_v36, %v1007_v21  ;;  %v1028_v31 = vadd.f32 %v7338_v46, %v8809_v51  ;;  %7508 = vmatprep.mubr.msk.bf16.mxu1 %vm18_vm0, %v8706_v11  ;;  %7576 = vmatprep.mubr.msk.bf16.mxu0 %vm18_vm0, %v2466_v50  ;;  %v2468_v11 = vpack.c.bf16 %v2427_v28, %v2426_v39 }
 0x16a   : > { %v1019_v58 = vpop.f32.mrf.mxu1  ;;  %v1517_v22 = vpop.f32.mrf.mxu0 }
 0x16b   : > { %v8999_v25 = vadd.f32 %v7406_v33, %v1028_v31  ;;  %v1020_v53 = vadd.f32 %v1019_v58, %v8821_v56  ;;  %v2430_v31 = vld [vmem:[#allocation2 + $0x289] sm:$0xff] }
 0x16c   : > { %v7339_v35 = vpop.f32.mrf.mxu1  ;;  %v7407_v21 = vpop.f32.mrf.mxu0 }
 0x16d   : > { %v9002_v23 = vadd.f32 %v1517_v22, %v1020_v53  ;;  %v1031_v46 = vadd.f32 %v7339_v35, %v8825_v61  ;;  %v2428_v61 = vld [vmem:[#allocation2 + $0x271] sm:$0xff] }
 0x16e   : > { %v1022_v51 = vpop.f32.mrf.mxu1  ;;  %v1520_v44 = vpop.f32.mrf.mxu0  ;;  %v2469_v39 = vpack.c.bf16 %v2429_v62, %v2428_v61 }
 0x16f   : > { %v9005_v29 = vadd.f32 %v7407_v21, %v1031_v46  ;;  %v1023_v37 = vadd.f32 %v1022_v51, %v8829_v8 }
 0x170   : > { %v7342_v43 = vpop.f32.mrf.mxu1  ;;  %v7410_v50 = vpop.f32.mrf.mxu0  ;;  %7509 = vmatmul.mubr.msk.bf16.gmra.mxu1 %vm18_vm0, %v8708_v13  ;;  %7577 = vmatmul.mubr.msk.bf16.gmra.mxu0 %vm18_vm0, %v2467_v34 }
 0x171   : > { %v9011_v56 = vadd.f32 %v1520_v44, %v1023_v37  ;;  %v1044_v33 = vadd.f32 %v7342_v43, %v8833_v15  ;;  %7512 = vmatprep.mubr.msk.bf16.mxu1 %vm18_vm0, %v8716_v38  ;;  %7580 = vmatprep.mubr.msk.bf16.mxu0 %vm18_vm0, %v2468_v11  ;;  %v2470_v38 = vpack.c.bf16 %v2431_v3, %v2430_v31  ;;  %v2433_v44 = vld [vmem:[#allocation2 + $0x2a9] sm:$0xff]  ;;  %v2434_v43 = vld [vmem:[#allocation2 + $0x2b9] sm:$0xff] }
 0x172   : > { %v1035_v36 = vpop.f32.mrf.mxu1  ;;  %v1533_v8 = vpop.f32.mrf.mxu0 }
 0x173   : > { %v9017_v18 = vadd.f32 %v7410_v50, %v1044_v33  ;;  %v1036_v13 = vadd.f32 %v1035_v36, %v8845_v45  ;;  %v2435_v50 = vld [vmem:[#allocation2 + $0x2c1] sm:$0xff] }
 0x174   : > { %v7343_v58 = vpop.f32.mrf.mxu1  ;;  %v7411_v22 = vpop.f32.mrf.mxu0 }
 0x175   : > { %v9020_v28 = vadd.f32 %v1533_v8, %v1036_v13  ;;  %v1047_v15 = vadd.f32 %v7343_v58, %v8849_v16  ;;  %v2432_v16 = vld [vmem:[#allocation2 + $0x2a1] sm:$0xff] }
 0x176   : > { %v1038_v53 = vpop.f32.mrf.mxu1  ;;  %v1536_v35 = vpop.f32.mrf.mxu0  ;;  %v2471_v36 = vpack.c.bf16 %v2433_v44, %v2432_v16 }
 0x177   : > { %v9023_v21 = vadd.f32 %v7411_v22, %v1047_v15  ;;  %v1039_v34 = vadd.f32 %v1038_v53, %v8853_v24 }
 0x178   : > { %v7346_v46 = vpop.f32.mrf.mxu1  ;;  %v7414_v11 = vpop.f32.mrf.mxu0  ;;  %7513 = vmatmul.mubr.msk.bf16.gmra.mxu1 %vm18_vm0, %v8718_v41  ;;  %7581 = vmatmul.mubr.msk.bf16.gmra.mxu0 %vm18_vm0, %v2469_v39 }
 0x179   : > { %v9029_v45 = vadd.f32 %v1536_v35, %v1039_v34  ;;  %v1060_v51 = vadd.f32 %v7346_v46, %v8857_v59  ;;  %7516 = vmatprep.mubr.msk.bf16.mxu1 %vm18_vm0, %v8726_v0  ;;  %7584 = vmatprep.mubr.msk.bf16.mxu0 %vm18_vm0, %v2470_v38  ;;  %v2472_v0 = vpack.c.bf16 %v2435_v50, %v2434_v43  ;;  %v2437_v38 = vld [vmem:[#allocation2 + $0x2d9] sm:$0xff]  ;;  %v2438_v35 = vld [vmem:[#allocation2 + $0x2e9] sm:$0xff]  ;;  %v2439_v34 = vld [vmem:[#allocation2 + $0x2f1] sm:$0xff] }
 0x17a   : > { %v1051_v37 = vpop.f32.mrf.mxu1  ;;  %v1549_v24 = vpop.f32.mrf.mxu0 }
 0x17b   : > { %v9035_v33 = vadd.f32 %v7414_v11, %v1060_v51  ;;  %v1052_v41 = vadd.f32 %v1051_v37, %v8869_v57 }
 0x17c   : > { %v7347_v61 = vpop.f32.mrf.mxu1  ;;  %v7415_v62 = vpop.f32.mrf.mxu0 }
 0x17d   : > { %v9038_v8 = vadd.f32 %v1549_v24, %v1052_v41  ;;  %v1063_v59 = vadd.f32 %v7347_v61, %v8873_v30  ;;  %v2436_v30 = vld [vmem:[#allocation2 + $0x2d1] sm:$0xff] }
 0x17e   : > { %v1054_v31 = vpop.f32.mrf.mxu1  ;;  %v1552_v3 = vpop.f32.mrf.mxu0  ;;  %v2473_v16 = vpack.c.bf16 %v2437_v38, %v2436_v30 }
 0x17f   : > { %v9041_v13 = vadd.f32 %v7415_v62, %v1063_v59  ;;  %v1055_v58 = vadd.f32 %v1054_v31, %v8877_v42  ;;  %v2443_v31 = vld [vmem:[#allocation2 + $0x321] sm:$0xff] }
 0x180   : > { %v7350_v22 = vpop.f32.mrf.mxu1  ;;  %v7418_v39 = vpop.f32.mrf.mxu0  ;;  %7517 = vmatmul.mubr.msk.bf16.gmra.mxu1 %vm18_vm0, %v8728_v5  ;;  %7585 = vmatmul.mubr.msk.bf16.gmra.mxu0 %vm18_vm0, %v2471_v36  ;;  %v2441_v36 = vld [vmem:[#allocation2 + $0x309] sm:$0xff] }
 0x181   : > { %v9047_v57 = vadd.f32 %v1552_v3, %v1055_v58  ;;  %v1076_v15 = vadd.f32 %v7350_v22, %v8881_v47  ;;  %7520 = vmatprep.mubr.msk.bf16.mxu1 %vm18_vm0, %v8736_v32  ;;  %7588 = vmatprep.mubr.msk.bf16.mxu0 %vm18_vm0, %v2472_v0  ;;  %v2474_v32 = vpack.c.bf16 %v2439_v34, %v2438_v35  ;;  %v2442_v0 = vld [vmem:[#allocation2 + $0x319] sm:$0xff] }
 0x182   : > { %v1067_v53 = vpop.f32.mrf.mxu1  ;;  %v1565_v42 = vpop.f32.mrf.mxu0 }
 0x183   : > { %v9053_v46 = vadd.f32 %v7418_v39, %v1076_v15  ;;  %v1068_v5 = vadd.f32 %v1067_v53, %v8893_v7 }
 0x184   : > { %v7351_v11 = vpop.f32.mrf.mxu1  ;;  %v7419_v51 = vpop.f32.mrf.mxu0 }
 0x185   : > { %v9056_v44 = vadd.f32 %v1565_v42, %v1068_v5  ;;  %v1079_v47 = vadd.f32 %v7351_v11, %v8897_v54  ;;  %v2440_v54 = vld [vmem:[#allocation2 + $0x301] sm:$0xff]  ;;  %v1883_v5 = vld [vmem:[#allocation2 + $0x338] sm:$0xff] }
 0x186   : > { %v1070_v37 = vpop.f32.mrf.mxu1  ;;  %v1568_v24 = vpop.f32.mrf.mxu0  ;;  %v2475_v39 = vpack.c.bf16 %v2441_v36, %v2440_v54 }
 0x187   : > { %v9059_v43 = vadd.f32 %v7419_v51, %v1079_v47  ;;  %v1071_v50 = vadd.f32 %v1070_v37, %v8901_v60  ;;  %v2444_v51 = vld [vmem:[#allocation2 + $0x331] sm:$0xff]  ;;  %v2945_v37 = vld [vmem:[#allocation2 + $0x22] sm:$0xff] }
 0x188   : > { %v7354_v41 = vpop.f32.mrf.mxu1  ;;  %v7422_v61 = vpop.f32.mrf.mxu0  ;;  %7521 = vmatmul.mubr.msk.bf16.gmra.mxu1 %vm18_vm0, %v8738_v40  ;;  %7589 = vmatmul.mubr.msk.bf16.gmra.mxu0 %vm18_vm0, %v2473_v16  ;;  %v2944_v16 = vld [vmem:[#allocation2 + $0x1a] sm:$0xff] }
 0x189   : > { %v9065_v7 = vadd.f32 %v1568_v24, %v1071_v50  ;;  %v1092_v62 = vadd.f32 %v7354_v41, %v8905_v52  ;;  %7524 = vmatprep.mubr.msk.bf16.mxu1 %vm18_vm0, %v8746_v4  ;;  %7592 = vmatprep.mubr.msk.bf16.mxu0 %vm18_vm0, %v2474_v32  ;;  %v2476_v4 = vpack.c.bf16 %v2443_v31, %v2442_v0  ;;  %v3508_v24 = vld [vmem:[#allocation2 + $0x38] sm:$0xff] }
 0x18a   : > { %v1083_v59 = vpop.f32.mrf.mxu1  ;;  %v1581_v60 = vpop.f32.mrf.mxu0 }
 0x18b   : > { %v9071_v3 = vadd.f32 %v7422_v61, %v1092_v62  ;;  %v1084_v40 = vadd.f32 %v1083_v59, %v8917_v20  ;;  %v1882_v20 = vld [vmem:[#allocation2 + $0x330] sm:$0xff]  ;;  %v3008_v59 = vpack.c.bf16 %v2945_v37, %v2944_v16 }
 0x18c   : > { %v7355_v58 = vpop.f32.mrf.mxu1  ;;  %v7423_v22 = vpop.f32.mrf.mxu0 }
 0x18d   : > { %v9074_v15 = vadd.f32 %v1581_v60, %v1084_v40  ;;  %v1095_v52 = vadd.f32 %v7355_v58, %v8921_v10 }
 0x18e   : > { %v1086_v30 = vpop.f32.mrf.mxu1  ;;  %v1584_v38 = vpop.f32.mrf.mxu0 }
 0x18f   : > { %v9077_v53 = vadd.f32 %v7423_v22, %v1095_v52  ;;  %v1087_v42 = vadd.f32 %v1086_v30, %v8925_v9  ;;  %v2445_v9 = vld [vmem:[#allocation2 + $0x339] sm:$0xff]  ;;  %v3509_v30 = vld [vmem:[#allocation2 + $0x48] sm:$0xff] }
 0x190   : > { %v7358_v35 = vpop.f32.mrf.mxu1  ;;  %v7426_v34 = vpop.f32.mrf.mxu0  ;;  %7525 = vmatmul.mubr.msk.bf16.gmra.mxu1 %vm18_vm0, %v8748_v12  ;;  %7593 = vmatmul.mubr.msk.bf16.gmra.mxu0 %vm18_vm0, %v2475_v39  ;;  %v3507_v12 = vld [vmem:[#allocation2 + $0x30] sm:$0xff]  ;;  %v2477_v54 = vpack.c.bf16 %v2445_v9, %v2444_v51  ;;  %v3512_v51 = vld [vmem:[#allocation2 + $0x68] sm:$0xff] }
 0x191   : > { %v9083_v11 = vadd.f32 %v1584_v38, %v1087_v42  ;;  %v1108_v10 = vadd.f32 %v7358_v35, %v8929_v6  ;;  %7528 = vmatprep.mubr.msk.bf16.mxu1 %vm18_vm0, %v8756_v27  ;;  %7596 = vmatprep.mubr.msk.bf16.mxu0 %vm18_vm0, %v2476_v4  ;;  %v1915_v6 = vpack.c.bf16 %v1883_v5, %v1882_v20  ;;  %v3510_v38 = vld [vmem:[#allocation2 + $0x50] sm:$0xff] }
 0x192   : > { %v1099_v47 = vpop.f32.mrf.mxu1  ;;  %v1597_v32 = vpop.f32.mrf.mxu0  ;;  %v3571_v60 = vpack.c.bf16 %v3508_v24, %v3507_v12  ;;  %v2948_v35 = vld [vmem:[#allocation2 + $0x4a] sm:$0xff]  ;;  %v2949_v5 = vld [vmem:[#allocation2 + $0x52] sm:$0xff] }
 0x193   : > { %v9089_v50 = vadd.f32 %v7426_v34, %v1108_v10  ;;  %v1100_v41 = vadd.f32 %v1099_v47, %v8941_v26  ;;  %v2946_v26 = vld [vmem:[#allocation2 + $0x32] sm:$0xff]  ;;  %v3511_v10 = vld [vmem:[#allocation2 + $0x60] sm:$0xff]  ;;  %v3572_v47 = vpack.c.bf16 %v3510_v38, %v3509_v30 }
 0x194   : > { %v7359_v61 = vpop.f32.mrf.mxu1  ;;  %v7427_v62 = vpop.f32.mrf.mxu0  ;;  %v2952_v30 = vld [vmem:[#allocation2 + $0x7a] sm:$0xff]  ;;  %v2953_v38 = vld [vmem:[#allocation2 + $0x82] sm:$0xff] }
 0x195   : > { %v9092_v36 = vadd.f32 %v1597_v32, %v1100_v41  ;;  %v1111_v27 = vadd.f32 %v7359_v61, %v8945_v48  ;;  %v2947_v48 = vld [vmem:[#allocation2 + $0x3a] sm:$0xff]  ;;  %v9111_v41 = vpack.c.bf16 %v2949_v5, %v2948_v35  ;;  %v3573_v61 = vpack.c.bf16 %v3512_v51, %v3511_v10  ;;  %v3515_v35 = vld [vmem:[#allocation2 + $0x90] sm:$0xff]  ;;  %v11890_v10 = vld [vmem:[#allocation4_spill] sm:$0xff] }
 0x196   : > { %v1102_v0 = vpop.f32.mrf.mxu1  ;;  %v1600_v31 = vpop.f32.mrf.mxu0 }
 0x197   : > { %v9095_v40 = vadd.f32 %v7427_v62, %v1111_v27  ;;  %v1103_v58 = vadd.f32 %v1102_v0, %v8949_v2  ;;  %v7902_v27 = vld [vmem:[%s11767_s1 + $0x80] sm:$0xff]   ;;  %v2951_v0 = vld [vmem:[#allocation2 + $0x6a] sm:$0xff] }
 0x198   : > { %v7362_v22 = vpop.f32.mrf.mxu1  ;;  %v7430_v39 = vpop.f32.mrf.mxu0  ;;  %7529 = vmatmul.mubr.msk.bf16.gmra.mxu1 %vm18_vm0, %v1915_v6  ;;  %7597 = vmatmul.mubr.msk.bf16.gmra.mxu0 %vm18_vm0, %v2477_v54  ;;  %v11886_v6 = vld [vmem:[#allocation36_spill] sm:$0xff]  ;;  %v7901_v54 = vld [vmem:[%s11767_s1 + $0x70] sm:$0xff]  }
 0x199   : > { %v9100_v52 = vadd.f32 %v1600_v31, %v1103_v58  ;;  %v1124_v4 = vadd.f32 %v7362_v22, %v8953_v49  ;;  %7604 = vmatprep.mubr.msk.bf16.mxu1 %vm18_vm0, %v3008_v59  ;;  %7672 = vmatprep.mubr.msk.bf16.mxu0 %vm18_vm0, %v3571_v60  ;;  %v3009_v49 = vpack.c.bf16 %v2947_v48, %v2946_v26  ;;  %v3513_v31 = vld [vmem:[#allocation2 + $0x78] sm:$0xff]  ;;  %v11887_v22 = vld [vmem:[#allocation3_spill] sm:$0xff]  ;;  %v11888_v26 = vld [vmem:[#allocation5_spill] sm:$0xff] }
 0x19a   : > { %v1115_v42 = vpop.f32.mrf.mxu1  ;;  %v1613_v2 = vpop.f32.mrf.mxu0  ;;  %v3514_v48 = vld [vmem:[#allocation2 + $0x80] sm:$0xff] }
 0x19b   : > { %v9105_v34 = vadd.f32 %v7430_v39, %v1124_v4  ;;  %v1116_v20 = vadd.f32 %v1115_v42, %v8962_v17  ;;  %v11889_v4 = vld [vmem:[#allocation7_spill] sm:$0xff] }
 0x19c   : > { %v7363_v9 = vpop.f32.mrf.mxu1  ;;  %v7431_v16 = vpop.f32.mrf.mxu0 }
 0x19d   : > { %v9108_v32 = vadd.f32 %v1613_v2, %v1116_v20  ;;  %v1127_v37 = vadd.f32 %v7363_v9, %v8966_v63  ;;  %v2950_v63 = vld [vmem:[#allocation2 + $0x62] sm:$0xff]  ;;  %v3516_v20 = vld [vmem:[#allocation2 + $0x98] sm:$0xff] }
 0x19e   : > { %v1118_v12 = vpop.f32.mrf.mxu1  ;;  %v1616_v24 = vpop.f32.mrf.mxu0 }
 0x19f   : > { %v9113_v62 = vadd.f32 %v7431_v16, %v1127_v37  ;;  %v1119_v17 = vadd.f32 %v1118_v12, %v11886_v6  ;;  %v9135_v37 = vpack.c.bf16 %v2953_v38, %v2952_v30  ;;  %v2956_v38 = vld [vmem:[#allocation2 + $0xaa] sm:$0xff] }
 0x1a0   : > { %v7366_v59 = vpop.f32.mrf.mxu1  ;;  %v7434_v60 = vpop.f32.mrf.mxu0  ;;  %7605 = vmatmul.mubr.msk.bf16.vlgmr.msra.gmra.mxu1 %vm18_vm0, %v3009_v49  ;;  %7673 = vmatmul.mubr.msk.bf16.vlgmr.msra.gmra.mxu0 %vm18_vm0, %v3572_v47  ;;  %v3011_v49 = vpack.c.bf16 %v2951_v0, %v2950_v63  ;;  %v3574_v47 = vpack.c.bf16 %v3514_v48, %v3513_v31  ;;  %v2954_v63 = vld [vmem:[#allocation2 + $0x92] sm:$0xff]  ;;  %v2955_v0 = vld [vmem:[#allocation2 + $0x9a] sm:$0xff] }
 0x1a1   : > { %v9124_v58 = vadd.f32 %v1616_v24, %v1119_v17  ;;  %v1140_v39 = vadd.f32 %v7366_v59, %v11887_v22  ;;  %7737 = vmatpush3.bf16.msra.mxu1 %v11888_v26  ;;  %7805 = vmatpush3.bf16.msra.mxu0 %v11889_v4  ;;  %11891 = vst [vmem:[#allocation36_spill] sm:$0xff] %v9135_v37  ;;  %v11892_v24 = vld [vmem:[#allocation6_spill] sm:$0xff]  ;;  %v11894_v22 = vld [vmem:[#allocation8_spill] sm:$0xff]  ;;  %v11896_v48 = vld [vmem:[#allocation9_spill] sm:$0xff] }
 0x1a2   : > { %v1131_v42 = vpop.f32.mrf.mxu1  ;;  %v1629_v2 = vpop.f32.mrf.mxu0  ;;  %7608 = vmatprep.mubr.msk.bf16.mxu1 %vm18_vm0, %v9111_v41  ;;  %7676 = vmatprep.mubr.msk.bf16.mxu0 %vm18_vm0, %v3573_v61  ;;  %v3575_v17 = vpack.c.bf16 %v3516_v20, %v3515_v35  ;;  %v2957_v35 = vld [vmem:[#allocation2 + $0xb2] sm:$0xff]  ;;  %v3519_v20 = vld [vmem:[#allocation2 + $0xc0] sm:$0xff] }
 0x1a3   : > { %v9132_v5 = vadd.f32 %v7434_v60, %v1140_v39  ;;  %v1132_v51 = vadd.f32 %v1131_v42, %v11890_v10  ;;  %7738 = vmatprep.subr.bf16.mxu1 %v7901_v54  ;;  %7806 = vmatprep.subr.bf16.mxu0 %v7902_v27  ;;  %v3520_v10 = vld [vmem:[#allocation2 + $0xc8] sm:$0xff] }
 0x1a4   : > { %v7367_v9 = vpop.f32.mrf.mxu1  ;;  %v7435_v16 = vpop.f32.mrf.mxu0 }
 0x1a5   : > { %v9137_v12 = vadd.f32 %v1629_v2, %v1132_v51  ;;  %v1143_v6 = vadd.f32 %v7367_v9, %v11892_v24  ;;  %7739 = vmatpush3.bf16.msra.mxu1 %v7901_v54  ;;  %7807 = vmatpush3.bf16.msra.mxu0 %v7902_v27  ;;  %v3517_v54 = vld [vmem:[#allocation2 + $0xa8] sm:$0xff]  ;;  %v3518_v27 = vld [vmem:[#allocation2 + $0xb0] sm:$0xff]  ;;  %v11898_v9 = vld [vmem:[#allocation10_spill] sm:$0xff]  ;;  %v3013_v24 = vpack.c.bf16 %v2955_v0, %v2954_v63 }
 0x1a6   : > { %v1134_v61 = vpop.f32.mrf.mxu1  ;;  %v1632_v59 = vpop.f32.mrf.mxu0  ;;  %v2958_v63 = vld [vmem:[#allocation2 + $0xc2] sm:$0xff]  ;;  %v2959_v0 = vld [vmem:[#allocation2 + $0xca] sm:$0xff] }
 0x1a7   : > { %v9140_v60 = vadd.f32 %v7435_v16, %v1143_v6  ;;  %v1135_v39 = vadd.f32 %v1134_v61, %v11894_v22  ;;  %v3576_v6 = vpack.c.bf16 %v3518_v27, %v3517_v54  ;;  %v9157_v22 = vpack.c.bf16 %v2957_v35, %v2956_v38  ;;  %v11905_v27 = vld [vmem:[#allocation13_spill] sm:$0xff] }
 0x1a8   : > { %v7370_v26 = vpop.f32.mrf.mxu1  ;;  %v7438_v4 = vpop.f32.mrf.mxu0  ;;  %7609 = vmatmul.mubr.msk.bf16.gmra.mxu1 %vm18_vm0, %v3011_v49  ;;  %7677 = vmatmul.mubr.msk.bf16.gmra.mxu0 %vm18_vm0, %v3574_v47 }
 0x1a9   : > { %11893 = vst [vmem:[#allocation3_spill] sm:$0xff] %v9140_v60  ;;  %v9145_v31 = vadd.f32 %v1632_v59, %v1135_v39  ;;  %v1156_v30 = vadd.f32 %v7370_v26, %v11896_v48  ;;  %7612 = vmatprep.mubr.msk.bf16.mxu1 %vm18_vm0, %v9135_v37  ;;  %7680 = vmatprep.mubr.msk.bf16.mxu0 %vm18_vm0, %v3575_v17  ;;  %v11900_v59 = vld [vmem:[#allocation11_spill] sm:$0xff]  ;;  %11901 = vst [vmem:[#allocation6_spill] sm:$0xff] %v9157_v22 }
 0x1aa   : > { %v1147_v42 = vpop.f32.mrf.mxu1  ;;  %v1645_v2 = vpop.f32.mrf.mxu0  ;;  %v3577_v39 = vpack.c.bf16 %v3520_v10, %v3519_v20  ;;  %v2961_v10 = vld [vmem:[#allocation2 + $0xe2] sm:$0xff] }
 0x1ab   : > { %11895 = vst [vmem:[#allocation5_spill] sm:$0xff] %v9145_v31  ;;  %v9151_v51 = vadd.f32 %v7438_v4, %v1156_v30  ;;  %v1148_v16 = vadd.f32 %v1147_v42, %v11898_v9  ;;  %v11903_v31 = vld [vmem:[#allocation12_spill] sm:$0xff]  ;;  %v3521_v42 = vld [vmem:[#allocation2 + $0xd8] sm:$0xff]  ;;  %v3523_v9 = vld [vmem:[#allocation2 + $0xf0] sm:$0xff] }
 0x1ac   : > { %v7371_v49 = vpop.f32.mrf.mxu1  ;;  %v7439_v47 = vpop.f32.mrf.mxu0 }
 0x1ad   : > { %11897 = vst [vmem:[#allocation7_spill] sm:$0xff] %v9151_v51  ;;  %v9154_v61 = vadd.f32 %v1645_v2, %v1148_v16  ;;  %v1159_v17 = vadd.f32 %v7371_v49, %v11900_v59  ;;  %v3522_v2 = vld [vmem:[#allocation2 + $0xe0] sm:$0xff]  ;;  %v3524_v16 = vld [vmem:[#allocation2 + $0xf8] sm:$0xff] }
 0x1ae   : > { %v1150_v26 = vpop.f32.mrf.mxu1  ;;  %v1648_v48 = vpop.f32.mrf.mxu0 }
 0x1af   : > { %11899 = vst [vmem:[#allocation4_spill] sm:$0xff] %v9154_v61  ;;  %v9159_v37 = vadd.f32 %v7439_v47, %v1159_v17  ;;  %v1151_v4 = vadd.f32 %v1150_v26, %v11903_v31  ;;  %v2960_v31 = vld [vmem:[#allocation2 + $0xda] sm:$0xff]  ;;  %v3015_v17 = vpack.c.bf16 %v2959_v0, %v2958_v63  ;;  %v3578_v26 = vpack.c.bf16 %v3522_v2, %v3521_v42  ;;  %v11912_v61 = vld [vmem:[#allocation16_spill] sm:$0xff]  ;;  %v2962_v63 = vld [vmem:[#allocation2 + $0xf2] sm:$0xff] }
 0x1b0   : > { %v7374_v30 = vpop.f32.mrf.mxu1  ;;  %v7442_v51 = vpop.f32.mrf.mxu0  ;;  %7613 = vmatmul.mubr.msk.bf16.gmra.mxu1 %vm18_vm0, %v3013_v24  ;;  %7681 = vmatmul.mubr.msk.bf16.gmra.mxu0 %vm18_vm0, %v3576_v6  ;;  %v11907_v47 = vld [vmem:[#allocation14_spill] sm:$0xff]  ;;  %v11914_v2 = vld [vmem:[#allocation17_spill] sm:$0xff] }
 0x1b1   : > { %11902 = vst [vmem:[#allocation8_spill] sm:$0xff] %v9159_v37  ;;  %v9164_v54 = vadd.f32 %v1648_v48, %v1151_v4  ;;  %v1172_v38 = vadd.f32 %v7374_v30, %v11905_v27  ;;  %7616 = vmatprep.mubr.msk.bf16.mxu1 %vm18_vm0, %v9157_v22  ;;  %7684 = vmatprep.mubr.msk.bf16.mxu0 %vm18_vm0, %v3577_v39  ;;  %v11909_v4 = vld [vmem:[#allocation15_spill] sm:$0xff] }
 0x1b2   : > { %v1163_v35 = vpop.f32.mrf.mxu1  ;;  %v1661_v20 = vpop.f32.mrf.mxu0  ;;  %v9176_v30 = vpack.c.bf16 %v2961_v10, %v2960_v31  ;;  %v3579_v27 = vpack.c.bf16 %v3524_v16, %v3523_v9  ;;  %v2963_v0 = vld [vmem:[#allocation2 + $0xfa] sm:$0xff]  ;;  %v2965_v9 = vld [vmem:[#allocation2 + $0x112] sm:$0xff] }
 0x1b3   : > { %11904 = vst [vmem:[#allocation9_spill] sm:$0xff] %v9164_v54  ;;  %v9170_v49 = vadd.f32 %v7442_v51, %v1172_v38  ;;  %v1164_v24 = vadd.f32 %v1163_v35, %v11907_v47  ;;  %v3525_v35 = vld [vmem:[#allocation2 + $0x108] sm:$0xff]  ;;  %v3527_v16 = vld [vmem:[#allocation2 + $0x120] sm:$0xff] }
 0x1b4   : > { %v7375_v6 = vpop.f32.mrf.mxu1  ;;  %v7443_v59 = vpop.f32.mrf.mxu0  ;;  %11910 = vst [vmem:[#allocation12_spill] sm:$0xff] %v9176_v30  ;;  %v3528_v47 = vld [vmem:[#allocation2 + $0x128] sm:$0xff] }
 0x1b5   : > { %11906 = vst [vmem:[#allocation10_spill] sm:$0xff] %v9170_v49  ;;  %v9173_v48 = vadd.f32 %v1661_v20, %v1164_v24  ;;  %v1175_v39 = vadd.f32 %v7375_v6, %v11909_v4  ;;  %v3526_v20 = vld [vmem:[#allocation2 + $0x110] sm:$0xff]  ;;  %v11916_v6 = vld [vmem:[#allocation18_spill] sm:$0xff] }
 0x1b6   : > { %v1166_v22 = vpop.f32.mrf.mxu1  ;;  %v1664_v54 = vpop.f32.mrf.mxu0  ;;  %v3580_v4 = vpack.c.bf16 %v3526_v20, %v3525_v35  ;;  %v11923_v20 = vld [vmem:[#allocation21_spill] sm:$0xff] }
 0x1b7   : > { %11908 = vst [vmem:[#allocation11_spill] sm:$0xff] %v9173_v48  ;;  %v9178_v37 = vadd.f32 %v7443_v59, %v1175_v39  ;;  %v1167_v51 = vadd.f32 %v1166_v22, %v11912_v61  ;;  %v2964_v61 = vld [vmem:[#allocation2 + $0x10a] sm:$0xff] }
 0x1b8   : > { %v7378_v38 = vpop.f32.mrf.mxu1  ;;  %v7446_v49 = vpop.f32.mrf.mxu0  ;;  %7617 = vmatmul.mubr.msk.bf16.gmra.mxu1 %vm18_vm0, %v3015_v17  ;;  %7685 = vmatmul.mubr.msk.bf16.gmra.mxu0 %vm18_vm0, %v3578_v26  ;;  %v3017_v26 = vpack.c.bf16 %v2963_v0, %v2962_v63  ;;  %v11921_v48 = vld [vmem:[#allocation20_spill] sm:$0xff] }
 0x1b9   : > { %11911 = vst [vmem:[#allocation13_spill] sm:$0xff] %v9178_v37  ;;  %v9183_v42 = vadd.f32 %v1664_v54, %v1167_v51  ;;  %v1188_v31 = vadd.f32 %v7378_v38, %v11914_v2  ;;  %7620 = vmatprep.mubr.msk.bf16.mxu1 %vm18_vm0, %v9176_v30  ;;  %7688 = vmatprep.mubr.msk.bf16.mxu0 %vm18_vm0, %v3579_v27  ;;  %v11918_v51 = vld [vmem:[#allocation19_spill] sm:$0xff]  ;;  %v2967_v0 = vld [vmem:[#allocation2 + $0x12a] sm:$0xff] }
 0x1ba   : > { %v1179_v22 = vpop.f32.mrf.mxu1  ;;  %v1677_v10 = vpop.f32.mrf.mxu0  ;;  %v9195_v38 = vpack.c.bf16 %v2965_v9, %v2964_v61  ;;  %v3581_v2 = vpack.c.bf16 %v3528_v47, %v3527_v16  ;;  %v2966_v63 = vld [vmem:[#allocation2 + $0x122] sm:$0xff]  ;;  %v3531_v47 = vld [vmem:[#allocation2 + $0x150] sm:$0xff] }
 0x1bb   : > { %11913 = vst [vmem:[#allocation14_spill] sm:$0xff] %v9183_v42  ;;  %v9189_v24 = vadd.f32 %v7446_v49, %v1188_v31  ;;  %v1180_v54 = vadd.f32 %v1179_v22, %v11916_v6  ;;  %v3529_v22 = vld [vmem:[#allocation2 + $0x138] sm:$0xff]  ;;  %v2969_v16 = vld [vmem:[#allocation2 + $0x142] sm:$0xff] }
 0x1bc   : > { %v7379_v59 = vpop.f32.mrf.mxu1  ;;  %v7447_v17 = vpop.f32.mrf.mxu0  ;;  %11919 = vst [vmem:[#allocation17_spill] sm:$0xff] %v9195_v38  ;;  %v3532_v6 = vld [vmem:[#allocation2 + $0x158] sm:$0xff] }
 0x1bd   : > { %11915 = vst [vmem:[#allocation15_spill] sm:$0xff] %v9189_v24  ;;  %v9192_v39 = vadd.f32 %v1677_v10, %v1180_v54  ;;  %v1191_v27 = vadd.f32 %v7379_v59, %v11918_v51  ;;  %v3530_v10 = vld [vmem:[#allocation2 + $0x140] sm:$0xff]  ;;  %v11925_v59 = vld [vmem:[#allocation22_spill] sm:$0xff] }
 0x1be   : > { %v1182_v30 = vpop.f32.mrf.mxu1  ;;  %v1680_v42 = vpop.f32.mrf.mxu0  ;;  %v3582_v51 = vpack.c.bf16 %v3530_v10, %v3529_v22  ;;  %v11932_v10 = vld [vmem:[#allocation25_spill] sm:$0xff] }
 0x1bf   : > { %11917 = vst [vmem:[#allocation16_spill] sm:$0xff] %v9192_v39  ;;  %v9197_v37 = vadd.f32 %v7447_v17, %v1191_v27  ;;  %v1183_v49 = vadd.f32 %v1182_v30, %v11921_v48  ;;  %v2968_v48 = vld [vmem:[#allocation2 + $0x13a] sm:$0xff]  ;;  %v11930_v39 = vld [vmem:[#allocation24_spill] sm:$0xff] }
 0x1c0   : > { %v7382_v31 = vpop.f32.mrf.mxu1  ;;  %v7450_v24 = vpop.f32.mrf.mxu0  ;;  %7621 = vmatmul.mubr.msk.bf16.gmra.mxu1 %vm18_vm0, %v3017_v26  ;;  %7689 = vmatmul.mubr.msk.bf16.gmra.mxu0 %vm18_vm0, %v3580_v4  ;;  %v3019_v4 = vpack.c.bf16 %v2967_v0, %v2966_v63  ;;  %v2970_v63 = vld [vmem:[#allocation2 + $0x152] sm:$0xff]  ;;  %v2971_v0 = vld [vmem:[#allocation2 + $0x15a] sm:$0xff] }
 0x1c1   : > { %11920 = vst [vmem:[#allocation18_spill] sm:$0xff] %v9197_v37  ;;  %v9202_v35 = vadd.f32 %v1680_v42, %v1183_v49  ;;  %v1204_v61 = vadd.f32 %v7382_v31, %v11923_v20  ;;  %7624 = vmatprep.mubr.msk.bf16.mxu1 %vm18_vm0, %v9195_v38  ;;  %7692 = vmatprep.mubr.msk.bf16.mxu0 %vm18_vm0, %v3581_v2  ;;  %v11927_v49 = vld [vmem:[#allocation23_spill] sm:$0xff] }
 0x1c2   : > { %v1195_v30 = vpop.f32.mrf.mxu1  ;;  %v1693_v9 = vpop.f32.mrf.mxu0  ;;  %v9214_v31 = vpack.c.bf16 %v2969_v16, %v2968_v48  ;;  %v3583_v20 = vpack.c.bf16 %v3532_v6, %v3531_v47  ;;  %v2973_v47 = vld [vmem:[#allocation2 + $0x172] sm:$0xff]  ;;  %v3535_v6 = vld [vmem:[#allocation2 + $0x180] sm:$0xff] }
 0x1c3   : > { %11922 = vst [vmem:[#allocation19_spill] sm:$0xff] %v9202_v35  ;;  %v9208_v54 = vadd.f32 %v7450_v24, %v1204_v61  ;;  %v1196_v42 = vadd.f32 %v1195_v30, %v11925_v59  ;;  %v3533_v30 = vld [vmem:[#allocation2 + $0x168] sm:$0xff] }
 0x1c4   : > { %v7383_v17 = vpop.f32.mrf.mxu1  ;;  %v7451_v26 = vpop.f32.mrf.mxu0  ;;  %11928 = vst [vmem:[#allocation22_spill] sm:$0xff] %v9214_v31  ;;  %v3536_v59 = vld [vmem:[#allocation2 + $0x188] sm:$0xff] }
 0x1c5   : > { %11924 = vst [vmem:[#allocation20_spill] sm:$0xff] %v9208_v54  ;;  %v9211_v27 = vadd.f32 %v1693_v9, %v1196_v42  ;;  %v1207_v2 = vadd.f32 %v7383_v17, %v11927_v49  ;;  %v3534_v9 = vld [vmem:[#allocation2 + $0x170] sm:$0xff]  ;;  %v11934_v17 = vld [vmem:[#allocation26_spill] sm:$0xff] }
 0x1c6   : > { %v1198_v38 = vpop.f32.mrf.mxu1  ;;  %v1696_v35 = vpop.f32.mrf.mxu0  ;;  %v3584_v49 = vpack.c.bf16 %v3534_v9, %v3533_v30  ;;  %v11941_v9 = vld [vmem:[#allocation29_spill] sm:$0xff] }
 0x1c7   : > { %11926 = vst [vmem:[#allocation21_spill] sm:$0xff] %v9211_v27  ;;  %v9216_v37 = vadd.f32 %v7451_v26, %v1207_v2  ;;  %v1199_v24 = vadd.f32 %v1198_v38, %v11930_v39  ;;  %v2972_v39 = vld [vmem:[#allocation2 + $0x16a] sm:$0xff] }
 0x1c8   : > { %v7386_v61 = vpop.f32.mrf.mxu1  ;;  %v7454_v54 = vpop.f32.mrf.mxu0  ;;  %7625 = vmatmul.mubr.msk.bf16.gmra.mxu1 %vm18_vm0, %v3019_v4  ;;  %7693 = vmatmul.mubr.msk.bf16.gmra.mxu0 %vm18_vm0, %v3582_v51  ;;  %v3021_v51 = vpack.c.bf16 %v2971_v0, %v2970_v63  ;;  %v11939_v27 = vld [vmem:[#allocation28_spill] sm:$0xff] }
 0x1c9   : > { %11929 = vst [vmem:[#allocation23_spill] sm:$0xff] %v9216_v37  ;;  %v9221_v22 = vadd.f32 %v1696_v35, %v1199_v24  ;;  %v1220_v48 = vadd.f32 %v7386_v61, %v11932_v10  ;;  %7628 = vmatprep.mubr.msk.bf16.mxu1 %vm18_vm0, %v9214_v31  ;;  %7696 = vmatprep.mubr.msk.bf16.mxu0 %vm18_vm0, %v3583_v20  ;;  %v11936_v24 = vld [vmem:[#allocation27_spill] sm:$0xff]  ;;  %v2975_v0 = vld [vmem:[#allocation2 + $0x18a] sm:$0xff] }
 0x1ca   : > { %v1211_v38 = vpop.f32.mrf.mxu1  ;;  %v1709_v16 = vpop.f32.mrf.mxu0  ;;  %v9233_v61 = vpack.c.bf16 %v2973_v47, %v2972_v39  ;;  %v3585_v10 = vpack.c.bf16 %v3536_v59, %v3535_v6  ;;  %v2974_v63 = vld [vmem:[#allocation2 + $0x182] sm:$0xff]  ;;  %v2977_v6 = vld [vmem:[#allocation2 + $0x1d2] sm:$0xff] }
 0x1cb   : > { %11931 = vst [vmem:[#allocation24_spill] sm:$0xff] %v9221_v22  ;;  %v9227_v42 = vadd.f32 %v7454_v54, %v1220_v48  ;;  %v1212_v35 = vadd.f32 %v1211_v38, %v11934_v17  ;;  %v3537_v38 = vld [vmem:[#allocation2 + $0x198] sm:$0xff]  ;;  %v3539_v59 = vld [vmem:[#allocation2 + $0x1e0] sm:$0xff]  ;;  %v3540_v17 = vld [vmem:[#allocation2 + $0x1e8] sm:$0xff] }
 0x1cc   : > { %v7387_v26 = vpop.f32.mrf.mxu1  ;;  %v7455_v4 = vpop.f32.mrf.mxu0  ;;  %11937 = vst [vmem:[#allocation27_spill] sm:$0xff] %v9233_v61 }
 0x1cd   : > { %11933 = vst [vmem:[#allocation25_spill] sm:$0xff] %v9227_v42  ;;  %v9230_v2 = vadd.f32 %v1709_v16, %v1212_v35  ;;  %v1223_v20 = vadd.f32 %v7387_v26, %v11936_v24  ;;  %v3538_v16 = vld [vmem:[#allocation2 + $0x1a0] sm:$0xff]  ;;  %v11942_v26 = vld [vmem:[#allocation30_spill] sm:$0xff] }
 0x1ce   : > { %v1214_v31 = vpop.f32.mrf.mxu1  ;;  %v1712_v22 = vpop.f32.mrf.mxu0  ;;  %v3586_v24 = vpack.c.bf16 %v3538_v16, %v3537_v38  ;;  %v11948_v16 = vld [vmem:[#allocation33_spill] sm:$0xff] }
 0x1cf   : > { %11935 = vst [vmem:[#allocation26_spill] sm:$0xff] %v9230_v2  ;;  %v9235_v37 = vadd.f32 %v7455_v4, %v1223_v20  ;;  %v1215_v54 = vadd.f32 %v1214_v31, %v11939_v27  ;;  %v2976_v27 = vld [vmem:[#allocation2 + $0x1ca] sm:$0xff] }
 0x1d0   : > { %v7390_v48 = vpop.f32.mrf.mxu1  ;;  %v7458_v42 = vpop.f32.mrf.mxu0  ;;  %7629 = vmatmul.mubr.msk.bf16.gmra.mxu1 %vm18_vm0, %v3021_v51  ;;  %7697 = vmatmul.mubr.msk.bf16.gmra.mxu0 %vm18_vm0, %v3584_v49  ;;  %v3023_v49 = vpack.c.bf16 %v2975_v0, %v2974_v63  ;;  %v11946_v2 = vld [vmem:[#allocation32_spill] sm:$0xff] }
 0x1d1   : > { %11938 = vst [vmem:[#allocation38_spill] sm:$0xff] %v9235_v37  ;;  %v9240_v30 = vadd.f32 %v1712_v22, %v1215_v54  ;;  %v1236_v39 = vadd.f32 %v7390_v48, %v11941_v9  ;;  %7632 = vmatprep.mubr.msk.bf16.mxu1 %vm18_vm0, %v9233_v61  ;;  %7700 = vmatprep.mubr.msk.bf16.mxu0 %vm18_vm0, %v3585_v10  ;;  %v11944_v54 = vld [vmem:[#allocation31_spill] sm:$0xff]  ;;  %v2979_v0 = vld [vmem:[#allocation2 + $0x1ea] sm:$0xff] }
 0x1d2   : > { %v1227_v31 = vpop.f32.mrf.mxu1  ;;  %v1725_v47 = vpop.f32.mrf.mxu0  ;;  %v3024_v48 = vpack.c.bf16 %v2977_v6, %v2976_v27  ;;  %v3587_v9 = vpack.c.bf16 %v3540_v17, %v3539_v59  ;;  %v2978_v63 = vld [vmem:[#allocation2 + $0x1e2] sm:$0xff]  ;;  %v3541_v27 = vld [vmem:[#allocation2 + $0x1f8] sm:$0xff]  ;;  %v3543_v17 = vld [vmem:[#allocation2 + $0x210] sm:$0xff] }
 0x1d3   : > { %11940 = vst [vmem:[#allocation28_spill] sm:$0xff] %v9240_v30  ;;  %v9246_v35 = vadd.f32 %v7458_v42, %v1236_v39  ;;  %v1228_v22 = vadd.f32 %v1227_v31, %v11942_v26  ;;  %v2980_v6 = vld [vmem:[#allocation2 + $0x1fa] sm:$0xff]  ;;  %v2981_v59 = vld [vmem:[#allocation2 + $0x202] sm:$0xff] }
 0x1d4   : > { %v7391_v4 = vpop.f32.mrf.mxu1  ;;  %v7459_v51 = vpop.f32.mrf.mxu0  ;;  %v3544_v26 = vld [vmem:[#allocation2 + $0x218] sm:$0xff] }
 0x1d5   : > { %v9249_v20 = vadd.f32 %v1725_v47, %v1228_v22  ;;  %v1239_v10 = vadd.f32 %v7391_v4, %v11944_v54  ;;  %v3542_v47 = vld [vmem:[#allocation2 + $0x200] sm:$0xff]  ;;  %v11950_v4 = vld [vmem:[#allocation34_spill] sm:$0xff] }
 0x1d6   : > { %v1230_v61 = vpop.f32.mrf.mxu1  ;;  %v1728_v30 = vpop.f32.mrf.mxu0 }
 0x1d7   : > { %11943 = vst [vmem:[#allocation29_spill] sm:$0xff] %v9249_v20  ;;  %v9252_v37 = vadd.f32 %v7459_v51, %v1239_v10  ;;  %v1231_v60 = vadd.f32 %v1230_v61, %v11946_v2  ;;  %v11951_v10 = vld [vmem:[#allocation35_spill] sm:$0xff]  ;;  %v11952_v20 = vld [vmem:[#allocation37_spill] sm:$0xff] }
 0x1d8   : > { %v7394_v42 = vpop.f32.mrf.mxu1  ;;  %v7462_v39 = vpop.f32.mrf.mxu0  ;;  %7633 = vmatmul.mubr.msk.bf16.gmra.mxu1 %vm18_vm0, %v3023_v49  ;;  %7701 = vmatmul.mubr.msk.bf16.gmra.mxu0 %vm18_vm0, %v3586_v24  ;;  %v3025_v49 = vpack.c.bf16 %v2979_v0, %v2978_v63  ;;  %v3588_v24 = vpack.c.bf16 %v3542_v47, %v3541_v27  ;;  %v2982_v63 = vld [vmem:[#allocation2 + $0x212] sm:$0xff]  ;;  %v2983_v0 = vld [vmem:[#allocation2 + $0x21a] sm:$0xff] }
 0x1d9   : > { %11945 = vst [vmem:[#allocation30_spill] sm:$0xff] %v9252_v37  ;;  %v9257_v38 = vadd.f32 %v1728_v30, %v1231_v60  ;;  %v1252_v31 = vadd.f32 %v7394_v42, %v11948_v16  ;;  %7636 = vmatprep.mubr.msk.bf16.mxu1 %vm18_vm0, %v3024_v48  ;;  %7704 = vmatprep.mubr.msk.bf16.mxu0 %vm18_vm0, %v3587_v9 }
 0x1da   : > { %v1243_v2 = vpop.f32.mrf.mxu1  ;;  %v1741_v61 = vpop.f32.mrf.mxu0  ;;  %v9268_v9 = vpack.c.bf16 %v2981_v59, %v2980_v6  ;;  %v3589_v42 = vpack.c.bf16 %v3544_v26, %v3543_v17  ;;  %v3545_v6 = vld [vmem:[#allocation2 + $0x228] sm:$0xff]  ;;  %v2985_v17 = vld [vmem:[#allocation2 + $0x232] sm:$0xff]  ;;  %v3547_v26 = vld [vmem:[#allocation2 + $0x240] sm:$0xff] }
 0x1db   : > { %11947 = vst [vmem:[#allocation31_spill] sm:$0xff] %v9257_v38  ;;  %v9262_v22 = vadd.f32 %v7462_v39, %v1252_v31  ;;  %v1244_v51 = vadd.f32 %v1243_v2, %v11950_v4  ;;  %v3546_v2 = vld [vmem:[#allocation2 + $0x230] sm:$0xff]  ;;  %v3548_v4 = vld [vmem:[#allocation2 + $0x248] sm:$0xff] }
 0x1dc   : > { %v7395_v60 = vpop.f32.mrf.mxu1  ;;  %v7463_v30 = vpop.f32.mrf.mxu0 }
 0x1dd   : > { %11949 = vst [vmem:[#allocation32_spill] sm:$0xff] %v9262_v22  ;;  %v9265_v54 = vadd.f32 %v1741_v61, %v1244_v51  ;;  %v1255_v48 = vadd.f32 %v7395_v60, %v11951_v10 }
 0x1de   : > { %v1246_v16 = vpop.f32.mrf.mxu1  ;;  %v1744_v38 = vpop.f32.mrf.mxu0 }
 0x1df   : > { %v9270_v37 = vadd.f32 %v7463_v30, %v1255_v48  ;;  %v1247_v39 = vadd.f32 %v1246_v16, %v11952_v20  ;;  %v2984_v20 = vld [vmem:[#allocation2 + $0x22a] sm:$0xff] }
 0x1e0   : > { %v7470_v31 = vpop.f32.mrf.mxu1  ;;  %v7538_v22 = vpop.f32.mrf.mxu0  ;;  %7637 = vmatmul.mubr.msk.bf16.gmra.mxu1 %vm18_vm0, %v3025_v49  ;;  %7705 = vmatmul.mubr.msk.bf16.gmra.mxu0 %vm18_vm0, %v3588_v24  ;;  %v3590_v49 = vpack.c.bf16 %v3546_v2, %v3545_v6  ;;  %v9289_v48 = vpack.c.bf16 %v2985_v17, %v2984_v20  ;;  %v3549_v2 = vld [vmem:[#allocation2 + $0x258] sm:$0xff]  ;;  %v2989_v17 = vld [vmem:[#allocation2 + $0x262] sm:$0xff] }
 0x1e1   : > { %v9275_v27 = vadd.f32 %v1744_v38, %v1247_v39  ;;  %v2320_v47 = vadd.f32 %v7470_v31, %v8981_v55  ;;  %7640 = vmatprep.mubr.msk.bf16.mxu1 %vm18_vm0, %v9268_v9  ;;  %7708 = vmatprep.mubr.msk.bf16.mxu0 %vm18_vm0, %v3589_v42  ;;  %v9284_v55 = vpack.c.bf16 %v2983_v0, %v2982_v63  ;;  %v2986_v63 = vld [vmem:[#allocation2 + $0x242] sm:$0xff]  ;;  %v2987_v0 = vld [vmem:[#allocation2 + $0x24a] sm:$0xff]  ;;  %v2988_v20 = vld [vmem:[#allocation2 + $0x25a] sm:$0xff] }
 0x1e2   : > { %v2063_v61 = vpop.f32.mrf.mxu1  ;;  %v2625_v59 = vpop.f32.mrf.mxu0  ;;  %11953 = vst [vmem:[#allocation33_spill] sm:$0xff] %v9289_v48  ;;  %v3591_v42 = vpack.c.bf16 %v3548_v4, %v3547_v26  ;;  %v3551_v26 = vld [vmem:[#allocation2 + $0x270] sm:$0xff]  ;;  %v3552_v4 = vld [vmem:[#allocation2 + $0x278] sm:$0xff] }
 0x1e3   : > { %v9281_v51 = vadd.f32 %v7538_v22, %v2320_v47  ;;  %v2318_v38 = vadd.f32 %v2063_v61, %v8984_v1 }
 0x1e4   : > { %v7471_v60 = vpop.f32.mrf.mxu1  ;;  %v7539_v30 = vpop.f32.mrf.mxu0 }
 0x1e5   : > { %v9286_v24 = vadd.f32 %v2625_v59, %v2318_v38  ;;  %v2321_v10 = vadd.f32 %v7471_v60, %v8987_v19 }
 0x1e6   : > { %v2066_v16 = vpop.f32.mrf.mxu1  ;;  %v2628_v39 = vpop.f32.mrf.mxu0 }
 0x1e7   : > { %v9291_v31 = vadd.f32 %v7539_v30, %v2321_v10  ;;  %v2319_v22 = vadd.f32 %v2066_v16, %v8993_v14  ;;  %v3550_v14 = vld [vmem:[#allocation2 + $0x260] sm:$0xff] }
 0x1e8   : > { %v7474_v47 = vpop.f32.mrf.mxu1  ;;  %v7542_v1 = vpop.f32.mrf.mxu0  ;;  %7641 = vmatmul.mubr.msk.bf16.gmra.mxu1 %vm18_vm0, %v9284_v55  ;;  %7709 = vmatmul.mubr.msk.bf16.gmra.mxu0 %vm18_vm0, %v3590_v49  ;;  %v3592_v10 = vpack.c.bf16 %v3550_v14, %v3549_v2  ;;  %v3553_v14 = vld [vmem:[#allocation2 + $0x288] sm:$0xff] }
 0x1e9   : > { %v9297_v6 = vadd.f32 %v2628_v39, %v2319_v22  ;;  %v2324_v19 = vadd.f32 %v7474_v47, %v8999_v25  ;;  %7644 = vmatprep.mubr.msk.bf16.mxu1 %vm18_vm0, %v9289_v48  ;;  %7712 = vmatprep.mubr.msk.bf16.mxu0 %vm18_vm0, %v3591_v42  ;;  %v9306_v25 = vpack.c.bf16 %v2987_v0, %v2986_v63  ;;  %v2990_v63 = vld [vmem:[#allocation2 + $0x272] sm:$0xff]  ;;  %v2991_v0 = vld [vmem:[#allocation2 + $0x27a] sm:$0xff] }
 0x1ea   : > { %v2079_v61 = vpop.f32.mrf.mxu1  ;;  %v2641_v59 = vpop.f32.mrf.mxu0  ;;  %v9311_v39 = vpack.c.bf16 %v2989_v17, %v2988_v20  ;;  %v3593_v22 = vpack.c.bf16 %v3552_v4, %v3551_v26  ;;  %v2992_v20 = vld [vmem:[#allocation2 + $0x28a] sm:$0xff]  ;;  %v2993_v17 = vld [vmem:[#allocation2 + $0x292] sm:$0xff]  ;;  %v3555_v26 = vld [vmem:[#allocation2 + $0x2a0] sm:$0xff] }
 0x1eb   : > { %11954 = vst [vmem:[#allocation34_spill] sm:$0xff] %v9297_v6  ;;  %v9303_v38 = vadd.f32 %v7542_v1, %v2324_v19  ;;  %v2322_v60 = vadd.f32 %v2079_v61, %v9002_v23  ;;  %v3556_v4 = vld [vmem:[#allocation2 + $0x2a8] sm:$0xff] }
 0x1ec   : > { %v7475_v30 = vpop.f32.mrf.mxu1  ;;  %v7543_v49 = vpop.f32.mrf.mxu0  ;;  %11955 = vst [vmem:[#allocation35_spill] sm:$0xff] %v9311_v39 }
 0x1ed   : > { %v9308_v16 = vadd.f32 %v2641_v59, %v2322_v60  ;;  %v2325_v42 = vadd.f32 %v7475_v30, %v9005_v29 }
 0x1ee   : > { %v2082_v47 = vpop.f32.mrf.mxu1  ;;  %v2644_v48 = vpop.f32.mrf.mxu0 }
 0x1ef   : > { %v9313_v6 = vadd.f32 %v7543_v49, %v2325_v42  ;;  %v2323_v1 = vadd.f32 %v2082_v47, %v9011_v56  ;;  %v3554_v56 = vld [vmem:[#allocation2 + $0x290] sm:$0xff]  ;;  %v9333_v47 = vpack.c.bf16 %v2993_v17, %v2992_v20  ;;  %v2996_v20 = vld [vmem:[#allocation2 + $0x2ba] sm:$0xff]  ;;  %v2997_v17 = vld [vmem:[#allocation2 + $0x2c2] sm:$0xff] }
 0x1f0   : > { %v7478_v19 = vpop.f32.mrf.mxu1  ;;  %v7546_v23 = vpop.f32.mrf.mxu0  ;;  %7645 = vmatmul.mubr.msk.bf16.gmra.mxu1 %vm18_vm0, %v9306_v25  ;;  %7713 = vmatmul.mubr.msk.bf16.gmra.mxu0 %vm18_vm0, %v3592_v10  ;;  %v3594_v10 = vpack.c.bf16 %v3554_v56, %v3553_v14  ;;  %v3557_v56 = vld [vmem:[#allocation2 + $0x2b8] sm:$0xff] }
 0x1f1   : > { %v9319_v2 = vadd.f32 %v2644_v48, %v2323_v1  ;;  %v2328_v29 = vadd.f32 %v7478_v19, %v9017_v18  ;;  %7648 = vmatprep.mubr.msk.bf16.mxu1 %vm18_vm0, %v9311_v39  ;;  %7716 = vmatprep.mubr.msk.bf16.mxu0 %vm18_vm0, %v3593_v22  ;;  %v9328_v18 = vpack.c.bf16 %v2991_v0, %v2990_v63  ;;  %v2994_v63 = vld [vmem:[#allocation2 + $0x2a2] sm:$0xff]  ;;  %v2995_v0 = vld [vmem:[#allocation2 + $0x2aa] sm:$0xff] }
 0x1f2   : > { %v2095_v61 = vpop.f32.mrf.mxu1  ;;  %v2657_v59 = vpop.f32.mrf.mxu0  ;;  %11957 = vst [vmem:[#allocation39_spill] sm:$0xff] %v9333_v47  ;;  %v3595_v1 = vpack.c.bf16 %v3556_v4, %v3555_v26  ;;  %v3559_v26 = vld [vmem:[#allocation2 + $0x2d0] sm:$0xff]  ;;  %v3560_v4 = vld [vmem:[#allocation2 + $0x2d8] sm:$0xff] }
 0x1f3   : > { %11956 = vst [vmem:[#allocation37_spill] sm:$0xff] %v9319_v2  ;;  %v9325_v60 = vadd.f32 %v7546_v23, %v2328_v29  ;;  %v2326_v48 = vadd.f32 %v2095_v61, %v9020_v28 }
 0x1f4   : > { %v7479_v30 = vpop.f32.mrf.mxu1  ;;  %v7547_v49 = vpop.f32.mrf.mxu0 }
 0x1f5   : > { %v9330_v42 = vadd.f32 %v2657_v59, %v2326_v48  ;;  %v2329_v22 = vadd.f32 %v7479_v30, %v9023_v21 }
 0x1f6   : > { %v2098_v19 = vpop.f32.mrf.mxu1  ;;  %v2660_v39 = vpop.f32.mrf.mxu0 }
 0x1f7   : > { %v9335_v2 = vadd.f32 %v7547_v49, %v2329_v22  ;;  %v2327_v23 = vadd.f32 %v2098_v19, %v9029_v45  ;;  %v3558_v45 = vld [vmem:[#allocation2 + $0x2c0] sm:$0xff]  ;;  %v9355_v19 = vpack.c.bf16 %v2997_v17, %v2996_v20  ;;  %v3000_v20 = vld [vmem:[#allocation2 + $0x2ea] sm:$0xff]  ;;  %v3001_v17 = vld [vmem:[#allocation2 + $0x2f2] sm:$0xff] }
 0x1f8   : > { %v7482_v29 = vpop.f32.mrf.mxu1  ;;  %v7550_v28 = vpop.f32.mrf.mxu0  ;;  %7649 = vmatmul.mubr.msk.bf16.gmra.mxu1 %vm18_vm0, %v9328_v18  ;;  %7717 = vmatmul.mubr.msk.bf16.gmra.mxu0 %vm18_vm0, %v3594_v10  ;;  %v3596_v10 = vpack.c.bf16 %v3558_v45, %v3557_v56  ;;  %v3561_v45 = vld [vmem:[#allocation2 + $0x2e8] sm:$0xff] }
 0x1f9   : > { %v9341_v14 = vadd.f32 %v2660_v39, %v2327_v23  ;;  %v2332_v21 = vadd.f32 %v7482_v29, %v9035_v33  ;;  %7652 = vmatprep.mubr.msk.bf16.mxu1 %vm18_vm0, %v9333_v47  ;;  %7720 = vmatprep.mubr.msk.bf16.mxu0 %vm18_vm0, %v3595_v1  ;;  %v9350_v33 = vpack.c.bf16 %v2995_v0, %v2994_v63  ;;  %v2998_v63 = vld [vmem:[#allocation2 + $0x2d2] sm:$0xff]  ;;  %v2999_v0 = vld [vmem:[#allocation2 + $0x2da] sm:$0xff] }
 0x1fa   : > { %v2111_v61 = vpop.f32.mrf.mxu1  ;;  %v2673_v59 = vpop.f32.mrf.mxu0  ;;  %11959 = vst [vmem:[#allocation41_spill] sm:$0xff] %v9355_v19  ;;  %v3597_v23 = vpack.c.bf16 %v3560_v4, %v3559_v26  ;;  %v3563_v26 = vld [vmem:[#allocation2 + $0x300] sm:$0xff]  ;;  %v3564_v4 = vld [vmem:[#allocation2 + $0x308] sm:$0xff] }
 0x1fb   : > { %11958 = vst [vmem:[#allocation40_spill] sm:$0xff] %v9341_v14  ;;  %v9347_v48 = vadd.f32 %v7550_v28, %v2332_v21  ;;  %v2330_v39 = vadd.f32 %v2111_v61, %v9038_v8 }
 0x1fc   : > { %v7483_v30 = vpop.f32.mrf.mxu1  ;;  %v7551_v49 = vpop.f32.mrf.mxu0 }
 0x1fd   : > { %v9352_v22 = vadd.f32 %v2673_v59, %v2330_v39  ;;  %v2333_v1 = vadd.f32 %v7483_v30, %v9041_v13 }
 0x1fe   : > { %v2114_v29 = vpop.f32.mrf.mxu1  ;;  %v2676_v47 = vpop.f32.mrf.mxu0 }
 0x1ff   : > { %v9357_v14 = vadd.f32 %v7551_v49, %v2333_v1  ;;  %v2331_v28 = vadd.f32 %v2114_v29, %v9047_v57  ;;  %v3562_v57 = vld [vmem:[#allocation2 + $0x2f0] sm:$0xff]  ;;  %v9377_v29 = vpack.c.bf16 %v3001_v17, %v3000_v20  ;;  %v3004_v20 = vld [vmem:[#allocation2 + $0x31a] sm:$0xff]  ;;  %v3005_v17 = vld [vmem:[#allocation2 + $0x322] sm:$0xff] }
 0x200   : > { %v7486_v21 = vpop.f32.mrf.mxu1  ;;  %v7554_v8 = vpop.f32.mrf.mxu0  ;;  %7653 = vmatmul.mubr.msk.bf16.gmra.mxu1 %vm18_vm0, %v9350_v33  ;;  %7721 = vmatmul.mubr.msk.bf16.gmra.mxu0 %vm18_vm0, %v3596_v10  ;;  %v3598_v10 = vpack.c.bf16 %v3562_v57, %v3561_v45  ;;  %v3565_v57 = vld [vmem:[#allocation2 + $0x318] sm:$0xff] }
 0x201   : > { %v9363_v56 = vadd.f32 %v2676_v47, %v2331_v28  ;;  %v2336_v13 = vadd.f32 %v7486_v21, %v9053_v46  ;;  %7656 = vmatprep.mubr.msk.bf16.mxu1 %vm18_vm0, %v9355_v19  ;;  %7724 = vmatprep.mubr.msk.bf16.mxu0 %vm18_vm0, %v3597_v23  ;;  %v9372_v46 = vpack.c.bf16 %v2999_v0, %v2998_v63  ;;  %v3002_v63 = vld [vmem:[#allocation2 + $0x302] sm:$0xff]  ;;  %v3003_v0 = vld [vmem:[#allocation2 + $0x30a] sm:$0xff] }
 0x202   : > { %v2127_v61 = vpop.f32.mrf.mxu1  ;;  %v2689_v59 = vpop.f32.mrf.mxu0  ;;  %11961 = vst [vmem:[#allocation43_spill] sm:$0xff] %v9377_v29  ;;  %v3599_v28 = vpack.c.bf16 %v3564_v4, %v3563_v26  ;;  %v3567_v26 = vld [vmem:[#allocation2 + $0x330] sm:$0xff]  ;;  %v3568_v4 = vld [vmem:[#allocation2 + $0x338] sm:$0xff] }
 0x203   : > { %11960 = vst [vmem:[#allocation42_spill] sm:$0xff] %v9363_v56  ;;  %v9369_v39 = vadd.f32 %v7554_v8, %v2336_v13  ;;  %v2334_v47 = vadd.f32 %v2127_v61, %v9056_v44 }
 0x204   : > { %v7487_v30 = vpop.f32.mrf.mxu1  ;;  %v7555_v49 = vpop.f32.mrf.mxu0 }
 0x205   : > { %v9374_v1 = vadd.f32 %v2689_v59, %v2334_v47  ;;  %v2337_v23 = vadd.f32 %v7487_v30, %v9059_v43 }
 0x206   : > { %v2130_v21 = vpop.f32.mrf.mxu1  ;;  %v2692_v19 = vpop.f32.mrf.mxu0 }
 0x207   : > { %v9379_v56 = vadd.f32 %v7555_v49, %v2337_v23  ;;  %v2335_v8 = vadd.f32 %v2130_v21, %v9065_v7  ;;  %v3566_v7 = vld [vmem:[#allocation2 + $0x320] sm:$0xff]  ;;  %v9399_v21 = vpack.c.bf16 %v3005_v17, %v3004_v20  ;;  %v4069_v20 = vld [vmem:[#allocation2 + $0x31] sm:$0xff] }
 0x208   : > { %v7490_v13 = vpop.f32.mrf.mxu1  ;;  %v7558_v44 = vpop.f32.mrf.mxu0  ;;  %7657 = vmatmul.mubr.msk.bf16.gmra.mxu1 %vm18_vm0, %v9372_v46  ;;  %7725 = vmatmul.mubr.msk.bf16.gmra.mxu0 %vm18_vm0, %v3598_v10  ;;  %v3600_v10 = vpack.c.bf16 %v3566_v7, %v3565_v57  ;;  %v3569_v7 = vld [vmem:[#allocation2 + $0x348] sm:$0xff]  ;;  %v4070_v17 = vld [vmem:[#allocation2 + $0x39] sm:$0xff] }
 0x209   : > { %v9385_v45 = vadd.f32 %v2692_v19, %v2335_v8  ;;  %v2340_v43 = vadd.f32 %v7490_v13, %v9071_v3  ;;  %7660 = vmatprep.mubr.msk.bf16.mxu1 %vm18_vm0, %v9377_v29  ;;  %7728 = vmatprep.mubr.msk.bf16.mxu0 %vm18_vm0, %v3599_v28  ;;  %v9394_v3 = vpack.c.bf16 %v3003_v0, %v3002_v63  ;;  %v3006_v63 = vld [vmem:[#allocation2 + $0x332] sm:$0xff]  ;;  %v3007_v0 = vld [vmem:[#allocation2 + $0x33a] sm:$0xff] }
 0x20a   : > { %v2143_v61 = vpop.f32.mrf.mxu1  ;;  %v2705_v59 = vpop.f32.mrf.mxu0  ;;  %11963 = vst [vmem:[#allocation45_spill] sm:$0xff] %v9399_v21  ;;  %v3601_v8 = vpack.c.bf16 %v3568_v4, %v3567_v26  ;;  %v4631_v26 = vld [vmem:[#allocation2 + $0x32] sm:$0xff]  ;;  %v4632_v4 = vld [vmem:[#allocation2 + $0x3a] sm:$0xff] }
 0x20b   : > { %11962 = vst [vmem:[#allocation44_spill] sm:$0xff] %v9385_v45  ;;  %v9391_v47 = vadd.f32 %v7558_v44, %v2340_v43  ;;  %v2338_v19 = vadd.f32 %v2143_v61, %v9074_v15 }
 0x20c   : > { %v7491_v30 = vpop.f32.mrf.mxu1  ;;  %v7559_v49 = vpop.f32.mrf.mxu0 }
 0x20d   : > { %v9396_v23 = vadd.f32 %v2705_v59, %v2338_v19  ;;  %v2341_v28 = vadd.f32 %v7491_v30, %v9077_v53 }
 0x20e   : > { %v2146_v13 = vpop.f32.mrf.mxu1  ;;  %v2708_v29 = vpop.f32.mrf.mxu0 }
 0x20f   : > { %v9401_v45 = vadd.f32 %v7559_v49, %v2341_v28  ;;  %v2339_v44 = vadd.f32 %v2146_v13, %v9083_v11  ;;  %v3570_v11 = vld [vmem:[#allocation2 + $0x350] sm:$0xff]  ;;  %v4133_v13 = vpack.c.bf16 %v4070_v17, %v4069_v20 }
 0x210   : > { %v7494_v43 = vpop.f32.mrf.mxu1  ;;  %v7562_v15 = vpop.f32.mrf.mxu0  ;;  %7661 = vmatmul.mubr.msk.bf16.gmra.mxu1 %vm18_vm0, %v9394_v3  ;;  %7729 = vmatmul.mubr.msk.bf16.gmra.mxu0 %vm18_vm0, %v3600_v10  ;;  %v3602_v10 = vpack.c.bf16 %v3570_v11, %v3569_v7  ;;  %v4073_v7 = vld [vmem:[#allocation2 + $0x61] sm:$0xff]  ;;  %v4074_v20 = vld [vmem:[#allocation2 + $0x69] sm:$0xff] }
 0x211   : > { %v9407_v57 = vadd.f32 %v2708_v29, %v2339_v44  ;;  %v2344_v53 = vadd.f32 %v7494_v43, %v9089_v50  ;;  %7664 = vmatprep.mubr.msk.bf16.mxu1 %vm18_vm0, %v9399_v21  ;;  %7732 = vmatprep.mubr.msk.bf16.mxu0 %vm18_vm0, %v3601_v8  ;;  %v9416_v50 = vpack.c.bf16 %v3007_v0, %v3006_v63  ;;  %v4072_v0 = vld [vmem:[#allocation2 + $0x51] sm:$0xff] }
 0x212   : > { %v2159_v61 = vpop.f32.mrf.mxu1  ;;  %v2721_v59 = vpop.f32.mrf.mxu0  ;;  %v4695_v44 = vpack.c.bf16 %v4632_v4, %v4631_v26 }
 0x213   : > { %11964 = vst [vmem:[#allocation46_spill] sm:$0xff] %v9407_v57  ;;  %v9413_v19 = vadd.f32 %v7562_v15, %v2344_v53  ;;  %v2342_v29 = vadd.f32 %v2159_v61, %v9092_v36  ;;  %v4635_v61 = vld [vmem:[#allocation2 + $0x62] sm:$0xff] }
 0x214   : > { %v7495_v30 = vpop.f32.mrf.mxu1  ;;  %v7563_v49 = vpop.f32.mrf.mxu0 }
 0x215   : > { %11965 = vst [vmem:[#allocation47_spill] sm:$0xff] %v9413_v19  ;;  %v9418_v28 = vadd.f32 %v2721_v59, %v2342_v29  ;;  %v2345_v8 = vadd.f32 %v7495_v30, %v9095_v40  ;;  %v4071_v40 = vld [vmem:[#allocation2 + $0x49] sm:$0xff] }
 0x216   : > { %v2162_v43 = vpop.f32.mrf.mxu1  ;;  %v2724_v21 = vpop.f32.mrf.mxu0  ;;  %v4636_v59 = vld [vmem:[#allocation2 + $0x6a] sm:$0xff]  ;;  %v4134_v29 = vpack.c.bf16 %v4072_v0, %v4071_v40 }
 0x217   : > { %v9421_v57 = vadd.f32 %v7563_v49, %v2345_v8  ;;  %v2343_v15 = vadd.f32 %v2162_v43, %v9100_v52  ;;  %v4135_v49 = vpack.c.bf16 %v4074_v20, %v4073_v7  ;;  %v4077_v40 = vld [vmem:[#allocation2 + $0x91] sm:$0xff]  ;;  %v4078_v7 = vld [vmem:[#allocation2 + $0x99] sm:$0xff] }
 0x218   : > { %v7498_v53 = vpop.f32.mrf.mxu1  ;;  %v7566_v19 = vpop.f32.mrf.mxu0  ;;  %7665 = vmatmul.mubr.msk.bf16.gmra.mxu1 %vm18_vm0, %v9416_v50  ;;  %7733 = vmatmul.mubr.msk.bf16.gmra.mxu0 %vm18_vm0, %v3602_v10  ;;  %v4697_v10 = vpack.c.bf16 %v4636_v59, %v4635_v61 }
 0x219   : > { %v9427_v36 = vadd.f32 %v2724_v21, %v2343_v15  ;;  %v2348_v63 = vadd.f32 %v7498_v53, %v9105_v34  ;;  %7740 = vmatprep.mubr.msk.bf16.mxu1 %vm18_vm0, %v4133_v13  ;;  %7808 = vmatprep.mubr.msk.bf16.mxu0 %vm18_vm0, %v4695_v44 }
 0x21a   : > { %v2175_v11 = vpop.f32.mrf.mxu1  ;;  %v2737_v52 = vpop.f32.mrf.mxu0 }
 0x21b   : > { %v9432_v17 = vadd.f32 %v7566_v19, %v2348_v63  ;;  %v2346_v26 = vadd.f32 %v2175_v11, %v9108_v32  ;;  %v4076_v63 = vld [vmem:[#allocation2 + $0x81] sm:$0xff]  ;;  %v4639_v11 = vld [vmem:[#allocation2 + $0x92] sm:$0xff] }
 0x21c   : > { %v7499_v21 = vpop.f32.mrf.mxu1  ;;  %v7567_v4 = vpop.f32.mrf.mxu0 }
 0x21d   : > { %v9435_v34 = vadd.f32 %v2737_v52, %v2346_v26  ;;  %v2349_v30 = vadd.f32 %v7499_v21, %v9113_v62  ;;  %v4075_v62 = vld [vmem:[#allocation2 + $0x79] sm:$0xff] }
 0x21e   : > { %v2178_v8 = vpop.f32.mrf.mxu1  ;;  %v2740_v13 = vpop.f32.mrf.mxu0  ;;  %v4640_v52 = vld [vmem:[#allocation2 + $0x9a] sm:$0xff]  ;;  %v4136_v26 = vpack.c.bf16 %v4076_v63, %v4075_v62 }
 0x21f   : > { %v9438_v44 = vadd.f32 %v7567_v4, %v2349_v30  ;;  %v2347_v43 = vadd.f32 %v2178_v8, %v9124_v58  ;;  %v11969_v21 = vld [vmem:[#allocation3_spill] sm:$0xff]  ;;  %v4699_v30 = vpack.c.bf16 %v4640_v52, %v4639_v11  ;;  %v4082_v52 = vld [vmem:[#allocation2 + $0xc9] sm:$0xff] }
 0x220   : > { %v7502_v15 = vpop.f32.mrf.mxu1  ;;  %v7570_v19 = vpop.f32.mrf.mxu0  ;;  %7741 = vmatmul.mubr.msk.bf16.vlgmr.msra.gmra.mxu1 %vm18_vm0, %v4134_v29  ;;  %7809 = vmatmul.mubr.msk.bf16.vlgmr.msra.gmra.mxu0 %vm18_vm0, %v9111_v41  ;;  %v4137_v29 = vpack.c.bf16 %v4078_v7, %v4077_v40  ;;  %v11974_v62 = vld [vmem:[#allocation7_spill] sm:$0xff]  ;;  %v4079_v40 = vld [vmem:[#allocation2 + $0xa9] sm:$0xff] }
 0x221   : > { %v9444_v32 = vadd.f32 %v2740_v13, %v2347_v43  ;;  %v2352_v53 = vadd.f32 %v7502_v15, %v9132_v5  ;;  %7744 = vmatprep.mubr.msk.bf16.mxu1 %vm18_vm0, %v4135_v49  ;;  %7812 = vmatprep.mubr.msk.bf16.mxu0 %vm18_vm0, %v4697_v10  ;;  %v11971_v13 = vld [vmem:[#allocation5_spill] sm:$0xff] }
 0x222   : > { %v2191_v0 = vpop.f32.mrf.mxu1  ;;  %v2753_v58 = vpop.f32.mrf.mxu0 }
 0x223   : > { %11966 = vst [vmem:[#allocation48_spill] sm:$0xff] %v9444_v32  ;;  %v9449_v20 = vadd.f32 %v7570_v19, %v2352_v53  ;;  %v2350_v41 = vadd.f32 %v2191_v0, %v9137_v12  ;;  %v11972_v12 = vld [vmem:[#allocation36_spill] sm:$0xff]  ;;  %v4080_v0 = vld [vmem:[#allocation2 + $0xb1] sm:$0xff] }
 0x224   : > { %v7503_v61 = vpop.f32.mrf.mxu1  ;;  %v7571_v59 = vpop.f32.mrf.mxu0 }
 0x225   : > { %11967 = vst [vmem:[#allocation49_spill] sm:$0xff] %v9449_v20  ;;  %v9452_v5 = vadd.f32 %v2753_v58, %v2350_v41  ;;  %v2353_v4 = vadd.f32 %v7503_v61, %v11969_v21  ;;  %v4081_v58 = vld [vmem:[#allocation2 + $0xc1] sm:$0xff]  ;;  %v4644_v61 = vld [vmem:[#allocation2 + $0xca] sm:$0xff] }
 0x226   : > { %v2194_v49 = vpop.f32.mrf.mxu1  ;;  %v2756_v10 = vpop.f32.mrf.mxu0  ;;  %v4643_v41 = vld [vmem:[#allocation2 + $0xc2] sm:$0xff] }
 0x227   : > { %11968 = vst [vmem:[#allocation50_spill] sm:$0xff] %v9452_v5  ;;  %v9455_v8 = vadd.f32 %v7571_v59, %v2353_v4  ;;  %v2351_v43 = vadd.f32 %v2194_v49, %v11971_v13 }
 0x228   : > { %v7506_v15 = vpop.f32.mrf.mxu1  ;;  %v7574_v19 = vpop.f32.mrf.mxu0  ;;  %7745 = vmatmul.mubr.msk.bf16.gmra.mxu1 %vm18_vm0, %v4136_v26  ;;  %7813 = vmatmul.mubr.msk.bf16.gmra.mxu0 %vm18_vm0, %v11972_v12  ;;  %v11976_v26 = vld [vmem:[#allocation4_spill] sm:$0xff] }
 0x229   : > { %11970 = vst [vmem:[#allocation3_spill] sm:$0xff] %v9455_v8  ;;  %v9461_v53 = vadd.f32 %v2756_v10, %v2351_v43  ;;  %v2356_v63 = vadd.f32 %v7506_v15, %v11974_v62  ;;  %7748 = vmatprep.mubr.msk.bf16.mxu1 %vm18_vm0, %v4137_v29  ;;  %7816 = vmatprep.mubr.msk.bf16.mxu0 %vm18_vm0, %v4699_v30  ;;  %v11978_v29 = vld [vmem:[#allocation8_spill] sm:$0xff]  ;;  %v11980_v8 = vld [vmem:[#allocation9_spill] sm:$0xff] }
 0x22a   : > { %v2207_v7 = vpop.f32.mrf.mxu1  ;;  %v2769_v11 = vpop.f32.mrf.mxu0  ;;  %v4138_v10 = vpack.c.bf16 %v4080_v0, %v4079_v40  ;;  %v4139_v30 = vpack.c.bf16 %v4082_v52, %v4081_v58  ;;  %v4701_v15 = vpack.c.bf16 %v4644_v61, %v4643_v41  ;;  %v11983_v0 = vld [vmem:[#allocation10_spill] sm:$0xff] }
 0x22b   : > { %11973 = vst [vmem:[#allocation5_spill] sm:$0xff] %v9461_v53  ;;  %v9466_v59 = vadd.f32 %v7574_v19, %v2356_v63  ;;  %v2354_v21 = vadd.f32 %v2207_v7, %v11976_v26  ;;  %v11981_v63 = vld [vmem:[#allocation6_spill] sm:$0xff] }
 0x22c   : > { %v7507_v4 = vpop.f32.mrf.mxu1  ;;  %v7575_v49 = vpop.f32.mrf.mxu0  ;;  %v4083_v58 = vld [vmem:[#allocation2 + $0xd9] sm:$0xff]  ;;  %v4085_v52 = vld [vmem:[#allocation2 + $0xf1] sm:$0xff] }
 0x22d   : > { %11975 = vst [vmem:[#allocation36_spill] sm:$0xff] %v9466_v59  ;;  %v9469_v13 = vadd.f32 %v2769_v11, %v2354_v21  ;;  %v2357_v43 = vadd.f32 %v7507_v4, %v11978_v29  ;;  %v4084_v11 = vld [vmem:[#allocation2 + $0xe1] sm:$0xff]  ;;  %v4086_v61 = vld [vmem:[#allocation2 + $0xf9] sm:$0xff] }
 0x22e   : > { %v2210_v12 = vpop.f32.mrf.mxu1  ;;  %v2772_v62 = vpop.f32.mrf.mxu0  ;;  %v4647_v26 = vld [vmem:[#allocation2 + $0xf2] sm:$0xff]  ;;  %v4648_v21 = vld [vmem:[#allocation2 + $0xfa] sm:$0xff] }
 0x22f   : > { %11977 = vst [vmem:[#allocation7_spill] sm:$0xff] %v9469_v13  ;;  %v9472_v53 = vadd.f32 %v7575_v49, %v2357_v43  ;;  %v2355_v5 = vadd.f32 %v2210_v12, %v11980_v8  ;;  %v11985_v49 = vld [vmem:[#allocation11_spill] sm:$0xff]  ;;  %v4140_v43 = vpack.c.bf16 %v4084_v11, %v4083_v58 }
 0x230   : > { %v7510_v20 = vpop.f32.mrf.mxu1  ;;  %v7578_v19 = vpop.f32.mrf.mxu0  ;;  %7749 = vmatmul.mubr.msk.bf16.gmra.mxu1 %vm18_vm0, %v4138_v10  ;;  %7817 = vmatmul.mubr.msk.bf16.gmra.mxu0 %vm18_vm0, %v11981_v63  ;;  %v11992_v11 = vld [vmem:[#allocation15_spill] sm:$0xff] }
 0x231   : > { %11979 = vst [vmem:[#allocation4_spill] sm:$0xff] %v9472_v53  ;;  %v9478_v40 = vadd.f32 %v2772_v62, %v2355_v5  ;;  %v2360_v7 = vadd.f32 %v7510_v20, %v11983_v0  ;;  %7752 = vmatprep.mubr.msk.bf16.mxu1 %vm18_vm0, %v4139_v30  ;;  %7820 = vmatprep.mubr.msk.bf16.mxu0 %vm18_vm0, %v4701_v15  ;;  %v11987_v30 = vld [vmem:[#allocation13_spill] sm:$0xff]  ;;  %v11989_v53 = vld [vmem:[#allocation14_spill] sm:$0xff] }
 0x232   : > { %v2223_v41 = vpop.f32.mrf.mxu1  ;;  %v2785_v8 = vpop.f32.mrf.mxu0  ;;  %v4141_v15 = vpack.c.bf16 %v4086_v61, %v4085_v52  ;;  %v4703_v62 = vpack.c.bf16 %v4648_v21, %v4647_v26  ;;  %v4087_v52 = vld [vmem:[#allocation2 + $0x109] sm:$0xff]  ;;  %v4089_v61 = vld [vmem:[#allocation2 + $0x121] sm:$0xff] }
 0x233   : > { %11982 = vst [vmem:[#allocation8_spill] sm:$0xff] %v9478_v40  ;;  %v9483_v4 = vadd.f32 %v7578_v19, %v2360_v7  ;;  %v2358_v10 = vadd.f32 %v2223_v41, %v11985_v49  ;;  %v11990_v7 = vld [vmem:[#allocation12_spill] sm:$0xff] }
 0x234   : > { %v7511_v5 = vpop.f32.mrf.mxu1  ;;  %v7579_v29 = vpop.f32.mrf.mxu0  ;;  %v4090_v21 = vld [vmem:[#allocation2 + $0x129] sm:$0xff] }
 0x235   : > { %11984 = vst [vmem:[#allocation9_spill] sm:$0xff] %v9483_v4  ;;  %v9486_v20 = vadd.f32 %v2785_v8, %v2358_v10  ;;  %v2361_v12 = vadd.f32 %v7511_v5, %v11987_v30  ;;  %v4088_v8 = vld [vmem:[#allocation2 + $0x111] sm:$0xff]  ;;  %v4651_v49 = vld [vmem:[#allocation2 + $0x122] sm:$0xff] }
 0x236   : > { %v2226_v63 = vpop.f32.mrf.mxu1  ;;  %v2788_v0 = vpop.f32.mrf.mxu0  ;;  %v4652_v10 = vld [vmem:[#allocation2 + $0x12a] sm:$0xff] }
 0x237   : > { %11986 = vst [vmem:[#allocation6_spill] sm:$0xff] %v9486_v20  ;;  %v9489_v40 = vadd.f32 %v7579_v29, %v2361_v12  ;;  %v2359_v13 = vadd.f32 %v2226_v63, %v11989_v53  ;;  %v11994_v29 = vld [vmem:[#allocation16_spill] sm:$0xff]  ;;  %v4142_v12 = vpack.c.bf16 %v4088_v8, %v4087_v52 }
 0x238   : > { %v7514_v59 = vpop.f32.mrf.mxu1  ;;  %v7582_v19 = vpop.f32.mrf.mxu0  ;;  %7753 = vmatmul.mubr.msk.bf16.gmra.mxu1 %vm18_vm0, %v4140_v43  ;;  %7821 = vmatmul.mubr.msk.bf16.gmra.mxu0 %vm18_vm0, %v11990_v7  ;;  %v12001_v8 = vld [vmem:[#allocation20_spill] sm:$0xff] }
 0x239   : > { %11988 = vst [vmem:[#allocation10_spill] sm:$0xff] %v9489_v40  ;;  %v9495_v58 = vadd.f32 %v2788_v0, %v2359_v13  ;;  %v2364_v41 = vadd.f32 %v7514_v59, %v11992_v11  ;;  %7756 = vmatprep.mubr.msk.bf16.mxu1 %vm18_vm0, %v4141_v15  ;;  %7824 = vmatprep.mubr.msk.bf16.mxu0 %vm18_vm0, %v4703_v62  ;;  %v11996_v15 = vld [vmem:[#allocation18_spill] sm:$0xff]  ;;  %v11998_v40 = vld [vmem:[#allocation19_spill] sm:$0xff] }
 0x23a   : > { %v2239_v26 = vpop.f32.mrf.mxu1  ;;  %v2801_v53 = vpop.f32.mrf.mxu0  ;;  %v4143_v62 = vpack.c.bf16 %v4090_v21, %v4089_v61  ;;  %v4705_v0 = vpack.c.bf16 %v4652_v10, %v4651_v49  ;;  %v4091_v61 = vld [vmem:[#allocation2 + $0x139] sm:$0xff]  ;;  %v4093_v21 = vld [vmem:[#allocation2 + $0x151] sm:$0xff] }
 0x23b   : > { %11991 = vst [vmem:[#allocation11_spill] sm:$0xff] %v9495_v58  ;;  %v9500_v5 = vadd.f32 %v7582_v19, %v2364_v41  ;;  %v2362_v43 = vadd.f32 %v2239_v26, %v11994_v29  ;;  %v11999_v41 = vld [vmem:[#allocation17_spill] sm:$0xff]  ;;  %v4094_v10 = vld [vmem:[#allocation2 + $0x159] sm:$0xff] }
 0x23c   : > { %v7515_v13 = vpop.f32.mrf.mxu1  ;;  %v7583_v30 = vpop.f32.mrf.mxu0  ;;  %v4655_v29 = vld [vmem:[#allocation2 + $0x152] sm:$0xff] }
 0x23d   : > { %11993 = vst [vmem:[#allocation13_spill] sm:$0xff] %v9500_v5  ;;  %v9503_v59 = vadd.f32 %v2801_v53, %v2362_v43  ;;  %v2365_v63 = vadd.f32 %v7515_v13, %v11996_v15  ;;  %v4092_v53 = vld [vmem:[#allocation2 + $0x141] sm:$0xff] }
 0x23e   : > { %v2242_v7 = vpop.f32.mrf.mxu1  ;;  %v2804_v11 = vpop.f32.mrf.mxu0  ;;  %v4656_v43 = vld [vmem:[#allocation2 + $0x15a] sm:$0xff] }
 0x23f   : > { %11995 = vst [vmem:[#allocation14_spill] sm:$0xff] %v9503_v59  ;;  %v9506_v58 = vadd.f32 %v7583_v30, %v2365_v63  ;;  %v2363_v20 = vadd.f32 %v2242_v7, %v11998_v40  ;;  %v12003_v30 = vld [vmem:[#allocation21_spill] sm:$0xff]  ;;  %v4144_v63 = vpack.c.bf16 %v4092_v53, %v4091_v61 }
 0x240   : > { %v7518_v4 = vpop.f32.mrf.mxu1  ;;  %v7586_v19 = vpop.f32.mrf.mxu0  ;;  %7757 = vmatmul.mubr.msk.bf16.gmra.mxu1 %vm18_vm0, %v4142_v12  ;;  %7825 = vmatmul.mubr.msk.bf16.gmra.mxu0 %vm18_vm0, %v11999_v41  ;;  %v12010_v53 = vld [vmem:[#allocation25_spill] sm:$0xff] }
 0x241   : > { %11997 = vst [vmem:[#allocation12_spill] sm:$0xff] %v9506_v58  ;;  %v9512_v52 = vadd.f32 %v2804_v11, %v2363_v20  ;;  %v2368_v26 = vadd.f32 %v7518_v4, %v12001_v8  ;;  %7760 = vmatprep.mubr.msk.bf16.mxu1 %vm18_vm0, %v4143_v62  ;;  %7828 = vmatprep.mubr.msk.bf16.mxu0 %vm18_vm0, %v4705_v0  ;;  %v12005_v62 = vld [vmem:[#allocation23_spill] sm:$0xff]  ;;  %v12007_v58 = vld [vmem:[#allocation24_spill] sm:$0xff] }
 0x242   : > { %v2255_v49 = vpop.f32.mrf.mxu1  ;;  %v2817_v40 = vpop.f32.mrf.mxu0  ;;  %v4145_v0 = vpack.c.bf16 %v4094_v10, %v4093_v21  ;;  %v4707_v11 = vpack.c.bf16 %v4656_v43, %v4655_v29  ;;  %v4095_v21 = vld [vmem:[#allocation2 + $0x169] sm:$0xff]  ;;  %v4097_v10 = vld [vmem:[#allocation2 + $0x181] sm:$0xff] }
 0x243   : > { %12000 = vst [vmem:[#allocation15_spill] sm:$0xff] %v9512_v52  ;;  %v9517_v13 = vadd.f32 %v7586_v19, %v2368_v26  ;;  %v2366_v12 = vadd.f32 %v2255_v49, %v12003_v30  ;;  %v12008_v26 = vld [vmem:[#allocation22_spill] sm:$0xff]  ;;  %v4098_v43 = vld [vmem:[#allocation2 + $0x189] sm:$0xff] }
 0x244   : > { %v7519_v20 = vpop.f32.mrf.mxu1  ;;  %v7587_v15 = vpop.f32.mrf.mxu0  ;;  %v4659_v30 = vld [vmem:[#allocation2 + $0x182] sm:$0xff] }
 0x245   : > { %12002 = vst [vmem:[#allocation16_spill] sm:$0xff] %v9517_v13  ;;  %v9520_v4 = vadd.f32 %v2817_v40, %v2366_v12  ;;  %v2369_v7 = vadd.f32 %v7519_v20, %v12005_v62  ;;  %v4096_v40 = vld [vmem:[#allocation2 + $0x171] sm:$0xff] }
 0x246   : > { %v2258_v41 = vpop.f32.mrf.mxu1  ;;  %v2820_v8 = vpop.f32.mrf.mxu0  ;;  %v4660_v12 = vld [vmem:[#allocation2 + $0x18a] sm:$0xff] }
 0x247   : > { %12004 = vst [vmem:[#allocation18_spill] sm:$0xff] %v9520_v4  ;;  %v9523_v52 = vadd.f32 %v7587_v15, %v2369_v7  ;;  %v2367_v59 = vadd.f32 %v2258_v41, %v12007_v58  ;;  %v12012_v15 = vld [vmem:[#allocation26_spill] sm:$0xff]  ;;  %v4146_v7 = vpack.c.bf16 %v4096_v40, %v4095_v21  ;;  %v4100_v40 = vld [vmem:[#allocation2 + $0x1a1] sm:$0xff] }
 0x248   : > { %v7522_v5 = vpop.f32.mrf.mxu1  ;;  %v7590_v19 = vpop.f32.mrf.mxu0  ;;  %7761 = vmatmul.mubr.msk.bf16.gmra.mxu1 %vm18_vm0, %v4144_v63  ;;  %7829 = vmatmul.mubr.msk.bf16.gmra.mxu0 %vm18_vm0, %v12008_v26  ;;  %v4099_v21 = vld [vmem:[#allocation2 + $0x199] sm:$0xff] }
 0x249   : > { %12006 = vst [vmem:[#allocation19_spill] sm:$0xff] %v9523_v52  ;;  %v9529_v61 = vadd.f32 %v2820_v8, %v2367_v59  ;;  %v2372_v49 = vadd.f32 %v7522_v5, %v12010_v53  ;;  %7764 = vmatprep.mubr.msk.bf16.mxu1 %vm18_vm0, %v4145_v0  ;;  %7832 = vmatprep.mubr.msk.bf16.mxu0 %vm18_vm0, %v4707_v11  ;;  %v12014_v0 = vld [vmem:[#allocation38_spill] sm:$0xff]  ;;  %v12016_v52 = vld [vmem:[#allocation28_spill] sm:$0xff] }
 0x24a   : > { %v2271_v29 = vpop.f32.mrf.mxu1  ;;  %v2833_v58 = vpop.f32.mrf.mxu0  ;;  %v4147_v11 = vpack.c.bf16 %v4098_v43, %v4097_v10  ;;  %v4709_v8 = vpack.c.bf16 %v4660_v12, %v4659_v30  ;;  %v4662_v43 = vld [vmem:[#allocation2 + $0x1a2] sm:$0xff] }
 0x24b   : > { %12009 = vst [vmem:[#allocation17_spill] sm:$0xff] %v9529_v61  ;;  %v9534_v20 = vadd.f32 %v7590_v19, %v2372_v49  ;;  %v2370_v63 = vadd.f32 %v2271_v29, %v12012_v15  ;;  %v12017_v49 = vld [vmem:[#allocation27_spill] sm:$0xff]  ;;  %v4102_v15 = vld [vmem:[#allocation2 + $0x1e9] sm:$0xff] }
 0x24c   : > { %v7523_v59 = vpop.f32.mrf.mxu1  ;;  %v7591_v62 = vpop.f32.mrf.mxu0 }
 0x24d   : > { %12011 = vst [vmem:[#allocation20_spill] sm:$0xff] %v9534_v20  ;;  %v9537_v5 = vadd.f32 %v2833_v58, %v2370_v63  ;;  %v2373_v41 = vadd.f32 %v7523_v59, %v12014_v0  ;;  %v4661_v58 = vld [vmem:[#allocation2 + $0x19a] sm:$0xff]  ;;  %v4663_v63 = vld [vmem:[#allocation2 + $0x1e2] sm:$0xff]  ;;  %v4664_v59 = vld [vmem:[#allocation2 + $0x1ea] sm:$0xff] }
 0x24e   : > { %v2274_v26 = vpop.f32.mrf.mxu1  ;;  %v2836_v53 = vpop.f32.mrf.mxu0  ;;  %v12021_v20 = vld [vmem:[#allocation31_spill] sm:$0xff] }
 0x24f   : > { %12013 = vst [vmem:[#allocation21_spill] sm:$0xff] %v9537_v5  ;;  %v9540_v61 = vadd.f32 %v7591_v62, %v2373_v41  ;;  %v2371_v4 = vadd.f32 %v2274_v26, %v12016_v52  ;;  %v4101_v52 = vld [vmem:[#allocation2 + $0x1e1] sm:$0xff]  ;;  %v4148_v26 = vpack.c.bf16 %v4100_v40, %v4099_v21 }
 0x250   : > { %v7526_v13 = vpop.f32.mrf.mxu1  ;;  %v7594_v19 = vpop.f32.mrf.mxu0  ;;  %7765 = vmatmul.mubr.msk.bf16.gmra.mxu1 %vm18_vm0, %v4146_v7  ;;  %7833 = vmatmul.mubr.msk.bf16.gmra.mxu0 %vm18_vm0, %v12017_v49  ;;  %v12019_v7 = vld [vmem:[#allocation29_spill] sm:$0xff]  ;;  %v4711_v49 = vpack.c.bf16 %v4664_v59, %v4663_v63  ;;  %v12022_v40 = vld [vmem:[#allocation32_spill] sm:$0xff] }
 0x251   : > { %12015 = vst [vmem:[#allocation23_spill] sm:$0xff] %v9540_v61  ;;  %v9546_v29 = vadd.f32 %v2836_v53, %v2371_v4  ;;  %v2376_v10 = vadd.f32 %v7526_v13, %v9246_v35  ;;  %7768 = vmatprep.mubr.msk.bf16.mxu1 %vm18_vm0, %v4147_v11  ;;  %7836 = vmatprep.mubr.msk.bf16.mxu0 %vm18_vm0, %v4709_v8  ;;  %v12020_v11 = vld [vmem:[#allocation30_spill] sm:$0xff] }
 0x252   : > { %v2287_v30 = vpop.f32.mrf.mxu1  ;;  %v2849_v12 = vpop.f32.mrf.mxu0  ;;  %v4710_v35 = vpack.c.bf16 %v4662_v43, %v4661_v58  ;;  %v4149_v53 = vpack.c.bf16 %v4102_v15, %v4101_v52  ;;  %v4103_v43 = vld [vmem:[#allocation2 + $0x1f9] sm:$0xff]  ;;  %v4104_v52 = vld [vmem:[#allocation2 + $0x201] sm:$0xff]  ;;  %v4105_v15 = vld [vmem:[#allocation2 + $0x211] sm:$0xff] }
 0x253   : > { %12018 = vst [vmem:[#allocation24_spill] sm:$0xff] %v9546_v29  ;;  %v9551_v62 = vadd.f32 %v7594_v19, %v2376_v10  ;;  %v2374_v0 = vadd.f32 %v2287_v30, %v12019_v7 }
 0x254   : > { %v7527_v4 = vpop.f32.mrf.mxu1  ;;  %v7595_v41 = vpop.f32.mrf.mxu0 }
 0x255   : > { %v9554_v13 = vadd.f32 %v2849_v12, %v2374_v0  ;;  %v2377_v8 = vadd.f32 %v7527_v4, %v12020_v11 }
 0x256   : > { %v2290_v29 = vpop.f32.mrf.mxu1  ;;  %v2852_v61 = vpop.f32.mrf.mxu0 }
 0x257   : > { %v9557_v5 = vadd.f32 %v7595_v41, %v2377_v8  ;;  %v2375_v32 = vadd.f32 %v2290_v29, %v12021_v20  ;;  %v4106_v20 = vld [vmem:[#allocation2 + $0x219] sm:$0xff] }
 0x258   : > { %v7530_v19 = vpop.f32.mrf.mxu1  ;;  %v7598_v10 = vpop.f32.mrf.mxu0  ;;  %7769 = vmatmul.mubr.msk.bf16.gmra.mxu1 %vm18_vm0, %v4148_v26  ;;  %7837 = vmatmul.mubr.msk.bf16.gmra.mxu0 %vm18_vm0, %v4710_v35  ;;  %v4151_v4 = vpack.c.bf16 %v4106_v20, %v4105_v15 }
 0x259   : > { %v9562_v21 = vadd.f32 %v2852_v61, %v2375_v32  ;;  %v2380_v58 = vadd.f32 %v7530_v19, %v12022_v40  ;;  %7772 = vmatprep.mubr.msk.bf16.mxu1 %vm18_vm0, %v4149_v53  ;;  %7840 = vmatprep.mubr.msk.bf16.mxu0 %vm18_vm0, %v4711_v49  ;;  %v4150_v32 = vpack.c.bf16 %v4104_v52, %v4103_v43  ;;  %v4108_v19 = vld [vmem:[#allocation2 + $0x231] sm:$0xff]  ;;  %v4109_v40 = vld [vmem:[#allocation2 + $0x241] sm:$0xff] }
 0x25a   : > { %v2303_v30 = vpop.f32.mrf.mxu1  ;;  %v2865_v12 = vpop.f32.mrf.mxu0 }
 0x25b   : > { %v9567_v29 = vadd.f32 %v7598_v10, %v2380_v58  ;;  %v2378_v63 = vadd.f32 %v2303_v30, %v9265_v54  ;;  %v4110_v58 = vld [vmem:[#allocation2 + $0x249] sm:$0xff] }
 0x25c   : > { %v7531_v59 = vpop.f32.mrf.mxu1  ;;  %v7599_v7 = vpop.f32.mrf.mxu0  ;;  %v4153_v20 = vpack.c.bf16 %v4110_v58, %v4109_v40 }
 0x25d   : > { %v9570_v61 = vadd.f32 %v2865_v12, %v2378_v63  ;;  %v2381_v0 = vadd.f32 %v7531_v59, %v9270_v37  ;;  %v4107_v37 = vld [vmem:[#allocation2 + $0x229] sm:$0xff] }
 0x25e   : > { %v2306_v41 = vpop.f32.mrf.mxu1  ;;  %v2868_v26 = vpop.f32.mrf.mxu0  ;;  %v4152_v12 = vpack.c.bf16 %v4108_v19, %v4107_v37  ;;  %v4114_v37 = vld [vmem:[#allocation2 + $0x279] sm:$0xff] }
 0x25f   : > { %v9573_v35 = vadd.f32 %v7599_v7, %v2381_v0  ;;  %v2379_v11 = vadd.f32 %v2306_v41, %v9275_v27  ;;  %v12023_v7 = vld [vmem:[#allocation34_spill] sm:$0xff]  ;;  %v12024_v41 = vld [vmem:[#allocation33_spill] sm:$0xff] }
 0x260   : > { %v7606_v8 = vpop.f32.mrf.mxu1  ;;  %v7674_v53 = vpop.f32.mrf.mxu0  ;;  %7773 = vmatmul.mubr.msk.bf16.gmra.mxu1 %vm18_vm0, %v4150_v32  ;;  %7841 = vmatmul.mubr.msk.bf16.gmra.mxu0 %vm18_vm0, %v9268_v9 }
 0x261   : > { %v9579_v54 = vadd.f32 %v2868_v26, %v2379_v11  ;;  %v3444_v49 = vadd.f32 %v7606_v8, %v9281_v51  ;;  %7776 = vmatprep.mubr.msk.bf16.mxu1 %vm18_vm0, %v4151_v4  ;;  %7844 = vmatprep.mubr.msk.bf16.mxu0 %vm18_vm0, %v9284_v55  ;;  %v4112_v11 = vld [vmem:[#allocation2 + $0x261] sm:$0xff] }
 0x262   : > { %v3187_v10 = vpop.f32.mrf.mxu1  ;;  %v3750_v27 = vpop.f32.mrf.mxu0 }
 0x263   : > { %v9585_v43 = vadd.f32 %v7674_v53, %v3444_v49  ;;  %v3442_v52 = vadd.f32 %v3187_v10, %v9286_v24  ;;  %v4113_v49 = vld [vmem:[#allocation2 + $0x271] sm:$0xff] }
 0x264   : > { %v7607_v9 = vpop.f32.mrf.mxu1  ;;  %v7675_v30 = vpop.f32.mrf.mxu0 }
 0x265   : > { %v9588_v15 = vadd.f32 %v3750_v27, %v3442_v52  ;;  %v3445_v51 = vadd.f32 %v7607_v9, %v9291_v31  ;;  %v4111_v31 = vld [vmem:[#allocation2 + $0x259] sm:$0xff]  ;;  %v4155_v9 = vpack.c.bf16 %v4114_v37, %v4113_v49 }
 0x266   : > { %v3190_v63 = vpop.f32.mrf.mxu1  ;;  %v3753_v55 = vpop.f32.mrf.mxu0  ;;  %v4154_v58 = vpack.c.bf16 %v4112_v11, %v4111_v31  ;;  %v4118_v31 = vld [vmem:[#allocation2 + $0x2a9] sm:$0xff] }
 0x267   : > { %v9591_v59 = vadd.f32 %v7675_v30, %v3445_v51  ;;  %v3443_v32 = vadd.f32 %v3190_v63, %v12023_v7  ;;  %v12025_v51 = vld [vmem:[#allocation37_spill] sm:$0xff]  ;;  %v12026_v7 = vld [vmem:[#allocation35_spill] sm:$0xff] }
 0x268   : > { %v7610_v0 = vpop.f32.mrf.mxu1  ;;  %v7678_v4 = vpop.f32.mrf.mxu0  ;;  %7777 = vmatmul.mubr.msk.bf16.gmra.mxu1 %vm18_vm0, %v4152_v12  ;;  %7845 = vmatmul.mubr.msk.bf16.gmra.mxu0 %vm18_vm0, %v12024_v41 }
 0x269   : > { %v9597_v24 = vadd.f32 %v3753_v55, %v3443_v32  ;;  %v3448_v26 = vadd.f32 %v7610_v0, %v9303_v38  ;;  %7780 = vmatprep.mubr.msk.bf16.mxu1 %vm18_vm0, %v4153_v20  ;;  %7848 = vmatprep.mubr.msk.bf16.mxu0 %vm18_vm0, %v9306_v25  ;;  %v4116_v0 = vld [vmem:[#allocation2 + $0x291] sm:$0xff] }
 0x26a   : > { %v3203_v8 = vpop.f32.mrf.mxu1  ;;  %v3766_v53 = vpop.f32.mrf.mxu0 }
 0x26b   : > { %v9603_v19 = vadd.f32 %v7678_v4, %v3448_v26  ;;  %v3446_v10 = vadd.f32 %v3203_v8, %v9308_v16  ;;  %v4117_v26 = vld [vmem:[#allocation2 + $0x2a1] sm:$0xff] }
 0x26c   : > { %v7611_v27 = vpop.f32.mrf.mxu1  ;;  %v7679_v40 = vpop.f32.mrf.mxu0 }
 0x26d   : > { %v9606_v52 = vadd.f32 %v3766_v53, %v3446_v10  ;;  %v3449_v38 = vadd.f32 %v7611_v27, %v9313_v6  ;;  %v4115_v6 = vld [vmem:[#allocation2 + $0x289] sm:$0xff]  ;;  %v4157_v27 = vpack.c.bf16 %v4118_v31, %v4117_v26 }
 0x26e   : > { %v3206_v30 = vpop.f32.mrf.mxu1  ;;  %v3769_v25 = vpop.f32.mrf.mxu0  ;;  %v4156_v37 = vpack.c.bf16 %v4116_v0, %v4115_v6  ;;  %v4122_v6 = vld [vmem:[#allocation2 + $0x2d9] sm:$0xff] }
 0x26f   : > { %v9609_v12 = vadd.f32 %v7679_v40, %v3449_v38  ;;  %v3447_v20 = vadd.f32 %v3206_v30, %v12025_v51  ;;  %v12027_v38 = vld [vmem:[#allocation40_spill] sm:$0xff]  ;;  %v12028_v51 = vld [vmem:[#allocation39_spill] sm:$0xff] }
 0x270   : > { %v7614_v63 = vpop.f32.mrf.mxu1  ;;  %v7682_v55 = vpop.f32.mrf.mxu0  ;;  %7781 = vmatmul.mubr.msk.bf16.gmra.mxu1 %vm18_vm0, %v4154_v58  ;;  %7849 = vmatmul.mubr.msk.bf16.gmra.mxu0 %vm18_vm0, %v12026_v7 }
 0x271   : > { %v9615_v16 = vadd.f32 %v3769_v25, %v3447_v20  ;;  %v3452_v32 = vadd.f32 %v7614_v63, %v9325_v60  ;;  %7784 = vmatprep.mubr.msk.bf16.mxu1 %vm18_vm0, %v4155_v9  ;;  %7852 = vmatprep.mubr.msk.bf16.mxu0 %vm18_vm0, %v9328_v18  ;;  %v4120_v63 = vld [vmem:[#allocation2 + $0x2c1] sm:$0xff] }
 0x272   : > { %v3219_v4 = vpop.f32.mrf.mxu1  ;;  %v3782_v41 = vpop.f32.mrf.mxu0 }
 0x273   : > { %v9621_v11 = vadd.f32 %v7682_v55, %v3452_v32  ;;  %v3450_v8 = vadd.f32 %v3219_v4, %v9330_v42  ;;  %v4121_v32 = vld [vmem:[#allocation2 + $0x2d1] sm:$0xff] }
 0x274   : > { %v7615_v53 = vpop.f32.mrf.mxu1  ;;  %v7683_v49 = vpop.f32.mrf.mxu0 }
 0x275   : > { %v9624_v10 = vadd.f32 %v3782_v41, %v3450_v8  ;;  %v3453_v60 = vadd.f32 %v7615_v53, %v9335_v2  ;;  %v4119_v2 = vld [vmem:[#allocation2 + $0x2b9] sm:$0xff]  ;;  %v4159_v53 = vpack.c.bf16 %v4122_v6, %v4121_v32 }
 0x276   : > { %v3222_v40 = vpop.f32.mrf.mxu1  ;;  %v3785_v18 = vpop.f32.mrf.mxu0  ;;  %v4158_v31 = vpack.c.bf16 %v4120_v63, %v4119_v2  ;;  %v4126_v2 = vld [vmem:[#allocation2 + $0x309] sm:$0xff] }
 0x277   : > { %v9627_v58 = vadd.f32 %v7683_v49, %v3453_v60  ;;  %v3451_v9 = vadd.f32 %v3222_v40, %v12027_v38  ;;  %v12029_v60 = vld [vmem:[#allocation42_spill] sm:$0xff]  ;;  %v12030_v38 = vld [vmem:[#allocation41_spill] sm:$0xff] }
 0x278   : > { %v7618_v30 = vpop.f32.mrf.mxu1  ;;  %v7686_v25 = vpop.f32.mrf.mxu0  ;;  %7785 = vmatmul.mubr.msk.bf16.gmra.mxu1 %vm18_vm0, %v4156_v37  ;;  %7853 = vmatmul.mubr.msk.bf16.gmra.mxu0 %vm18_vm0, %v12028_v51 }
 0x279   : > { %v9633_v42 = vadd.f32 %v3785_v18, %v3451_v9  ;;  %v3456_v20 = vadd.f32 %v7618_v30, %v9347_v48  ;;  %7788 = vmatprep.mubr.msk.bf16.mxu1 %vm18_vm0, %v4157_v27  ;;  %7856 = vmatprep.mubr.msk.bf16.mxu0 %vm18_vm0, %v9350_v33  ;;  %v4124_v30 = vld [vmem:[#allocation2 + $0x2f1] sm:$0xff] }
 0x27a   : > { %v3235_v55 = vpop.f32.mrf.mxu1  ;;  %v3798_v7 = vpop.f32.mrf.mxu0 }
 0x27b   : > { %v9639_v0 = vadd.f32 %v7686_v25, %v3456_v20  ;;  %v3454_v4 = vadd.f32 %v3235_v55, %v9352_v22  ;;  %v4125_v20 = vld [vmem:[#allocation2 + $0x301] sm:$0xff] }
 0x27c   : > { %v7619_v41 = vpop.f32.mrf.mxu1  ;;  %v7687_v26 = vpop.f32.mrf.mxu0 }
 0x27d   : > { %v9642_v8 = vadd.f32 %v3798_v7, %v3454_v4  ;;  %v3457_v48 = vadd.f32 %v7619_v41, %v9357_v14  ;;  %v4123_v14 = vld [vmem:[#allocation2 + $0x2e9] sm:$0xff]  ;;  %v4161_v41 = vpack.c.bf16 %v4126_v2, %v4125_v20 }
 0x27e   : > { %v3238_v49 = vpop.f32.mrf.mxu1  ;;  %v3801_v33 = vpop.f32.mrf.mxu0  ;;  %v4160_v6 = vpack.c.bf16 %v4124_v30, %v4123_v14  ;;  %v4130_v14 = vld [vmem:[#allocation2 + $0x339] sm:$0xff] }
 0x27f   : > { %v9645_v37 = vadd.f32 %v7687_v26, %v3457_v48  ;;  %v3455_v27 = vadd.f32 %v3238_v49, %v12029_v60  ;;  %v12031_v48 = vld [vmem:[#allocation44_spill] sm:$0xff]  ;;  %v12032_v60 = vld [vmem:[#allocation43_spill] sm:$0xff] }
 0x280   : > { %v7622_v40 = vpop.f32.mrf.mxu1  ;;  %v7690_v18 = vpop.f32.mrf.mxu0  ;;  %7789 = vmatmul.mubr.msk.bf16.gmra.mxu1 %vm18_vm0, %v4158_v31  ;;  %7857 = vmatmul.mubr.msk.bf16.gmra.mxu0 %vm18_vm0, %v12030_v38 }
 0x281   : > { %v9651_v22 = vadd.f32 %v3801_v33, %v3455_v27  ;;  %v3460_v9 = vadd.f32 %v7622_v40, %v9369_v39  ;;  %7792 = vmatprep.mubr.msk.bf16.mxu1 %vm18_vm0, %v4159_v53  ;;  %7860 = vmatprep.mubr.msk.bf16.mxu0 %vm18_vm0, %v9372_v46  ;;  %v4128_v40 = vld [vmem:[#allocation2 + $0x321] sm:$0xff] }
 0x282   : > { %v3251_v25 = vpop.f32.mrf.mxu1  ;;  %v3814_v51 = vpop.f32.mrf.mxu0 }
 0x283   : > { %v9657_v63 = vadd.f32 %v7690_v18, %v3460_v9  ;;  %v3458_v55 = vadd.f32 %v3251_v25, %v9374_v1  ;;  %v4129_v9 = vld [vmem:[#allocation2 + $0x331] sm:$0xff] }
 0x284   : > { %v7623_v7 = vpop.f32.mrf.mxu1  ;;  %v7691_v32 = vpop.f32.mrf.mxu0 }
 0x285   : > { %v9660_v4 = vadd.f32 %v3814_v51, %v3458_v55  ;;  %v3461_v39 = vadd.f32 %v7623_v7, %v9379_v56  ;;  %v4127_v56 = vld [vmem:[#allocation2 + $0x319] sm:$0xff]  ;;  %v4163_v7 = vpack.c.bf16 %v4130_v14, %v4129_v9 }
 0x286   : > { %v3254_v26 = vpop.f32.mrf.mxu1  ;;  %v3817_v46 = vpop.f32.mrf.mxu0  ;;  %v4162_v2 = vpack.c.bf16 %v4128_v40, %v4127_v56 }
 0x287   : > { %v9663_v31 = vadd.f32 %v7691_v32, %v3461_v39  ;;  %v3459_v53 = vadd.f32 %v3254_v26, %v12031_v48  ;;  %v12033_v39 = vld [vmem:[#allocation46_spill] sm:$0xff]  ;;  %v12034_v48 = vld [vmem:[#allocation45_spill] sm:$0xff] }
 0x288   : > { %v7626_v49 = vpop.f32.mrf.mxu1  ;;  %v7694_v33 = vpop.f32.mrf.mxu0  ;;  %7793 = vmatmul.mubr.msk.bf16.gmra.mxu1 %vm18_vm0, %v4160_v6  ;;  %7861 = vmatmul.mubr.msk.bf16.gmra.mxu0 %vm18_vm0, %v12032_v60  ;;  %v4693_v60 = vld [vmem:[#allocation2 + $0x34a] sm:$0xff] }
 0x289   : > { %v9669_v1 = vadd.f32 %v3817_v46, %v3459_v53  ;;  %v3464_v27 = vadd.f32 %v7626_v49, %v9391_v47  ;;  %7796 = vmatprep.mubr.msk.bf16.mxu1 %vm18_vm0, %v4161_v41  ;;  %7864 = vmatprep.mubr.msk.bf16.mxu0 %vm18_vm0, %v9394_v3  ;;  %v12035_v49 = vld [vmem:[#allocation47_spill] sm:$0xff] }
 0x28a   : > { %v3267_v18 = vpop.f32.mrf.mxu1  ;;  %v3830_v38 = vpop.f32.mrf.mxu0 }
 0x28b   : > { %v9675_v30 = vadd.f32 %v7694_v33, %v3464_v27  ;;  %v3462_v25 = vadd.f32 %v3267_v18, %v9396_v23  ;;  %v4131_v23 = vld [vmem:[#allocation2 + $0x349] sm:$0xff]  ;;  %v4694_v27 = vld [vmem:[#allocation2 + $0x352] sm:$0xff] }
 0x28c   : > { %v7627_v51 = vpop.f32.mrf.mxu1  ;;  %v7695_v20 = vpop.f32.mrf.mxu0 }
 0x28d   : > { %v9678_v55 = vadd.f32 %v3830_v38, %v3462_v25  ;;  %v3465_v47 = vadd.f32 %v7627_v51, %v9401_v45  ;;  %v4132_v45 = vld [vmem:[#allocation2 + $0x351] sm:$0xff]  ;;  %v4726_v51 = vpack.c.bf16 %v4694_v27, %v4693_v60 }
 0x28e   : > { %v3270_v32 = vpop.f32.mrf.mxu1  ;;  %v3833_v3 = vpop.f32.mrf.mxu0  ;;  %v4164_v25 = vpack.c.bf16 %v4132_v45, %v4131_v23 }
 0x28f   : > { %v9681_v6 = vadd.f32 %v7695_v20, %v3465_v47  ;;  %v3463_v41 = vadd.f32 %v3270_v32, %v12033_v39 }
 0x290   : > { %v7630_v26 = vpop.f32.mrf.mxu1  ;;  %v7698_v46 = vpop.f32.mrf.mxu0  ;;  %7797 = vmatmul.mubr.msk.bf16.gmra.mxu1 %vm18_vm0, %v4162_v2  ;;  %7865 = vmatmul.mubr.msk.bf16.gmra.mxu0 %vm18_vm0, %v12034_v48 }
 0x291   : > { %v9687_v53 = vadd.f32 %v3833_v3, %v3463_v41  ;;  %v3468_v33 = vadd.f32 %v7630_v26, %v12035_v49  ;;  %7800 = vmatprep.mubr.msk.bf16.mxu1 %vm18_vm0, %v4163_v7  ;;  %7868 = vmatprep.mubr.msk.bf16.mxu0 %vm18_vm0, %v9416_v50 }
 0x292   : > { %v3283_v56 = vpop.f32.mrf.mxu1  ;;  %v3846_v40 = vpop.f32.mrf.mxu0 }
 0x293   : > { %v9693_v18 = vadd.f32 %v7698_v46, %v3468_v33  ;;  %v3466_v38 = vadd.f32 %v3283_v56, %v9418_v28  ;;  %v12036_v56 = vld [vmem:[#allocation48_spill] sm:$0xff] }
 0x294   : > { %v7631_v9 = vpop.f32.mrf.mxu1  ;;  %v7699_v14 = vpop.f32.mrf.mxu0 }
 0x295   : > { %v9696_v20 = vadd.f32 %v3846_v40, %v3466_v38  ;;  %v3469_v2 = vadd.f32 %v7631_v9, %v9421_v57 }
 0x296   : > { %v3286_v47 = vpop.f32.mrf.mxu1  ;;  %v3849_v7 = vpop.f32.mrf.mxu0 }
 0x297   : > { %v9699_v50 = vadd.f32 %v7699_v14, %v3469_v2  ;;  %v3467_v32 = vadd.f32 %v3286_v47, %v9427_v36  ;;  %v12037_v14 = vld [vmem:[#allocation49_spill] sm:$0xff]  ;;  %v12038_v47 = vld [vmem:[#allocation50_spill] sm:$0xff] }
 0x298   : > { %v7634_v3 = vpop.f32.mrf.mxu1  ;;  %v7702_v39 = vpop.f32.mrf.mxu0  ;;  %7801 = vmatmul.mubr.msk.bf16.gmra.mxu1 %vm18_vm0, %v4164_v25  ;;  %7869 = vmatmul.mubr.msk.bf16.gmra.mxu0 %vm18_vm0, %v4726_v51 }
 0x299   : > { %v9704_v28 = vadd.f32 %v3849_v7, %v3467_v32  ;;  %v3472_v41 = vadd.f32 %v7634_v3, %v9432_v17 }
 0x29a   : > { %v3299_v26 = vpop.f32.mrf.mxu1  ;;  %v3862_v46 = vpop.f32.mrf.mxu0 }
 0x29b   : > { %v9707_v48 = vadd.f32 %v7702_v39, %v3472_v41  ;;  %v3470_v57 = vadd.f32 %v3299_v26, %v9435_v34  ;;  %v12039_v39 = vld [vmem:[#allocation3_spill] sm:$0xff] }
 0x29c   : > { %v7635_v23 = vpop.f32.mrf.mxu1  ;;  %v7703_v49 = vpop.f32.mrf.mxu0 }
 0x29d   : > { %v9710_v33 = vadd.f32 %v3862_v46, %v3470_v57  ;;  %v3473_v36 = vadd.f32 %v7635_v23, %v9438_v44  ;;  %v12040_v23 = vld [vmem:[#allocation5_spill] sm:$0xff] }
 0x29e   : > { %v3302_v45 = vpop.f32.mrf.mxu1  ;;  %v3865_v60 = vpop.f32.mrf.mxu0 }
 0x29f   : > { %v9713_v27 = vadd.f32 %v7703_v49, %v3473_v36  ;;  %v3471_v40 = vadd.f32 %v3302_v45, %v12036_v56  ;;  %v12041_v56 = vld [vmem:[#allocation36_spill] sm:$0xff] }
 0x2a0   : > { %v7638_v38 = vpop.f32.mrf.mxu1  ;;  %v7706_v17 = vpop.f32.mrf.mxu0 }
 0x2a1   : > { %v9716_v9 = vadd.f32 %v3865_v60, %v3471_v40  ;;  %v3476_v25 = vadd.f32 %v7638_v38, %v12037_v14 }
 0x2a2   : > { %v3315_v51 = vpop.f32.mrf.mxu1  ;;  %v3878_v34 = vpop.f32.mrf.mxu0 }
 0x2a3   : > { %v9719_v2 = vadd.f32 %v7706_v17, %v3476_v25  ;;  %v3474_v7 = vadd.f32 %v3315_v51, %v12038_v47  ;;  %v12043_v25 = vld [vmem:[#allocation7_spill] sm:$0xff] }
 0x2a4   : > { %v7639_v32 = vpop.f32.mrf.mxu1  ;;  %v7707_v44 = vpop.f32.mrf.mxu0 }
 0x2a5   : > { %v9722_v3 = vadd.f32 %v3878_v34, %v3474_v7  ;;  %v3477_v41 = vadd.f32 %v7639_v32, %v12039_v39  ;;  %v12045_v32 = vld [vmem:[#allocation4_spill] sm:$0xff] }
 0x2a6   : > { %v3318_v26 = vpop.f32.mrf.mxu1  ;;  %v3881_v46 = vpop.f32.mrf.mxu0 }
 0x2a7   : > { %v9725_v57 = vadd.f32 %v7707_v44, %v3477_v41  ;;  %v3475_v49 = vadd.f32 %v3318_v26, %v12040_v23 }
 0x2a8   : > { %v7642_v36 = vpop.f32.mrf.mxu1  ;;  %v7710_v45 = vpop.f32.mrf.mxu0 }
 0x2a9   : > { %v9728_v60 = vadd.f32 %v3881_v46, %v3475_v49  ;;  %v3480_v40 = vadd.f32 %v7642_v36, %v12041_v56  ;;  %v12047_v46 = vld [vmem:[#allocation8_spill] sm:$0xff] }
 0x2aa   : > { %v3331_v38 = vpop.f32.mrf.mxu1  ;;  %v3894_v17 = vpop.f32.mrf.mxu0 }
 0x2ab   : > { %v9731_v14 = vadd.f32 %v7710_v45, %v3480_v40  ;;  %v3478_v51 = vadd.f32 %v3331_v38, %v12043_v25  ;;  %v12049_v45 = vld [vmem:[#allocation9_spill] sm:$0xff] }
 0x2ac   : > { %v7643_v34 = vpop.f32.mrf.mxu1  ;;  %v7711_v47 = vpop.f32.mrf.mxu0 }
 0x2ad   : > { %12042 = vst [vmem:[#allocation22_spill] sm:$0xff] %v9731_v14  ;;  %v9734_v7 = vadd.f32 %v3894_v17, %v3478_v51  ;;  %v3481_v44 = vadd.f32 %v7643_v34, %v12045_v32  ;;  %v12051_v17 = vld [vmem:[#allocation6_spill] sm:$0xff] }
 0x2ae   : > { %v3334_v39 = vpop.f32.mrf.mxu1  ;;  %v3897_v41 = vpop.f32.mrf.mxu0 }
 0x2af   : > { %12044 = vst [vmem:[#allocation25_spill] sm:$0xff] %v9734_v7  ;;  %v9737_v26 = vadd.f32 %v7711_v47, %v3481_v44  ;;  %v3479_v23 = vadd.f32 %v3334_v39, %v12047_v46  ;;  %v12053_v47 = vld [vmem:[#allocation10_spill] sm:$0xff] }
 0x2b0   : > { %v7646_v49 = vpop.f32.mrf.mxu1  ;;  %v7714_v36 = vpop.f32.mrf.mxu0 }
 0x2b1   : > { %12046 = vst [vmem:[#allocation26_spill] sm:$0xff] %v9737_v26  ;;  %v9740_v56 = vadd.f32 %v3897_v41, %v3479_v23  ;;  %v3484_v40 = vadd.f32 %v7646_v49, %v12049_v45  ;;  %v12055_v41 = vld [vmem:[#allocation11_spill] sm:$0xff] }
 0x2b2   : > { %v3347_v14 = vpop.f32.mrf.mxu1  ;;  %v3910_v38 = vpop.f32.mrf.mxu0 }
 0x2b3   : > { %12048 = vst [vmem:[#allocation38_spill] sm:$0xff] %v9740_v56  ;;  %v9743_v25 = vadd.f32 %v7714_v36, %v3484_v40  ;;  %v3482_v51 = vadd.f32 %v3347_v14, %v12051_v17  ;;  %v12057_v36 = vld [vmem:[#allocation13_spill] sm:$0xff] }
 0x2b4   : > { %v7647_v7 = vpop.f32.mrf.mxu1  ;;  %v7715_v34 = vpop.f32.mrf.mxu0 }
 0x2b5   : > { %12050 = vst [vmem:[#allocation28_spill] sm:$0xff] %v9743_v25  ;;  %v9746_v32 = vadd.f32 %v3910_v38, %v3482_v51  ;;  %v3485_v44 = vadd.f32 %v7647_v7, %v12053_v47  ;;  %v12059_v38 = vld [vmem:[#allocation14_spill] sm:$0xff] }
 0x2b6   : > { %v3350_v26 = vpop.f32.mrf.mxu1  ;;  %v3913_v39 = vpop.f32.mrf.mxu0 }
 0x2b7   : > { %12052 = vst [vmem:[#allocation27_spill] sm:$0xff] %v9746_v32  ;;  %v9749_v46 = vadd.f32 %v7715_v34, %v3485_v44  ;;  %v3483_v23 = vadd.f32 %v3350_v26, %v12055_v41  ;;  %v12061_v34 = vld [vmem:[#allocation12_spill] sm:$0xff] }
 0x2b8   : > { %v7650_v56 = vpop.f32.mrf.mxu1  ;;  %v7718_v49 = vpop.f32.mrf.mxu0 }
 0x2b9   : > { %12054 = vst [vmem:[#allocation29_spill] sm:$0xff] %v9749_v46  ;;  %v9752_v45 = vadd.f32 %v3913_v39, %v3483_v23  ;;  %v3488_v40 = vadd.f32 %v7650_v56, %v12057_v36  ;;  %v12063_v39 = vld [vmem:[#allocation15_spill] sm:$0xff] }
 0x2ba   : > { %v3363_v25 = vpop.f32.mrf.mxu1  ;;  %v3926_v14 = vpop.f32.mrf.mxu0 }
 0x2bb   : > { %12056 = vst [vmem:[#allocation30_spill] sm:$0xff] %v9752_v45  ;;  %v9755_v17 = vadd.f32 %v7718_v49, %v3488_v40  ;;  %v3486_v51 = vadd.f32 %v3363_v25, %v12059_v38  ;;  %v12065_v49 = vld [vmem:[#allocation16_spill] sm:$0xff] }
 0x2bc   : > { %v7651_v32 = vpop.f32.mrf.mxu1  ;;  %v7719_v7 = vpop.f32.mrf.mxu0 }
 0x2bd   : > { %12058 = vst [vmem:[#allocation31_spill] sm:$0xff] %v9755_v17  ;;  %v9758_v47 = vadd.f32 %v3926_v14, %v3486_v51  ;;  %v3489_v44 = vadd.f32 %v7651_v32, %v12061_v34  ;;  %v12067_v14 = vld [vmem:[#allocation18_spill] sm:$0xff] }
 0x2be   : > { %v3366_v46 = vpop.f32.mrf.mxu1  ;;  %v3929_v26 = vpop.f32.mrf.mxu0 }
 0x2bf   : > { %12060 = vst [vmem:[#allocation32_spill] sm:$0xff] %v9758_v47  ;;  %v9761_v41 = vadd.f32 %v7719_v7, %v3489_v44  ;;  %v3487_v23 = vadd.f32 %v3366_v46, %v12063_v39  ;;  %v12069_v7 = vld [vmem:[#allocation19_spill] sm:$0xff] }
 0x2c0   : > { %v7654_v45 = vpop.f32.mrf.mxu1  ;;  %v7722_v56 = vpop.f32.mrf.mxu0 }
 0x2c1   : > { %12062 = vst [vmem:[#allocation34_spill] sm:$0xff] %v9761_v41  ;;  %v9764_v36 = vadd.f32 %v3929_v26, %v3487_v23  ;;  %v3492_v40 = vadd.f32 %v7654_v45, %v12065_v49  ;;  %v12071_v26 = vld [vmem:[#allocation17_spill] sm:$0xff] }
 0x2c2   : > { %v3379_v17 = vpop.f32.mrf.mxu1  ;;  %v3942_v25 = vpop.f32.mrf.mxu0 }
 0x2c3   : > { %12064 = vst [vmem:[#allocation33_spill] sm:$0xff] %v9764_v36  ;;  %v9767_v38 = vadd.f32 %v7722_v56, %v3492_v40  ;;  %v3490_v51 = vadd.f32 %v3379_v17, %v12067_v14  ;;  %v12073_v56 = vld [vmem:[#allocation20_spill] sm:$0xff] }
 0x2c4   : > { %v7655_v47 = vpop.f32.mrf.mxu1  ;;  %v7723_v32 = vpop.f32.mrf.mxu0 }
 0x2c5   : > { %12066 = vst [vmem:[#allocation37_spill] sm:$0xff] %v9767_v38  ;;  %v9770_v34 = vadd.f32 %v3942_v25, %v3490_v51  ;;  %v3493_v44 = vadd.f32 %v7655_v47, %v12069_v7  ;;  %v12074_v25 = vld [vmem:[#allocation21_spill] sm:$0xff] }
 0x2c6   : > { %v3382_v41 = vpop.f32.mrf.mxu1  ;;  %v3945_v46 = vpop.f32.mrf.mxu0 }
 0x2c7   : > { %12068 = vst [vmem:[#allocation35_spill] sm:$0xff] %v9770_v34  ;;  %v9773_v39 = vadd.f32 %v7723_v32, %v3493_v44  ;;  %v3491_v23 = vadd.f32 %v3382_v41, %v12071_v26  ;;  %v12075_v32 = vld [vmem:[#allocation23_spill] sm:$0xff] }
 0x2c8   : > { %v7658_v36 = vpop.f32.mrf.mxu1  ;;  %v7726_v45 = vpop.f32.mrf.mxu0 }
 0x2c9   : > { %12070 = vst [vmem:[#allocation40_spill] sm:$0xff] %v9773_v39  ;;  %v9776_v49 = vadd.f32 %v3945_v46, %v3491_v23  ;;  %v3496_v40 = vadd.f32 %v7658_v36, %v12073_v56  ;;  %v12076_v46 = vld [vmem:[#allocation24_spill] sm:$0xff] }
 0x2ca   : > { %v3395_v38 = vpop.f32.mrf.mxu1  ;;  %v3958_v17 = vpop.f32.mrf.mxu0 }
 0x2cb   : > { %12072 = vst [vmem:[#allocation39_spill] sm:$0xff] %v9776_v49  ;;  %v9779_v14 = vadd.f32 %v7726_v45, %v3496_v40  ;;  %v3494_v51 = vadd.f32 %v3395_v38, %v12074_v25 }
 0x2cc   : > { %v7659_v34 = vpop.f32.mrf.mxu1  ;;  %v7727_v47 = vpop.f32.mrf.mxu0 }
 0x2cd   : > { %v9782_v7 = vadd.f32 %v3958_v17, %v3494_v51  ;;  %v3497_v44 = vadd.f32 %v7659_v34, %v12075_v32 }
 0x2ce   : > { %v3398_v39 = vpop.f32.mrf.mxu1  ;;  %v3961_v41 = vpop.f32.mrf.mxu0 }
 0x2cf   : > { %v9785_v26 = vadd.f32 %v7727_v47, %v3497_v44  ;;  %v3495_v23 = vadd.f32 %v3398_v39, %v12076_v46 }
 0x2d0   : > { %v7662_v49 = vpop.f32.mrf.mxu1  ;;  %v7730_v36 = vpop.f32.mrf.mxu0 }
 0x2d1   : > { %v9788_v56 = vadd.f32 %v3961_v41, %v3495_v23  ;;  %v3500_v45 = vadd.f32 %v7662_v49, %v9551_v62 }
 0x2d2   : > { %v3411_v40 = vpop.f32.mrf.mxu1  ;;  %v3974_v38 = vpop.f32.mrf.mxu0 }
 0x2d3   : > { %v9791_v25 = vadd.f32 %v7730_v36, %v3500_v45  ;;  %v3498_v17 = vadd.f32 %v3411_v40, %v9554_v13 }
 0x2d4   : > { %v7663_v51 = vpop.f32.mrf.mxu1  ;;  %v7731_v34 = vpop.f32.mrf.mxu0 }
 0x2d5   : > { %v9794_v32 = vadd.f32 %v3974_v38, %v3498_v17  ;;  %v3501_v47 = vadd.f32 %v7663_v51, %v9557_v5 }
 0x2d6   : > { %v3414_v44 = vpop.f32.mrf.mxu1  ;;  %v3977_v39 = vpop.f32.mrf.mxu0 }
 0x2d7   : > { %v9797_v46 = vadd.f32 %v7731_v34, %v3501_v47  ;;  %v3499_v41 = vadd.f32 %v3414_v44, %v9562_v21 }
 0x2d8   : > { %v7666_v23 = vpop.f32.mrf.mxu1  ;;  %v7734_v62 = vpop.f32.mrf.mxu0 }
 0x2d9   : > { %v9800_v49 = vadd.f32 %v3977_v39, %v3499_v41  ;;  %v3504_v36 = vadd.f32 %v7666_v23, %v9567_v29 }
 0x2da   : > { %v3427_v45 = vpop.f32.mrf.mxu1  ;;  %v3990_v13 = vpop.f32.mrf.mxu0 }
 0x2db   : > { %v9803_v40 = vadd.f32 %v7734_v62, %v3504_v36  ;;  %v3502_v38 = vadd.f32 %v3427_v45, %v9570_v61 }
 0x2dc   : > { %v7667_v17 = vpop.f32.mrf.mxu1  ;;  %v7735_v5 = vpop.f32.mrf.mxu0 }
 0x2dd   : > { %12077 = vst [vmem:[#allocation42_spill] sm:$0xff] %v9803_v40  ;;  %v9806_v51 = vadd.f32 %v3990_v13, %v3502_v38  ;;  %v3505_v34 = vadd.f32 %v7667_v17, %v9573_v35 }
 0x2de   : > { %v3430_v47 = vpop.f32.mrf.mxu1  ;;  %v3993_v21 = vpop.f32.mrf.mxu0 }
 0x2df   : > { %v9809_v44 = vadd.f32 %v7735_v5, %v3505_v34  ;;  %v3503_v39 = vadd.f32 %v3430_v47, %v9579_v54 }
 0x2e0   : > { %v7742_v41 = vpop.f32.mrf.mxu1  ;;  %v7810_v29 = vpop.f32.mrf.mxu0 }
 0x2e1   : > { %v9812_v23 = vadd.f32 %v3993_v21, %v3503_v39  ;;  %v4569_v13 = vadd.f32 %v7742_v41, %v9585_v43 }
 0x2e2   : > { %v4312_v62 = vpop.f32.mrf.mxu1  ;;  %v4874_v36 = vpop.f32.mrf.mxu0 }
 0x2e3   : > { %12078 = vst [vmem:[#allocation41_spill] sm:$0xff] %v9812_v23  ;;  %v4567_v61 = vadd.f32 %v4312_v62, %v9588_v15  ;;  %v9820_v21 = vadd.f32 %v7810_v29, %v4569_v13 }
 0x2e4   : > { %v7743_v45 = vpop.f32.mrf.mxu1  ;;  %v7811_v40 = vpop.f32.mrf.mxu0 }
 0x2e5   : > { %v9816_v17 = vadd.f32 %v4874_v36, %v4567_v61  ;;  %v4570_v5 = vadd.f32 %v7743_v45, %v9591_v59  ;;  %v5196_v29 = vsel %vm18_vm0, %v9820_v21, 0.0 }
 0x2e6   : > { %v4315_v38 = vpop.f32.mrf.mxu1  ;;  %v4877_v35 = vpop.f32.mrf.mxu0 }
 0x2e7   : > { %v4568_v54 = vadd.f32 %v4315_v38, %v9597_v24  ;;  %v5193_v62 = vsel %vm18_vm0, %v9816_v17, 0.0  ;;  %v9826_v43 = vadd.f32 %v7811_v40, %v4570_v5 }
 0x2e8   : > { %v7746_v34 = vpop.f32.mrf.mxu1  ;;  %v7814_v47 = vpop.f32.mrf.mxu0 }
 0x2e9   : > { %v9822_v39 = vadd.f32 %v4877_v35, %v4568_v54  ;;  %v4573_v45 = vadd.f32 %v7746_v34, %v9603_v19  ;;  %v5198_v40 = vsel %vm18_vm0, %v9826_v43, 0.0 }
 0x2ea   : > { %v4328_v23 = vpop.f32.mrf.mxu1  ;;  %v4890_v15 = vpop.f32.mrf.mxu0 }
 0x2eb   : > { %12079 = vst [vmem:[#allocation44_spill] sm:$0xff] %v9822_v39  ;;  %v5194_v41 = vsel %vm18_vm0, %v9822_v39, 0.0  ;;  %v4571_v59 = vadd.f32 %v4328_v23, %v9606_v52  ;;  %v9840_v39 = vadd.f32 %v7814_v47, %v4573_v45 }
 0x2ec   : > { %v5195_v36 = vadd.f32 %v5194_v41, %v5193_v62  ;;  %v7747_v24 = vpop.f32.mrf.mxu1  ;;  %v7815_v61 = vpop.f32.mrf.mxu0 }
 0x2ed   : > { %v9834_v13 = vadd.f32 %v4890_v15, %v4571_v59  ;;  %v4574_v5 = vadd.f32 %v7747_v24, %v9609_v12  ;;  %v5204_v47 = vsel %vm18_vm0, %v9840_v39, 0.0 }
 0x2ee   : > { %v5197_v38 = vadd.f32 %v5196_v29, %v5195_v36  ;;  %v4331_v35 = vpop.f32.mrf.mxu1  ;;  %v4893_v54 = vpop.f32.mrf.mxu0 }
 0x2ef   : > { %v4572_v52 = vadd.f32 %v4331_v35, %v9615_v16  ;;  %v5200_v19 = vsel %vm18_vm0, %v9834_v13, 0.0  ;;  %v9846_v29 = vadd.f32 %v7815_v61, %v4574_v5 }
 0x2f0   : > { %v5199_v23 = vadd.f32 %v5198_v40, %v5197_v38  ;;  %v7750_v62 = vpop.f32.mrf.mxu1  ;;  %v7818_v41 = vpop.f32.mrf.mxu0 }
 0x2f1   : > { %v9844_v34 = vadd.f32 %v4893_v54, %v4572_v52  ;;  %v4577_v45 = vadd.f32 %v7750_v62, %v9621_v11  ;;  %v5206_v61 = vsel %vm18_vm0, %v9846_v29, 0.0 }
 0x2f2   : > { %v5201_v15 = vadd.f32 %v5200_v19, %v5199_v23  ;;  %v4344_v59 = vpop.f32.mrf.mxu1  ;;  %v4906_v36 = vpop.f32.mrf.mxu0 }
 0x2f3   : > { %v5202_v12 = vsel %vm18_vm0, %v9844_v34, 0.0  ;;  %v4575_v16 = vadd.f32 %v4344_v59, %v9624_v10 }
 0x2f4   : > { %v5203_v24 = vadd.f32 %v5202_v12, %v5201_v15  ;;  %v7751_v38 = vpop.f32.mrf.mxu1  ;;  %v7819_v35 = vpop.f32.mrf.mxu0  ;;  %v9860_v12 = vadd.f32 %v7818_v41, %v4577_v45 }
 0x2f5   : > { %v9854_v54 = vadd.f32 %v4906_v36, %v4575_v16  ;;  %v4578_v5 = vadd.f32 %v7751_v38, %v9627_v58 }
 0x2f6   : > { %v5205_v40 = vadd.f32 %v5204_v47, %v5203_v24  ;;  %v4347_v52 = vpop.f32.mrf.mxu1  ;;  %v4909_v23 = vpop.f32.mrf.mxu0  ;;  %v5212_v41 = vsel %vm18_vm0, %v9860_v12, 0.0 }
 0x2f7   : > { %v4576_v10 = vadd.f32 %v4347_v52, %v9633_v42  ;;  %v5208_v11 = vsel %vm18_vm0, %v9854_v54, 0.0  ;;  %v9866_v47 = vadd.f32 %v7819_v35, %v4578_v5 }
 0x2f8   : > { %v5207_v19 = vadd.f32 %v5206_v61, %v5205_v40  ;;  %v7754_v15 = vpop.f32.mrf.mxu1  ;;  %v7822_v59 = vpop.f32.mrf.mxu0 }
 0x2f9   : > { %v9864_v62 = vadd.f32 %v4909_v23, %v4576_v10  ;;  %v4581_v45 = vadd.f32 %v7754_v15, %v9639_v0  ;;  %v5214_v35 = vsel %vm18_vm0, %v9866_v47, 0.0 }
 0x2fa   : > { %v5209_v36 = vadd.f32 %v5208_v11, %v5207_v19  ;;  %v4360_v16 = vpop.f32.mrf.mxu1  ;;  %v4922_v24 = vpop.f32.mrf.mxu0 }
 0x2fb   : > { %v5210_v58 = vsel %vm18_vm0, %v9864_v62, 0.0  ;;  %v4579_v42 = vadd.f32 %v4360_v16, %v9642_v8 }
 0x2fc   : > { %v5211_v38 = vadd.f32 %v5210_v58, %v5209_v36  ;;  %v7755_v40 = vpop.f32.mrf.mxu1  ;;  %v7823_v52 = vpop.f32.mrf.mxu0  ;;  %v9880_v58 = vadd.f32 %v7822_v59, %v4581_v45 }
 0x2fd   : > { %v9874_v23 = vadd.f32 %v4922_v24, %v4579_v42  ;;  %v4582_v5 = vadd.f32 %v7755_v40, %v9645_v37 }
 0x2fe   : > { %v5213_v61 = vadd.f32 %v5212_v41, %v5211_v38  ;;  %v4363_v10 = vpop.f32.mrf.mxu1  ;;  %v4925_v19 = vpop.f32.mrf.mxu0  ;;  %v5220_v59 = vsel %vm18_vm0, %v9880_v58, 0.0 }
 0x2ff   : > { %v4580_v8 = vadd.f32 %v4363_v10, %v9651_v22  ;;  %v5216_v0 = vsel %vm18_vm0, %v9874_v23, 0.0  ;;  %v9886_v41 = vadd.f32 %v7823_v52, %v4582_v5 }
 0x300   : > { %v5215_v11 = vadd.f32 %v5214_v35, %v5213_v61  ;;  %v7758_v36 = vpop.f32.mrf.mxu1  ;;  %v7826_v16 = vpop.f32.mrf.mxu0 }
 0x301   : > { %v9884_v15 = vadd.f32 %v4925_v19, %v4580_v8  ;;  %v4585_v45 = vadd.f32 %v7758_v36, %v9657_v63  ;;  %v5222_v52 = vsel %vm18_vm0, %v9886_v41, 0.0 }
 0x302   : > { %v5217_v24 = vadd.f32 %v5216_v0, %v5215_v11  ;;  %v4376_v42 = vpop.f32.mrf.mxu1  ;;  %v4938_v38 = vpop.f32.mrf.mxu0 }
 0x303   : > { %v5218_v37 = vsel %vm18_vm0, %v9884_v15, 0.0  ;;  %v4583_v22 = vadd.f32 %v4376_v42, %v9660_v4 }
 0x304   : > { %v5219_v40 = vadd.f32 %v5218_v37, %v5217_v24  ;;  %v7759_v61 = vpop.f32.mrf.mxu1  ;;  %v7827_v10 = vpop.f32.mrf.mxu0  ;;  %v9900_v37 = vadd.f32 %v7826_v16, %v4585_v45 }
 0x305   : > { %v9894_v19 = vadd.f32 %v4938_v38, %v4583_v22  ;;  %v4586_v5 = vadd.f32 %v7759_v61, %v9663_v31 }
 0x306   : > { %v5221_v35 = vadd.f32 %v5220_v59, %v5219_v40  ;;  %v4379_v8 = vpop.f32.mrf.mxu1  ;;  %v4941_v11 = vpop.f32.mrf.mxu0  ;;  %v5228_v16 = vsel %vm18_vm0, %v9900_v37, 0.0 }
 0x307   : > { %v4584_v4 = vadd.f32 %v4379_v8, %v9669_v1  ;;  %v5224_v63 = vsel %vm18_vm0, %v9894_v19, 0.0  ;;  %v9906_v59 = vadd.f32 %v7827_v10, %v4586_v5 }
 0x308   : > { %v5223_v0 = vadd.f32 %v5222_v52, %v5221_v35  ;;  %v7762_v24 = vpop.f32.mrf.mxu1  ;;  %v7830_v42 = vpop.f32.mrf.mxu0 }
 0x309   : > { %v9904_v36 = vadd.f32 %v4941_v11, %v4584_v4  ;;  %v4589_v45 = vadd.f32 %v7762_v24, %v9675_v30  ;;  %v5230_v10 = vsel %vm18_vm0, %v9906_v59, 0.0 }
 0x30a   : > { %v5225_v38 = vadd.f32 %v5224_v63, %v5223_v0  ;;  %v4392_v22 = vpop.f32.mrf.mxu1  ;;  %v4954_v40 = vpop.f32.mrf.mxu0 }
 0x30b   : > { %v5226_v31 = vsel %vm18_vm0, %v9904_v36, 0.0  ;;  %v4587_v1 = vadd.f32 %v4392_v22, %v9678_v55 }
 0x30c   : > { %v5227_v61 = vadd.f32 %v5226_v31, %v5225_v38  ;;  %v7763_v35 = vpop.f32.mrf.mxu1  ;;  %v7831_v8 = vpop.f32.mrf.mxu0  ;;  %v9920_v31 = vadd.f32 %v7830_v42, %v4589_v45 }
 0x30d   : > { %v9914_v11 = vadd.f32 %v4954_v40, %v4587_v1  ;;  %v4590_v5 = vadd.f32 %v7763_v35, %v9681_v6 }
 0x30e   : > { %v5229_v52 = vadd.f32 %v5228_v16, %v5227_v61  ;;  %v4395_v4 = vpop.f32.mrf.mxu1  ;;  %v4957_v0 = vpop.f32.mrf.mxu0  ;;  %v5236_v42 = vsel %vm18_vm0, %v9920_v31, 0.0 }
 0x30f   : > { %v4588_v55 = vadd.f32 %v4395_v4, %v9687_v53  ;;  %v5232_v30 = vsel %vm18_vm0, %v9914_v11, 0.0  ;;  %v9926_v16 = vadd.f32 %v7831_v8, %v4590_v5 }
 0x310   : > { %v5231_v63 = vadd.f32 %v5230_v10, %v5229_v52  ;;  %v7766_v38 = vpop.f32.mrf.mxu1  ;;  %v7834_v22 = vpop.f32.mrf.mxu0 }
 0x311   : > { %v9924_v24 = vadd.f32 %v4957_v0, %v4588_v55  ;;  %v4593_v45 = vadd.f32 %v7766_v38, %v9693_v18  ;;  %v5238_v8 = vsel %vm18_vm0, %v9926_v16, 0.0 }
 0x312   : > { %v5233_v40 = vadd.f32 %v5232_v30, %v5231_v63  ;;  %v4408_v1 = vpop.f32.mrf.mxu1  ;;  %v4970_v61 = vpop.f32.mrf.mxu0 }
 0x313   : > { %v5234_v6 = vsel %vm18_vm0, %v9924_v24, 0.0  ;;  %v4591_v53 = vadd.f32 %v4408_v1, %v9696_v20 }
 0x314   : > { %v5235_v35 = vadd.f32 %v5234_v6, %v5233_v40  ;;  %v7767_v52 = vpop.f32.mrf.mxu1  ;;  %v7835_v4 = vpop.f32.mrf.mxu0  ;;  %v9940_v6 = vadd.f32 %v7834_v22, %v4593_v45 }
 0x315   : > { %v9934_v0 = vadd.f32 %v4970_v61, %v4591_v53  ;;  %v4594_v5 = vadd.f32 %v7767_v52, %v9699_v50 }
 0x316   : > { %v5237_v10 = vadd.f32 %v5236_v42, %v5235_v35  ;;  %v4411_v55 = vpop.f32.mrf.mxu1  ;;  %v4973_v63 = vpop.f32.mrf.mxu0  ;;  %12080 = vst [vmem:[#allocation43_spill] sm:$0xff] %v9940_v6  ;;  %v5244_v22 = vsel %vm18_vm0, %v9940_v6, 0.0 }
 0x317   : > { %v4592_v20 = vadd.f32 %v4411_v55, %v9704_v28  ;;  %v5240_v18 = vsel %vm18_vm0, %v9934_v0, 0.0  ;;  %v9946_v42 = vadd.f32 %v7835_v4, %v4594_v5 }
 0x318   : > { %v5239_v30 = vadd.f32 %v5238_v8, %v5237_v10  ;;  %v7770_v40 = vpop.f32.mrf.mxu1  ;;  %v7838_v1 = vpop.f32.mrf.mxu0 }
 0x319   : > { %v9944_v38 = vadd.f32 %v4973_v63, %v4592_v20  ;;  %12081 = vst [vmem:[#allocation46_spill] sm:$0xff] %v9946_v42  ;;  %v4597_v45 = vadd.f32 %v7770_v40, %v9707_v48  ;;  %v5246_v4 = vsel %vm18_vm0, %v9946_v42, 0.0 }
 0x31a   : > { %v5241_v61 = vadd.f32 %v5240_v18, %v5239_v30  ;;  %v4424_v53 = vpop.f32.mrf.mxu1  ;;  %v4986_v35 = vpop.f32.mrf.mxu0 }
 0x31b   : > { %v5242_v50 = vsel %vm18_vm0, %v9944_v38, 0.0  ;;  %v4595_v28 = vadd.f32 %v4424_v53, %v9710_v33 }
 0x31c   : > { %v5243_v52 = vadd.f32 %v5242_v50, %v5241_v61  ;;  %v7771_v10 = vpop.f32.mrf.mxu1  ;;  %v7839_v55 = vpop.f32.mrf.mxu0  ;;  %v9960_v50 = vadd.f32 %v7838_v1, %v4597_v45 }
 0x31d   : > { %v9954_v63 = vadd.f32 %v4986_v35, %v4595_v28  ;;  %v4598_v5 = vadd.f32 %v7771_v10, %v9713_v27 }
 0x31e   : > { %v5245_v8 = vadd.f32 %v5244_v22, %v5243_v52  ;;  %v4427_v20 = vpop.f32.mrf.mxu1  ;;  %v4989_v30 = vpop.f32.mrf.mxu0  ;;  %12083 = vst [vmem:[#allocation47_spill] sm:$0xff] %v9960_v50  ;;  %v5252_v1 = vsel %vm18_vm0, %v9960_v50, 0.0 }
 0x31f   : > { %12082 = vst [vmem:[#allocation45_spill] sm:$0xff] %v9954_v63  ;;  %v4596_v33 = vadd.f32 %v4427_v20, %v9716_v9  ;;  %v5248_v48 = vsel %vm18_vm0, %v9954_v63, 0.0  ;;  %v9966_v22 = vadd.f32 %v7839_v55, %v4598_v5 }
 0x320   : > { %v5247_v18 = vadd.f32 %v5246_v4, %v5245_v8  ;;  %v7774_v61 = vpop.f32.mrf.mxu1  ;;  %v7842_v53 = vpop.f32.mrf.mxu0 }
 0x321   : > { %v9964_v40 = vadd.f32 %v4989_v30, %v4596_v33  ;;  %12085 = vst [vmem:[#allocation49_spill] sm:$0xff] %v9966_v22  ;;  %v4601_v45 = vadd.f32 %v7774_v61, %v9719_v2  ;;  %v5254_v55 = vsel %vm18_vm0, %v9966_v22, 0.0  ;;  %v12094_v22 = vld [vmem:[#allocation38_spill] sm:$0xff] }
 0x322   : > { %v5249_v35 = vadd.f32 %v5248_v48, %v5247_v18  ;;  %v4440_v28 = vpop.f32.mrf.mxu1  ;;  %v5002_v52 = vpop.f32.mrf.mxu0 }
 0x323   : > { %12084 = vst [vmem:[#allocation48_spill] sm:$0xff] %v9964_v40  ;;  %v5250_v27 = vsel %vm18_vm0, %v9964_v40, 0.0  ;;  %v4599_v9 = vadd.f32 %v4440_v28, %v9722_v3 }
 0x324   : > { %v5251_v10 = vadd.f32 %v5250_v27, %v5249_v35  ;;  %v7775_v8 = vpop.f32.mrf.mxu1  ;;  %v7843_v20 = vpop.f32.mrf.mxu0  ;;  %v9980_v27 = vadd.f32 %v7842_v53, %v4601_v45  ;;  %v12091_v45 = vld [vmem:[#allocation22_spill] sm:$0xff] }
 0x325   : > { %v9974_v30 = vadd.f32 %v5002_v52, %v4599_v9  ;;  %v4602_v5 = vadd.f32 %v7775_v8, %v9725_v57  ;;  %v12090_v8 = vld [vmem:[#allocation25_spill] sm:$0xff] }
 0x326   : > { %v5253_v4 = vadd.f32 %v5252_v1, %v5251_v10  ;;  %v4443_v33 = vpop.f32.mrf.mxu1  ;;  %v5005_v18 = vpop.f32.mrf.mxu0  ;;  %12087 = vst [vmem:[#allocation3_spill] sm:$0xff] %v9980_v27  ;;  %v5260_v53 = vsel %vm18_vm0, %v9980_v27, 0.0 }
 0x327   : > { %12086 = vst [vmem:[#allocation50_spill] sm:$0xff] %v9974_v30  ;;  %v4600_v3 = vadd.f32 %v4443_v33, %v9728_v60  ;;  %v5256_v2 = vsel %vm18_vm0, %v9974_v30, 0.0  ;;  %v9986_v1 = vadd.f32 %v7843_v20, %v4602_v5  ;;  %v12093_v5 = vld [vmem:[#allocation26_spill] sm:$0xff] }
 0x328   : > { %v5255_v48 = vadd.f32 %v5254_v55, %v5253_v4  ;;  %v7778_v35 = vpop.f32.mrf.mxu1  ;;  %v7846_v28 = vpop.f32.mrf.mxu0 }
 0x329   : > { %v9984_v61 = vadd.f32 %v5005_v18, %v4600_v3  ;;  %12089 = vst [vmem:[#allocation36_spill] sm:$0xff] %v9986_v1  ;;  %v4605_v30 = vadd.f32 %v7778_v35, %v12091_v45  ;;  %v5262_v20 = vsel %vm18_vm0, %v9986_v1, 0.0  ;;  %v12102_v1 = vld [vmem:[#allocation30_spill] sm:$0xff] }
 0x32a   : > { %v5257_v52 = vadd.f32 %v5256_v2, %v5255_v48  ;;  %v4456_v9 = vpop.f32.mrf.mxu1  ;;  %v5018_v10 = vpop.f32.mrf.mxu0 }
 0x32b   : > { %12088 = vst [vmem:[#allocation5_spill] sm:$0xff] %v9984_v61  ;;  %v5258_v57 = vsel %vm18_vm0, %v9984_v61, 0.0  ;;  %v4603_v60 = vadd.f32 %v4456_v9, %v12090_v8  ;;  %v10000_v50 = vadd.f32 %v7846_v28, %v4605_v30  ;;  %v12099_v28 = vld [vmem:[#allocation28_spill] sm:$0xff] }
 0x32c   : > { %v5259_v4 = vadd.f32 %v5258_v57, %v5257_v52  ;;  %v7779_v33 = vpop.f32.mrf.mxu1  ;;  %v7847_v55 = vpop.f32.mrf.mxu0 }
 0x32d   : > { %v9994_v18 = vadd.f32 %v5018_v10, %v4603_v60  ;;  %v4606_v61 = vadd.f32 %v7779_v33, %v12093_v5  ;;  %12095 = vst [vmem:[#allocation4_spill] sm:$0xff] %v10000_v50  ;;  %v12098_v5 = vld [vmem:[#allocation27_spill] sm:$0xff]  ;;  %v5268_v30 = vsel %vm18_vm0, %v10000_v50, 0.0 }
 0x32e   : > { %v5261_v3 = vadd.f32 %v5260_v53, %v5259_v4  ;;  %v4459_v48 = vpop.f32.mrf.mxu1  ;;  %v5021_v2 = vpop.f32.mrf.mxu0 }
 0x32f   : > { %12092 = vst [vmem:[#allocation7_spill] sm:$0xff] %v9994_v18  ;;  %v4604_v9 = vadd.f32 %v4459_v48, %v12094_v22  ;;  %v5264_v35 = vsel %vm18_vm0, %v9994_v18, 0.0  ;;  %v10006_v45 = vadd.f32 %v7847_v55, %v4606_v61  ;;  %v12101_v55 = vld [vmem:[#allocation29_spill] sm:$0xff] }
 0x330   : > { %v5263_v52 = vadd.f32 %v5262_v20, %v5261_v3  ;;  %v7782_v57 = vpop.f32.mrf.mxu1  ;;  %v7850_v8 = vpop.f32.mrf.mxu0 }
 0x331   : > { %v10004_v10 = vadd.f32 %v5021_v2, %v4604_v9  ;;  %12097 = vst [vmem:[#allocation9_spill] sm:$0xff] %v10006_v45  ;;  %v4609_v18 = vadd.f32 %v7782_v57, %v12099_v28  ;;  %v5270_v61 = vsel %vm18_vm0, %v10006_v45, 0.0  ;;  %v12110_v45 = vld [vmem:[#allocation33_spill] sm:$0xff] }
 0x332   : > { %v5265_v60 = vadd.f32 %v5264_v35, %v5263_v52  ;;  %v4472_v4 = vpop.f32.mrf.mxu1  ;;  %v5034_v53 = vpop.f32.mrf.mxu0 }
 0x333   : > { %12096 = vst [vmem:[#allocation8_spill] sm:$0xff] %v10004_v10  ;;  %v5266_v33 = vsel %vm18_vm0, %v10004_v10, 0.0  ;;  %v4607_v22 = vadd.f32 %v4472_v4, %v12098_v5  ;;  %v10020_v27 = vadd.f32 %v7850_v8, %v4609_v18  ;;  %v12107_v8 = vld [vmem:[#allocation31_spill] sm:$0xff] }
 0x334   : > { %v5267_v3 = vadd.f32 %v5266_v33, %v5265_v60  ;;  %v7783_v48 = vpop.f32.mrf.mxu1  ;;  %v7851_v20 = vpop.f32.mrf.mxu0 }
 0x335   : > { %v10014_v2 = vadd.f32 %v5034_v53, %v4607_v22  ;;  %v4610_v10 = vadd.f32 %v7783_v48, %v12101_v55  ;;  %12103 = vst [vmem:[#allocation10_spill] sm:$0xff] %v10020_v27  ;;  %v12106_v55 = vld [vmem:[#allocation32_spill] sm:$0xff]  ;;  %v5276_v18 = vsel %vm18_vm0, %v10020_v27, 0.0  ;;  %v12116_v27 = vld [vmem:[#allocation39_spill] sm:$0xff] }
 0x336   : > { %v5269_v9 = vadd.f32 %v5268_v30, %v5267_v3  ;;  %v4475_v52 = vpop.f32.mrf.mxu1  ;;  %v5037_v35 = vpop.f32.mrf.mxu0 }
 0x337   : > { %12100 = vst [vmem:[#allocation6_spill] sm:$0xff] %v10014_v2  ;;  %v4608_v4 = vadd.f32 %v4475_v52, %v12102_v1  ;;  %v5272_v57 = vsel %vm18_vm0, %v10014_v2, 0.0  ;;  %v10026_v28 = vadd.f32 %v7851_v20, %v4610_v10  ;;  %v12109_v20 = vld [vmem:[#allocation34_spill] sm:$0xff] }
 0x338   : > { %v5271_v60 = vadd.f32 %v5270_v61, %v5269_v9  ;;  %v7786_v33 = vpop.f32.mrf.mxu1  ;;  %v7854_v5 = vpop.f32.mrf.mxu0 }
 0x339   : > { %v10024_v53 = vadd.f32 %v5037_v35, %v4608_v4  ;;  %12105 = vst [vmem:[#allocation13_spill] sm:$0xff] %v10026_v28  ;;  %v4613_v2 = vadd.f32 %v7786_v33, %v12107_v8  ;;  %v5278_v10 = vsel %vm18_vm0, %v10026_v28, 0.0 }
 0x33a   : > { %v5273_v22 = vadd.f32 %v5272_v57, %v5271_v60  ;;  %v4488_v3 = vpop.f32.mrf.mxu1  ;;  %v5050_v30 = vpop.f32.mrf.mxu0 }
 0x33b   : > { %12104 = vst [vmem:[#allocation11_spill] sm:$0xff] %v10024_v53  ;;  %v5274_v48 = vsel %vm18_vm0, %v10024_v53, 0.0  ;;  %v4611_v1 = vadd.f32 %v4488_v3, %v12106_v55  ;;  %v10040_v50 = vadd.f32 %v7854_v5, %v4613_v2  ;;  %v12114_v5 = vld [vmem:[#allocation37_spill] sm:$0xff] }
 0x33c   : > { %v5275_v9 = vadd.f32 %v5274_v48, %v5273_v22  ;;  %v7787_v52 = vpop.f32.mrf.mxu1  ;;  %v7855_v61 = vpop.f32.mrf.mxu0 }
 0x33d   : > { %v10034_v35 = vadd.f32 %v5050_v30, %v4611_v1  ;;  %v4614_v53 = vadd.f32 %v7787_v52, %v12109_v20  ;;  %12111 = vst [vmem:[#allocation12_spill] sm:$0xff] %v10040_v50  ;;  %v12113_v20 = vld [vmem:[#allocation35_spill] sm:$0xff]  ;;  %v5284_v2 = vsel %vm18_vm0, %v10040_v50, 0.0 }
 0x33e   : > { %v5277_v4 = vadd.f32 %v5276_v18, %v5275_v9  ;;  %v4491_v60 = vpop.f32.mrf.mxu1  ;;  %v5053_v57 = vpop.f32.mrf.mxu0 }
 0x33f   : > { %12108 = vst [vmem:[#allocation14_spill] sm:$0xff] %v10034_v35  ;;  %v4612_v3 = vadd.f32 %v4491_v60, %v12110_v45  ;;  %v5280_v33 = vsel %vm18_vm0, %v10034_v35, 0.0  ;;  %v10046_v8 = vadd.f32 %v7855_v61, %v4614_v53  ;;  %v12115_v61 = vld [vmem:[#allocation40_spill] sm:$0xff] }
 0x340   : > { %v5279_v22 = vadd.f32 %v5278_v10, %v5277_v4  ;;  %v7790_v48 = vpop.f32.mrf.mxu1  ;;  %v7858_v55 = vpop.f32.mrf.mxu0 }
 0x341   : > { %v10044_v30 = vadd.f32 %v5053_v57, %v4612_v3  ;;  %12112 = vst [vmem:[#allocation15_spill] sm:$0xff] %v10046_v8  ;;  %v4617_v35 = vadd.f32 %v7790_v48, %v12114_v5  ;;  %v5286_v53 = vsel %vm18_vm0, %v10046_v8, 0.0 }
 0x342   : > { %v5281_v1 = vadd.f32 %v5280_v33, %v5279_v22  ;;  %v4504_v9 = vpop.f32.mrf.mxu1  ;;  %v5066_v18 = vpop.f32.mrf.mxu0 }
 0x343   : > { %v5282_v52 = vsel %vm18_vm0, %v10044_v30, 0.0  ;;  %v4615_v45 = vadd.f32 %v4504_v9, %v12113_v20  ;;  %v10060_v40 = vadd.f32 %v7858_v55, %v4617_v35 }
 0x344   : > { %v5283_v4 = vadd.f32 %v5282_v52, %v5281_v1  ;;  %v7791_v60 = vpop.f32.mrf.mxu1  ;;  %v7859_v10 = vpop.f32.mrf.mxu0 }
 0x345   : > { %v10054_v57 = vadd.f32 %v5066_v18, %v4615_v45  ;;  %v4618_v28 = vadd.f32 %v7791_v60, %v12115_v61  ;;  %v5292_v35 = vsel %vm18_vm0, %v10060_v40, 0.0 }
 0x346   : > { %v5285_v3 = vadd.f32 %v5284_v2, %v5283_v4  ;;  %v4507_v22 = vpop.f32.mrf.mxu1  ;;  %v5069_v33 = vpop.f32.mrf.mxu0 }
 0x347   : > { %v4616_v9 = vadd.f32 %v4507_v22, %v12116_v27  ;;  %v5288_v48 = vsel %vm18_vm0, %v10054_v57, 0.0  ;;  %v10066_v5 = vadd.f32 %v7859_v10, %v4618_v28 }
 0x348   : > { %v5287_v1 = vadd.f32 %v5286_v53, %v5285_v3  ;;  %v7794_v52 = vpop.f32.mrf.mxu1  ;;  %v7862_v20 = vpop.f32.mrf.mxu0 }
 0x349   : > { %v10064_v18 = vadd.f32 %v5069_v33, %v4616_v9  ;;  %v4621_v55 = vadd.f32 %v7794_v52, %v9779_v14  ;;  %v5294_v28 = vsel %vm18_vm0, %v10066_v5, 0.0 }
 0x34a   : > { %v5289_v45 = vadd.f32 %v5288_v48, %v5287_v1  ;;  %v4520_v4 = vpop.f32.mrf.mxu1  ;;  %v5082_v2 = vpop.f32.mrf.mxu0 }
 0x34b   : > { %v5290_v60 = vsel %vm18_vm0, %v10064_v18, 0.0  ;;  %v4619_v27 = vadd.f32 %v4520_v4, %v9782_v7 }
 0x34c   : > { %v5291_v3 = vadd.f32 %v5290_v60, %v5289_v45  ;;  %v7795_v22 = vpop.f32.mrf.mxu1  ;;  %v7863_v53 = vpop.f32.mrf.mxu0  ;;  %v10080_v60 = vadd.f32 %v7862_v20, %v4621_v55 }
 0x34d   : > { %v10074_v33 = vadd.f32 %v5082_v2, %v4619_v27  ;;  %v4622_v10 = vadd.f32 %v7795_v22, %v9785_v26 }
 0x34e   : > { %v5293_v61 = vadd.f32 %v5292_v35, %v5291_v3  ;;  %v4523_v9 = vpop.f32.mrf.mxu1  ;;  %v5085_v1 = vpop.f32.mrf.mxu0  ;;  %v5300_v20 = vsel %vm18_vm0, %v10080_v60, 0.0 }
 0x34f   : > { %v4620_v7 = vadd.f32 %v4523_v9, %v9788_v56  ;;  %v5296_v14 = vsel %vm18_vm0, %v10074_v33, 0.0  ;;  %v10086_v35 = vadd.f32 %v7863_v53, %v4622_v10 }
 0x350   : > { %v5295_v48 = vadd.f32 %v5294_v28, %v5293_v61  ;;  %v7798_v45 = vpop.f32.mrf.mxu1  ;;  %v7866_v4 = vpop.f32.mrf.mxu0 }
 0x351   : > { %v10084_v52 = vadd.f32 %v5085_v1, %v4620_v7  ;;  %v4625_v55 = vadd.f32 %v7798_v45, %v9791_v25  ;;  %v5302_v53 = vsel %vm18_vm0, %v10086_v35, 0.0 }
 0x352   : > { %v5297_v2 = vadd.f32 %v5296_v14, %v5295_v48  ;;  %v4536_v27 = vpop.f32.mrf.mxu1  ;;  %v5098_v3 = vpop.f32.mrf.mxu0 }
 0x353   : > { %v5298_v26 = vsel %vm18_vm0, %v10084_v52, 0.0  ;;  %v4623_v56 = vadd.f32 %v4536_v27, %v9794_v32 }
 0x354   : > { %v5299_v22 = vadd.f32 %v5298_v26, %v5297_v2  ;;  %v7799_v61 = vpop.f32.mrf.mxu1  ;;  %v7867_v9 = vpop.f32.mrf.mxu0  ;;  %v5187_v26 = vadd.f32 %v7866_v4, %v4625_v55 }
 0x355   : > { %v5185_v1 = vadd.f32 %v5098_v3, %v4623_v56  ;;  %v4626_v10 = vadd.f32 %v7799_v61, %v9797_v46  ;;  %v12117_v61 = vld [vmem:[#allocation42_spill] sm:$0xff] }
 0x356   : > { %v5301_v28 = vadd.f32 %v5300_v20, %v5299_v22  ;;  %v4539_v7 = vpop.f32.mrf.mxu1  ;;  %v5101_v48 = vpop.f32.mrf.mxu0 }
 0x357   : > { %v4624_v14 = vadd.f32 %v4539_v7, %v9800_v49  ;;  %v5304_v8 = vsel %vm18_vm0, %v5185_v1, 0.0  ;;  %v5188_v3 = vadd.f32 %v7867_v9, %v4626_v10  ;;  %v5308_v49 = vsel %vm18_vm0, %v5187_v26, 0.0 }
 0x358   : > { %v5303_v32 = vadd.f32 %v5302_v53, %v5301_v28  ;;  %v7802_v2 = vpop.f32.mrf.mxu1  ;;  %v7870_v27 = vpop.f32.mrf.mxu0  ;;  %v12118_v53 = vld [vmem:[#allocation41_spill] sm:$0xff] }
 0x359   : > { %v5186_v50 = vadd.f32 %v5101_v48, %v4624_v14  ;;  %v4629_v28 = vadd.f32 %v7802_v2, %v12117_v61  ;;  %v5310_v48 = vsel %vm18_vm0, %v5188_v3, 0.0 }
 0x35a   : > { %v5305_v63 = vadd.f32 %v5304_v8, %v5303_v32  ;;  %v4552_v25 = vpop.f32.mrf.mxu1  ;;  %v5114_v45 = vpop.f32.mrf.mxu0 }
 0x35b   : > { %v5306_v56 = vsel %vm18_vm0, %v5186_v50, 0.0  ;;  %v4627_v22 = vadd.f32 %v4552_v25, %v9806_v51  ;;  %v5191_v32 = vadd.f32 %v7870_v27, %v4629_v28 }
 0x35c   : > { %v5307_v20 = vadd.f32 %v5306_v56, %v5305_v63  ;;  %v7803_v42 = vpop.f32.mrf.mxu1  ;;  %v7871_v46 = vpop.f32.mrf.mxu0 }
 0x35d   : > { %v5189_v7 = vadd.f32 %v5114_v45, %v4627_v22  ;;  %v4630_v8 = vadd.f32 %v7803_v42, %v9809_v44  ;;  %v5316_v45 = vsel %vm18_vm0, %v5191_v32, 0.0 }
 0x35e   : > { %v5309_v4 = vadd.f32 %v5308_v49, %v5307_v20  ;;  %v4555_v55 = vpop.f32.mrf.mxu1  ;;  %v5117_v14 = vpop.f32.mrf.mxu0 }
 0x35f   : > { %v4628_v9 = vadd.f32 %v4555_v55, %v12118_v53  ;;  %v5312_v51 = vsel %vm18_vm0, %v5189_v7, 0.0  ;;  %v5192_v56 = vadd.f32 %v7871_v46, %v4630_v8 }
 0x360   : > { %v5311_v10 = vadd.f32 %v5310_v48, %v5309_v4 }
 0x361   : > { %v5190_v63 = vadd.f32 %v5117_v14, %v4628_v9  ;;  %v5318_v20 = vsel %vm18_vm0, %v5192_v56, 0.0 }
 0x362   : > { %v5313_v25 = vadd.f32 %v5312_v51, %v5311_v10 }
 0x363   : > { %v5314_v6 = vsel %vm18_vm0, %v5190_v63, 0.0 }
 0x364   : > { %v5315_v2 = vadd.f32 %v5314_v6, %v5313_v25 }
 0x366   : > { %v5317_v22 = vadd.f32 %v5316_v45, %v5315_v2 }
 0x368   : > { %v5319_v49 = vadd.f32 %v5318_v20, %v5317_v22 }
 0x36a   : > { %v5320_v44 = vrot.slane %v5319_v49, 4 }
 0x36c   : > { %v5321_v42 = vadd.f32 %v5320_v44, %v5319_v49 }
 0x36e   : > { %v5322_v61 = vrot.slane %v5321_v42, 2 }
 0x370   : > { %v5323_v4 = vadd.f32 %v5322_v61, %v5321_v42 }
 0x372   : > { %v5324_v55 = vrot.slane %v5323_v4, 1 }
 0x374   : > { %v5325_v27 = vadd.f32 %v5324_v55, %v5323_v4 }
 0x376   : > { %v10110_v28 = vmul.f32 0.001953125, %v5325_v27 }
 0x378   : > { %v10114_v46 = vsub.f32 %v10044_v30, %v10110_v28  ;;  %v10118_v6 = vsub.f32 %v10054_v57, %v10110_v28  ;;  %v10122_v48 = vsub.f32 %v10064_v18, %v10110_v28  ;;  %v10126_v8 = vsub.f32 %v10060_v40, %v10110_v28 }
 0x379   : > { %v10130_v53 = vsub.f32 %v10066_v5, %v10110_v28  ;;  %v10134_v30 = vsub.f32 %v10074_v33, %v10110_v28  ;;  %v10138_v57 = vsub.f32 %v10084_v52, %v10110_v28  ;;  %v10142_v18 = vsub.f32 %v10080_v60, %v10110_v28 }
 0x37a   : > { %12119 = vst [vmem:[#allocation16_spill] sm:$0xff] %v10114_v46  ;;  %v10146_v40 = vsub.f32 %v10086_v35, %v10110_v28  ;;  %v10149_v9 = vsub.f32 %v5185_v1, %v10110_v28  ;;  %v10152_v5 = vsub.f32 %v5186_v50, %v10110_v28  ;;  %v10155_v33 = vsub.f32 %v5187_v26, %v10110_v28  ;;  %v12124_v26 = vld [vmem:[#allocation44_spill] sm:$0xff] }
 0x37b   : > { %v10158_v52 = vsub.f32 %v5188_v3, %v10110_v28  ;;  %v10161_v10 = vsub.f32 %v5189_v7, %v10110_v28  ;;  %v10164_v60 = vsub.f32 %v5190_v63, %v10110_v28  ;;  %v10167_v35 = vsub.f32 %v5191_v32, %v10110_v28 }
 0x37c   : > { %v10170_v1 = vsub.f32 %v5192_v56, %v10110_v28  ;;  %v10174_v50 = vsub.f32 %v9816_v17, %v10110_v28  ;;  %v10178_v3 = vsub.f32 %v12124_v26, %v10110_v28  ;;  %v10182_v7 = vsub.f32 %v9820_v21, %v10110_v28 }
 0x37d   : > { %12120 = vst [vmem:[#allocation18_spill] sm:$0xff] %v10158_v52  ;;  %12121 = vst [vmem:[#allocation19_spill] sm:$0xff] %v10161_v10  ;;  %v10186_v14 = vsub.f32 %v9826_v43, %v10110_v28  ;;  %v10194_v17 = vsub.f32 %v9834_v13, %v10110_v28  ;;  %v10200_v21 = vsub.f32 %v9844_v34, %v10110_v28 }
 0x37e   : > { %12122 = vst [vmem:[#allocation17_spill] sm:$0xff] %v10164_v60  ;;  %12123 = vst [vmem:[#allocation20_spill] sm:$0xff] %v10167_v35  ;;  %v5392_v32 = vmul.f32 %v10174_v50, %v10174_v50  ;;  %v5393_v51 = vmul.f32 %v10178_v3, %v10178_v3  ;;  %v5394_v63 = vmul.f32 %v10182_v7, %v10182_v7 }
 0x37f   : > { %v5395_v43 = vmul.f32 %v10186_v14, %v10186_v14  ;;  %v10208_v45 = vsub.f32 %v9840_v39, %v10110_v28  ;;  %v5396_v13 = vmul.f32 %v10194_v17, %v10194_v17  ;;  %v10215_v34 = vsub.f32 %v9846_v29, %v10110_v28 }
 0x380   : > { %v5456_v25 = vsel %vm18_vm0, %v5392_v32, 0.0  ;;  %v5457_v56 = vsel %vm18_vm0, %v5393_v51, 0.0  ;;  %v5459_v22 = vsel %vm18_vm0, %v5394_v63, 0.0  ;;  %v5397_v49 = vmul.f32 %v10200_v21, %v10200_v21 }
 0x381   : > { %v5458_v2 = vadd.f32 %v5457_v56, %v5456_v25  ;;  %v5461_v44 = vsel %vm18_vm0, %v5395_v43, 0.0  ;;  %v10222_v39 = vsub.f32 %v9854_v54, %v10110_v28  ;;  %v5398_v61 = vmul.f32 %v10208_v45, %v10208_v45 }
 0x382   : > { %v5463_v4 = vsel %vm18_vm0, %v5396_v13, 0.0  ;;  %v10229_v29 = vsub.f32 %v9864_v62, %v10110_v28  ;;  %v5399_v27 = vmul.f32 %v10215_v34, %v10215_v34  ;;  %v5465_v26 = vsel %vm18_vm0, %v5397_v49, 0.0 }
 0x383   : > { %v5460_v20 = vadd.f32 %v5459_v22, %v5458_v2  ;;  %v10236_v54 = vsub.f32 %v9860_v12, %v10110_v28  ;;  %v5400_v51 = vmul.f32 %v10222_v39, %v10222_v39  ;;  %v5467_v63 = vsel %vm18_vm0, %v5398_v61, 0.0 }
 0x384   : > { %v10243_v62 = vsub.f32 %v9866_v47, %v10110_v28  ;;  %v5401_v25 = vmul.f32 %v10229_v29, %v10229_v29  ;;  %v5469_v56 = vsel %vm18_vm0, %v5399_v27, 0.0  ;;  %v10250_v12 = vsub.f32 %v9874_v23, %v10110_v28 }
 0x385   : > { %v5462_v42 = vadd.f32 %v5461_v44, %v5460_v20  ;;  %v5402_v13 = vmul.f32 %v10236_v54, %v10236_v54  ;;  %v5471_v22 = vsel %vm18_vm0, %v5400_v51, 0.0  ;;  %v10257_v47 = vsub.f32 %v9884_v15, %v10110_v28 }
 0x386   : > { %v5403_v49 = vmul.f32 %v10243_v62, %v10243_v62  ;;  %v5473_v44 = vsel %vm18_vm0, %v5401_v25, 0.0  ;;  %v10264_v23 = vsub.f32 %v9880_v58, %v10110_v28  ;;  %v5404_v61 = vmul.f32 %v10250_v12, %v10250_v12 }
 0x387   : > { %v5464_v55 = vadd.f32 %v5463_v4, %v5462_v42  ;;  %v5475_v4 = vsel %vm18_vm0, %v5402_v13, 0.0  ;;  %v10271_v15 = vsub.f32 %v9886_v41, %v10110_v28  ;;  %v5405_v27 = vmul.f32 %v10257_v47, %v10257_v47 }
 0x388   : > { %v10278_v58 = vsub.f32 %v9894_v19, %v10110_v28  ;;  %v5406_v51 = vmul.f32 %v10264_v23, %v10264_v23  ;;  %v10285_v41 = vsub.f32 %v9904_v36, %v10110_v28  ;;  %v10292_v19 = vsub.f32 %v9900_v37, %v10110_v28 }
 0x389   : > { %v5466_v32 = vadd.f32 %v5465_v26, %v5464_v55  ;;  %v5477_v26 = vsel %vm18_vm0, %v5403_v49, 0.0  ;;  %v5407_v25 = vmul.f32 %v10271_v15, %v10271_v15  ;;  %v10299_v36 = vsub.f32 %v9906_v59, %v10110_v28 }
 0x38a   : > { %v5408_v13 = vmul.f32 %v10278_v58, %v10278_v58  ;;  %v5409_v49 = vmul.f32 %v10285_v41, %v10285_v41  ;;  %v10306_v37 = vsub.f32 %v9914_v11, %v10110_v28  ;;  %v10313_v59 = vsub.f32 %v9924_v24, %v10110_v28 }
 0x38b   : > { %v5468_v43 = vadd.f32 %v5467_v63, %v5466_v32  ;;  %v5479_v63 = vsel %vm18_vm0, %v5404_v61, 0.0  ;;  %v5410_v61 = vmul.f32 %v10292_v19, %v10292_v19  ;;  %v10320_v11 = vsub.f32 %v9920_v31, %v10110_v28 }
 0x38c   : > { %v10327_v24 = vsub.f32 %v9926_v16, %v10110_v28  ;;  %v10334_v31 = vsub.f32 %v9934_v0, %v10110_v28  ;;  %v10341_v16 = vsub.f32 %v9944_v38, %v10110_v28 }
 0x38d   : > { %v5470_v2 = vadd.f32 %v5469_v56, %v5468_v43  ;;  %v5481_v56 = vsel %vm18_vm0, %v5405_v27, 0.0  ;;  %v5411_v27 = vmul.f32 %v10299_v36, %v10299_v36 }
 0x38f   : > { %v5472_v20 = vadd.f32 %v5471_v22, %v5470_v2  ;;  %v5483_v22 = vsel %vm18_vm0, %v5406_v51, 0.0  ;;  %v5412_v51 = vmul.f32 %v10306_v37, %v10306_v37 }
 0x391   : > { %v5474_v42 = vadd.f32 %v5473_v44, %v5472_v20  ;;  %v5485_v44 = vsel %vm18_vm0, %v5407_v25, 0.0  ;;  %v5413_v25 = vmul.f32 %v10313_v59, %v10313_v59 }
 0x393   : > { %v5476_v55 = vadd.f32 %v5475_v4, %v5474_v42  ;;  %v5487_v4 = vsel %vm18_vm0, %v5408_v13, 0.0  ;;  %v5414_v13 = vmul.f32 %v10320_v11, %v10320_v11 }
 0x395   : > { %v5478_v32 = vadd.f32 %v5477_v26, %v5476_v55  ;;  %v5489_v26 = vsel %vm18_vm0, %v5409_v49, 0.0  ;;  %v5415_v49 = vmul.f32 %v10327_v24, %v10327_v24 }
 0x397   : > { %v5480_v43 = vadd.f32 %v5479_v63, %v5478_v32  ;;  %v5491_v63 = vsel %vm18_vm0, %v5410_v61, 0.0  ;;  %v12125_v61 = vld [vmem:[#allocation43_spill] sm:$0xff] }
 0x398   : > { %v10348_v0 = vsub.f32 %v12125_v61, %v10110_v28  ;;  %v12130_v61 = vld [vmem:[#allocation47_spill] sm:$0xff] }
 0x399   : > { %v5482_v2 = vadd.f32 %v5481_v56, %v5480_v43  ;;  %v5493_v56 = vsel %vm18_vm0, %v5411_v27, 0.0 }
 0x39b   : > { %v5484_v20 = vadd.f32 %v5483_v22, %v5482_v2  ;;  %v5495_v22 = vsel %vm18_vm0, %v5412_v51, 0.0  ;;  %v5501_v51 = vsel %vm18_vm0, %v5415_v49, 0.0 }
 0x39d   : > { %v5486_v42 = vadd.f32 %v5485_v44, %v5484_v20  ;;  %v5497_v44 = vsel %vm18_vm0, %v5413_v25, 0.0 }
 0x39f   : > { %v5488_v55 = vadd.f32 %v5487_v4, %v5486_v42  ;;  %v5416_v4 = vmul.f32 %v10334_v31, %v10334_v31 }
 0x3a1   : > { %v5490_v32 = vadd.f32 %v5489_v26, %v5488_v55  ;;  %v5499_v55 = vsel %vm18_vm0, %v5414_v13, 0.0  ;;  %v12126_v26 = vld [vmem:[#allocation46_spill] sm:$0xff] }
 0x3a2   : > { %v10355_v38 = vsub.f32 %v12126_v26, %v10110_v28 }
 0x3a3   : > { %v5492_v43 = vadd.f32 %v5491_v63, %v5490_v32  ;;  %v5417_v32 = vmul.f32 %v10341_v16, %v10341_v16 }
 0x3a5   : > { %v5494_v2 = vadd.f32 %v5493_v56, %v5492_v43  ;;  %v12127_v43 = vld [vmem:[#allocation45_spill] sm:$0xff]  ;;  %v5418_v56 = vmul.f32 %v10348_v0, %v10348_v0  ;;  %v5505_v49 = vsel %vm18_vm0, %v5417_v32, 0.0 }
 0x3a6   : > { %v10362_v25 = vsub.f32 %v12127_v43, %v10110_v28 }
 0x3a7   : > { %v5496_v20 = vadd.f32 %v5495_v22, %v5494_v2  ;;  %v5503_v2 = vsel %vm18_vm0, %v5416_v4, 0.0  ;;  %v12128_v22 = vld [vmem:[#allocation48_spill] sm:$0xff]  ;;  %v5507_v4 = vsel %vm18_vm0, %v5418_v56, 0.0 }
 0x3a9   : > { %v5498_v42 = vadd.f32 %v5497_v44, %v5496_v20  ;;  %v10369_v20 = vsub.f32 %v12128_v22, %v10110_v28  ;;  %v5419_v44 = vmul.f32 %v10355_v38, %v10355_v38 }
 0x3ab   : > { %v5500_v27 = vadd.f32 %v5499_v55, %v5498_v42  ;;  %12129 = vst [vmem:[#allocation21_spill] sm:$0xff] %v10369_v20  ;;  %v10376_v55 = vsub.f32 %v12130_v61, %v10110_v28  ;;  %v5421_v43 = vmul.f32 %v10369_v20, %v10369_v20  ;;  %v5509_v32 = vsel %vm18_vm0, %v5419_v44, 0.0  ;;  %v12136_v61 = vld [vmem:[#allocation5_spill] sm:$0xff] }
 0x3ad   : > { %v5502_v63 = vadd.f32 %v5501_v51, %v5500_v27  ;;  %12131 = vst [vmem:[#allocation23_spill] sm:$0xff] %v10376_v55  ;;  %v5420_v27 = vmul.f32 %v10362_v25, %v10362_v25  ;;  %v12132_v51 = vld [vmem:[#allocation49_spill] sm:$0xff]  ;;  %v5513_v44 = vsel %vm18_vm0, %v5421_v43, 0.0 }
 0x3af   : > { %v5504_v13 = vadd.f32 %v5503_v2, %v5502_v63  ;;  %v10383_v63 = vsub.f32 %v12132_v51, %v10110_v28  ;;  %v5511_v56 = vsel %vm18_vm0, %v5420_v27, 0.0 }
 0x3b1   : > { %v5506_v42 = vadd.f32 %v5505_v49, %v5504_v13  ;;  %12133 = vst [vmem:[#allocation24_spill] sm:$0xff] %v10383_v63  ;;  %v12134_v13 = vld [vmem:[#allocation50_spill] sm:$0xff]  ;;  %v5422_v49 = vmul.f32 %v10376_v55, %v10376_v55  ;;  %v5423_v51 = vmul.f32 %v10383_v63, %v10383_v63 }
 0x3b2   : > { %v10390_v22 = vsub.f32 %v12134_v13, %v10110_v28 }
 0x3b3   : > { %v5508_v26 = vadd.f32 %v5507_v4, %v5506_v42  ;;  %v10397_v4 = vsub.f32 %v12136_v61, %v10110_v28  ;;  %v5515_v27 = vsel %vm18_vm0, %v5422_v49, 0.0  ;;  %v5517_v43 = vsel %vm18_vm0, %v5423_v51, 0.0 }
 0x3b4   : > { %12135 = vst [vmem:[#allocation25_spill] sm:$0xff] %v10390_v22  ;;  %v5424_v55 = vmul.f32 %v10390_v22, %v10390_v22 }
 0x3b5   : > { %v5510_v2 = vadd.f32 %v5509_v32, %v5508_v26  ;;  %12137 = vst [vmem:[#allocation22_spill] sm:$0xff] %v10397_v4  ;;  %v12138_v32 = vld [vmem:[#allocation3_spill] sm:$0xff]  ;;  %v5425_v63 = vmul.f32 %v10397_v4, %v10397_v4 }
 0x3b6   : > { %v10404_v13 = vsub.f32 %v12138_v32, %v10110_v28  ;;  %v5519_v49 = vsel %vm18_vm0, %v5424_v55, 0.0 }
 0x3b7   : > { %v5512_v42 = vadd.f32 %v5511_v56, %v5510_v2  ;;  %v12140_v56 = vld [vmem:[#allocation36_spill] sm:$0xff]  ;;  %v5521_v51 = vsel %vm18_vm0, %v5425_v63, 0.0 }
 0x3b8   : > { %12139 = vst [vmem:[#allocation26_spill] sm:$0xff] %v10404_v13  ;;  %v10411_v61 = vsub.f32 %v12140_v56, %v10110_v28  ;;  %v5426_v22 = vmul.f32 %v10404_v13, %v10404_v13 }
 0x3b9   : > { %v5514_v26 = vadd.f32 %v5513_v44, %v5512_v42  ;;  %v12142_v44 = vld [vmem:[#allocation7_spill] sm:$0xff] }
 0x3ba   : > { %12141 = vst [vmem:[#allocation38_spill] sm:$0xff] %v10411_v61  ;;  %v10418_v32 = vsub.f32 %v12142_v44, %v10110_v28  ;;  %v5427_v4 = vmul.f32 %v10411_v61, %v10411_v61  ;;  %v5523_v55 = vsel %vm18_vm0, %v5426_v22, 0.0 }
 0x3bb   : > { %v5516_v2 = vadd.f32 %v5515_v27, %v5514_v26  ;;  %v12144_v27 = vld [vmem:[#allocation8_spill] sm:$0xff] }
 0x3bc   : > { %12143 = vst [vmem:[#allocation27_spill] sm:$0xff] %v10418_v32  ;;  %v10425_v56 = vsub.f32 %v12144_v27, %v10110_v28  ;;  %v5428_v13 = vmul.f32 %v10418_v32, %v10418_v32  ;;  %v5525_v63 = vsel %vm18_vm0, %v5427_v4, 0.0 }
 0x3bd   : > { %v5518_v42 = vadd.f32 %v5517_v43, %v5516_v2  ;;  %v12146_v43 = vld [vmem:[#allocation4_spill] sm:$0xff] }
 0x3be   : > { %12145 = vst [vmem:[#allocation28_spill] sm:$0xff] %v10425_v56  ;;  %v10432_v44 = vsub.f32 %v12146_v43, %v10110_v28  ;;  %v5429_v61 = vmul.f32 %v10425_v56, %v10425_v56  ;;  %v5527_v22 = vsel %vm18_vm0, %v5428_v13, 0.0 }
 0x3bf   : > { %v5520_v26 = vadd.f32 %v5519_v49, %v5518_v42  ;;  %v12148_v49 = vld [vmem:[#allocation9_spill] sm:$0xff] }
 0x3c0   : > { %12147 = vst [vmem:[#allocation29_spill] sm:$0xff] %v10432_v44  ;;  %v10439_v27 = vsub.f32 %v12148_v49, %v10110_v28  ;;  %v5430_v32 = vmul.f32 %v10432_v44, %v10432_v44  ;;  %v5529_v4 = vsel %vm18_vm0, %v5429_v61, 0.0 }
 0x3c1   : > { %v5522_v2 = vadd.f32 %v5521_v51, %v5520_v26  ;;  %v12150_v51 = vld [vmem:[#allocation6_spill] sm:$0xff] }
 0x3c2   : > { %12149 = vst [vmem:[#allocation30_spill] sm:$0xff] %v10439_v27  ;;  %v10446_v43 = vsub.f32 %v12150_v51, %v10110_v28  ;;  %v5431_v56 = vmul.f32 %v10439_v27, %v10439_v27  ;;  %v5531_v13 = vsel %vm18_vm0, %v5430_v32, 0.0 }
 0x3c3   : > { %v5524_v42 = vadd.f32 %v5523_v55, %v5522_v2  ;;  %v12152_v55 = vld [vmem:[#allocation11_spill] sm:$0xff] }
 0x3c4   : > { %12151 = vst [vmem:[#allocation32_spill] sm:$0xff] %v10446_v43  ;;  %v10453_v49 = vsub.f32 %v12152_v55, %v10110_v28  ;;  %v5432_v44 = vmul.f32 %v10446_v43, %v10446_v43  ;;  %v5533_v61 = vsel %vm18_vm0, %v5431_v56, 0.0 }
 0x3c5   : > { %v5526_v26 = vadd.f32 %v5525_v63, %v5524_v42  ;;  %v12154_v63 = vld [vmem:[#allocation10_spill] sm:$0xff] }
 0x3c6   : > { %12153 = vst [vmem:[#allocation31_spill] sm:$0xff] %v10453_v49  ;;  %v10460_v51 = vsub.f32 %v12154_v63, %v10110_v28  ;;  %v5433_v27 = vmul.f32 %v10453_v49, %v10453_v49  ;;  %v5535_v32 = vsel %vm18_vm0, %v5432_v44, 0.0  ;;  %v12158_v49 = vld [vmem:[#allocation12_spill] sm:$0xff] }
 0x3c7   : > { %v5528_v2 = vadd.f32 %v5527_v22, %v5526_v26  ;;  %v12156_v22 = vld [vmem:[#allocation13_spill] sm:$0xff]  ;;  %v10484_v56 = vsub.f32 %v12158_v49, %v10110_v28 }
 0x3c8   : > { %12155 = vst [vmem:[#allocation34_spill] sm:$0xff] %v10460_v51  ;;  %v10467_v55 = vsub.f32 %v12156_v22, %v10110_v28  ;;  %v5434_v43 = vmul.f32 %v10460_v51, %v10460_v51  ;;  %v5537_v22 = vsel %vm18_vm0, %v5433_v27, 0.0  ;;  %v12159_v51 = vld [vmem:[#allocation15_spill] sm:$0xff] }
 0x3c9   : > { %v5530_v42 = vadd.f32 %v5529_v4, %v5528_v2  ;;  %v12157_v4 = vld [vmem:[#allocation14_spill] sm:$0xff]  ;;  %v10491_v44 = vsub.f32 %v12159_v51, %v10110_v28  ;;  %v5438_v49 = vmul.f32 %v10484_v56, %v10484_v56 }
 0x3ca   : > { %v10474_v63 = vsub.f32 %v12157_v4, %v10110_v28  ;;  %v5440_v28 = vmul.f32 %v10118_v6, %v10118_v6 }
 0x3cb   : > { %v5532_v26 = vadd.f32 %v5531_v13, %v5530_v42  ;;  %v5435_v13 = vmul.f32 %v10467_v55, %v10467_v55  ;;  %v5547_v51 = vsel %vm18_vm0, %v5438_v49, 0.0  ;;  %v5444_v49 = vmul.f32 %v10134_v30, %v10134_v30 }
 0x3cd   : > { %v5534_v2 = vadd.f32 %v5533_v61, %v5532_v26  ;;  %v5436_v26 = vmul.f32 %v10474_v63, %v10474_v63  ;;  %v5539_v61 = vsel %vm18_vm0, %v5434_v43, 0.0  ;;  %v5541_v27 = vsel %vm18_vm0, %v5435_v13, 0.0 }
 0x3ce   : > { %v5439_v43 = vmul.f32 %v10491_v44, %v10491_v44  ;;  %v5441_v13 = vmul.f32 %v10122_v48, %v10122_v48 }
 0x3cf   : > { %v5536_v42 = vadd.f32 %v5535_v32, %v5534_v2  ;;  %v5437_v2 = vmul.f32 %v10114_v46, %v10114_v46 }
 0x3d1   : > { %v5538_v20 = vadd.f32 %v5537_v22, %v5536_v42  ;;  %v5543_v42 = vsel %vm18_vm0, %v5436_v26, 0.0  ;;  %v5442_v26 = vmul.f32 %v10126_v8, %v10126_v8 }
 0x3d3   : > { %v5540_v4 = vadd.f32 %v5539_v61, %v5538_v20  ;;  %v5545_v20 = vsel %vm18_vm0, %v5437_v2, 0.0  ;;  %v5443_v2 = vmul.f32 %v10130_v53, %v10130_v53 }
 0x3d5   : > { %v5542_v32 = vadd.f32 %v5541_v27, %v5540_v4  ;;  %v5549_v4 = vsel %vm18_vm0, %v5439_v43, 0.0  ;;  %v5557_v43 = vsel %vm18_vm0, %v5443_v2, 0.0  ;;  %v5449_v2 = vmul.f32 %v10152_v5, %v10152_v5 }
 0x3d7   : > { %v5544_v22 = vadd.f32 %v5543_v42, %v5542_v32  ;;  %v5551_v32 = vsel %vm18_vm0, %v5440_v28, 0.0  ;;  %v5446_v28 = vmul.f32 %v10142_v18, %v10142_v18 }
 0x3d9   : > { %v5546_v61 = vadd.f32 %v5545_v20, %v5544_v22  ;;  %v5553_v22 = vsel %vm18_vm0, %v5441_v13, 0.0  ;;  %v5447_v13 = vmul.f32 %v10146_v40, %v10146_v40 }
 0x3db   : > { %v5548_v46 = vadd.f32 %v5547_v51, %v5546_v61  ;;  %v5555_v61 = vsel %vm18_vm0, %v5442_v26, 0.0  ;;  %v5448_v26 = vmul.f32 %v10149_v9, %v10149_v9 }
 0x3dd   : > { %v5550_v27 = vadd.f32 %v5549_v4, %v5548_v46  ;;  %v5445_v46 = vmul.f32 %v10138_v57, %v10138_v57 }
 0x3df   : > { %v5552_v42 = vadd.f32 %v5551_v32, %v5550_v27  ;;  %v5559_v27 = vsel %vm18_vm0, %v5444_v49, 0.0  ;;  %v5450_v49 = vmul.f32 %v10155_v33, %v10155_v33 }
 0x3e1   : > { %v5554_v20 = vadd.f32 %v5553_v22, %v5552_v42  ;;  %v5561_v42 = vsel %vm18_vm0, %v5445_v46, 0.0  ;;  %v5451_v46 = vmul.f32 %v10158_v52, %v10158_v52 }
 0x3e3   : > { %v5556_v51 = vadd.f32 %v5555_v61, %v5554_v20  ;;  %v5563_v20 = vsel %vm18_vm0, %v5446_v28, 0.0  ;;  %v5452_v28 = vmul.f32 %v10161_v10, %v10161_v10 }
 0x3e5   : > { %v5558_v4 = vadd.f32 %v5557_v43, %v5556_v51  ;;  %v5565_v51 = vsel %vm18_vm0, %v5447_v13, 0.0  ;;  %v5453_v13 = vmul.f32 %v10164_v60, %v10164_v60 }
 0x3e7   : > { %v5560_v32 = vadd.f32 %v5559_v27, %v5558_v4  ;;  %v5567_v4 = vsel %vm18_vm0, %v5448_v26, 0.0  ;;  %v5454_v26 = vmul.f32 %v10167_v35, %v10167_v35 }
 0x3e9   : > { %v5562_v22 = vadd.f32 %v5561_v42, %v5560_v32  ;;  %v5569_v32 = vsel %vm18_vm0, %v5449_v2, 0.0  ;;  %v5455_v2 = vmul.f32 %v10170_v1, %v10170_v1 }
 0x3eb   : > { %v5564_v61 = vadd.f32 %v5563_v20, %v5562_v22  ;;  %v5571_v22 = vsel %vm18_vm0, %v5450_v49, 0.0  ;;  %v5579_v49 = vsel %vm18_vm0, %v5454_v26, 0.0 }
 0x3ed   : > { %v5566_v43 = vadd.f32 %v5565_v51, %v5564_v61  ;;  %v5573_v61 = vsel %vm18_vm0, %v5451_v46, 0.0 }
 0x3ef   : > { %v5568_v27 = vadd.f32 %v5567_v4, %v5566_v43  ;;  %v5575_v43 = vsel %vm18_vm0, %v5452_v28, 0.0 }
 0x3f1   : > { %v5570_v42 = vadd.f32 %v5569_v32, %v5568_v27  ;;  %v5577_v27 = vsel %vm18_vm0, %v5453_v13, 0.0 }
 0x3f3   : > { %v5572_v20 = vadd.f32 %v5571_v22, %v5570_v42  ;;  %v5581_v22 = vsel %vm18_vm0, %v5455_v2, 0.0  ;;  %v12162_v2 = vld [vmem:[#allocation24_spill] sm:$0xff] }
 0x3f5   : > { %v5574_v51 = vadd.f32 %v5573_v61, %v5572_v20 }
 0x3f7   : > { %v5576_v4 = vadd.f32 %v5575_v43, %v5574_v51 }
 0x3f9   : > { %v5578_v32 = vadd.f32 %v5577_v27, %v5576_v4  ;;  %v12161_v4 = vld [vmem:[#allocation23_spill] sm:$0xff]  ;;  %v12163_v27 = vld [vmem:[#allocation25_spill] sm:$0xff] }
 0x3fb   : > { %v5580_v42 = vadd.f32 %v5579_v49, %v5578_v32  ;;  %v12164_v32 = vld [vmem:[#allocation22_spill] sm:$0xff] }
 0x3fc   : > { %v12165_v49 = vld [vmem:[#allocation26_spill] sm:$0xff] }
 0x3fd   : > { %v5582_v60 = vadd.f32 %v5581_v22, %v5580_v42  ;;  %v12166_v22 = vld [vmem:[#allocation38_spill] sm:$0xff] }
 0x3ff   : > { %v5583_v46 = vrot.slane %v5582_v60, 4 }
 0x401   : > { %v5584_v20 = vadd.f32 %v5583_v46, %v5582_v60 }
 0x403   : > { %v5585_v61 = vrot.slane %v5584_v20, 2 }
 0x405   : > { %v5586_v10 = vadd.f32 %v5585_v61, %v5584_v20  ;;  %v12167_v20 = vld [vmem:[#allocation27_spill] sm:$0xff] }
 0x407   : > { %v5587_v35 = vrot.slane %v5586_v10, 1 }
 0x409   : > { %v5588_v52 = vadd.f32 %v5587_v35, %v5586_v10 }
 0x40b   : > { %v5589_v28 = vmul.f32 0.001953125, %v5588_v52 }
 0x40d   : > { %v5590_v51 = vadd.f32 1e-05, %v5589_v28  ;;  %v12169_v28 = vld [vmem:[#allocation28_spill] sm:$0xff] }
 0x40f   : > { %7903 = vrsqrt.f32 %v5590_v51 }
 0x41c   : > { %v10552_v43 = vpop.eup %7903 }
 0x41d   : > { %v10556_v13 = vmul.f32 %v10552_v43, %v10174_v50  ;;  %v10560_v26 = vmul.f32 %v10552_v43, %v10178_v3  ;;  %v10564_v60 = vmul.f32 %v10552_v43, %v10182_v7  ;;  %v10568_v10 = vmul.f32 %v10552_v43, %v10186_v14 }
 0x41e   : > { %v10572_v52 = vmul.f32 %v10552_v43, %v10194_v17  ;;  %v10576_v35 = vmul.f32 %v10552_v43, %v10200_v21  ;;  %v10580_v50 = vmul.f32 %v10552_v43, %v10208_v45  ;;  %v10584_v3 = vmul.f32 %v10552_v43, %v10215_v34 }
 0x41f   : > { %v10588_v7 = vmul.f32 %v10552_v43, %v10222_v39  ;;  %v10592_v14 = vmul.f32 %v10552_v43, %v10229_v29  ;;  %v10596_v17 = vmul.f32 %v10552_v43, %v10236_v54  ;;  %v10600_v21 = vmul.f32 %v10552_v43, %v10243_v62 }
 0x420   : > { %v10604_v45 = vmul.f32 %v10552_v43, %v10250_v12  ;;  %v10608_v34 = vmul.f32 %v10552_v43, %v10257_v47  ;;  %v10612_v39 = vmul.f32 %v10552_v43, %v10264_v23  ;;  %v10616_v29 = vmul.f32 %v10552_v43, %v10271_v15 }
 0x421   : > { %v10620_v54 = vmul.f32 %v10552_v43, %v10278_v58  ;;  %v10624_v62 = vmul.f32 %v10552_v43, %v10285_v41  ;;  %v10628_v12 = vmul.f32 %v10552_v43, %v10292_v19  ;;  %v10632_v47 = vmul.f32 %v10552_v43, %v10299_v36 }
 0x422   : > { %v10636_v23 = vmul.f32 %v10552_v43, %v10306_v37  ;;  %v10640_v15 = vmul.f32 %v10552_v43, %v10313_v59  ;;  %v10644_v58 = vmul.f32 %v10552_v43, %v10320_v11  ;;  %v10648_v41 = vmul.f32 %v10552_v43, %v10327_v24  ;;  %v12160_v24 = vld [vmem:[#allocation21_spill] sm:$0xff] }
 0x423   : > { %v10652_v19 = vmul.f32 %v10552_v43, %v10334_v31  ;;  %v10656_v36 = vmul.f32 %v10552_v43, %v10341_v16  ;;  %v10660_v37 = vmul.f32 %v10552_v43, %v10348_v0  ;;  %v10664_v59 = vmul.f32 %v10552_v43, %v10355_v38 }
 0x424   : > { %v10668_v11 = vmul.f32 %v10552_v43, %v10362_v25  ;;  %v10672_v31 = vmul.f32 %v10552_v43, %v12160_v24  ;;  %v10676_v16 = vmul.f32 %v10552_v43, %v12161_v4  ;;  %v10680_v0 = vmul.f32 %v10552_v43, %v12162_v2  ;;  %v12170_v24 = vld [vmem:[#allocation29_spill] sm:$0xff]  ;;  %v12171_v2 = vld [vmem:[#allocation30_spill] sm:$0xff] }
 0x425   : > { %v10684_v38 = vmul.f32 %v10552_v43, %v12163_v27  ;;  %v10688_v25 = vmul.f32 %v10552_v43, %v12164_v32  ;;  %v10692_v42 = vmul.f32 %v10552_v43, %v12165_v49  ;;  %v10696_v46 = vmul.f32 %v10552_v43, %v12166_v22  ;;  %v12173_v32 = vld [vmem:[#allocation32_spill] sm:$0xff]  ;;  %v12174_v22 = vld [vmem:[#allocation31_spill] sm:$0xff] }
 0x426   : > { %v10700_v61 = vmul.f32 %v10552_v43, %v12167_v20  ;;  %v10704_v51 = vmul.f32 %v10552_v43, %v12169_v28  ;;  %v10708_v4 = vmul.f32 %v10552_v43, %v12170_v24  ;;  %v10712_v27 = vmul.f32 %v10552_v43, %v12171_v2 }
 0x427   : > { %v10716_v49 = vmul.f32 %v10552_v43, %v12173_v32  ;;  %v10720_v20 = vmul.f32 %v10552_v43, %v12174_v22  ;;  %v10728_v24 = vmul.f32 %v10552_v43, %v10467_v55  ;;  %v10732_v2 = vmul.f32 %v10552_v43, %v10474_v63 }
 0x428   : > { %12168 = vst [vmem:[#allocation33_spill] sm:$0xff] %v10700_v61  ;;  %12172 = vst [vmem:[#allocation35_spill] sm:$0xff] %v10712_v27  ;;  %v12175_v61 = vld [vmem:[#allocation34_spill] sm:$0xff]  ;;  %v12176_v27 = vld [vmem:[#allocation16_spill] sm:$0xff]  ;;  %v10740_v22 = vmul.f32 %v10552_v43, %v10484_v56  ;;  %v10748_v55 = vmul.f32 %v10552_v43, %v10118_v6  ;;  %v10752_v63 = vmul.f32 %v10552_v43, %v10122_v48 }
 0x429   : > { %v10724_v28 = vmul.f32 %v10552_v43, %v12175_v61  ;;  %v10736_v32 = vmul.f32 %v10552_v43, %v12176_v27  ;;  %v10744_v61 = vmul.f32 %v10552_v43, %v10491_v44  ;;  %v10756_v27 = vmul.f32 %v10552_v43, %v10126_v8 }
 0x42a   : > { %v10760_v56 = vmul.f32 %v10552_v43, %v10130_v53  ;;  %v10764_v44 = vmul.f32 %v10552_v43, %v10134_v30  ;;  %v10768_v6 = vmul.f32 %v10552_v43, %v10138_v57  ;;  %v10772_v48 = vmul.f32 %v10552_v43, %v10142_v18  ;;  %v10781_v53 = vld [vmem:[%s11768_s2] ss:$0 sm:$0xff] }
 0x42b   : > { %v10776_v8 = vmul.f32 %v10552_v43, %v10146_v40  ;;  %v10785_v30 = vmul.f32 %v10552_v43, %v10149_v9  ;;  %v10789_v57 = vmul.f32 %v10552_v43, %v10152_v5  ;;  %v10793_v18 = vmul.f32 %v10552_v43, %v10155_v33 }
 0x42c   : > { %12177 = vst [vmem:[#allocation37_spill] sm:$0xff] %v10764_v44  ;;  %12178 = vst [vmem:[#allocation40_spill] sm:$0xff] %v10768_v6  ;;  %v12184_v44 = vld [vmem:[#allocation17_spill] sm:$0xff]  ;;  %v10813_v33 = vmul.f32 %v10552_v43, %v10170_v1  ;;  %v10833_v1 = vmul.f32 %v10781_v53, %v10572_v52  ;;  %v10857_v52 = vmul.f32 %v10781_v53, %v10596_v17 }
 0x42d   : > { %12179 = vst [vmem:[#allocation39_spill] sm:$0xff] %v10772_v48  ;;  %12180 = vst [vmem:[#allocation42_spill] sm:$0xff] %v10776_v8  ;;  %v12182_v48 = vld [vmem:[#allocation18_spill] sm:$0xff]  ;;  %v12183_v8 = vld [vmem:[#allocation19_spill] sm:$0xff]  ;;  %v10805_v9 = vmul.f32 %v10552_v43, %v12184_v44  ;;  %v10825_v44 = vmul.f32 %v10781_v53, %v10564_v60  ;;  %v10849_v60 = vmul.f32 %v10781_v53, %v10588_v7 }
 0x42e   : > { %12181 = vst [vmem:[#allocation41_spill] sm:$0xff] %v10785_v30  ;;  %v10797_v40 = vmul.f32 %v10552_v43, %v12182_v48  ;;  %v10801_v6 = vmul.f32 %v10552_v43, %v12183_v8  ;;  %v12185_v30 = vld [vmem:[#allocation20_spill] sm:$0xff]  ;;  %v10817_v48 = vmul.f32 %v10781_v53, %v10556_v13  ;;  %v10821_v8 = vmul.f32 %v10781_v53, %v10560_v26 }
 0x42f   : > { %v10809_v5 = vmul.f32 %v10552_v43, %v12185_v30  ;;  %v10829_v30 = vmul.f32 %v10781_v53, %v10568_v10  ;;  %v10837_v43 = vmul.f32 %v10781_v53, %v10576_v35  ;;  %v10841_v13 = vmul.f32 %v10781_v53, %v10580_v50 }
 0x430   : > { %v10845_v26 = vmul.f32 %v10781_v53, %v10584_v3  ;;  %v10853_v10 = vmul.f32 %v10781_v53, %v10592_v14  ;;  %v10861_v35 = vmul.f32 %v10781_v53, %v10600_v21  ;;  %v10865_v50 = vmul.f32 %v10781_v53, %v10604_v45 }
 0x431   : > { %v10869_v3 = vmul.f32 %v10781_v53, %v10608_v34  ;;  %v10873_v7 = vmul.f32 %v10781_v53, %v10612_v39  ;;  %v10877_v14 = vmul.f32 %v10781_v53, %v10616_v29  ;;  %v10881_v17 = vmul.f32 %v10781_v53, %v10620_v54 }
 0x432   : > { %v10885_v21 = vmul.f32 %v10781_v53, %v10624_v62  ;;  %v10889_v45 = vmul.f32 %v10781_v53, %v10628_v12  ;;  %v10893_v34 = vmul.f32 %v10781_v53, %v10632_v47  ;;  %v10897_v39 = vmul.f32 %v10781_v53, %v10636_v23 }
 0x433   : > { %v10901_v29 = vmul.f32 %v10781_v53, %v10640_v15  ;;  %v10905_v54 = vmul.f32 %v10781_v53, %v10644_v58  ;;  %v10909_v62 = vmul.f32 %v10781_v53, %v10648_v41  ;;  %v10913_v12 = vmul.f32 %v10781_v53, %v10652_v19 }
 0x434   : > { %v10917_v47 = vmul.f32 %v10781_v53, %v10656_v36  ;;  %v10921_v23 = vmul.f32 %v10781_v53, %v10660_v37  ;;  %v10925_v15 = vmul.f32 %v10781_v53, %v10664_v59  ;;  %v10929_v58 = vmul.f32 %v10781_v53, %v10668_v11 }
 0x435   : > { %v10933_v41 = vmul.f32 %v10781_v53, %v10672_v31  ;;  %v10937_v19 = vmul.f32 %v10781_v53, %v10676_v16  ;;  %v10941_v36 = vmul.f32 %v10781_v53, %v10680_v0  ;;  %v10945_v37 = vmul.f32 %v10781_v53, %v10684_v38  ;;  %v12187_v16 = vld [vmem:[#allocation33_spill] sm:$0xff] }
 0x436   : > { %v10949_v59 = vmul.f32 %v10781_v53, %v10688_v25  ;;  %v10953_v11 = vmul.f32 %v10781_v53, %v10692_v42  ;;  %v10957_v31 = vmul.f32 %v10781_v53, %v10696_v46  ;;  %v10961_v0 = vmul.f32 %v10781_v53, %v12187_v16 }
 0x437   : > { %v10965_v38 = vmul.f32 %v10781_v53, %v10704_v51  ;;  %v10969_v25 = vmul.f32 %v10781_v53, %v10708_v4  ;;  %v10977_v46 = vmul.f32 %v10781_v53, %v10716_v49  ;;  %v10981_v16 = vmul.f32 %v10781_v53, %v10720_v20 }
 0x438   : > { %12186 = vst [vmem:[#allocation44_spill] sm:$0xff] %v10949_v59  ;;  %v12188_v59 = vld [vmem:[#allocation35_spill] sm:$0xff]  ;;  %v10985_v51 = vmul.f32 %v10781_v53, %v10724_v28  ;;  %v10989_v4 = vmul.f32 %v10781_v53, %v10728_v24  ;;  %v10997_v49 = vmul.f32 %v10781_v53, %v10736_v32  ;;  %v11001_v20 = vmul.f32 %v10781_v53, %v10740_v22 }
 0x439   : > { %v10973_v42 = vmul.f32 %v10781_v53, %v12188_v59  ;;  %v10993_v59 = vmul.f32 %v10781_v53, %v10732_v2  ;;  %v11005_v28 = vmul.f32 %v10781_v53, %v10744_v61  ;;  %v11009_v24 = vmul.f32 %v10781_v53, %v10748_v55 }
 0x43a   : > { %12189 = vst [vmem:[#allocation43_spill] sm:$0xff] %v11001_v20  ;;  %v11013_v2 = vmul.f32 %v10781_v53, %v10752_v63  ;;  %v11017_v32 = vmul.f32 %v10781_v53, %v10756_v27  ;;  %v11021_v22 = vmul.f32 %v10781_v53, %v10760_v56  ;;  %v12194_v20 = vld [vmem:[#allocation37_spill] sm:$0xff]  ;;  %v11042_v56 = vld [vmem:[%s11769_s3] ss:$0 sm:$0xff] }
 0x43b   : > { %12190 = vst [vmem:[#allocation46_spill] sm:$0xff] %v11005_v28  ;;  %12191 = vst [vmem:[#allocation45_spill] sm:$0xff] %v11009_v24  ;;  %v11025_v61 = vmul.f32 %v10781_v53, %v12194_v20  ;;  %v12195_v28 = vld [vmem:[#allocation40_spill] sm:$0xff]  ;;  %v12196_v24 = vld [vmem:[#allocation39_spill] sm:$0xff] }
 0x43c   : > { %12192 = vst [vmem:[#allocation48_spill] sm:$0xff] %v11013_v2  ;;  %12193 = vst [vmem:[#allocation47_spill] sm:$0xff] %v11021_v22  ;;  %v11029_v55 = vmul.f32 %v10781_v53, %v12195_v28  ;;  %v11033_v63 = vmul.f32 %v10781_v53, %v12196_v24  ;;  %v12197_v2 = vld [vmem:[#allocation42_spill] sm:$0xff]  ;;  %v12199_v22 = vld [vmem:[#allocation41_spill] sm:$0xff]  ;;  %v11050_v28 = vmul.f32 %v10781_v53, %v10789_v57 }
 0x43d   : > { %v11037_v27 = vmul.f32 %v10781_v53, %v12197_v2  ;;  %v11046_v20 = vmul.f32 %v10781_v53, %v12199_v22  ;;  %v11054_v24 = vmul.f32 %v10781_v53, %v10793_v18  ;;  %v11058_v2 = vmul.f32 %v10781_v53, %v10797_v40 }
 0x43e   : > { %v11066_v22 = vmul.f32 %v10781_v53, %v10805_v9  ;;  %v11070_v57 = vmul.f32 %v10781_v53, %v10809_v5  ;;  %v11074_v18 = vmul.f32 %v10781_v53, %v10813_v33  ;;  %v11078_v40 = vadd.f32 %v11042_v56, %v10817_v48 }
 0x43f   : > { %12198 = vst [vmem:[#allocation49_spill] sm:$0xff] %v11037_v27  ;;  %v11062_v27 = vmul.f32 %v10781_v53, %v10801_v6  ;;  %v11082_v6 = vadd.f32 %v11042_v56, %v10821_v8  ;;  %v11086_v9 = vadd.f32 %v11042_v56, %v10825_v44  ;;  %v11090_v5 = vadd.f32 %v11042_v56, %v10829_v30 }
 0x440   : > { %v11094_v53 = vadd.f32 %v11042_v56, %v10833_v1  ;;  %v11098_v33 = vadd.f32 %v11042_v56, %v10837_v43  ;;  %v11102_v48 = vadd.f32 %v11042_v56, %v10841_v13  ;;  %v11106_v8 = vadd.f32 %v11042_v56, %v10845_v26 }
 0x441   : > { %v11110_v44 = vadd.f32 %v11042_v56, %v10849_v60  ;;  %v11114_v30 = vadd.f32 %v11042_v56, %v10853_v10  ;;  %v11118_v1 = vadd.f32 %v11042_v56, %v10857_v52  ;;  %v11122_v43 = vadd.f32 %v11042_v56, %v10861_v35 }
 0x442   : > { %v11126_v13 = vadd.f32 %v11042_v56, %v10865_v50  ;;  %v11130_v26 = vadd.f32 %v11042_v56, %v10869_v3  ;;  %v11134_v60 = vadd.f32 %v11042_v56, %v10873_v7  ;;  %v11138_v10 = vadd.f32 %v11042_v56, %v10877_v14 }
 0x443   : > { %v11142_v52 = vadd.f32 %v11042_v56, %v10881_v17  ;;  %v11146_v35 = vadd.f32 %v11042_v56, %v10885_v21  ;;  %v11150_v50 = vadd.f32 %v11042_v56, %v10889_v45  ;;  %v11154_v3 = vadd.f32 %v11042_v56, %v10893_v34 }
 0x444   : > { %v11158_v7 = vadd.f32 %v11042_v56, %v10897_v39  ;;  %v11162_v14 = vadd.f32 %v11042_v56, %v10901_v29  ;;  %v11166_v17 = vadd.f32 %v11042_v56, %v10905_v54  ;;  %v11170_v21 = vadd.f32 %v11042_v56, %v10909_v62 }
 0x445   : > { %v11174_v45 = vadd.f32 %v11042_v56, %v10913_v12  ;;  %v11178_v34 = vadd.f32 %v11042_v56, %v10917_v47  ;;  %v11182_v39 = vadd.f32 %v11042_v56, %v10921_v23  ;;  %v11186_v29 = vadd.f32 %v11042_v56, %v10925_v15  ;;  %v12203_v15 = vld [vmem:[#allocation44_spill] sm:$0xff] }
 0x446   : > { %v11190_v54 = vadd.f32 %v11042_v56, %v10929_v58  ;;  %v11194_v62 = vadd.f32 %v11042_v56, %v10933_v41  ;;  %v11198_v12 = vadd.f32 %v11042_v56, %v10937_v19  ;;  %v11202_v47 = vadd.f32 %v11042_v56, %v10941_v36 }
 0x447   : > { %v11206_v23 = vadd.f32 %v11042_v56, %v10945_v37  ;;  %v11210_v58 = vadd.f32 %v11042_v56, %v12203_v15  ;;  %v11214_v41 = vadd.f32 %v11042_v56, %v10953_v11  ;;  %v11218_v19 = vadd.f32 %v11042_v56, %v10957_v31 }
 0x448   : > { %12200 = vst [vmem:[#allocation50_spill] sm:$0xff] %v11198_v12  ;;  %12201 = vst [vmem:[#allocation5_spill] sm:$0xff] %v11202_v47  ;;  %v11222_v36 = vadd.f32 %v11042_v56, %v10961_v0  ;;  %v11226_v37 = vadd.f32 %v11042_v56, %v10965_v38  ;;  %v11230_v15 = vadd.f32 %v11042_v56, %v10969_v25 }
 0x449   : > { %12202 = vst [vmem:[#allocation3_spill] sm:$0xff] %v11206_v23  ;;  %12204 = vst [vmem:[#allocation36_spill] sm:$0xff] %v11214_v41  ;;  %v11234_v11 = vadd.f32 %v11042_v56, %v10973_v42  ;;  %v11238_v31 = vadd.f32 %v11042_v56, %v10977_v46  ;;  %v11242_v0 = vadd.f32 %v11042_v56, %v10981_v16 }
 0x44a   : > { %12205 = vst [vmem:[#allocation7_spill] sm:$0xff] %v11230_v15  ;;  %v11246_v38 = vadd.f32 %v11042_v56, %v10985_v51  ;;  %v11250_v25 = vadd.f32 %v11042_v56, %v10989_v4  ;;  %v11254_v42 = vadd.f32 %v11042_v56, %v10993_v59  ;;  %v11258_v46 = vadd.f32 %v11042_v56, %v10997_v49 }
 0x44b   : > { %12206 = vst [vmem:[#allocation8_spill] sm:$0xff] %v11238_v31  ;;  %12207 = vst [vmem:[#allocation4_spill] sm:$0xff] %v11242_v0  ;;  %v12211_v31 = vld [vmem:[#allocation43_spill] sm:$0xff]  ;;  %v12212_v0 = vld [vmem:[#allocation46_spill] sm:$0xff]  ;;  %v11278_v49 = vadd.f32 %v11042_v56, %v11017_v32 }
 0x44c   : > { %12208 = vst [vmem:[#allocation9_spill] sm:$0xff] %v11246_v38  ;;  %12209 = vst [vmem:[#allocation6_spill] sm:$0xff] %v11250_v25  ;;  %v11262_v16 = vadd.f32 %v11042_v56, %v12211_v31  ;;  %v11266_v51 = vadd.f32 %v11042_v56, %v12212_v0  ;;  %v12214_v38 = vld [vmem:[#allocation45_spill] sm:$0xff]  ;;  %v12216_v25 = vld [vmem:[#allocation48_spill] sm:$0xff]  ;;  %v11286_v0 = vadd.f32 %v11042_v56, %v11025_v61 }
 0x44d   : > { %12210 = vst [vmem:[#allocation11_spill] sm:$0xff] %v11258_v46  ;;  %v11270_v4 = vadd.f32 %v11042_v56, %v12214_v38  ;;  %v11274_v59 = vadd.f32 %v11042_v56, %v12216_v25  ;;  %12218 = vst [vmem:[#allocation12_spill] sm:$0xff] %v11278_v49  ;;  %v12219_v46 = vld [vmem:[#allocation47_spill] sm:$0xff]  ;;  %v11290_v38 = vadd.f32 %v11042_v56, %v11029_v55  ;;  %v7909_v49 = vld [vmem:[#allocation2 + $0x49] sm:$0xff] }
 0x44e   : > { %12213 = vst [vmem:[#allocation10_spill] sm:$0xff] %v11266_v51  ;;  %v11282_v31 = vadd.f32 %v11042_v56, %v12219_v46  ;;  %v11294_v25 = vadd.f32 %v11042_v56, %v11033_v63  ;;  %v11302_v46 = vadd.f32 %v11042_v56, %v11046_v20  ;;  %v11306_v61 = vadd.f32 %v11042_v56, %v11050_v28 }
 0x44f   : > { %12215 = vst [vmem:[#allocation13_spill] sm:$0xff] %v11270_v4  ;;  %12217 = vst [vmem:[#allocation14_spill] sm:$0xff] %v11274_v59  ;;  %v12222_v59 = vld [vmem:[#allocation49_spill] sm:$0xff]  ;;  %v11310_v55 = vadd.f32 %v11042_v56, %v11054_v24  ;;  %v11314_v63 = vadd.f32 %v11042_v56, %v11058_v2  ;;  %v11322_v20 = vadd.f32 %v11042_v56, %v11066_v22  ;;  %v7908_v4 = vld [vmem:[#allocation2 + $0x39] sm:$0xff] }
 0x450   : > { %12220 = vst [vmem:[#allocation15_spill] sm:$0xff] %v11282_v31  ;;  %12221 = vst [vmem:[#allocation21_spill] sm:$0xff] %v11290_v38  ;;  %v11298_v32 = vadd.f32 %v11042_v56, %v12222_v59  ;;  %v11318_v59 = vadd.f32 %v11042_v56, %v11062_v27  ;;  %v11326_v28 = vadd.f32 %v11042_v56, %v11070_v57  ;;  %v7905_v38 = vld [vmem:[#allocation2 + $0x19] sm:$0xff] }
 0x451   : > { %12224 = vst [vmem:[#allocation24_spill] sm:$0xff] %v11306_v61  ;;  %12225 = vst [vmem:[#allocation25_spill] sm:$0xff] %v11310_v55  ;;  %v11330_v24 = vadd.f32 %v11042_v56, %v11074_v18  ;;  %v7907_v61 = vld [vmem:[#allocation2 + $0x31] sm:$0xff]  ;;  %v12245_v18 = vmax.f32 %v11090_v5, 0.0  ;;  %v12250_v5 = vmax.f32 %v11110_v44, 0.0  ;;  %v12254_v44 = vmax.f32 %v11126_v13, 0.0 }
 0x452   : > { %12223 = vst [vmem:[#allocation23_spill] sm:$0xff] %v11298_v32  ;;  %12226 = vst [vmem:[#allocation22_spill] sm:$0xff] %v11314_v63  ;;  %v12231_v55 = vld [vmem:[#allocation8_spill] sm:$0xff]  ;;  %v12239_v15 = vmov %v11318_v59  ;;  %v12241_v31 = vmov %v11326_v28  ;;  %v12246_v63 = vmax.f32 %v11094_v53, 0.0  ;;  %v12251_v53 = vmax.f32 %v11114_v30, 0.0  ;;  %v7921_v13 = vld [vmem:[#allocation2 + $0xd9] sm:$0xff] }
 0x453   : > { %12227 = vst [vmem:[#allocation26_spill] sm:$0xff] %v11318_v59  ;;  %12228 = vst [vmem:[#allocation38_spill] sm:$0xff] %v11322_v20  ;;  %v12232_v12 = vld [vmem:[#allocation4_spill] sm:$0xff]  ;;  %v12233_v47 = vld [vmem:[#allocation9_spill] sm:$0xff]  ;;  %v12242_v59 = vmax.f32 %v11078_v40, 0.0  ;;  %v12243_v20 = vmax.f32 %v11082_v6, 0.0  ;;  %v5865_v2 = vadd.f32 %v7908_v4, %v12245_v18 }
 0x454   : > { %12229 = vst [vmem:[#allocation27_spill] sm:$0xff] %v11326_v28  ;;  %12230 = vst [vmem:[#allocation28_spill] sm:$0xff] %v11330_v24  ;;  %v12234_v23 = vld [vmem:[#allocation6_spill] sm:$0xff]  ;;  %v12235_v41 = vld [vmem:[#allocation11_spill] sm:$0xff]  ;;  %v12244_v28 = vmax.f32 %v11086_v9, 0.0  ;;  %v5866_v27 = vadd.f32 %v7909_v49, %v12246_v63  ;;  %v12247_v40 = vmax.f32 %v11098_v33, 0.0 }
 0x455   : > { %v5862_v22 = vadd.f32 %v7905_v38, %v12242_v59  ;;  %v7906_v32 = vld [vmem:[#allocation2 + $0x21] sm:$0xff]  ;;  %v7910_v24 = vld [vmem:[#allocation2 + $0x51] sm:$0xff]  ;;  %v12248_v6 = vmax.f32 %v11102_v48, 0.0  ;;  %v12249_v9 = vmax.f32 %v11106_v8, 0.0  ;;  %v12252_v33 = vmax.f32 %v11118_v1, 0.0  ;;  %5929 = vst.msk [vmem:[#allocation2 + $0x39] sm:$0xff] %vm18_vm0, %v5865_v2 }
 0x456   : > { %v5863_v57 = vadd.f32 %v7906_v32, %v12243_v20  ;;  %v5864_v56 = vadd.f32 %v7907_v61, %v12244_v28  ;;  %v5867_v38 = vadd.f32 %v7910_v24, %v12247_v40  ;;  %v7911_v59 = vld [vmem:[#allocation2 + $0x61] sm:$0xff]  ;;  %v7912_v20 = vld [vmem:[#allocation2 + $0x69] sm:$0xff]  ;;  %v7913_v28 = vld [vmem:[#allocation2 + $0x79] sm:$0xff]  ;;  %v12253_v48 = vmax.f32 %v11122_v43, 0.0  ;;  %5930 = vst.msk [vmem:[#allocation2 + $0x49] sm:$0xff] %vm18_vm0, %v5866_v27 }
 0x457   : > { %v5868_v32 = vadd.f32 %v7911_v59, %v12248_v6  ;;  %v5869_v61 = vadd.f32 %v7912_v20, %v12249_v9  ;;  %v5870_v4 = vadd.f32 %v7913_v28, %v12250_v5  ;;  %v7914_v18 = vld [vmem:[#allocation2 + $0x81] sm:$0xff]  ;;  %v7915_v63 = vld [vmem:[#allocation2 + $0x91] sm:$0xff]  ;;  %v7916_v40 = vld [vmem:[#allocation2 + $0x99] sm:$0xff]  ;;  %5926 = vst.msk [vmem:[#allocation2 + $0x19] sm:$0xff] %vm18_vm0, %v5862_v22  ;;  %v12255_v1 = vmax.f32 %v11130_v26, 0.0 }
 0x458   : > { %v12237_v51 = vld [vmem:[#allocation25_spill] sm:$0xff]  ;;  %v5871_v49 = vadd.f32 %v7914_v18, %v12251_v53  ;;  %v5872_v24 = vadd.f32 %v7915_v63, %v12252_v33  ;;  %v5873_v59 = vadd.f32 %v7916_v40, %v12253_v48  ;;  %5927 = vst.msk [vmem:[#allocation2 + $0x21] sm:$0xff] %vm18_vm0, %v5863_v57  ;;  %5928 = vst.msk [vmem:[#allocation2 + $0x31] sm:$0xff] %vm18_vm0, %v5864_v56  ;;  %v7919_v9 = vld [vmem:[#allocation2 + $0xc1] sm:$0xff]  ;;  %v12256_v43 = vmax.f32 %v11134_v60, 0.0 }
 0x459   : > { %v7917_v8 = vld [vmem:[#allocation2 + $0xa9] sm:$0xff]  ;;  %v7918_v6 = vld [vmem:[#allocation2 + $0xb1] sm:$0xff]  ;;  %v12257_v22 = vmax.f32 %v11138_v10, 0.0  ;;  %5931 = vst.msk [vmem:[#allocation2 + $0x51] sm:$0xff] %vm18_vm0, %v5867_v38  ;;  %5932 = vst.msk [vmem:[#allocation2 + $0x61] sm:$0xff] %vm18_vm0, %v5868_v32  ;;  %v12258_v26 = vmax.f32 %v11142_v52, 0.0 }
 0x45a   : > { %v5874_v30 = vadd.f32 %v7917_v8, %v12254_v44  ;;  %v5875_v20 = vadd.f32 %v7918_v6, %v12255_v1  ;;  %v5876_v28 = vadd.f32 %v7919_v9, %v12256_v43  ;;  %v7920_v5 = vld [vmem:[#allocation2 + $0xc9] sm:$0xff]  ;;  %5933 = vst.msk [vmem:[#allocation2 + $0x69] sm:$0xff] %vm18_vm0, %v5869_v61  ;;  %v7922_v56 = vld [vmem:[#allocation2 + $0xe1] sm:$0xff]  ;;  %v12259_v60 = vmax.f32 %v11146_v35, 0.0  ;;  %v7923_v53 = vld [vmem:[#allocation2 + $0xf1] sm:$0xff] }
 0x45b   : > { %v5877_v57 = vadd.f32 %v7920_v5, %v12257_v22  ;;  %v5878_v2 = vadd.f32 %v7921_v13, %v12258_v26  ;;  %v12260_v10 = vmax.f32 %v11150_v50, 0.0  ;;  %v7924_v33 = vld [vmem:[#allocation2 + $0xf9] sm:$0xff]  ;;  %v12261_v27 = vmax.f32 %v11154_v3, 0.0  ;;  %5934 = vst.msk [vmem:[#allocation2 + $0x79] sm:$0xff] %vm18_vm0, %v5870_v4  ;;  %5935 = vst.msk [vmem:[#allocation2 + $0x81] sm:$0xff] %vm18_vm0, %v5871_v49  ;;  %v7925_v52 = vld [vmem:[#allocation2 + $0x109] sm:$0xff] }
 0x45c   : > { %v5879_v18 = vadd.f32 %v7922_v56, %v12259_v60  ;;  %5936 = vst.msk [vmem:[#allocation2 + $0x91] sm:$0xff] %vm18_vm0, %v5872_v24  ;;  %5937 = vst.msk [vmem:[#allocation2 + $0x99] sm:$0xff] %vm18_vm0, %v5873_v59  ;;  %v12262_v35 = vmax.f32 %v11158_v7, 0.0  ;;  %v7926_v61 = vld [vmem:[#allocation2 + $0x111] sm:$0xff]  ;;  %v12263_v50 = vmax.f32 %v11162_v14, 0.0  ;;  %v7927_v48 = vld [vmem:[#allocation2 + $0x121] sm:$0xff] }
 0x45d   : > { %v5880_v63 = vadd.f32 %v7923_v53, %v12260_v10  ;;  %v5881_v38 = vadd.f32 %v7924_v33, %v12261_v27  ;;  %v12264_v3 = vmax.f32 %v11166_v17, 0.0  ;;  %v7928_v44 = vld [vmem:[#allocation2 + $0x129] sm:$0xff]  ;;  %v12265_v4 = vmax.f32 %v11170_v21, 0.0  ;;  %5938 = vst.msk [vmem:[#allocation2 + $0xa9] sm:$0xff] %vm18_vm0, %v5874_v30  ;;  %5939 = vst.msk [vmem:[#allocation2 + $0xb1] sm:$0xff] %vm18_vm0, %v5875_v20  ;;  %v7929_v7 = vld [vmem:[#allocation2 + $0x139] sm:$0xff] }
 0x45e   : > { %v5882_v32 = vadd.f32 %v7925_v52, %v12262_v35  ;;  %v5883_v40 = vadd.f32 %v7926_v61, %v12263_v50  ;;  %5940 = vst.msk [vmem:[#allocation2 + $0xc1] sm:$0xff] %vm18_vm0, %v5876_v28  ;;  %5941 = vst.msk [vmem:[#allocation2 + $0xc9] sm:$0xff] %vm18_vm0, %v5877_v57  ;;  %v12266_v14 = vmax.f32 %v11174_v45, 0.0  ;;  %v7930_v59 = vld [vmem:[#allocation2 + $0x141] sm:$0xff]  ;;  %v12267_v17 = vmax.f32 %v11178_v34, 0.0  ;;  %v7931_v1 = vld [vmem:[#allocation2 + $0x151] sm:$0xff] }
 0x45f   : > { %v5884_v8 = vadd.f32 %v7927_v48, %v12264_v3  ;;  %v5885_v49 = vadd.f32 %v7928_v44, %v12265_v4  ;;  %v12268_v21 = vmax.f32 %v11182_v39, 0.0  ;;  %v7932_v43 = vld [vmem:[#allocation2 + $0x159] sm:$0xff]  ;;  %v12269_v30 = vmax.f32 %v11186_v29, 0.0  ;;  %5942 = vst.msk [vmem:[#allocation2 + $0xd9] sm:$0xff] %vm18_vm0, %v5878_v2  ;;  %5943 = vst.msk [vmem:[#allocation2 + $0xe1] sm:$0xff] %vm18_vm0, %v5879_v18  ;;  %v7933_v45 = vld [vmem:[#allocation2 + $0x169] sm:$0xff] }
 0x460   : > { %v5886_v24 = vadd.f32 %v7929_v7, %v12266_v14  ;;  %v5887_v6 = vadd.f32 %v7930_v59, %v12267_v17  ;;  %5944 = vst.msk [vmem:[#allocation2 + $0xf1] sm:$0xff] %vm18_vm0, %v5880_v63  ;;  %5945 = vst.msk [vmem:[#allocation2 + $0xf9] sm:$0xff] %vm18_vm0, %v5881_v38  ;;  %v12270_v34 = vmax.f32 %v11190_v54, 0.0  ;;  %v7934_v5 = vld [vmem:[#allocation2 + $0x171] sm:$0xff]  ;;  %v12271_v39 = vmax.f32 %v11194_v62, 0.0  ;;  %v7935_v57 = vld [vmem:[#allocation2 + $0x181] sm:$0xff] }
 0x461   : > { %v5888_v9 = vadd.f32 %v7931_v1, %v12268_v21  ;;  %v5889_v20 = vadd.f32 %v7932_v43, %v12269_v30  ;;  %v12272_v13 = vld [vmem:[#allocation50_spill] sm:$0xff]  ;;  %v7936_v56 = vld [vmem:[#allocation2 + $0x189] sm:$0xff]  ;;  %5946 = vst.msk [vmem:[#allocation2 + $0x109] sm:$0xff] %vm18_vm0, %v5882_v32  ;;  %5947 = vst.msk [vmem:[#allocation2 + $0x111] sm:$0xff] %vm18_vm0, %v5883_v40  ;;  %v12278_v33 = vmax.f32 %v11210_v58, 0.0  ;;  %v12281_v32 = vmax.f32 %v11218_v19, 0.0 }
 0x462   : > { %v5890_v28 = vadd.f32 %v7933_v45, %v12270_v34  ;;  %v5891_v22 = vadd.f32 %v7934_v5, %v12271_v39  ;;  %v12273_v29 = vmax.f32 %v12272_v13, 0.0  ;;  %v12274_v2 = vld [vmem:[#allocation5_spill] sm:$0xff]  ;;  %5948 = vst.msk [vmem:[#allocation2 + $0x121] sm:$0xff] %vm18_vm0, %v5884_v8  ;;  %5949 = vst.msk [vmem:[#allocation2 + $0x129] sm:$0xff] %vm18_vm0, %v5885_v49  ;;  %v12276_v53 = vld [vmem:[#allocation3_spill] sm:$0xff]  ;;  %v12282_v58 = vmax.f32 %v11222_v36, 0.0 }
 0x463   : > { %v12275_v60 = vmax.f32 %v12274_v2, 0.0  ;;  %v7937_v54 = vld [vmem:[#allocation2 + $0x1c9] sm:$0xff]  ;;  %v12277_v62 = vmax.f32 %v12276_v53, 0.0  ;;  %v7938_v63 = vld [vmem:[#allocation2 + $0x1d1] sm:$0xff]  ;;  %v7939_v38 = vld [vmem:[#allocation2 + $0x1e1] sm:$0xff]  ;;  %5950 = vst.msk [vmem:[#allocation2 + $0x139] sm:$0xff] %vm18_vm0, %v5886_v24 }
 0x464   : > { %v5892_v26 = vadd.f32 %v7935_v57, %v12273_v29  ;;  %v5895_v27 = vadd.f32 %v7938_v63, %v12278_v33  ;;  %v12279_v52 = vld [vmem:[#allocation36_spill] sm:$0xff]  ;;  %5951 = vst.msk [vmem:[#allocation2 + $0x141] sm:$0xff] %vm18_vm0, %v5887_v6  ;;  %5952 = vst.msk [vmem:[#allocation2 + $0x151] sm:$0xff] %vm18_vm0, %v5888_v9  ;;  %v7941_v48 = vld [vmem:[#allocation2 + $0x1f9] sm:$0xff]  ;;  %v12283_v44 = vmax.f32 %v11226_v37, 0.0  ;;  %v12286_v24 = vmax.f32 %v11234_v11, 0.0 }
 0x465   : > { %v5893_v18 = vadd.f32 %v7936_v56, %v12275_v60  ;;  %v5894_v10 = vadd.f32 %v7937_v54, %v12277_v62  ;;  %v12280_v35 = vmax.f32 %v12279_v52, 0.0  ;;  %v7940_v50 = vld [vmem:[#allocation2 + $0x1e9] sm:$0xff]  ;;  %5953 = vst.msk [vmem:[#allocation2 + $0x159] sm:$0xff] %vm18_vm0, %v5889_v20  ;;  %v5898_v3 = vadd.f32 %v7941_v48, %v12282_v58  ;;  %v7942_v8 = vld [vmem:[#allocation2 + $0x201] sm:$0xff]  ;;  %v7943_v49 = vld [vmem:[#allocation2 + $0x211] sm:$0xff] }
 0x466   : > { %v5897_v40 = vadd.f32 %v7940_v50, %v12281_v32  ;;  %v5899_v4 = vadd.f32 %v7942_v8, %v12283_v44  ;;  %v12284_v7 = vld [vmem:[#allocation7_spill] sm:$0xff]  ;;  %5954 = vst.msk [vmem:[#allocation2 + $0x169] sm:$0xff] %vm18_vm0, %v5890_v28  ;;  %5955 = vst.msk [vmem:[#allocation2 + $0x171] sm:$0xff] %vm18_vm0, %v5891_v22  ;;  %v7945_v36 = vld [vmem:[#allocation2 + $0x229] sm:$0xff]  ;;  %v12287_v37 = vmax.f32 %v12231_v55, 0.0  ;;  %v12288_v21 = vmax.f32 %v12232_v12, 0.0 }
 0x467   : > { %v5896_v61 = vadd.f32 %v7939_v38, %v12280_v35  ;;  %v12285_v19 = vmax.f32 %v12284_v7, 0.0  ;;  %v7944_v59 = vld [vmem:[#allocation2 + $0x219] sm:$0xff]  ;;  %5956 = vst.msk [vmem:[#allocation2 + $0x181] sm:$0xff] %vm18_vm0, %v5892_v26  ;;  %5957 = vst.msk [vmem:[#allocation2 + $0x189] sm:$0xff] %vm18_vm0, %v5893_v18  ;;  %v7946_v1 = vld [vmem:[#allocation2 + $0x231] sm:$0xff]  ;;  %v12289_v11 = vmax.f32 %v12233_v47, 0.0 }
 0x468   : > { %v5901_v17 = vadd.f32 %v7944_v59, %v12286_v24  ;;  %v5902_v6 = vadd.f32 %v7945_v36, %v12287_v37  ;;  %v5903_v9 = vadd.f32 %v7946_v1, %v12288_v21  ;;  %v7947_v43 = vld [vmem:[#allocation2 + $0x241] sm:$0xff]  ;;  %v7948_v20 = vld [vmem:[#allocation2 + $0x249] sm:$0xff]  ;;  %v12290_v45 = vmax.f32 %v12234_v23, 0.0  ;;  %5958 = vst.msk [vmem:[#allocation2 + $0x1c9] sm:$0xff] %vm18_vm0, %v5894_v10  ;;  %5959 = vst.msk [vmem:[#allocation2 + $0x1d1] sm:$0xff] %vm18_vm0, %v5895_v27 }
 0x469   : > { %v5900_v14 = vadd.f32 %v7943_v49, %v12285_v19  ;;  %v5904_v30 = vadd.f32 %v7947_v43, %v12289_v11  ;;  %5960 = vst.msk [vmem:[#allocation2 + $0x1e1] sm:$0xff] %vm18_vm0, %v5896_v61  ;;  %5961 = vst.msk [vmem:[#allocation2 + $0x1e9] sm:$0xff] %vm18_vm0, %v5897_v40  ;;  %v7949_v55 = vld [vmem:[#allocation2 + $0x259] sm:$0xff]  ;;  %v12291_v12 = vmax.f32 %v11254_v42, 0.0  ;;  %v7950_v5 = vld [vmem:[#allocation2 + $0x261] sm:$0xff]  ;;  %v12292_v47 = vmax.f32 %v12235_v41, 0.0 }
 0x46a   : > { %v5905_v34 = vadd.f32 %v7948_v20, %v12290_v45  ;;  %v7951_v22 = vld [vmem:[#allocation2 + $0x271] sm:$0xff]  ;;  %v12293_v23 = vmax.f32 %v11262_v16, 0.0  ;;  %v7952_v13 = vld [vmem:[#allocation2 + $0x279] sm:$0xff]  ;;  %5962 = vst.msk [vmem:[#allocation2 + $0x1f9] sm:$0xff] %vm18_vm0, %v5898_v3  ;;  %5963 = vst.msk [vmem:[#allocation2 + $0x201] sm:$0xff] %vm18_vm0, %v5899_v4  ;;  %v12304_v50 = vmax.f32 %v11286_v0, 0.0 }
 0x46b   : > { %v5906_v28 = vadd.f32 %v7949_v55, %v12291_v12  ;;  %v5907_v39 = vadd.f32 %v7950_v5, %v12292_v47  ;;  %v12294_v29 = vld [vmem:[#allocation10_spill] sm:$0xff]  ;;  %5964 = vst.msk [vmem:[#allocation2 + $0x211] sm:$0xff] %vm18_vm0, %v5900_v14  ;;  %5965 = vst.msk [vmem:[#allocation2 + $0x219] sm:$0xff] %vm18_vm0, %v5901_v17  ;;  %v7953_v42 = vld [vmem:[#allocation2 + $0x289] sm:$0xff]  ;;  %v12307_v44 = vmax.f32 %v11294_v25, 0.0  ;;  %v12310_v59 = vmax.f32 %v11302_v46, 0.0 }
 0x46c   : > { %v5908_v57 = vadd.f32 %v7951_v22, %v12293_v23  ;;  %v12295_v26 = vmax.f32 %v12294_v29, 0.0  ;;  %v12296_v2 = vld [vmem:[#allocation13_spill] sm:$0xff]  ;;  %v12298_v54 = vld [vmem:[#allocation14_spill] sm:$0xff]  ;;  %v7955_v62 = vld [vmem:[#allocation2 + $0x2a1] sm:$0xff]  ;;  %5966 = vst.msk [vmem:[#allocation2 + $0x229] sm:$0xff] %vm18_vm0, %v5902_v6  ;;  %v12313_v1 = vmax.f32 %v12237_v51, 0.0 }
 0x46d   : > { %v12297_v41 = vmax.f32 %v12296_v2, 0.0  ;;  %v7954_v18 = vld [vmem:[#allocation2 + $0x291] sm:$0xff]  ;;  %v12299_v16 = vmax.f32 %v12298_v54, 0.0  ;;  %v12300_v10 = vld [vmem:[#allocation12_spill] sm:$0xff]  ;;  %v12302_v38 = vld [vmem:[#allocation15_spill] sm:$0xff]  ;;  %5967 = vst.msk [vmem:[#allocation2 + $0x231] sm:$0xff] %vm18_vm0, %v5903_v9 }
 0x46e   : > { %v5909_v56 = vadd.f32 %v7952_v13, %v12295_v26  ;;  %v12301_v63 = vmax.f32 %v12300_v10, 0.0  ;;  %v7956_v27 = vld [vmem:[#allocation2 + $0x2a9] sm:$0xff]  ;;  %v12303_v52 = vmax.f32 %v12302_v38, 0.0  ;;  %5968 = vst.msk [vmem:[#allocation2 + $0x241] sm:$0xff] %vm18_vm0, %v5904_v30  ;;  %5969 = vst.msk [vmem:[#allocation2 + $0x249] sm:$0xff] %vm18_vm0, %v5905_v34  ;;  %v7957_v61 = vld [vmem:[#allocation2 + $0x2b9] sm:$0xff] }
 0x46f   : > { %v5910_v60 = vadd.f32 %v7953_v42, %v12297_v41  ;;  %v5911_v53 = vadd.f32 %v7954_v18, %v12299_v16  ;;  %v5914_v32 = vadd.f32 %v7957_v61, %v12304_v50  ;;  %v7958_v40 = vld [vmem:[#allocation2 + $0x2c1] sm:$0xff]  ;;  %v12305_v48 = vld [vmem:[#allocation21_spill] sm:$0xff]  ;;  %v7960_v49 = vld [vmem:[#allocation2 + $0x2d9] sm:$0xff]  ;;  %5970 = vst.msk [vmem:[#allocation2 + $0x259] sm:$0xff] %vm18_vm0, %v5906_v28  ;;  %v12316_v20 = vmax.f32 %v12239_v15, 0.0 }
 0x470   : > { %v5912_v33 = vadd.f32 %v7955_v62, %v12301_v63  ;;  %v5913_v35 = vadd.f32 %v7956_v27, %v12303_v52  ;;  %v12306_v58 = vmax.f32 %v12305_v48, 0.0  ;;  %v7959_v8 = vld [vmem:[#allocation2 + $0x2d1] sm:$0xff]  ;;  %v12308_v7 = vld [vmem:[#allocation23_spill] sm:$0xff]  ;;  %5971 = vst.msk [vmem:[#allocation2 + $0x261] sm:$0xff] %vm18_vm0, %v5907_v39  ;;  %5972 = vst.msk [vmem:[#allocation2 + $0x271] sm:$0xff] %vm18_vm0, %v5908_v57  ;;  %v12319_v5 = vmax.f32 %v12241_v31, 0.0 }
 0x471   : > { %v5916_v4 = vadd.f32 %v7959_v8, %v12307_v44  ;;  %v12309_v19 = vmax.f32 %v12308_v7, 0.0  ;;  %5973 = vst.msk [vmem:[#allocation2 + $0x279] sm:$0xff] %vm18_vm0, %v5909_v56  ;;  %v7961_v0 = vld [vmem:[#allocation2 + $0x2e9] sm:$0xff]  ;;  %v7962_v17 = vld [vmem:[#allocation2 + $0x2f1] sm:$0xff]  ;;  %v7963_v6 = vld [vmem:[#allocation2 + $0x301] sm:$0xff] }
 0x472   : > { %v5915_v3 = vadd.f32 %v7958_v40, %v12306_v58  ;;  %v5918_v24 = vadd.f32 %v7961_v0, %v12310_v59  ;;  %v12311_v36 = vld [vmem:[#allocation24_spill] sm:$0xff]  ;;  %v5920_v21 = vadd.f32 %v7963_v6, %v12313_v1  ;;  %v12314_v43 = vld [vmem:[#allocation22_spill] sm:$0xff]  ;;  %5974 = vst.msk [vmem:[#allocation2 + $0x289] sm:$0xff] %vm18_vm0, %v5910_v60  ;;  %5975 = vst.msk [vmem:[#allocation2 + $0x291] sm:$0xff] %vm18_vm0, %v5911_v53 }
 0x473   : > { %v5917_v14 = vadd.f32 %v7960_v49, %v12309_v19  ;;  %v12312_v25 = vmax.f32 %v12311_v36, 0.0  ;;  %v7964_v9 = vld [vmem:[#allocation2 + $0x309] sm:$0xff]  ;;  %v12315_v11 = vmax.f32 %v12314_v43, 0.0  ;;  %5976 = vst.msk [vmem:[#allocation2 + $0x2a1] sm:$0xff] %vm18_vm0, %v5912_v33  ;;  %5977 = vst.msk [vmem:[#allocation2 + $0x2a9] sm:$0xff] %vm18_vm0, %v5913_v35  ;;  %v7965_v46 = vld [vmem:[#allocation2 + $0x319] sm:$0xff] }
 0x474   : > { %v5922_v45 = vadd.f32 %v7965_v46, %v12316_v20  ;;  %v7966_v34 = vld [vmem:[#allocation2 + $0x321] sm:$0xff]  ;;  %v12317_v55 = vld [vmem:[#allocation38_spill] sm:$0xff]  ;;  %5978 = vst.msk [vmem:[#allocation2 + $0x2b9] sm:$0xff] %vm18_vm0, %v5914_v32  ;;  %5979 = vst.msk [vmem:[#allocation2 + $0x2c1] sm:$0xff] %vm18_vm0, %v5915_v3 }
 0x475   : > { %v5919_v37 = vadd.f32 %v7962_v17, %v12312_v25  ;;  %v5921_v30 = vadd.f32 %v7964_v9, %v12315_v11  ;;  %v12318_v51 = vmax.f32 %v12317_v55, 0.0  ;;  %v7967_v28 = vld [vmem:[#allocation2 + $0x331] sm:$0xff]  ;;  %v7968_v39 = vld [vmem:[#allocation2 + $0x339] sm:$0xff]  ;;  %v12320_v22 = vld [vmem:[#allocation28_spill] sm:$0xff]  ;;  %5980 = vst.msk [vmem:[#allocation2 + $0x2d1] sm:$0xff] %vm18_vm0, %v5916_v4 }
 0x476   : > { %v5924_v47 = vadd.f32 %v7967_v28, %v12319_v5  ;;  %v12321_v23 = vmax.f32 %v12320_v22, 0.0  ;;  %5981 = vst.msk [vmem:[#allocation2 + $0x2d9] sm:$0xff] %vm18_vm0, %v5917_v14  ;;  %5982 = vst.msk [vmem:[#allocation2 + $0x2e9] sm:$0xff] %vm18_vm0, %v5918_v24  ;;  %261 = sbr.rel (!%p259_p0) target bundleno = 87 (0x57), region = 53  ;;  %v5990_v15 = vld [vmem:[#allocation2 + $0x19] sm:$0xff] (%p259_p0)  ;;  %v5991_v31 = vld [vmem:[#allocation2 + $0x21] sm:$0xff] (%p259_p0) }
 0x477   : > { %v5923_v12 = vadd.f32 %v7966_v34, %v12318_v51  ;;  %5983 = vst.msk [vmem:[#allocation2 + $0x2f1] sm:$0xff] %vm18_vm0, %v5919_v37  ;;  %5984 = vst.msk [vmem:[#allocation2 + $0x301] sm:$0xff] %vm18_vm0, %v5920_v21  ;;  %v5992_v13 = vld [vmem:[#allocation2 + $0x31] sm:$0xff] (%p259_p0)  ;;  %v5993_v29 = vld [vmem:[#allocation2 + $0x39] sm:$0xff] (%p259_p0) }
 0x478   : > { %v5925_v57 = vadd.f32 %v7968_v39, %v12321_v23  ;;  %5985 = vst.msk [vmem:[#allocation2 + $0x309] sm:$0xff] %vm18_vm0, %v5921_v30  ;;  %5986 = vst.msk [vmem:[#allocation2 + $0x319] sm:$0xff] %vm18_vm0, %v5922_v45  ;;  %v6054_v26 = vmax.f32 (%p259_p0), %v5990_v15, %v5992_v13  ;;  %v5994_v56 = vld [vmem:[#allocation2 + $0x49] sm:$0xff] (%p259_p0)  ;;  %v5995_v42 = vld [vmem:[#allocation2 + $0x51] sm:$0xff] (%p259_p0)  ;;  %v6055_v2 = vmax.f32 (%p259_p0), %v5991_v31, %v5993_v29 }
 0x479   : > { %5987 = vst.msk [vmem:[#allocation2 + $0x321] sm:$0xff] %vm18_vm0, %v5923_v12  ;;  %5988 = vst.msk [vmem:[#allocation2 + $0x331] sm:$0xff] %vm18_vm0, %v5924_v47  ;;  %v5996_v41 = vld [vmem:[#allocation2 + $0x61] sm:$0xff] (%p259_p0)  ;;  %v5997_v60 = vld [vmem:[#allocation2 + $0x69] sm:$0xff] (%p259_p0) }
 0x47a   : > { %5989 = vst.msk [vmem:[#allocation2 + $0x339] sm:$0xff] %vm18_vm0, %v5925_v57  ;;  %v5998_v18 = vld [vmem:[#allocation2 + $0x79] sm:$0xff] (%p259_p0)  ;;  %v6102_v54 = vrot.slane (%p259_p0), %v6054_v26, 1  ;;  %v6056_v16 = vmax.f32 (%p259_p0), %v5994_v56, %v5996_v41  ;;  %v6057_v53 = vmax.f32 (%p259_p0), %v5995_v42, %v5997_v60  ;;  %v5999_v62 = vld [vmem:[#allocation2 + $0x81] sm:$0xff] (%p259_p0)  ;;  %v6000_v10 = vld [vmem:[#allocation2 + $0x91] sm:$0xff] (%p259_p0)  ;;  %v6166_v33 = vrot.slane (%p259_p0), %v6055_v2, 1 }
 0x47b   :  { %v6001_v63 = vld [vmem:[#allocation2 + $0x99] sm:$0xff]  ;;  %v6058_v27 = vmax.f32 %v5998_v18, %v6000_v10  ;;  %v6002_v52 = vld [vmem:[#allocation2 + $0xa9] sm:$0xff]  ;;  %v6003_v35 = vld [vmem:[#allocation2 + $0xb1] sm:$0xff] }
 0x47c   :  { %v6059_v38 = vmax.f32 %v5999_v62, %v6001_v63  ;;  %v6004_v61 = vld [vmem:[#allocation2 + $0xc1] sm:$0xff]  ;;  %v6134_v50 = vmax.f32 %v6054_v26, %v6102_v54  ;;  %v6103_v32 = vrot.slane %v6056_v16, 1  ;;  %v6167_v40 = vrot.slane %v6057_v53, 1  ;;  %v6005_v48 = vld [vmem:[#allocation2 + $0xc9] sm:$0xff]  ;;  %v6006_v39 = vld [vmem:[#allocation2 + $0xd9] sm:$0xff] }
 0x47d   :  { %v6060_v58 = vmax.f32 %v6002_v52, %v6004_v61  ;;  %v6198_v3 = vmax.f32 %v6055_v2, %v6166_v33  ;;  %v6104_v8 = vrot.slane %v6058_v27, 1  ;;  %v6061_v4 = vmax.f32 %v6003_v35, %v6005_v48  ;;  %v6007_v31 = vld [vmem:[#allocation2 + $0xe1] sm:$0xff]  ;;  %v6008_v13 = vld [vmem:[#allocation2 + $0xf1] sm:$0xff]  ;;  %v6009_v29 = vld [vmem:[#allocation2 + $0xf9] sm:$0xff] }
 0x47e   :  { %v6168_v44 = vrot.slane %v6059_v38, 1  ;;  %v6230_v49 = vrot.slane %v6134_v50, 1  ;;  %v6262_v7 = vrot.slane %v6134_v50, 2  ;;  %v6294_v19 = vrot.slane %v6134_v50, 3 }
 0x47f   :  { %v6135_v14 = vmax.f32 %v6056_v16, %v6103_v32  ;;  %v6342_v0 = vrot.slane %v6198_v3, 4  ;;  %v6374_v59 = vrot.slane %v6198_v3, 5  ;;  %v6406_v24 = vrot.slane %v6198_v3, 6  ;;  %v6010_v16 = vld [vmem:[#allocation2 + $0x109] sm:$0xff] }
 0x480   :  { %v6438_v17 = vrot.slane %v6198_v3, 7  ;;  %v6471_v36 = vsel %vm6470_vm2, %v6134_v50, %v6230_v49  ;;  %v6199_v25 = vmax.f32 %v6057_v53, %v6167_v40  ;;  %v6136_v9 = vmax.f32 %v6058_v27, %v6104_v8  ;;  %v6012_v53 = vld [vmem:[#allocation2 + $0x121] sm:$0xff]  ;;  %v6011_v49 = vld [vmem:[#allocation2 + $0x111] sm:$0xff] }
 0x481   :  { %v6231_v37 = vrot.slane %v6135_v14, 1  ;;  %v6263_v6 = vrot.slane %v6135_v14, 2  ;;  %v6488_v1 = vsel %vm6487_vm3, %v6471_v36, %v6262_v7  ;;  %v6295_v21 = vrot.slane %v6135_v14, 3  ;;  %v6013_v7 = vld [vmem:[#allocation2 + $0x129] sm:$0xff] }
 0x482   :  { %v6200_v43 = vmax.f32 %v6059_v38, %v6168_v44  ;;  %v6505_v11 = vsel %vm6504_vm4, %v6488_v1, %v6294_v19  ;;  %v6343_v30 = vrot.slane %v6199_v25, 4  ;;  %v6375_v46 = vrot.slane %v6199_v25, 5 }
 0x483   :  { %v6407_v20 = vrot.slane %v6199_v25, 6  ;;  %v6522_v45 = vsel %vm6521_vm5, %v6505_v11, %v6342_v0  ;;  %v6439_v34 = vrot.slane %v6199_v25, 7  ;;  %v6472_v55 = vsel %vm6470_vm2, %v6135_v14, %v6231_v37  ;;  %v6014_v11 = vld [vmem:[#allocation2 + $0x139] sm:$0xff] }
 0x484   :  { %v6232_v51 = vrot.slane %v6136_v9, 1  ;;  %v6539_v12 = vsel %vm6538_vm6, %v6522_v45, %v6374_v59  ;;  %v6489_v28 = vsel %vm6487_vm3, %v6472_v55, %v6263_v6  ;;  %v6264_v5 = vrot.slane %v6136_v9, 2 }
 0x485   :  { %v6296_v47 = vrot.slane %v6136_v9, 3  ;;  %v6556_v22 = vsel %vm6555_vm7, %v6539_v12, %v6406_v24  ;;  %v6506_v23 = vsel %vm6504_vm4, %v6489_v28, %v6295_v21  ;;  %v6344_v57 = vrot.slane %v6200_v43, 4 }
 0x486   :  { %v6376_v15 = vrot.slane %v6200_v43, 5  ;;  %v6573_v26 = vsel %vm6572_vm8, %v6556_v22, %v6438_v17  ;;  %v6523_v56 = vsel %vm6521_vm5, %v6506_v23, %v6343_v30  ;;  %v6408_v42 = vrot.slane %v6200_v43, 6  ;;  %v6016_v30 = vld [vmem:[#allocation2 + $0x151] sm:$0xff] }
 0x487   :  { %v6440_v2 = vrot.slane %v6200_v43, 7  ;;  %6589 = vst.msk [vmem:[%s11770_s4] sm:$0xff] %vm18_vm0, %v6573_v26  ;;  %v6540_v41 = vsel %vm6538_vm6, %v6523_v56, %v6375_v46  ;;  %v6473_v60 = vsel %vm6470_vm2, %v6136_v9, %v6232_v51  ;;  %v6105_v18 = vrot.slane %v6060_v58, 1 }
 0x488   :  { %v6169_v54 = vrot.slane %v6061_v4, 1  ;;  %v6557_v62 = vsel %vm6555_vm7, %v6540_v41, %v6407_v20  ;;  %v6490_v10 = vsel %vm6487_vm3, %v6473_v60, %v6264_v5  ;;  %v6062_v63 = vmax.f32 %v6006_v39, %v6008_v13  ;;  %v6015_v5 = vld [vmem:[#allocation2 + $0x141] sm:$0xff] }
 0x489   :  { %v6063_v33 = vmax.f32 %v6007_v31, %v6009_v29  ;;  %v6574_v27 = vsel %vm6572_vm8, %v6557_v62, %v6439_v34  ;;  %v6507_v38 = vsel %vm6504_vm4, %v6490_v10, %v6296_v47  ;;  %v6137_v52 = vmax.f32 %v6060_v58, %v6105_v18  ;;  %v6017_v47 = vld [vmem:[#allocation2 + $0x159] sm:$0xff]  ;;  %v6020_v31 = vld [vmem:[#allocation2 + $0x181] sm:$0xff]  ;;  %v6021_v62 = vld [vmem:[#allocation2 + $0x189] sm:$0xff] }
 0x48a   :  { %v6201_v35 = vmax.f32 %v6061_v4, %v6169_v54  ;;  %6590 = vst.msk [vmem:[%s11770_s4 + $0x8] sm:$0xff] %vm18_vm0, %v6574_v27  ;;  %v6524_v61 = vsel %vm6521_vm5, %v6507_v38, %v6344_v57  ;;  %v6106_v50 = vrot.slane %v6062_v63, 1  ;;  %v6064_v40 = vmax.f32 %v6010_v16, %v6012_v53  ;;  %v6019_v53 = vld [vmem:[#allocation2 + $0x171] sm:$0xff] }
 0x48b   :  { %v6170_v32 = vrot.slane %v6063_v33, 1  ;;  %v6541_v48 = vsel %vm6538_vm6, %v6524_v61, %v6376_v15  ;;  %v6233_v3 = vrot.slane %v6137_v52, 1  ;;  %v6265_v8 = vrot.slane %v6137_v52, 2  ;;  %v6018_v15 = vld [vmem:[#allocation2 + $0x169] sm:$0xff] }
 0x48c   :  { %v6297_v44 = vrot.slane %v6137_v52, 3  ;;  %v6558_v58 = vsel %vm6555_vm7, %v6541_v48, %v6408_v42  ;;  %v6345_v4 = vrot.slane %v6201_v35, 4  ;;  %v6377_v19 = vrot.slane %v6201_v35, 5 }
 0x48d   :  { %v6409_v14 = vrot.slane %v6201_v35, 6  ;;  %v6575_v0 = vsel %vm6572_vm8, %v6558_v58, %v6440_v2  ;;  %v6441_v59 = vrot.slane %v6201_v35, 7  ;;  %v6474_v24 = vsel %vm6470_vm2, %v6137_v52, %v6233_v3 }
 0x48e   :  { %v6138_v17 = vmax.f32 %v6062_v63, %v6106_v50  ;;  %6591 = vst.msk [vmem:[%s11770_s4 + $0x10] sm:$0xff] %vm18_vm0, %v6575_v0  ;;  %v6491_v36 = vsel %vm6487_vm3, %v6474_v24, %v6265_v8  ;;  %v6202_v25 = vmax.f32 %v6063_v33, %v6170_v32  ;;  %v6065_v37 = vmax.f32 %v6011_v49, %v6013_v7  ;;  %v6022_v32 = vld [vmem:[#allocation2 + $0x1c9] sm:$0xff]  ;;  %v6024_v49 = vld [vmem:[#allocation2 + $0x1e1] sm:$0xff] }
 0x48f   :  { %v6107_v6 = vrot.slane %v6064_v40, 1  ;;  %v6508_v1 = vsel %vm6504_vm4, %v6491_v36, %v6297_v44  ;;  %v6066_v57 = vmax.f32 %v6014_v11, %v6016_v30  ;;  %v6067_v60 = vmax.f32 %v6015_v5, %v6017_v47  ;;  %v6023_v44 = vld [vmem:[#allocation2 + $0x1d1] sm:$0xff]  ;;  %v6025_v7 = vld [vmem:[#allocation2 + $0x1e9] sm:$0xff] }
 0x490   :  { %v6234_v21 = vrot.slane %v6138_v17, 1  ;;  %v6266_v9 = vrot.slane %v6138_v17, 2  ;;  %v6298_v43 = vrot.slane %v6138_v17, 3  ;;  %v6525_v46 = vsel %vm6521_vm5, %v6508_v1, %v6345_v4 }
 0x491   :  { %v6346_v20 = vrot.slane %v6202_v25, 4  ;;  %v6378_v45 = vrot.slane %v6202_v25, 5  ;;  %v6410_v34 = vrot.slane %v6202_v25, 6  ;;  %v6542_v55 = vsel %vm6538_vm6, %v6525_v46, %v6377_v19 }
 0x492   :  { %v6442_v51 = vrot.slane %v6202_v25, 7  ;;  %v6475_v12 = vsel %vm6470_vm2, %v6138_v17, %v6234_v21  ;;  %v6139_v28 = vmax.f32 %v6064_v40, %v6107_v6  ;;  %v6559_v39 = vsel %vm6555_vm7, %v6542_v55, %v6409_v14 }
 0x493   :  { %v6492_v22 = vsel %vm6487_vm3, %v6475_v12, %v6266_v9  ;;  %v6171_v23 = vrot.slane %v6065_v37, 1  ;;  %v6576_v13 = vsel %vm6572_vm8, %v6559_v39, %v6441_v59  ;;  %v6108_v16 = vrot.slane %v6066_v57, 1  ;;  %v6026_v12 = vld [vmem:[#allocation2 + $0x1f9] sm:$0xff] }
 0x494   :  { %v6509_v29 = vsel %vm6504_vm4, %v6492_v22, %v6298_v43  ;;  %v6235_v26 = vrot.slane %v6139_v28, 1  ;;  %v6267_v56 = vrot.slane %v6139_v28, 2  ;;  %6592 = vst.msk [vmem:[%s11770_s4 + $0x18] sm:$0xff] %vm18_vm0, %v6576_v13  ;;  %v6299_v41 = vrot.slane %v6139_v28, 3  ;;  %v6027_v13 = vld [vmem:[#allocation2 + $0x201] sm:$0xff] }
 0x495   :  { %v6526_v42 = vsel %vm6521_vm5, %v6509_v29, %v6346_v20  ;;  %v6203_v2 = vmax.f32 %v6065_v37, %v6171_v23  ;;  %v6068_v10 = vmax.f32 %v6018_v15, %v6020_v31  ;;  %v6140_v50 = vmax.f32 %v6066_v57, %v6108_v16  ;;  %v6029_v29 = vld [vmem:[#allocation2 + $0x219] sm:$0xff] }
 0x496   :  { %v6543_v18 = vsel %vm6538_vm6, %v6526_v42, %v6378_v45  ;;  %v6476_v54 = vsel %vm6470_vm2, %v6139_v28, %v6235_v26  ;;  %v6172_v48 = vrot.slane %v6067_v60, 1  ;;  %v6069_v3 = vmax.f32 %v6019_v53, %v6021_v62  ;;  %v6028_v28 = vld [vmem:[#allocation2 + $0x211] sm:$0xff] }
 0x497   :  { %v6560_v63 = vsel %vm6555_vm7, %v6543_v18, %v6410_v34  ;;  %v6347_v33 = vrot.slane %v6203_v2, 4  ;;  %v6379_v27 = vrot.slane %v6203_v2, 5  ;;  %v6411_v38 = vrot.slane %v6203_v2, 6 }
 0x498   :  { %v6577_v52 = vsel %vm6572_vm8, %v6560_v63, %v6442_v51  ;;  %v6443_v35 = vrot.slane %v6203_v2, 7  ;;  %v6493_v61 = vsel %vm6487_vm3, %v6476_v54, %v6267_v56  ;;  %v6109_v8 = vrot.slane %v6068_v10, 1 }
 0x499   :  { %6593 = vst.msk [vmem:[%s11770_s4 + $0x20] sm:$0xff] %vm18_vm0, %v6577_v52  ;;  %v6510_v40 = vsel %vm6504_vm4, %v6493_v61, %v6299_v41  ;;  %v6236_v4 = vrot.slane %v6140_v50, 1  ;;  %v6268_v19 = vrot.slane %v6140_v50, 2  ;;  %v6300_v14 = vrot.slane %v6140_v50, 3  ;;  %v6030_v41 = vld [vmem:[#allocation2 + $0x229] sm:$0xff] }
 0x49a   :  { %v6527_v58 = vsel %vm6521_vm5, %v6510_v40, %v6347_v33  ;;  %v6204_v59 = vmax.f32 %v6067_v60, %v6172_v48  ;;  %v6141_v24 = vmax.f32 %v6068_v10, %v6109_v8  ;;  %v6173_v17 = vrot.slane %v6069_v3, 1  ;;  %v6032_v60 = vld [vmem:[#allocation2 + $0x241] sm:$0xff]  ;;  %v6033_v61 = vld [vmem:[#allocation2 + $0x249] sm:$0xff] }
 0x49b   :  { %v6544_v0 = vsel %vm6538_vm6, %v6527_v58, %v6379_v27  ;;  %v6477_v25 = vsel %vm6470_vm2, %v6140_v50, %v6236_v4  ;;  %v6070_v37 = vmax.f32 %v6022_v32, %v6024_v49  ;;  %v6071_v6 = vmax.f32 %v6023_v44, %v6025_v7  ;;  %v6034_v58 = vld [vmem:[#allocation2 + $0x259] sm:$0xff] }
 0x49c   :  { %v6561_v36 = vsel %vm6555_vm7, %v6544_v0, %v6411_v38  ;;  %v6348_v21 = vrot.slane %v6204_v59, 4  ;;  %v6380_v9 = vrot.slane %v6204_v59, 5  ;;  %v6412_v43 = vrot.slane %v6204_v59, 6 }
 0x49d   :  { %v6578_v1 = vsel %vm6572_vm8, %v6561_v36, %v6443_v35  ;;  %v6444_v11 = vrot.slane %v6204_v59, 7  ;;  %v6494_v30 = vsel %vm6487_vm3, %v6477_v25, %v6268_v19  ;;  %v6205_v46 = vmax.f32 %v6069_v3, %v6173_v17  ;;  %v6031_v35 = vld [vmem:[#allocation2 + $0x231] sm:$0xff]  ;;  %v6035_v59 = vld [vmem:[#allocation2 + $0x261] sm:$0xff]  ;;  %v6037_v17 = vld [vmem:[#allocation2 + $0x279] sm:$0xff] }
 0x49e   :  { %6594 = vst.msk [vmem:[%s11770_s4 + $0x28] sm:$0xff] %vm18_vm0, %v6578_v1  ;;  %v6237_v20 = vrot.slane %v6141_v24, 1  ;;  %v6511_v45 = vsel %vm6504_vm4, %v6494_v30, %v6300_v14  ;;  %v6269_v34 = vrot.slane %v6141_v24, 2  ;;  %v6301_v55 = vrot.slane %v6141_v24, 3 }
 0x49f   :  { %v6110_v51 = vrot.slane %v6070_v37, 1  ;;  %v6528_v5 = vsel %vm6521_vm5, %v6511_v45, %v6348_v21  ;;  %v6349_v47 = vrot.slane %v6205_v46, 4  ;;  %v6381_v39 = vrot.slane %v6205_v46, 5 }
 0x4a0   :  { %v6413_v22 = vrot.slane %v6205_v46, 6  ;;  %v6545_v23 = vsel %vm6538_vm6, %v6528_v5, %v6380_v9  ;;  %v6445_v57 = vrot.slane %v6205_v46, 7  ;;  %v6478_v15 = vsel %vm6470_vm2, %v6141_v24, %v6237_v20  ;;  %v6036_v24 = vld [vmem:[#allocation2 + $0x271] sm:$0xff] }
 0x4a1   :  { %v6142_v31 = vmax.f32 %v6070_v37, %v6110_v51  ;;  %v6562_v26 = vsel %vm6555_vm7, %v6545_v23, %v6412_v43  ;;  %v6495_v56 = vsel %vm6487_vm3, %v6478_v15, %v6269_v34  ;;  %v6174_v42 = vrot.slane %v6071_v6, 1  ;;  %v6038_v15 = vld [vmem:[#allocation2 + $0x289] sm:$0xff] }
 0x4a2   :  { %v6072_v2 = vmax.f32 %v6026_v12, %v6028_v28  ;;  %v6579_v18 = vsel %vm6572_vm8, %v6562_v26, %v6444_v11  ;;  %v6512_v54 = vsel %vm6504_vm4, %v6495_v56, %v6301_v55  ;;  %v6073_v33 = vmax.f32 %v6027_v13, %v6029_v29 }
 0x4a3   :  { %v6238_v16 = vrot.slane %v6142_v31, 1  ;;  %v6270_v53 = vrot.slane %v6142_v31, 2  ;;  %6595 = vst.msk [vmem:[%s11770_s4 + $0x30] sm:$0xff] %vm18_vm0, %v6579_v18  ;;  %v6529_v62 = vsel %vm6521_vm5, %v6512_v54, %v6349_v47  ;;  %v6206_v10 = vmax.f32 %v6071_v6, %v6174_v42  ;;  %v6039_v18 = vld [vmem:[#allocation2 + $0x291] sm:$0xff]  ;;  %v6041_v54 = vld [vmem:[#allocation2 + $0x2a9] sm:$0xff] }
 0x4a4   :  { %v6302_v63 = vrot.slane %v6142_v31, 3  ;;  %v6546_v27 = vsel %vm6538_vm6, %v6529_v62, %v6381_v39  ;;  %v6111_v52 = vrot.slane %v6072_v2, 1  ;;  %v6074_v50 = vmax.f32 %v6030_v41, %v6032_v60 }
 0x4a5   :  { %v6479_v38 = vsel %vm6470_vm2, %v6142_v31, %v6238_v16  ;;  %v6563_v32 = vsel %vm6555_vm7, %v6546_v27, %v6413_v22  ;;  %v6350_v40 = vrot.slane %v6206_v10, 4  ;;  %v6382_v48 = vrot.slane %v6206_v10, 5  ;;  %v6040_v31 = vld [vmem:[#allocation2 + $0x2a1] sm:$0xff] }
 0x4a6   :  { %v6414_v3 = vrot.slane %v6206_v10, 6  ;;  %v6580_v8 = vsel %vm6572_vm8, %v6563_v32, %v6445_v57  ;;  %v6446_v44 = vrot.slane %v6206_v10, 7  ;;  %v6496_v49 = vsel %vm6487_vm3, %v6479_v38, %v6270_v53 }
 0x4a7   :  { %v6143_v7 = vmax.f32 %v6072_v2, %v6111_v52  ;;  %6596 = vst.msk [vmem:[%s11770_s4 + $0x38] sm:$0xff] %vm18_vm0, %v6580_v8  ;;  %v6513_v4 = vsel %vm6504_vm4, %v6496_v49, %v6302_v63  ;;  %v6175_v19 = vrot.slane %v6073_v33, 1  ;;  %v6075_v14 = vmax.f32 %v6031_v35, %v6033_v61  ;;  %v6042_v63 = vld [vmem:[#allocation2 + $0x2b9] sm:$0xff] }
 0x4a8   :  { %v6112_v0 = vrot.slane %v6074_v50, 1  ;;  %v6530_v36 = vsel %vm6521_vm5, %v6513_v4, %v6350_v40  ;;  %v6076_v46 = vmax.f32 %v6034_v58, %v6036_v24  ;;  %v6077_v20 = vmax.f32 %v6035_v59, %v6037_v17  ;;  %v6045_v49 = vld [vmem:[#allocation2 + $0x2d9] sm:$0xff] }
 0x4a9   :  { %v6239_v25 = vrot.slane %v6143_v7, 1  ;;  %v6271_v37 = vrot.slane %v6143_v7, 2  ;;  %v6303_v6 = vrot.slane %v6143_v7, 3  ;;  %v6547_v1 = vsel %vm6538_vm6, %v6530_v36, %v6382_v48  ;;  %v6046_v36 = vld [vmem:[#allocation2 + $0x2e9] sm:$0xff] }
 0x4aa   :  { %v6207_v21 = vmax.f32 %v6073_v33, %v6175_v19  ;;  %v6144_v9 = vmax.f32 %v6074_v50, %v6112_v0  ;;  %v6176_v43 = vrot.slane %v6075_v14, 1  ;;  %v6564_v11 = vsel %vm6555_vm7, %v6547_v1, %v6414_v3  ;;  %v6044_v33 = vld [vmem:[#allocation2 + $0x2d1] sm:$0xff] }
 0x4ab   :  { %v6480_v30 = vsel %vm6470_vm2, %v6143_v7, %v6239_v25  ;;  %v6581_v45 = vsel %vm6572_vm8, %v6564_v11, %v6446_v44  ;;  %v6113_v57 = vrot.slane %v6076_v46, 1  ;;  %v6177_v62 = vrot.slane %v6077_v20, 1  ;;  %v6043_v44 = vld [vmem:[#allocation2 + $0x2c1] sm:$0xff] }
 0x4ac   :  { %v6351_v34 = vrot.slane %v6207_v21, 4  ;;  %v6383_v55 = vrot.slane %v6207_v21, 5  ;;  %v6415_v51 = vrot.slane %v6207_v21, 6  ;;  %6597 = vst.msk [vmem:[%s11770_s4 + $0x40] sm:$0xff] %vm18_vm0, %v6581_v45  ;;  %v6447_v12 = vrot.slane %v6207_v21, 7  ;;  %v6047_v21 = vld [vmem:[#allocation2 + $0x2f1] sm:$0xff] }
 0x4ad   :  { %v6497_v28 = vsel %vm6487_vm3, %v6480_v30, %v6271_v37  ;;  %v6208_v5 = vmax.f32 %v6075_v14, %v6176_v43  ;;  %v6240_v47 = vrot.slane %v6144_v9, 1  ;;  %v6272_v22 = vrot.slane %v6144_v9, 2  ;;  %v6049_v43 = vld [vmem:[#allocation2 + $0x309] sm:$0xff] }
 0x4ae   :  { %v6514_v39 = vsel %vm6504_vm4, %v6497_v28, %v6303_v6  ;;  %v6304_v23 = vrot.slane %v6144_v9, 3  ;;  %v6145_v60 = vmax.f32 %v6076_v46, %v6113_v57  ;;  %v6078_v10 = vmax.f32 %v6038_v15, %v6040_v31 }
 0x4af   :  { %v6531_v13 = vsel %vm6521_vm5, %v6514_v39, %v6351_v34  ;;  %v6352_v29 = vrot.slane %v6208_v5, 4  ;;  %v6384_v26 = vrot.slane %v6208_v5, 5  ;;  %v6416_v56 = vrot.slane %v6208_v5, 6 }
 0x4b0   :  { %v6548_v42 = vsel %vm6538_vm6, %v6531_v13, %v6383_v55  ;;  %v6448_v2 = vrot.slane %v6208_v5, 7  ;;  %v6481_v41 = vsel %vm6470_vm2, %v6144_v9, %v6240_v47  ;;  %v6241_v52 = vrot.slane %v6145_v60, 1  ;;  %v6048_v9 = vld [vmem:[#allocation2 + $0x301] sm:$0xff] }
 0x4b1   :  { %v6565_v16 = vsel %vm6555_vm7, %v6548_v42, %v6415_v51  ;;  %v6498_v53 = vsel %vm6487_vm3, %v6481_v41, %v6272_v22  ;;  %v6273_v35 = vrot.slane %v6145_v60, 2  ;;  %v6209_v50 = vmax.f32 %v6077_v20, %v6177_v62  ;;  %v6050_v41 = vld [vmem:[#allocation2 + $0x319] sm:$0xff] }
 0x4b2   :  { %v6582_v27 = vsel %vm6572_vm8, %v6565_v16, %v6447_v12  ;;  %v6515_v38 = vsel %vm6504_vm4, %v6498_v53, %v6304_v23  ;;  %v6305_v32 = vrot.slane %v6145_v60, 3  ;;  %v6079_v40 = vmax.f32 %v6039_v18, %v6041_v54 }
 0x4b3   :  { %6598 = vst.msk [vmem:[%s11770_s4 + $0x48] sm:$0xff] %vm18_vm0, %v6582_v27  ;;  %v6532_v61 = vsel %vm6521_vm5, %v6515_v38, %v6352_v29  ;;  %v6482_v3 = vsel %vm6470_vm2, %v6145_v60, %v6241_v52  ;;  %v6114_v8 = vrot.slane %v6078_v10, 1  ;;  %v6080_v7 = vmax.f32 %v6042_v63, %v6044_v33  ;;  %v6052_v60 = vld [vmem:[#allocation2 + $0x331] sm:$0xff]  ;;  %v6051_v27 = vld [vmem:[#allocation2 + $0x321] sm:$0xff]  ;;  %v6053_v38 = vld [vmem:[#allocation2 + $0x339] sm:$0xff] }
 0x4b4   :  { %v6549_v48 = vsel %vm6538_vm6, %v6532_v61, %v6384_v26  ;;  %v6353_v4 = vrot.slane %v6209_v50, 4  ;;  %v6385_v19 = vrot.slane %v6209_v50, 5  ;;  %v6417_v14 = vrot.slane %v6209_v50, 6 }
 0x4b5   :  { %v6566_v58 = vsel %vm6555_vm7, %v6549_v48, %v6416_v56  ;;  %v6449_v59 = vrot.slane %v6209_v50, 7  ;;  %v6499_v24 = vsel %vm6487_vm3, %v6482_v3, %v6273_v35  ;;  %v6146_v17 = vmax.f32 %v6078_v10, %v6114_v8 }
 0x4b6   :  { %v6583_v0 = vsel %vm6572_vm8, %v6566_v58, %v6448_v2  ;;  %v6516_v25 = vsel %vm6504_vm4, %v6499_v24, %v6305_v32  ;;  %v6178_v37 = vrot.slane %v6079_v40, 1  ;;  %v6081_v6 = vmax.f32 %v6043_v44, %v6045_v49 }
 0x4b7   :  { %6599 = vst.msk [vmem:[%s11770_s4 + $0x50] sm:$0xff] %vm18_vm0, %v6583_v0  ;;  %v6115_v1 = vrot.slane %v6080_v7, 1  ;;  %v6533_v11 = vsel %vm6521_vm5, %v6516_v25, %v6353_v4  ;;  %v6242_v30 = vrot.slane %v6146_v17, 1  ;;  %v6274_v46 = vrot.slane %v6146_v17, 2 }
 0x4b8   :  { %v6306_v20 = vrot.slane %v6146_v17, 3  ;;  %v6550_v45 = vsel %vm6538_vm6, %v6533_v11, %v6385_v19  ;;  %v6210_v34 = vmax.f32 %v6079_v40, %v6178_v37  ;;  %v6179_v51 = vrot.slane %v6081_v6, 1 }
 0x4b9   :  { %v6147_v55 = vmax.f32 %v6080_v7, %v6115_v1  ;;  %v6567_v12 = vsel %vm6555_vm7, %v6550_v45, %v6417_v14  ;;  %v6483_v28 = vsel %vm6470_vm2, %v6146_v17, %v6242_v30  ;;  %v6082_v5 = vmax.f32 %v6046_v36, %v6048_v9 }
 0x4ba   :  { %v6083_v47 = vmax.f32 %v6047_v21, %v6049_v43  ;;  %v6584_v39 = vsel %vm6572_vm8, %v6567_v12, %v6449_v59  ;;  %v6354_v22 = vrot.slane %v6210_v34, 4  ;;  %v6386_v23 = vrot.slane %v6210_v34, 5 }
 0x4bb   :  { %v6418_v57 = vrot.slane %v6210_v34, 6  ;;  %6600 = vst.msk [vmem:[%s11770_s4 + $0x58] sm:$0xff] %vm18_vm0, %v6584_v39  ;;  %v6450_v15 = vrot.slane %v6210_v34, 7  ;;  %v6500_v31 = vsel %vm6487_vm3, %v6483_v28, %v6274_v46  ;;  %v6211_v13 = vmax.f32 %v6081_v6, %v6179_v51 }
 0x4bc   :  { %v6243_v29 = vrot.slane %v6147_v55, 1  ;;  %v6517_v26 = vsel %vm6504_vm4, %v6500_v31, %v6306_v20  ;;  %v6275_v56 = vrot.slane %v6147_v55, 2  ;;  %v6307_v42 = vrot.slane %v6147_v55, 3 }
 0x4bd   :  { %v6116_v2 = vrot.slane %v6082_v5, 1  ;;  %v6534_v18 = vsel %vm6521_vm5, %v6517_v26, %v6354_v22  ;;  %v6355_v54 = vrot.slane %v6211_v13, 4  ;;  %v6387_v16 = vrot.slane %v6211_v13, 5 }
 0x4be   :  { %v6419_v53 = vrot.slane %v6211_v13, 6  ;;  %v6551_v62 = vsel %vm6538_vm6, %v6534_v18, %v6386_v23  ;;  %v6451_v10 = vrot.slane %v6211_v13, 7  ;;  %v6484_v63 = vsel %vm6470_vm2, %v6147_v55, %v6243_v29 }
 0x4bf   :  { %v6148_v33 = vmax.f32 %v6082_v5, %v6116_v2  ;;  %v6568_v52 = vsel %vm6555_vm7, %v6551_v62, %v6418_v57  ;;  %v6501_v35 = vsel %vm6487_vm3, %v6484_v63, %v6275_v56  ;;  %v6180_v61 = vrot.slane %v6083_v47, 1 }
 0x4c0   :  { %v6084_v50 = vmax.f32 %v6050_v41, %v6052_v60  ;;  %v6585_v32 = vsel %vm6572_vm8, %v6568_v52, %v6450_v15  ;;  %v6518_v40 = vsel %vm6504_vm4, %v6501_v35, %v6307_v42  ;;  %v6085_v7 = vmax.f32 %v6051_v27, %v6053_v38 }
 0x4c1   :  { %v6244_v48 = vrot.slane %v6148_v33, 1  ;;  %v6276_v3 = vrot.slane %v6148_v33, 2  ;;  %6601 = vst.msk [vmem:[%s11770_s4 + $0x60] sm:$0xff] %vm18_vm0, %v6585_v32  ;;  %v6535_v8 = vsel %vm6521_vm5, %v6518_v40, %v6355_v54  ;;  %v6212_v44 = vmax.f32 %v6083_v47, %v6180_v61 }
 0x4c2   :  { %v6308_v49 = vrot.slane %v6148_v33, 3  ;;  %v6552_v58 = vsel %vm6538_vm6, %v6535_v8, %v6387_v16  ;;  %v6117_v19 = vrot.slane %v6084_v50, 1  ;;  %v6181_v1 = vrot.slane %v6085_v7, 1 }
 0x4c3   :  { %v6485_v4 = vsel %vm6470_vm2, %v6148_v33, %v6244_v48  ;;  %v6569_v14 = vsel %vm6555_vm7, %v6552_v58, %v6419_v53  ;;  %v6356_v0 = vrot.slane %v6212_v44, 4  ;;  %v6388_v59 = vrot.slane %v6212_v44, 5 }
 0x4c4   :  { %v6586_v24 = vsel %vm6572_vm8, %v6569_v14, %v6451_v10  ;;  %v6420_v17 = vrot.slane %v6212_v44, 6  ;;  %v6502_v36 = vsel %vm6487_vm3, %v6485_v4, %v6276_v3  ;;  %v6149_v25 = vmax.f32 %v6084_v50, %v6117_v19 }
 0x4c5   :  { %6602 = vst.msk [vmem:[%s11770_s4 + $0x68] sm:$0xff] %vm18_vm0, %v6586_v24  ;;  %v6452_v37 = vrot.slane %v6212_v44, 7  ;;  %v6519_v6 = vsel %vm6504_vm4, %v6502_v36, %v6308_v49  ;;  %v6213_v30 = vmax.f32 %v6085_v7, %v6181_v1 }
 0x4c6   :  { %v6536_v21 = vsel %vm6521_vm5, %v6519_v6, %v6356_v0  ;;  %v6245_v9 = vrot.slane %v6149_v25, 1  ;;  %v6277_v43 = vrot.slane %v6149_v25, 2  ;;  %v6309_v46 = vrot.slane %v6149_v25, 3 }
 0x4c7   :  { %v6553_v11 = vsel %vm6538_vm6, %v6536_v21, %v6388_v59  ;;  %v6357_v55 = vrot.slane %v6213_v30, 4  ;;  %v6389_v51 = vrot.slane %v6213_v30, 5  ;;  %v6421_v12 = vrot.slane %v6213_v30, 6 }
 0x4c8   :  { %v6570_v20 = vsel %vm6555_vm7, %v6553_v11, %v6420_v17  ;;  %v6486_v45 = vsel %vm6470_vm2, %v6149_v25, %v6245_v9  ;;  %v6453_v5 = vrot.slane %v6213_v30, 7 }
 0x4c9   :  { %v6587_v34 = vsel %vm6572_vm8, %v6570_v20, %v6452_v37  ;;  %v6503_v28 = vsel %vm6487_vm3, %v6486_v45, %v6277_v43 }
 0x4ca   :  { %6603 = vst.msk [vmem:[%s11770_s4 + $0x70] sm:$0xff] %vm18_vm0, %v6587_v34  ;;  %v6520_v47 = vsel %vm6504_vm4, %v6503_v28, %v6309_v46 }
 0x4cb   :  { %v6537_v39 = vsel %vm6521_vm5, %v6520_v47, %v6357_v55 }
 0x4cc   :  { %v6554_v22 = vsel %vm6538_vm6, %v6537_v39, %v6389_v51 }
 0x4cd   :  { %v6571_v23 = vsel %vm6555_vm7, %v6554_v22, %v6421_v12 }
 0x4ce   :  { %v6588_v57 = vsel %vm6572_vm8, %v6571_v23, %v6453_v5 }
 0x4cf   :  { %6604 = vst.msk [vmem:[%s11770_s4 + $0x78] sm:$0xff] %vm18_vm0, %v6588_v57 }

</bundles_post_ra>
